<compile_context>
chip_gen: v7x
topology: tpu7x:2x2x1
jax: 0.10.0
libtpu: 0.0.40
codegen_flags: <defaults>
</compile_context>

<pallas_src>
import jax
import jax.numpy as jnp
from jax import lax
from jax.experimental import pallas as pl
from jax.experimental.pallas import tpu as pltpu

LANE = 128
BF16 = jnp.bfloat16
F32 = jnp.float32
VMEM_BUDGET_BYTES = 8 * 1024 * 1024   # per-tile working-set budget (<< scoped VMEM)

_PARALLEL = pltpu.CompilerParams(
    dimension_semantics=("parallel",),
    vmem_limit_bytes=32 * 1024 * 1024,
)


# ----------------------------- small helpers -----------------------------

def _round_up(x, m):
    return -(-x // m) * m


def _pad_axis(x, target, axis):
    pad = target - x.shape[axis]
    if pad <= 0:
        return x
    widths = [(0, 0)] * x.ndim
    widths[axis] = (0, pad)
    return jnp.pad(x, widths)


def _pad_cols(x, target):
    return _pad_axis(x, target, x.ndim - 1)


def _row_tile(m, bytes_per_row, budget=VMEM_BUDGET_BYTES):
    """Row tile: multiple of 8, >=2 grid steps when possible (v7x dual-TC), VMEM-capped."""
    mp8 = _round_up(max(m, 8), 8)
    cap = max(8, (budget // max(bytes_per_row, 1)) // 8 * 8)
    target = _round_up(-(-mp8 // 2), 8) if mp8 >= 16 else mp8
    tm = max(8, min(cap, target))
    mp = _round_up(mp8, tm)
    return tm, mp


def _attn_row_tile(m, k, dm, cpad):
    mp8 = _round_up(max(m, 8), 8)
    # one-hot (bf16 + f32 copies) + ~10 stacked f32 (K, tm, dm) intermediates + row slabs
    per_row = k * mp8 * 6 + 10 * k * dm * 4 + 4 * cpad * 4
    return _row_tile(m, bytes_per_row=per_row)


# ----------------------------- Pallas kernels -----------------------------

def _mlp2_kernel(x_ref, w1_ref, b1_ref, w2_ref, b2_ref, o_ref):
    """Backbone fc1: Linear-ReLU-Linear; output lane-padded (pad cols stay zero)."""
    x = x_ref[...]
    h = jnp.maximum(
        jnp.dot(x.astype(BF16), w1_ref[...], preferred_element_type=F32) + b1_ref[...], 0.0)
    o = jnp.dot(h.astype(BF16), w2_ref[...], preferred_element_type=F32) + b2_ref[...]
    o_ref[...] = o.astype(o_ref.dtype)


def pallas_mlp2(x, p):
    """x: (B, N, cin) -> (B, N, 128) with cols [32:128] == 0."""
    B, N, cin = x.shape
    c1 = p['w1'].shape[1]
    cpad = p['w2'].shape[1]
    m = B * N
    tm, mp = _row_tile(m, bytes_per_row=(cin + c1 + 2 * cpad) * 4)
    x2 = _pad_axis(x.reshape(m, cin), mp, 0)
    out = pl.pallas_call(
        _mlp2_kernel,
        out_shape=jax.ShapeDtypeStruct((mp, cpad), F32),
        grid=(mp // tm,),
        in_specs=[pl.BlockSpec((tm, cin), lambda i: (i, 0)),
                  pl.BlockSpec((cin, c1), lambda i: (0, 0)),
                  pl.BlockSpec((1, c1), lambda i: (0, 0)),
                  pl.BlockSpec((c1, cpad), lambda i: (0, 0)),
                  pl.BlockSpec((1, cpad), lambda i: (0, 0))],
        out_specs=pl.BlockSpec((tm, cpad), lambda i: (i, 0)),
        compiler_params=_PARALLEL,
    )(x2, p['w1'], p['b1'], p['w2'], p['b2'])
    return out[:m].reshape(B, N, cpad)


def _pt_block_kernel(ft_ref, ff_ref, xt_ref, xf_ref, idx_ref,
                     w1_ref, dw1_ref, wslab_ref, bslab_ref, o_ref):
    """Fully fused PointTransformer block for one row tile of query points.

    ft: (tm, cpad) lane-padded features (q path + residual);
    ff: (mp, cpad) full (resident) features -> k/v source;
    xt/xf: (tm, 8)/(mp, 8) lane-padded xyz;  idx: (1, K, tm) flattened kNN indices.
    Weight slab columns: [fc2(cpad) | wq | wk | wv | delta_w2 | gamma_w1 | gamma_w2].
    Bias slab rows: [fc1_b, delta_b1, delta_b2, gamma_b1, gamma_b2, fc2_b, 0, 0].
    """
    tm, cpad = ft_ref.shape
    mp = ff_ref.shape[0]
    k_nb = idx_ref.shape[1]
    dm = dw1_ref.shape[1]

    # ---- block fc1 on the tile (q / residual) and on the full set (k / v source)
    w1 = w1_ref[...]
    b1 = bslab_ref[0:1, :dm]
    ft = ft_ref[...]
    x_t = jnp.dot(ft.astype(BF16), w1, preferred_element_type=F32) + b1        # (tm, dm)
    x_f = jnp.dot(ff_ref[...].astype(BF16), w1, preferred_element_type=F32) + b1  # (mp, dm)

    wq = wslab_ref[:, cpad:cpad + dm]
    wk = wslab_ref[:, cpad + dm:cpad + 2 * dm]
    wv = wslab_ref[:, cpad + 2 * dm:cpad + 3 * dm]
    q = jnp.dot(x_t.astype(BF16), wq, preferred_element_type=F32)              # (tm, dm)
    k_f = jnp.dot(x_f.astype(BF16), wk, preferred_element_type=F32).astype(BF16)
    v_f = jnp.dot(x_f.astype(BF16), wv, preferred_element_type=F32).astype(BF16)

    # ---- in-kernel kNN gather as one-hot matmuls (no K-duplicated HBM traffic)
    idx = idx_ref[0]                                                           # (K, tm) int32
    iota = lax.broadcasted_iota(jnp.int32, (k_nb, tm, mp), 2)
    onehot = idx[:, :, None] == iota
    oh_b = onehot.astype(BF16).reshape(k_nb * tm, mp)
    oh_f = onehot.astype(F32).reshape(k_nb * tm, mp)
    gk = jnp.dot(oh_b, k_f, preferred_element_type=F32).reshape(k_nb, tm, dm)
    gv = jnp.dot(oh_b, v_f, preferred_element_type=F32).reshape(k_nb, tm, dm)
    gxyz = jnp.dot(oh_f, xf_ref[...],
                   preferred_element_type=F32).reshape(k_nb, tm, xf_ref.shape[1])

    # ---- fc_delta: layer 1 on the VPU (contraction dim is only 3), layer 2 on the MXU
    rel = xt_ref[...][None, :, :] - gxyz                                       # (K, tm, 8)
    db1 = bslab_ref[1:2, :dm]
    ph = (db1.reshape(1, 1, dm)
          + rel[:, :, 0:1] * dw1_ref[0:1, :].reshape(1, 1, dm)
          + rel[:, :, 1:2] * dw1_ref[1:2, :].reshape(1, 1, dm)
          + rel[:, :, 2:3] * dw1_ref[2:3, :].reshape(1, 1, dm))
    ph = jnp.maximum(ph, 0.0)                                                  # (K, tm, dm)
    dw2 = wslab_ref[:, cpad + 3 * dm:cpad + 4 * dm]
    db2 = bslab_ref[2:3, :dm]
    pos = (jnp.dot(ph.reshape(k_nb * tm, dm).astype(BF16), dw2,
                   preferred_element_type=F32) + db2).reshape(k_nb, tm, dm)

    # ---- fc_gamma on (q - k + pos): q broadcast over neighbors (no concat)
    t = q[None, :, :] - gk + pos                                               # (K, tm, dm)
    gw1 = wslab_ref[:, cpad + 4 * dm:cpad + 5 * dm]
    gb1 = bslab_ref[3:4, :dm]
    gw2 = wslab_ref[:, cpad + 5 * dm:cpad + 6 * dm]
    gb2 = bslab_ref[4:5, :dm]
    hg = jnp.maximum(
        jnp.dot(t.reshape(k_nb * tm, dm).astype(BF16), gw1,
                preferred_element_type=F32) + gb1, 0.0)
    score = (jnp.dot(hg.astype(BF16), gw2, preferred_element_type=F32) + gb2) \
        * (1.0 / (dm ** 0.5))
    s = score.reshape(k_nb, tm, dm)

    # ---- softmax over the neighbor axis + weighted sum (all f32)
    mx = jnp.max(s, axis=0, keepdims=True)
    e = jnp.exp(s - mx)
    den = jnp.sum(e, axis=0)                                                   # >= 1
    num = jnp.sum(e * (gv + pos), axis=0)
    res = num * pl.reciprocal(den, approx=True)                                # (tm, dm)

    # ---- fc2 (lane-padded to cpad) + residual, single lane-dense store
    fc2w = wslab_ref[:, 0:cpad]
    fc2b = bslab_ref[5:6, :]
    out = jnp.dot(res.astype(BF16), fc2w, preferred_element_type=F32) + fc2b + ft
    o_ref[...] = out.astype(o_ref.dtype)


def transformer_block(xyz, feats_p, prep, k):
    """xyz: (B,N,3); feats_p: (B,N,128) lane-padded (pad cols zero). Returns (B,N,128)."""
    B, N, cpad = feats_p.shape
    dm = prep['w1p'].shape[1]
    keff = min(k, N)

    # JAX glue: kNN indices per batch (top_k on negated distances; tie-breaking differs
    # from the reference argsort for exactly-equidistant points).
    dists = square_distance(xyz, xyz)
    _, knn_idx = lax.top_k(-dists, keff)                                       # (B, N, keff)
    m = B * N
    idx_flat = (knn_idx + (jnp.arange(B, dtype=jnp.int32) * N)[:, None, None]
                ).astype(jnp.int32).reshape(m, keff)

    tm, mp = _attn_row_tile(m, keff, dm, cpad)
    nt = mp // tm

    feats2 = _pad_axis(feats_p.reshape(m, cpad), mp, 0)                        # (mp, cpad)
    xyzp = _pad_axis(_pad_axis(xyz.reshape(m, 3), 8, 1), mp, 0)                # (mp, 8)
    # kNN indices in tile-major, neighbor-major layout: each block is a contiguous slab.
    idx_nm = _pad_axis(idx_flat.T, mp, 1)                                      # (keff, mp)
    idx_tiles = jnp.transpose(idx_nm.reshape(keff, nt, tm), (1, 0, 2))         # (nt, keff, tm)

    out = pl.pallas_call(
        _pt_block_kernel,
        out_shape=jax.ShapeDtypeStruct((mp, cpad), F32),
        grid=(nt,),
        in_specs=[
            pl.BlockSpec((tm, cpad), lambda i: (i, 0)),          # features (row tile)
            pl.BlockSpec((mp, cpad), lambda i: (0, 0)),          # features (resident, k/v)
            pl.BlockSpec((tm, 8), lambda i: (i, 0)),             # xyz (row tile)
            pl.BlockSpec((mp, 8), lambda i: (0, 0)),             # xyz (resident, gather)
            pl.BlockSpec((1, keff, tm), lambda i: (i, 0, 0)),    # kNN indices (tile)
            pl.BlockSpec((cpad, dm), lambda i: (0, 0)),          # fc1 weight (row-padded)
            pl.BlockSpec((3, dm), lambda i: (0, 0)),             # fc_delta layer-1 (VPU)
            pl.BlockSpec(prep['wslab'].shape, lambda i: (0, 0)),  # packed bf16 weights
            pl.BlockSpec(prep['bslab'].shape, lambda i: (0, 0)),  # packed f32 biases
        ],
        out_specs=pl.BlockSpec((tm, cpad), lambda i: (i, 0)),
        compiler_params=_PARALLEL,
    )(feats2, feats2, xyzp, xyzp, idx_tiles,
      prep['w1p'], prep['dw1'], prep['wslab'], prep['bslab'])
    return out[:m].reshape(B, N, cpad)


def _td_kernel(g_ref, w1_ref, b1_ref, w2_ref, b2_ref, o_ref):
    """TransitionDown MLP (Conv1x1+BN+ReLU x2, BN folded) + max over neighbors."""
    tm, cpad = o_ref.shape
    rows = g_ref.shape[1]
    ns = rows // tm
    g = g_ref[0]                                                               # (ns*tm, cin)
    h = jnp.maximum(
        jnp.dot(g.astype(BF16), w1_ref[...], preferred_element_type=F32) + b1_ref[...], 0.0)
    h = jnp.maximum(
        jnp.dot(h.astype(BF16), w2_ref[...], preferred_element_type=F32) + b2_ref[...], 0.0)
    o_ref[...] = jnp.max(h.reshape(ns, tm, cpad), axis=0).astype(o_ref.dtype)


def pallas_td_mlp_maxpool(grouped, p):
    """grouped: (ns, B, S, cin) neighbor-major -> (B, S, 128), pad cols zero."""
    ns, B, S, cin = grouped.shape
    c1 = p['w1'].shape[1]
    cpad = p['w2'].shape[1]
    m = B * S
    tm, mp = _row_tile(m, bytes_per_row=ns * (cin + c1 + 2 * cpad) * 4)
    nt = mp // tm
    g2 = _pad_axis(grouped.reshape(ns, m, cin), mp, 1)                         # (ns, mp, cin)
    # 2-D contiguous per-tile slabs (row-stacking done here, not with in-kernel reshapes)
    g_tiles = jnp.transpose(g2.reshape(ns, nt, tm, cin),
                            (1, 0, 2, 3)).reshape(nt, ns * tm, cin)
    out = pl.pallas_call(
        _td_kernel,
        out_shape=jax.ShapeDtypeStruct((mp, cpad), F32),
        grid=(nt,),
        in_specs=[pl.BlockSpec((1, ns * tm, cin), lambda i: (i, 0, 0)),
                  pl.BlockSpec((cin, c1), lambda i: (0, 0)),
                  pl.BlockSpec((1, c1), lambda i: (0, 0)),
                  pl.BlockSpec((c1, cpad), lambda i: (0, 0)),
                  pl.BlockSpec((1, cpad), lambda i: (0, 0))],
        out_specs=pl.BlockSpec((tm, cpad), lambda i: (i, 0)),
        compiler_params=_PARALLEL,
    )(g_tiles, p['w1'], p['b1'], p['w2'], p['b2'])
    return out[:m].reshape(B, S, cpad)


# ----------------------------- JAX glue (sampling / grouping) -----------------------------

def square_distance(src, dst):
    return (jnp.sum(src ** 2, -1)[..., :, None]
            + jnp.sum(dst ** 2, -1)[..., None, :]
            - 2.0 * jnp.einsum('bnc,bmc->bnm', src, dst))


def index_points(points, idx):
    B = points.shape[0]
    bidx = jnp.arange(B).reshape((B,) + (1,) * (idx.ndim - 1))
    return points[bidx, idx]


def knn_gather_neighbor_major(points, knn_idx):
    """points: (B,N,C), knn_idx: (B,M,K) -> (K,B,M,C)."""
    B = points.shape[0]
    idx_t = jnp.transpose(knn_idx, (2, 0, 1))
    bidx = jnp.arange(B).reshape(1, B, 1)
    return points[bidx, idx_t]


def farthest_point_sample(xyz, npoint):
    # TODO(synk): PyTorch seeds FPS with torch.randint; we deterministically start at point 0.
    B, N, _ = xyz.shape

    def body(i, state):
        cent, dist, far = state
        cent = cent.at[:, i].set(far)
        centroid = xyz[jnp.arange(B), far]
        d = jnp.sum((xyz - centroid[:, None, :]) ** 2, axis=-1)
        dist = jnp.minimum(dist, d)
        far = jnp.argmax(dist, axis=-1).astype(jnp.int32)
        return cent, dist, far

    cent0 = jnp.zeros((B, npoint), dtype=jnp.int32)
    dist0 = jnp.full((B, N), 1e10, dtype=xyz.dtype)
    far0 = jnp.zeros((B,), dtype=jnp.int32)
    cent, _, _ = jax.lax.fori_loop(0, npoint, body, (cent0, dist0, far0))
    return cent


def transition_down(xyz, points, prep, npoint, nsample):
    """PointNetSetAbstraction(knn=True): FPS -> kNN group -> shared MLP -> max-pool."""
    B, N, _ = xyz.shape
    ns = min(nsample, N)
    fps_idx = farthest_point_sample(xyz, npoint)
    new_xyz = index_points(xyz, fps_idx)                     # (B, S, 3)
    dists = square_distance(new_xyz, xyz)
    _, idx = lax.top_k(-dists, ns)                           # (B, S, ns)
    g_xyz = knn_gather_neighbor_major(xyz, idx)              # (ns, B, S, 3)
    g_xyz_norm = g_xyz - new_xyz[None]
    g_pts = knn_gather_neighbor_major(points, idx)           # (ns, B, S, D)
    grouped = jnp.concatenate([g_xyz_norm, g_pts], axis=-1)  # (ns, B, S, 3+D)
    new_feats = pallas_td_mlp_maxpool(grouped, prep)
    return new_xyz, new_feats


def backbone_forward(x, prep, cfg):
    xyz = x[..., :3]
    feats_p = pallas_mlp2(x, prep['fc1'])                    # (B, N, 128), width 32
    points_p = transformer_block(xyz, feats_p, prep['transformer1'], cfg['nneighbor'])
    width = 32
    xyz_and_feats = [(xyz, points_p[..., :width])]
    for i in range(cfg['nblocks']):
        channel = 32 * 2 ** (i + 1)
        npoint = cfg['num_point'] // 4 ** (i + 1)
        xyz, points_p = transition_down(xyz, points_p[..., :width], prep['td'][i],
                                        npoint, cfg['nneighbor'])
        width = channel
        points_p = transformer_block(xyz, points_p, prep['tf'][i], cfg['nneighbor'])
        xyz_and_feats.append((xyz, points_p[..., :width]))
    return points_p[..., :width], xyz_and_feats


# ----------------------------- parameters -----------------------------

def _linear_params(key, cin, cout, bias=True):
    k1, k2 = jax.random.split(key)
    bound = 1.0 / (cin ** 0.5)
    w = jax.random.uniform(k1, (cin, cout), F32, -bound, bound)
    b = (jax.random.uniform(k2, (cout,), F32, -bound, bound) if bias
         else jnp.zeros((cout,), F32))
    return w, b


def init_transformer(key, d_points, d_model):
    ks = jax.random.split(key, 9)
    p = {}
    p['fc1_w'], p['fc1_b'] = _linear_params(ks[0], d_points, d_model)
    p['fc2_w'], p['fc2_b'] = _linear_params(ks[1], d_model, d_points)
    p['delta_w1'], p['delta_b1'] = _linear_params(ks[2], 3, d_model)
    p['delta_w2'], p['delta_b2'] = _linear_params(ks[3], d_model, d_model)
    p['gamma_w1'], p['gamma_b1'] = _linear_params(ks[4], d_model, d_model)
    p['gamma_w2'], p['gamma_b2'] = _linear_params(ks[5], d_model, d_model)
    p['wq'], _ = _linear_params(ks[6], d_model, d_model, bias=False)
    p['wk'], _ = _linear_params(ks[7], d_model, d_model, bias=False)
    p['wv'], _ = _linear_params(ks[8], d_model, d_model, bias=False)
    return p


def init_td(key, cin, c1, c2, eps=1e-5):
    # Conv2d(1x1)+BatchNorm2d in eval mode with PyTorch-default running stats, BN folded.
    k1, k2 = jax.random.split(key)
    w1, cb1 = _linear_params(k1, cin, c1)
    w2, cb2 = _linear_params(k2, c1, c2)
    s = 1.0 / jnp.sqrt(jnp.float32(1.0 + eps))
    return {'w1': w1 * s, 'b1': cb1 * s, 'w2': w2 * s, 'b2': cb2 * s}


def init_backbone(key, cfg):
    d_points = cfg['input_dim']
    d_model = cfg['transformer_dim']
    nblocks = cfg['nblocks']
    keys = jax.random.split(key, 2 + 2 * nblocks)
    params = {}
    kf1, kf2 = jax.random.split(keys[0])
    w1, b1 = _linear_params(kf1, d_points, 32)
    w2, b2 = _linear_params(kf2, 32, 32)
    params['fc1'] = (w1, b1, w2, b2)
    params['transformer1'] = init_transformer(keys[1], 32, d_model)
    params['td'] = []
    params['tf'] = []
    for i in range(nblocks):
        channel = 32 * 2 ** (i + 1)
        params['td'].append(init_td(keys[2 + 2 * i], channel // 2 + 3, channel, channel))
        params['tf'].append(init_transformer(keys[3 + 2 * i], channel, d_model))
    return params


# One-time (outside jit) weight packing / bf16 pre-cast / lane padding.
def _prep_mlp2(w1, b1, w2, b2, cpad=LANE):
    return dict(w1=w1.astype(BF16), b1=b1.reshape(1, -1).astype(F32),
                w2=_pad_cols(w2, cpad).astype(BF16),
                b2=_pad_cols(b2.reshape(1, -1), cpad).astype(F32))


def _prep_td(p, cpad=LANE):
    return dict(w1=p['w1'].astype(BF16), b1=p['b1'].reshape(1, -1).astype(F32),
                w2=_pad_cols(p['w2'], cpad).astype(BF16),
                b2=_pad_cols(p['b2'].reshape(1, -1), cpad).astype(F32))


def _prep_transformer(p, cpad=LANE):
    d_in, dm = p['fc1_w'].shape
    w1p = _pad_axis(p['fc1_w'], cpad, 0).astype(BF16)                # (cpad, dm), zero rows
    fc2w_p = _pad_cols(p['fc2_w'], cpad)                             # (dm, cpad), zero cols
    wslab = jnp.concatenate(
        [fc2w_p, p['wq'], p['wk'], p['wv'], p['delta_w2'],
         p['gamma_w1'], p['gamma_w2']], axis=1).astype(BF16)         # (dm, cpad + 6*dm)
    rows = [p['fc1_b'], p['delta_b1'], p['delta_b2'],
            p['gamma_b1'], p['gamma_b2'], p['fc2_b']]
    bslab = jnp.stack([_pad_cols(r.reshape(1, -1), cpad)[0] for r in rows]
                      + [jnp.zeros((cpad,), F32)] * 2, axis=0)       # (8, cpad)
    return dict(w1p=w1p, dw1=p['delta_w1'].astype(F32), wslab=wslab, bslab=bslab)


def prepare_backbone(params):
    w1, b1, w2, b2 = params['fc1']
    return dict(fc1=_prep_mlp2(w1, b1, w2, b2),
                transformer1=_prep_transformer(params['transformer1']),
                td=[_prep_td(p) for p in params['td']],
                tf=[_prep_transformer(p) for p in params['tf']])


# ----------------------------- main -----------------------------

if __name__ == "__main__":
    cfg = dict(num_point=64, nblocks=2, nneighbor=4,
               input_dim=6, transformer_dim=32, num_class=8)  # num_class unused in forward
    key = jax.random.PRNGKey(0)
    kx, kp = jax.random.split(key)
    x = jax.random.normal(kx, (2, cfg['num_point'], cfg['input_dim']), dtype=jnp.float32)
    params = init_backbone(kp, cfg)
    prep = prepare_backbone(params)

    fwd = jax.jit(lambda xx, pp: backbone_forward(xx, pp, cfg))
    points, xyz_and_feats = fwd(x, prep)
    jax.block_until_ready(points)
    for xz, ft in xyz_and_feats:
        jax.block_until_ready(xz)
        jax.block_until_ready(ft)

    assert points.shape == (2, cfg['num_point'] // 4 ** cfg['nblocks'],
                            32 * 2 ** cfg['nblocks'])
    assert bool(jnp.all(jnp.isfinite(points)))
    print("KERNEL_OK")
</pallas_src>

<mosaic_0001>
module attributes {stable_mosaic.version = 11 : i64} {
  func.func @_mlp2_kernel(%arg0: i32, %arg1: memref<64x6xf32, #tpu.memory_space<vmem>>, %arg2: memref<6x32xbf16, #tpu.memory_space<vmem>>, %arg3: memref<1x32xf32, #tpu.memory_space<vmem>>, %arg4: memref<32x128xbf16, #tpu.memory_space<vmem>>, %arg5: memref<1x128xf32, #tpu.memory_space<vmem>>, %arg6: memref<64x128xf32, #tpu.memory_space<vmem>>) attributes {dimension_semantics = [#tpu.dimension_semantics<parallel>], iteration_bounds = array<i64: 2>, scalar_prefetch = 0 : i64, scratch_operands = 0 : i64, tpu.core_type = #tpu.core_type<tc>, window_params = [{transform_indices = @transform_0, window_bounds = array<i64: 64, 6>}, {pipeline_mode = #tpu.pipeline_mode<synchronous>, transform_indices = @transform_1, window_bounds = array<i64: 6, 32>}, {pipeline_mode = #tpu.pipeline_mode<synchronous>, transform_indices = @transform_2, window_bounds = array<i64: 1, 32>}, {pipeline_mode = #tpu.pipeline_mode<synchronous>, transform_indices = @transform_3, window_bounds = array<i64: 32, 128>}, {pipeline_mode = #tpu.pipeline_mode<synchronous>, transform_indices = @transform_4, window_bounds = array<i64: 1, 128>}, {transform_indices = @transform_5, window_bounds = array<i64: 64, 128>}]} {
    %c0 = arith.constant 0 : index
    %c0_0 = arith.constant 0 : index
    %0 = vector.load %arg1[%c0, %c0_0] : memref<64x6xf32, #tpu.memory_space<vmem>>, vector<64x6xf32>
    %1 = arith.truncf %0 : vector<64x6xf32> to vector<64x6xbf16>
    %c0_1 = arith.constant 0 : index
    %c0_2 = arith.constant 0 : index
    %2 = vector.load %arg2[%c0_1, %c0_2] : memref<6x32xbf16, #tpu.memory_space<vmem>>, vector<6x32xbf16>
    %cst = arith.constant dense<0.000000e+00> : vector<64x32xf32>
    %3 = tpu.matmul %1, %2, %cst {dimension_numbers = #tpu.dot_dimension_numbers<[1], [0], [0], [1], [0, 0, 1, 1], [], []>} : vector<64x6xbf16>, vector<6x32xbf16>, vector<64x32xf32> -> vector<64x32xf32>
    %c0_3 = arith.constant 0 : index
    %c0_4 = arith.constant 0 : index
    %4 = vector.load %arg3[%c0_3, %c0_4] : memref<1x32xf32, #tpu.memory_space<vmem>>, vector<1x32xf32>
    %5 = vector.broadcast %4 : vector<1x32xf32> to vector<64x32xf32>
    %6 = arith.addf %3, %5 : vector<64x32xf32>
    %cst_5 = arith.constant 0.000000e+00 : f32
    %7 = vector.broadcast %cst_5 : f32 to vector<64x32xf32>
    %8 = arith.maximumf %6, %7 : vector<64x32xf32>
    %9 = arith.truncf %8 : vector<64x32xf32> to vector<64x32xbf16>
    %c0_6 = arith.constant 0 : index
    %c0_7 = arith.constant 0 : index
    %10 = vector.load %arg4[%c0_6, %c0_7] : memref<32x128xbf16, #tpu.memory_space<vmem>>, vector<32x128xbf16>
    %cst_8 = arith.constant dense<0.000000e+00> : vector<64x128xf32>
    %11 = tpu.matmul %9, %10, %cst_8 {dimension_numbers = #tpu.dot_dimension_numbers<[1], [0], [0], [1], [0, 0, 1, 1], [], []>} : vector<64x32xbf16>, vector<32x128xbf16>, vector<64x128xf32> -> vector<64x128xf32>
    %c0_9 = arith.constant 0 : index
    %c0_10 = arith.constant 0 : index
    %12 = vector.load %arg5[%c0_9, %c0_10] : memref<1x128xf32, #tpu.memory_space<vmem>>, vector<1x128xf32>
    %13 = vector.broadcast %12 : vector<1x128xf32> to vector<64x128xf32>
    %14 = arith.addf %11, %13 : vector<64x128xf32>
    %c0_11 = arith.constant 0 : index
    %c0_12 = arith.constant 0 : index
    %15 = vector.load %arg6[%c0_11, %c0_12] : memref<64x128xf32, #tpu.memory_space<vmem>>, vector<64x128xf32>
    tpu.vector_store %arg6[%c0_11, %c0_12], %14 {strides = array<i32>} : memref<64x128xf32, #tpu.memory_space<vmem>>, vector<64x128xf32>,
    return
  }
  func.func @transform_0(%arg0: i32) -> (i32, i32) {
    %c0_i32 = arith.constant 0 : i32
    %c0_i32_0 = arith.constant 0 : i32
    return %arg0, %c0_i32 : i32, i32
  }
  func.func @transform_1(%arg0: i32) -> (i32, i32) {
    %c0_i32 = arith.constant 0 : i32
    %c0_i32_0 = arith.constant 0 : i32
    %c0_i32_1 = arith.constant 0 : i32
    return %c0_i32, %c0_i32_0 : i32, i32
  }
  func.func @transform_2(%arg0: i32) -> (i32, i32) {
    %c0_i32 = arith.constant 0 : i32
    %c0_i32_0 = arith.constant 0 : i32
    %c0_i32_1 = arith.constant 0 : i32
    return %c0_i32, %c0_i32_0 : i32, i32
  }
  func.func @transform_3(%arg0: i32) -> (i32, i32) {
    %c0_i32 = arith.constant 0 : i32
    %c0_i32_0 = arith.constant 0 : i32
    %c0_i32_1 = arith.constant 0 : i32
    return %c0_i32, %c0_i32_0 : i32, i32
  }
  func.func @transform_4(%arg0: i32) -> (i32, i32) {
    %c0_i32 = arith.constant 0 : i32
    %c0_i32_0 = arith.constant 0 : i32
    %c0_i32_1 = arith.constant 0 : i32
    return %c0_i32, %c0_i32_0 : i32, i32
  }
  func.func @transform_5(%arg0: i32) -> (i32, i32) {
    %c0_i32 = arith.constant 0 : i32
    %c0_i32_0 = arith.constant 0 : i32
    return %arg0, %c0_i32 : i32, i32
  }
}

module attributes {stable_mosaic.version = 11 : i64} {
  func.func @_pt_block_kernel(%arg0: i32, %arg1: memref<64x128xf32, #tpu.memory_space<vmem>>, %arg2: memref<128x128xf32, #tpu.memory_space<vmem>>, %arg3: memref<64x8xf32, #tpu.memory_space<vmem>>, %arg4: memref<128x8xf32, #tpu.memory_space<vmem>>, %arg5: memref<1x4x64xi32, #tpu.memory_space<vmem>>, %arg6: memref<128x32xbf16, #tpu.memory_space<vmem>>, %arg7: memref<3x32xf32, #tpu.memory_space<vmem>>, %arg8: memref<32x320xbf16, #tpu.memory_space<vmem>>, %arg9: memref<8x128xf32, #tpu.memory_space<vmem>>, %arg10: memref<64x128xf32, #tpu.memory_space<vmem>>) attributes {dimension_semantics = [#tpu.dimension_semantics<parallel>], iteration_bounds = array<i64: 2>, scalar_prefetch = 0 : i64, scratch_operands = 0 : i64, tpu.core_type = #tpu.core_type<tc>, window_params = [{transform_indices = @transform_0, window_bounds = array<i64: 64, 128>}, {pipeline_mode = #tpu.pipeline_mode<synchronous>, transform_indices = @transform_1, window_bounds = array<i64: 128, 128>}, {transform_indices = @transform_2, window_bounds = array<i64: 64, 8>}, {pipeline_mode = #tpu.pipeline_mode<synchronous>, transform_indices = @transform_3, window_bounds = array<i64: 128, 8>}, {transform_indices = @transform_4, window_bounds = array<i64: 1, 4, 64>}, {pipeline_mode = #tpu.pipeline_mode<synchronous>, transform_indices = @transform_5, window_bounds = array<i64: 128, 32>}, {pipeline_mode = #tpu.pipeline_mode<synchronous>, transform_indices = @transform_6, window_bounds = array<i64: 3, 32>}, {pipeline_mode = #tpu.pipeline_mode<synchronous>, transform_indices = @transform_7, window_bounds = array<i64: 32, 320>}, {pipeline_mode = #tpu.pipeline_mode<synchronous>, transform_indices = @transform_8, window_bounds = array<i64: 8, 128>}, {transform_indices = @transform_9, window_bounds = array<i64: 64, 128>}]} {
    %c0 = arith.constant 0 : index
    %c0_0 = arith.constant 0 : index
    %0 = vector.load %arg6[%c0, %c0_0] : memref<128x32xbf16, #tpu.memory_space<vmem>>, vector<128x32xbf16>
    %c0_1 = arith.constant 0 : index
    %c0_2 = arith.constant 0 : index
    %1 = vector.load %arg9[%c0_1, %c0_2] : memref<8x128xf32, #tpu.memory_space<vmem>>, vector<1x32xf32>
    %c0_3 = arith.constant 0 : index
    %c0_4 = arith.constant 0 : index
    %2 = vector.load %arg1[%c0_3, %c0_4] : memref<64x128xf32, #tpu.memory_space<vmem>>, vector<64x128xf32>
    %3 = arith.truncf %2 : vector<64x128xf32> to vector<64x128xbf16>
    %cst = arith.constant dense<0.000000e+00> : vector<64x32xf32>
    %4 = tpu.matmul %3, %0, %cst {dimension_numbers = #tpu.dot_dimension_numbers<[1], [0], [0], [1], [0, 0, 1, 1], [], []>} : vector<64x128xbf16>, vector<128x32xbf16>, vector<64x32xf32> -> vector<64x32xf32>
    %5 = vector.broadcast %1 : vector<1x32xf32> to vector<64x32xf32>
    %6 = arith.addf %4, %5 : vector<64x32xf32>
    %c0_5 = arith.constant 0 : index
    %c0_6 = arith.constant 0 : index
    %7 = vector.load %arg2[%c0_5, %c0_6] : memref<128x128xf32, #tpu.memory_space<vmem>>, vector<128x128xf32>
    %8 = arith.truncf %7 : vector<128x128xf32> to vector<128x128xbf16>
    %cst_7 = arith.constant dense<0.000000e+00> : vector<128x32xf32>
    %9 = tpu.matmul %8, %0, %cst_7 {dimension_numbers = #tpu.dot_dimension_numbers<[1], [0], [0], [1], [0, 0, 1, 1], [], []>} : vector<128x128xbf16>, vector<128x32xbf16>, vector<128x32xf32> -> vector<128x32xf32>
    %10 = vector.broadcast %1 : vector<1x32xf32> to vector<128x32xf32>
    %11 = arith.addf %9, %10 : vector<128x32xf32>
    %c0_8 = arith.constant 0 : index
    %c128 = arith.constant 128 : index
    %12 = vector.load %arg8[%c0_8, %c128] : memref<32x320xbf16, #tpu.memory_space<vmem>>, vector<32x32xbf16>
    %c0_9 = arith.constant 0 : index
    %c160 = arith.constant 160 : index
    %13 = vector.load %arg8[%c0_9, %c160] : memref<32x320xbf16, #tpu.memory_space<vmem>>, vector<32x32xbf16>
    %c0_10 = arith.constant 0 : index
    %c192 = arith.constant 192 : index
    %14 = vector.load %arg8[%c0_10, %c192] : memref<32x320xbf16, #tpu.memory_space<vmem>>, vector<32x32xbf16>
    %15 = arith.truncf %6 : vector<64x32xf32> to vector<64x32xbf16>
    %cst_11 = arith.constant dense<0.000000e+00> : vector<64x32xf32>
    %16 = tpu.matmul %15, %12, %cst_11 {dimension_numbers = #tpu.dot_dimension_numbers<[1], [0], [0], [1], [0, 0, 1, 1], [], []>} : vector<64x32xbf16>, vector<32x32xbf16>, vector<64x32xf32> -> vector<64x32xf32>
    %17 = arith.truncf %11 : vector<128x32xf32> to vector<128x32xbf16>
    %cst_12 = arith.constant dense<0.000000e+00> : vector<128x32xf32>
    %18 = tpu.matmul %17, %13, %cst_12 {dimension_numbers = #tpu.dot_dimension_numbers<[1], [0], [0], [1], [0, 0, 1, 1], [], []>} : vector<128x32xbf16>, vector<32x32xbf16>, vector<128x32xf32> -> vector<128x32xf32>
    %19 = arith.truncf %18 : vector<128x32xf32> to vector<128x32xbf16>
    %20 = arith.truncf %11 : vector<128x32xf32> to vector<128x32xbf16>
    %cst_13 = arith.constant dense<0.000000e+00> : vector<128x32xf32>
    %21 = tpu.matmul %20, %14, %cst_13 {dimension_numbers = #tpu.dot_dimension_numbers<[1], [0], [0], [1], [0, 0, 1, 1], [], []>} : vector<128x32xbf16>, vector<32x32xbf16>, vector<128x32xf32> -> vector<128x32xf32>
    %22 = arith.truncf %21 : vector<128x32xf32> to vector<128x32xbf16>
    %c0_14 = arith.constant 0 : index
    %c0_15 = arith.constant 0 : index
    %c0_16 = arith.constant 0 : index
    %23 = vector.load %arg5[%c0_14, %c0_15, %c0_16] : memref<1x4x64xi32, #tpu.memory_space<vmem>>, vector<1x4x64xi32>
    %24 = vector.shape_cast %23 : vector<1x4x64xi32> to vector<4x64xi32>
    %25 = tpu.iota {dimensions = array<i32: 2>} : vector<4x64x128xi32>
    %26 = vector.shape_cast %24 : vector<4x64xi32> to vector<4x64x1xi32>
    %27 = vector.broadcast %26 : vector<4x64x1xi32> to vector<4x64x128xi32>
    %28 = arith.cmpi eq, %27, %25 : vector<4x64x128xi32>
    %29 = arith.extui %28 : vector<4x64x128xi1> to vector<4x64x128xi32>
    %30 = arith.sitofp %29 : vector<4x64x128xi32> to vector<4x64x128xf32>
    %31 = arith.truncf %30 : vector<4x64x128xf32> to vector<4x64x128xbf16>
    %32 = vector.shape_cast %31 : vector<4x64x128xbf16> to vector<256x128xbf16>
    %33 = arith.extui %28 : vector<4x64x128xi1> to vector<4x64x128xi32>
    %34 = arith.sitofp %33 : vector<4x64x128xi32> to vector<4x64x128xf32>
    %35 = vector.shape_cast %34 : vector<4x64x128xf32> to vector<256x128xf32>
    %cst_17 = arith.constant dense<0.000000e+00> : vector<256x32xf32>
    %36 = tpu.matmul %32, %19, %cst_17 {dimension_numbers = #tpu.dot_dimension_numbers<[1], [0], [0], [1], [0, 0, 1, 1], [], []>} : vector<256x128xbf16>, vector<128x32xbf16>, vector<256x32xf32> -> vector<256x32xf32>
    %37 = vector.shape_cast %36 : vector<256x32xf32> to vector<4x64x32xf32>
    %cst_18 = arith.constant dense<0.000000e+00> : vector<256x32xf32>
    %38 = tpu.matmul %32, %22, %cst_18 {dimension_numbers = #tpu.dot_dimension_numbers<[1], [0], [0], [1], [0, 0, 1, 1], [], []>} : vector<256x128xbf16>, vector<128x32xbf16>, vector<256x32xf32> -> vector<256x32xf32>
    %39 = vector.shape_cast %38 : vector<256x32xf32> to vector<4x64x32xf32>
    %c0_19 = arith.constant 0 : index
    %c0_20 = arith.constant 0 : index
    %40 = vector.load %arg4[%c0_19, %c0_20] : memref<128x8xf32, #tpu.memory_space<vmem>>, vector<128x8xf32>
    %cst_21 = arith.constant dense<0.000000e+00> : vector<256x8xf32>
    %41 = tpu.matmul %35, %40, %cst_21 {dimension_numbers = #tpu.dot_dimension_numbers<[1], [0], [0], [1], [0, 0, 1, 1], [], []>} : vector<256x128xf32>, vector<128x8xf32>, vector<256x8xf32> -> vector<256x8xf32>
    %42 = vector.shape_cast %41 : vector<256x8xf32> to vector<4x64x8xf32>
    %c0_22 = arith.constant 0 : index
    %c0_23 = arith.constant 0 : index
    %43 = vector.load %arg3[%c0_22, %c0_23] : memref<64x8xf32, #tpu.memory_space<vmem>>, vector<64x8xf32>
    %44 = vector.shape_cast %43 : vector<64x8xf32> to vector<1x64x8xf32>
    %45 = vector.broadcast %44 : vector<1x64x8xf32> to vector<4x64x8xf32>
    %46 = arith.subf %45, %42 : vector<4x64x8xf32>
    %c1 = arith.constant 1 : index
    %c0_24 = arith.constant 0 : index
    %47 = vector.load %arg9[%c1, %c0_24] : memref<8x128xf32, #tpu.memory_space<vmem>>, vector<1x32xf32>
    %48 = vector.shape_cast %47 : vector<1x32xf32> to vector<1x1x32xf32>
    %49 = vector.extract_strided_slice %46 {offsets = [0, 0, 0], sizes = [4, 64, 1], strides = [1, 1, 1]} : vector<4x64x8xf32> to vector<4x64x1xf32>
    %c0_25 = arith.constant 0 : index
    %c0_26 = arith.constant 0 : index
    %50 = vector.load %arg7[%c0_25, %c0_26] : memref<3x32xf32, #tpu.memory_space<vmem>>, vector<1x32xf32>
    %51 = vector.shape_cast %50 : vector<1x32xf32> to vector<1x1x32xf32>
    %52 = vector.broadcast %49 : vector<4x64x1xf32> to vector<4x64x32xf32>
    %53 = vector.broadcast %51 : vector<1x1x32xf32> to vector<4x64x32xf32>
    %54 = arith.mulf %52, %53 : vector<4x64x32xf32>
    %55 = vector.broadcast %48 : vector<1x1x32xf32> to vector<4x64x32xf32>
    %56 = arith.addf %55, %54 : vector<4x64x32xf32>
    %57 = vector.extract_strided_slice %46 {offsets = [0, 0, 1], sizes = [4, 64, 1], strides = [1, 1, 1]} : vector<4x64x8xf32> to vector<4x64x1xf32>
    %c1_27 = arith.constant 1 : index
    %c0_28 = arith.constant 0 : index
    %58 = vector.load %arg7[%c1_27, %c0_28] : memref<3x32xf32, #tpu.memory_space<vmem>>, vector<1x32xf32>
    %59 = vector.shape_cast %58 : vector<1x32xf32> to vector<1x1x32xf32>
    %60 = vector.broadcast %57 : vector<4x64x1xf32> to vector<4x64x32xf32>
    %61 = vector.broadcast %59 : vector<1x1x32xf32> to vector<4x64x32xf32>
    %62 = arith.mulf %60, %61 : vector<4x64x32xf32>
    %63 = arith.addf %56, %62 : vector<4x64x32xf32>
    %64 = vector.extract_strided_slice %46 {offsets = [0, 0, 2], sizes = [4, 64, 1], strides = [1, 1, 1]} : vector<4x64x8xf32> to vector<4x64x1xf32>
    %c2 = arith.constant 2 : index
    %c0_29 = arith.constant 0 : index
    %65 = vector.load %arg7[%c2, %c0_29] : memref<3x32xf32, #tpu.memory_space<vmem>>, vector<1x32xf32>
    %66 = vector.shape_cast %65 : vector<1x32xf32> to vector<1x1x32xf32>
    %67 = vector.broadcast %64 : vector<4x64x1xf32> to vector<4x64x32xf32>
    %68 = vector.broadcast %66 : vector<1x1x32xf32> to vector<4x64x32xf32>
    %69 = arith.mulf %67, %68 : vector<4x64x32xf32>
    %70 = arith.addf %63, %69 : vector<4x64x32xf32>
    %cst_30 = arith.constant 0.000000e+00 : f32
    %71 = vector.broadcast %cst_30 : f32 to vector<4x64x32xf32>
    %72 = arith.maximumf %70, %71 : vector<4x64x32xf32>
    %c0_31 = arith.constant 0 : index
    %c224 = arith.constant 224 : index
    %73 = vector.load %arg8[%c0_31, %c224] : memref<32x320xbf16, #tpu.memory_space<vmem>>, vector<32x32xbf16>
    %c2_32 = arith.constant 2 : index
    %c0_33 = arith.constant 0 : index
    %74 = vector.load %arg9[%c2_32, %c0_33] : memref<8x128xf32, #tpu.memory_space<vmem>>, vector<1x32xf32>
    %75 = vector.shape_cast %72 : vector<4x64x32xf32> to vector<256x32xf32>
    %76 = arith.truncf %75 : vector<256x32xf32> to vector<256x32xbf16>
    %cst_34 = arith.constant dense<0.000000e+00> : vector<256x32xf32>
    %77 = tpu.matmul %76, %73, %cst_34 {dimension_numbers = #tpu.dot_dimension_numbers<[1], [0], [0], [1], [0, 0, 1, 1], [], []>} : vector<256x32xbf16>, vector<32x32xbf16>, vector<256x32xf32> -> vector<256x32xf32>
    %78 = vector.broadcast %74 : vector<1x32xf32> to vector<256x32xf32>
    %79 = arith.addf %77, %78 : vector<256x32xf32>
    %80 = vector.shape_cast %79 : vector<256x32xf32> to vector<4x64x32xf32>
    %81 = vector.shape_cast %16 : vector<64x32xf32> to vector<1x64x32xf32>
    %82 = vector.broadcast %81 : vector<1x64x32xf32> to vector<4x64x32xf32>
    %83 = arith.subf %82, %37 : vector<4x64x32xf32>
    %84 = arith.addf %83, %80 : vector<4x64x32xf32>
    %c0_35 = arith.constant 0 : index
    %c256 = arith.constant 256 : index
    %85 = vector.load %arg8[%c0_35, %c256] : memref<32x320xbf16, #tpu.memory_space<vmem>>, vector<32x32xbf16>
    %c3 = arith.constant 3 : index
    %c0_36 = arith.constant 0 : index
    %86 = vector.load %arg9[%c3, %c0_36] : memref<8x128xf32, #tpu.memory_space<vmem>>, vector<1x32xf32>
    %c0_37 = arith.constant 0 : index
    %c288 = arith.constant 288 : index
    %87 = vector.load %arg8[%c0_37, %c288] : memref<32x320xbf16, #tpu.memory_space<vmem>>, vector<32x32xbf16>
    %c4 = arith.constant 4 : index
    %c0_38 = arith.constant 0 : index
    %88 = vector.load %arg9[%c4, %c0_38] : memref<8x128xf32, #tpu.memory_space<vmem>>, vector<1x32xf32>
    %89 = vector.shape_cast %84 : vector<4x64x32xf32> to vector<256x32xf32>
    %90 = arith.truncf %89 : vector<256x32xf32> to vector<256x32xbf16>
    %cst_39 = arith.constant dense<0.000000e+00> : vector<256x32xf32>
    %91 = tpu.matmul %90, %85, %cst_39 {dimension_numbers = #tpu.dot_dimension_numbers<[1], [0], [0], [1], [0, 0, 1, 1], [], []>} : vector<256x32xbf16>, vector<32x32xbf16>, vector<256x32xf32> -> vector<256x32xf32>
    %92 = vector.broadcast %86 : vector<1x32xf32> to vector<256x32xf32>
    %93 = arith.addf %91, %92 : vector<256x32xf32>
    %cst_40 = arith.constant 0.000000e+00 : f32
    %94 = vector.broadcast %cst_40 : f32 to vector<256x32xf32>
    %95 = arith.maximumf %93, %94 : vector<256x32xf32>
    %96 = arith.truncf %95 : vector<256x32xf32> to vector<256x32xbf16>
    %cst_41 = arith.constant dense<0.000000e+00> : vector<256x32xf32>
    %97 = tpu.matmul %96, %87, %cst_41 {dimension_numbers = #tpu.dot_dimension_numbers<[1], [0], [0], [1], [0, 0, 1, 1], [], []>} : vector<256x32xbf16>, vector<32x32xbf16>, vector<256x32xf32> -> vector<256x32xf32>
    %98 = vector.broadcast %88 : vector<1x32xf32> to vector<256x32xf32>
    %99 = arith.addf %97, %98 : vector<256x32xf32>
    %cst_42 = arith.constant 0.176776692 : f32
    %100 = vector.broadcast %cst_42 : f32 to vector<256x32xf32>
    %101 = arith.mulf %99, %100 : vector<256x32xf32>
    %102 = vector.shape_cast %101 : vector<256x32xf32> to vector<4x64x32xf32>
    %cst_43 = arith.constant dense<0xFF800000> : vector<64x32xf32>
    %103 = vector.multi_reduction <maximumf>, %102, %cst_43 [0] : vector<4x64x32xf32> to vector<64x32xf32>
    %104 = vector.shape_cast %103 : vector<64x32xf32> to vector<1x64x32xf32>
    %105 = vector.broadcast %104 : vector<1x64x32xf32> to vector<4x64x32xf32>
    %106 = arith.subf %102, %105 : vector<4x64x32xf32>
    %107 = math.exp %106 : vector<4x64x32xf32>
    %cst_44 = arith.constant dense<0.000000e+00> : vector<64x32xf32>
    %108 = vector.multi_reduction <add>, %107, %cst_44 [0] : vector<4x64x32xf32> to vector<64x32xf32>
    %109 = arith.addf %39, %80 : vector<4x64x32xf32>
    %110 = arith.mulf %107, %109 : vector<4x64x32xf32>
    %cst_45 = arith.constant dense<0.000000e+00> : vector<64x32xf32>
    %111 = vector.multi_reduction <add>, %110, %cst_45 [0] : vector<4x64x32xf32> to vector<64x32xf32>
    %112 = tpu.reciprocal %108 {approx = true} : vector<64x32xf32> -> vector<64x32xf32>
    %113 = arith.mulf %111, %112 : vector<64x32xf32>
    %c0_46 = arith.constant 0 : index
    %c0_47 = arith.constant 0 : index
    %114 = vector.load %arg8[%c0_46, %c0_47] : memref<32x320xbf16, #tpu.memory_space<vmem>>, vector<32x128xbf16>
    %c5 = arith.constant 5 : index
    %c0_48 = arith.constant 0 : index
    %115 = vector.load %arg9[%c5, %c0_48] : memref<8x128xf32, #tpu.memory_space<vmem>>, vector<1x128xf32>
    %116 = arith.truncf %113 : vector<64x32xf32> to vector<64x32xbf16>
    %cst_49 = arith.constant dense<0.000000e+00> : vector<64x128xf32>
    %117 = tpu.matmul %116, %114, %cst_49 {dimension_numbers = #tpu.dot_dimension_numbers<[1], [0], [0], [1], [0, 0, 1, 1], [], []>} : vector<64x32xbf16>, vector<32x128xbf16>, vector<64x128xf32> -> vector<64x128xf32>
    %118 = vector.broadcast %115 : vector<1x128xf32> to vector<64x128xf32>
    %119 = arith.addf %117, %118 : vector<64x128xf32>
    %120 = arith.addf %119, %2 : vector<64x128xf32>
    %c0_50 = arith.constant 0 : index
    %c0_51 = arith.constant 0 : index
    %121 = vector.load %arg10[%c0_50, %c0_51] : memref<64x128xf32, #tpu.memory_space<vmem>>, vector<64x128xf32>
    tpu.vector_store %arg10[%c0_50, %c0_51], %120 {strides = array<i32>} : memref<64x128xf32, #tpu.memory_space<vmem>>, vector<64x128xf32>,
    return
  }
  func.func @transform_0(%arg0: i32) -> (i32, i32) {
    %c0_i32 = arith.constant 0 : i32
    %c0_i32_0 = arith.constant 0 : i32
    return %arg0, %c0_i32 : i32, i32
  }
  func.func @transform_1(%arg0: i32) -> (i32, i32) {
    %c0_i32 = arith.constant 0 : i32
    %c0_i32_0 = arith.constant 0 : i32
    %c0_i32_1 = arith.constant 0 : i32
    return %c0_i32, %c0_i32_0 : i32, i32
  }
  func.func @transform_2(%arg0: i32) -> (i32, i32) {
    %c0_i32 = arith.constant 0 : i32
    %c0_i32_0 = arith.constant 0 : i32
    return %arg0, %c0_i32 : i32, i32
  }
  func.func @transform_3(%arg0: i32) -> (i32, i32) {
    %c0_i32 = arith.constant 0 : i32
    %c0_i32_0 = arith.constant 0 : i32
    %c0_i32_1 = arith.constant 0 : i32
    return %c0_i32, %c0_i32_0 : i32, i32
  }
  func.func @transform_4(%arg0: i32) -> (i32, i32, i32) {
    %c0_i32 = arith.constant 0 : i32
    %c0_i32_0 = arith.constant 0 : i32
    %c0_i32_1 = arith.constant 0 : i32
    return %arg0, %c0_i32, %c0_i32_0 : i32, i32, i32
  }
  func.func @transform_5(%arg0: i32) -> (i32, i32) {
    %c0_i32 = arith.constant 0 : i32
    %c0_i32_0 = arith.constant 0 : i32
    %c0_i32_1 = arith.constant 0 : i32
    return %c0_i32, %c0_i32_0 : i32, i32
  }
  func.func @transform_6(%arg0: i32) -> (i32, i32) {
    %c0_i32 = arith.constant 0 : i32
    %c0_i32_0 = arith.constant 0 : i32
    %c0_i32_1 = arith.constant 0 : i32
    return %c0_i32, %c0_i32_0 : i32, i32
  }
  func.func @transform_7(%arg0: i32) -> (i32, i32) {
    %c0_i32 = arith.constant 0 : i32
    %c0_i32_0 = arith.constant 0 : i32
    %c0_i32_1 = arith.constant 0 : i32
    return %c0_i32, %c0_i32_0 : i32, i32
  }
  func.func @transform_8(%arg0: i32) -> (i32, i32) {
    %c0_i32 = arith.constant 0 : i32
    %c0_i32_0 = arith.constant 0 : i32
    %c0_i32_1 = arith.constant 0 : i32
    return %c0_i32, %c0_i32_0 : i32, i32
  }
  func.func @transform_9(%arg0: i32) -> (i32, i32) {
    %c0_i32 = arith.constant 0 : i32
    %c0_i32_0 = arith.constant 0 : i32
    return %arg0, %c0_i32 : i32, i32
  }
}

module attributes {stable_mosaic.version = 11 : i64} {
  func.func @_td_kernel(%arg0: i32, %arg1: memref<1x64x35xf32, #tpu.memory_space<vmem>>, %arg2: memref<35x64xbf16, #tpu.memory_space<vmem>>, %arg3: memref<1x64xf32, #tpu.memory_space<vmem>>, %arg4: memref<64x128xbf16, #tpu.memory_space<vmem>>, %arg5: memref<1x128xf32, #tpu.memory_space<vmem>>, %arg6: memref<16x128xf32, #tpu.memory_space<vmem>>) attributes {dimension_semantics = [#tpu.dimension_semantics<parallel>], iteration_bounds = array<i64: 2>, scalar_prefetch = 0 : i64, scratch_operands = 0 : i64, tpu.core_type = #tpu.core_type<tc>, window_params = [{transform_indices = @transform_0, window_bounds = array<i64: 1, 64, 35>}, {pipeline_mode = #tpu.pipeline_mode<synchronous>, transform_indices = @transform_1, window_bounds = array<i64: 35, 64>}, {pipeline_mode = #tpu.pipeline_mode<synchronous>, transform_indices = @transform_2, window_bounds = array<i64: 1, 64>}, {pipeline_mode = #tpu.pipeline_mode<synchronous>, transform_indices = @transform_3, window_bounds = array<i64: 64, 128>}, {pipeline_mode = #tpu.pipeline_mode<synchronous>, transform_indices = @transform_4, window_bounds = array<i64: 1, 128>}, {transform_indices = @transform_5, window_bounds = array<i64: 16, 128>}]} {
    %c0 = arith.constant 0 : index
    %c0_0 = arith.constant 0 : index
    %c0_1 = arith.constant 0 : index
    %0 = vector.load %arg1[%c0, %c0_0, %c0_1] : memref<1x64x35xf32, #tpu.memory_space<vmem>>, vector<1x64x35xf32>
    %1 = vector.shape_cast %0 : vector<1x64x35xf32> to vector<64x35xf32>
    %2 = arith.truncf %1 : vector<64x35xf32> to vector<64x35xbf16>
    %c0_2 = arith.constant 0 : index
    %c0_3 = arith.constant 0 : index
    %3 = vector.load %arg2[%c0_2, %c0_3] : memref<35x64xbf16, #tpu.memory_space<vmem>>, vector<35x64xbf16>
    %cst = arith.constant dense<0.000000e+00> : vector<64x64xf32>
    %4 = tpu.matmul %2, %3, %cst {dimension_numbers = #tpu.dot_dimension_numbers<[1], [0], [0], [1], [0, 0, 1, 1], [], []>} : vector<64x35xbf16>, vector<35x64xbf16>, vector<64x64xf32> -> vector<64x64xf32>
    %c0_4 = arith.constant 0 : index
    %c0_5 = arith.constant 0 : index
    %5 = vector.load %arg3[%c0_4, %c0_5] : memref<1x64xf32, #tpu.memory_space<vmem>>, vector<1x64xf32>
    %6 = vector.broadcast %5 : vector<1x64xf32> to vector<64x64xf32>
    %7 = arith.addf %4, %6 : vector<64x64xf32>
    %cst_6 = arith.constant 0.000000e+00 : f32
    %8 = vector.broadcast %cst_6 : f32 to vector<64x64xf32>
    %9 = arith.maximumf %7, %8 : vector<64x64xf32>
    %10 = arith.truncf %9 : vector<64x64xf32> to vector<64x64xbf16>
    %c0_7 = arith.constant 0 : index
    %c0_8 = arith.constant 0 : index
    %11 = vector.load %arg4[%c0_7, %c0_8] : memref<64x128xbf16, #tpu.memory_space<vmem>>, vector<64x128xbf16>
    %cst_9 = arith.constant dense<0.000000e+00> : vector<64x128xf32>
    %12 = tpu.matmul %10, %11, %cst_9 {dimension_numbers = #tpu.dot_dimension_numbers<[1], [0], [0], [1], [0, 0, 1, 1], [], []>} : vector<64x64xbf16>, vector<64x128xbf16>, vector<64x128xf32> -> vector<64x128xf32>
    %c0_10 = arith.constant 0 : index
    %c0_11 = arith.constant 0 : index
    %13 = vector.load %arg5[%c0_10, %c0_11] : memref<1x128xf32, #tpu.memory_space<vmem>>, vector<1x128xf32>
    %14 = vector.broadcast %13 : vector<1x128xf32> to vector<64x128xf32>
    %15 = arith.addf %12, %14 : vector<64x128xf32>
    %cst_12 = arith.constant 0.000000e+00 : f32
    %16 = vector.broadcast %cst_12 : f32 to vector<64x128xf32>
    %17 = arith.maximumf %15, %16 : vector<64x128xf32>
    %18 = vector.shape_cast %17 : vector<64x128xf32> to vector<4x16x128xf32>
    %cst_13 = arith.constant dense<0xFF800000> : vector<16x128xf32>
    %19 = vector.multi_reduction <maximumf>, %18, %cst_13 [0] : vector<4x16x128xf32> to vector<16x128xf32>
    %c0_14 = arith.constant 0 : index
    %c0_15 = arith.constant 0 : index
    %20 = vector.load %arg6[%c0_14, %c0_15] : memref<16x128xf32, #tpu.memory_space<vmem>>, vector<16x128xf32>
    tpu.vector_store %arg6[%c0_14, %c0_15], %19 {strides = array<i32>} : memref<16x128xf32, #tpu.memory_space<vmem>>, vector<16x128xf32>,
    return
  }
  func.func @transform_0(%arg0: i32) -> (i32, i32, i32) {
    %c0_i32 = arith.constant 0 : i32
    %c0_i32_0 = arith.constant 0 : i32
    %c0_i32_1 = arith.constant 0 : i32
    return %arg0, %c0_i32, %c0_i32_0 : i32, i32, i32
  }
  func.func @transform_1(%arg0: i32) -> (i32, i32) {
    %c0_i32 = arith.constant 0 : i32
    %c0_i32_0 = arith.constant 0 : i32
    %c0_i32_1 = arith.constant 0 : i32
    return %c0_i32, %c0_i32_0 : i32, i32
  }
  func.func @transform_2(%arg0: i32) -> (i32, i32) {
    %c0_i32 = arith.constant 0 : i32
    %c0_i32_0 = arith.constant 0 : i32
    %c0_i32_1 = arith.constant 0 : i32
    return %c0_i32, %c0_i32_0 : i32, i32
  }
  func.func @transform_3(%arg0: i32) -> (i32, i32) {
    %c0_i32 = arith.constant 0 : i32
    %c0_i32_0 = arith.constant 0 : i32
    %c0_i32_1 = arith.constant 0 : i32
    return %c0_i32, %c0_i32_0 : i32, i32
  }
  func.func @transform_4(%arg0: i32) -> (i32, i32) {
    %c0_i32 = arith.constant 0 : i32
    %c0_i32_0 = arith.constant 0 : i32
    %c0_i32_1 = arith.constant 0 : i32
    return %c0_i32, %c0_i32_0 : i32, i32
  }
  func.func @transform_5(%arg0: i32) -> (i32, i32) {
    %c0_i32 = arith.constant 0 : i32
    %c0_i32_0 = arith.constant 0 : i32
    return %arg0, %c0_i32 : i32, i32
  }
}

module attributes {stable_mosaic.version = 11 : i64} {
  func.func @_pt_block_kernel(%arg0: i32, %arg1: memref<16x128xf32, #tpu.memory_space<vmem>>, %arg2: memref<32x128xf32, #tpu.memory_space<vmem>>, %arg3: memref<16x8xf32, #tpu.memory_space<vmem>>, %arg4: memref<32x8xf32, #tpu.memory_space<vmem>>, %arg5: memref<1x4x16xi32, #tpu.memory_space<vmem>>, %arg6: memref<128x32xbf16, #tpu.memory_space<vmem>>, %arg7: memref<3x32xf32, #tpu.memory_space<vmem>>, %arg8: memref<32x320xbf16, #tpu.memory_space<vmem>>, %arg9: memref<8x128xf32, #tpu.memory_space<vmem>>, %arg10: memref<16x128xf32, #tpu.memory_space<vmem>>) attributes {dimension_semantics = [#tpu.dimension_semantics<parallel>], iteration_bounds = array<i64: 2>, scalar_prefetch = 0 : i64, scratch_operands = 0 : i64, tpu.core_type = #tpu.core_type<tc>, window_params = [{transform_indices = @transform_0, window_bounds = array<i64: 16, 128>}, {pipeline_mode = #tpu.pipeline_mode<synchronous>, transform_indices = @transform_1, window_bounds = array<i64: 32, 128>}, {transform_indices = @transform_2, window_bounds = array<i64: 16, 8>}, {pipeline_mode = #tpu.pipeline_mode<synchronous>, transform_indices = @transform_3, window_bounds = array<i64: 32, 8>}, {transform_indices = @transform_4, window_bounds = array<i64: 1, 4, 16>}, {pipeline_mode = #tpu.pipeline_mode<synchronous>, transform_indices = @transform_5, window_bounds = array<i64: 128, 32>}, {pipeline_mode = #tpu.pipeline_mode<synchronous>, transform_indices = @transform_6, window_bounds = array<i64: 3, 32>}, {pipeline_mode = #tpu.pipeline_mode<synchronous>, transform_indices = @transform_7, window_bounds = array<i64: 32, 320>}, {pipeline_mode = #tpu.pipeline_mode<synchronous>, transform_indices = @transform_8, window_bounds = array<i64: 8, 128>}, {transform_indices = @transform_9, window_bounds = array<i64: 16, 128>}]} {
    %c0 = arith.constant 0 : index
    %c0_0 = arith.constant 0 : index
    %0 = vector.load %arg6[%c0, %c0_0] : memref<128x32xbf16, #tpu.memory_space<vmem>>, vector<128x32xbf16>
    %c0_1 = arith.constant 0 : index
    %c0_2 = arith.constant 0 : index
    %1 = vector.load %arg9[%c0_1, %c0_2] : memref<8x128xf32, #tpu.memory_space<vmem>>, vector<1x32xf32>
    %c0_3 = arith.constant 0 : index
    %c0_4 = arith.constant 0 : index
    %2 = vector.load %arg1[%c0_3, %c0_4] : memref<16x128xf32, #tpu.memory_space<vmem>>, vector<16x128xf32>
    %3 = arith.truncf %2 : vector<16x128xf32> to vector<16x128xbf16>
    %cst = arith.constant dense<0.000000e+00> : vector<16x32xf32>
    %4 = tpu.matmul %3, %0, %cst {dimension_numbers = #tpu.dot_dimension_numbers<[1], [0], [0], [1], [0, 0, 1, 1], [], []>} : vector<16x128xbf16>, vector<128x32xbf16>, vector<16x32xf32> -> vector<16x32xf32>
    %5 = vector.broadcast %1 : vector<1x32xf32> to vector<16x32xf32>
    %6 = arith.addf %4, %5 : vector<16x32xf32>
    %c0_5 = arith.constant 0 : index
    %c0_6 = arith.constant 0 : index
    %7 = vector.load %arg2[%c0_5, %c0_6] : memref<32x128xf32, #tpu.memory_space<vmem>>, vector<32x128xf32>
    %8 = arith.truncf %7 : vector<32x128xf32> to vector<32x128xbf16>
    %cst_7 = arith.constant dense<0.000000e+00> : vector<32x32xf32>
    %9 = tpu.matmul %8, %0, %cst_7 {dimension_numbers = #tpu.dot_dimension_numbers<[1], [0], [0], [1], [0, 0, 1, 1], [], []>} : vector<32x128xbf16>, vector<128x32xbf16>, vector<32x32xf32> -> vector<32x32xf32>
    %10 = vector.broadcast %1 : vector<1x32xf32> to vector<32x32xf32>
    %11 = arith.addf %9, %10 : vector<32x32xf32>
    %c0_8 = arith.constant 0 : index
    %c128 = arith.constant 128 : index
    %12 = vector.load %arg8[%c0_8, %c128] : memref<32x320xbf16, #tpu.memory_space<vmem>>, vector<32x32xbf16>
    %c0_9 = arith.constant 0 : index
    %c160 = arith.constant 160 : index
    %13 = vector.load %arg8[%c0_9, %c160] : memref<32x320xbf16, #tpu.memory_space<vmem>>, vector<32x32xbf16>
    %c0_10 = arith.constant 0 : index
    %c192 = arith.constant 192 : index
    %14 = vector.load %arg8[%c0_10, %c192] : memref<32x320xbf16, #tpu.memory_space<vmem>>, vector<32x32xbf16>
    %15 = arith.truncf %6 : vector<16x32xf32> to vector<16x32xbf16>
    %cst_11 = arith.constant dense<0.000000e+00> : vector<16x32xf32>
    %16 = tpu.matmul %15, %12, %cst_11 {dimension_numbers = #tpu.dot_dimension_numbers<[1], [0], [0], [1], [0, 0, 1, 1], [], []>} : vector<16x32xbf16>, vector<32x32xbf16>, vector<16x32xf32> -> vector<16x32xf32>
    %17 = arith.truncf %11 : vector<32x32xf32> to vector<32x32xbf16>
    %cst_12 = arith.constant dense<0.000000e+00> : vector<32x32xf32>
    %18 = tpu.matmul %17, %13, %cst_12 {dimension_numbers = #tpu.dot_dimension_numbers<[1], [0], [0], [1], [0, 0, 1, 1], [], []>} : vector<32x32xbf16>, vector<32x32xbf16>, vector<32x32xf32> -> vector<32x32xf32>
    %19 = arith.truncf %18 : vector<32x32xf32> to vector<32x32xbf16>
    %20 = arith.truncf %11 : vector<32x32xf32> to vector<32x32xbf16>
    %cst_13 = arith.constant dense<0.000000e+00> : vector<32x32xf32>
    %21 = tpu.matmul %20, %14, %cst_13 {dimension_numbers = #tpu.dot_dimension_numbers<[1], [0], [0], [1], [0, 0, 1, 1], [], []>} : vector<32x32xbf16>, vector<32x32xbf16>, vector<32x32xf32> -> vector<32x32xf32>
    %22 = arith.truncf %21 : vector<32x32xf32> to vector<32x32xbf16>
    %c0_14 = arith.constant 0 : index
    %c0_15 = arith.constant 0 : index
    %c0_16 = arith.constant 0 : index
    %23 = vector.load %arg5[%c0_14, %c0_15, %c0_16] : memref<1x4x16xi32, #tpu.memory_space<vmem>>, vector<1x4x16xi32>
    %24 = vector.shape_cast %23 : vector<1x4x16xi32> to vector<4x16xi32>
    %25 = tpu.iota {dimensions = array<i32: 2>} : vector<4x16x32xi32>
    %26 = vector.shape_cast %24 : vector<4x16xi32> to vector<4x16x1xi32>
    %27 = vector.broadcast %26 : vector<4x16x1xi32> to vector<4x16x32xi32>
    %28 = arith.cmpi eq, %27, %25 : vector<4x16x32xi32>
    %29 = arith.extui %28 : vector<4x16x32xi1> to vector<4x16x32xi32>
    %30 = arith.sitofp %29 : vector<4x16x32xi32> to vector<4x16x32xf32>
    %31 = arith.truncf %30 : vector<4x16x32xf32> to vector<4x16x32xbf16>
    %32 = vector.shape_cast %31 : vector<4x16x32xbf16> to vector<64x32xbf16>
    %33 = arith.extui %28 : vector<4x16x32xi1> to vector<4x16x32xi32>
    %34 = arith.sitofp %33 : vector<4x16x32xi32> to vector<4x16x32xf32>
    %35 = vector.shape_cast %34 : vector<4x16x32xf32> to vector<64x32xf32>
    %cst_17 = arith.constant dense<0.000000e+00> : vector<64x32xf32>
    %36 = tpu.matmul %32, %19, %cst_17 {dimension_numbers = #tpu.dot_dimension_numbers<[1], [0], [0], [1], [0, 0, 1, 1], [], []>} : vector<64x32xbf16>, vector<32x32xbf16>, vector<64x32xf32> -> vector<64x32xf32>
    %37 = vector.shape_cast %36 : vector<64x32xf32> to vector<4x16x32xf32>
    %cst_18 = arith.constant dense<0.000000e+00> : vector<64x32xf32>
    %38 = tpu.matmul %32, %22, %cst_18 {dimension_numbers = #tpu.dot_dimension_numbers<[1], [0], [0], [1], [0, 0, 1, 1], [], []>} : vector<64x32xbf16>, vector<32x32xbf16>, vector<64x32xf32> -> vector<64x32xf32>
    %39 = vector.shape_cast %38 : vector<64x32xf32> to vector<4x16x32xf32>
    %c0_19 = arith.constant 0 : index
    %c0_20 = arith.constant 0 : index
    %40 = vector.load %arg4[%c0_19, %c0_20] : memref<32x8xf32, #tpu.memory_space<vmem>>, vector<32x8xf32>
    %cst_21 = arith.constant dense<0.000000e+00> : vector<64x8xf32>
    %41 = tpu.matmul %35, %40, %cst_21 {dimension_numbers = #tpu.dot_dimension_numbers<[1], [0], [0], [1], [0, 0, 1, 1], [], []>} : vector<64x32xf32>, vector<32x8xf32>, vector<64x8xf32> -> vector<64x8xf32>
    %42 = vector.shape_cast %41 : vector<64x8xf32> to vector<4x16x8xf32>
    %c0_22 = arith.constant 0 : index
    %c0_23 = arith.constant 0 : index
    %43 = vector.load %arg3[%c0_22, %c0_23] : memref<16x8xf32, #tpu.memory_space<vmem>>, vector<16x8xf32>
    %44 = vector.shape_cast %43 : vector<16x8xf32> to vector<1x16x8xf32>
    %45 = vector.broadcast %44 : vector<1x16x8xf32> to vector<4x16x8xf32>
    %46 = arith.subf %45, %42 : vector<4x16x8xf32>
    %c1 = arith.constant 1 : index
    %c0_24 = arith.constant 0 : index
    %47 = vector.load %arg9[%c1, %c0_24] : memref<8x128xf32, #tpu.memory_space<vmem>>, vector<1x32xf32>
    %48 = vector.shape_cast %47 : vector<1x32xf32> to vector<1x1x32xf32>
    %49 = vector.extract_strided_slice %46 {offsets = [0, 0, 0], sizes = [4, 16, 1], strides = [1, 1, 1]} : vector<4x16x8xf32> to vector<4x16x1xf32>
    %c0_25 = arith.constant 0 : index
    %c0_26 = arith.constant 0 : index
    %50 = vector.load %arg7[%c0_25, %c0_26] : memref<3x32xf32, #tpu.memory_space<vmem>>, vector<1x32xf32>
    %51 = vector.shape_cast %50 : vector<1x32xf32> to vector<1x1x32xf32>
    %52 = vector.broadcast %49 : vector<4x16x1xf32> to vector<4x16x32xf32>
    %53 = vector.broadcast %51 : vector<1x1x32xf32> to vector<4x16x32xf32>
    %54 = arith.mulf %52, %53 : vector<4x16x32xf32>
    %55 = vector.broadcast %48 : vector<1x1x32xf32> to vector<4x16x32xf32>
    %56 = arith.addf %55, %54 : vector<4x16x32xf32>
    %57 = vector.extract_strided_slice %46 {offsets = [0, 0, 1], sizes = [4, 16, 1], strides = [1, 1, 1]} : vector<4x16x8xf32> to vector<4x16x1xf32>
    %c1_27 = arith.constant 1 : index
    %c0_28 = arith.constant 0 : index
    %58 = vector.load %arg7[%c1_27, %c0_28] : memref<3x32xf32, #tpu.memory_space<vmem>>, vector<1x32xf32>
    %59 = vector.shape_cast %58 : vector<1x32xf32> to vector<1x1x32xf32>
    %60 = vector.broadcast %57 : vector<4x16x1xf32> to vector<4x16x32xf32>
    %61 = vector.broadcast %59 : vector<1x1x32xf32> to vector<4x16x32xf32>
    %62 = arith.mulf %60, %61 : vector<4x16x32xf32>
    %63 = arith.addf %56, %62 : vector<4x16x32xf32>
    %64 = vector.extract_strided_slice %46 {offsets = [0, 0, 2], sizes = [4, 16, 1], strides = [1, 1, 1]} : vector<4x16x8xf32> to vector<4x16x1xf32>
    %c2 = arith.constant 2 : index
    %c0_29 = arith.constant 0 : index
    %65 = vector.load %arg7[%c2, %c0_29] : memref<3x32xf32, #tpu.memory_space<vmem>>, vector<1x32xf32>
    %66 = vector.shape_cast %65 : vector<1x32xf32> to vector<1x1x32xf32>
    %67 = vector.broadcast %64 : vector<4x16x1xf32> to vector<4x16x32xf32>
    %68 = vector.broadcast %66 : vector<1x1x32xf32> to vector<4x16x32xf32>
    %69 = arith.mulf %67, %68 : vector<4x16x32xf32>
    %70 = arith.addf %63, %69 : vector<4x16x32xf32>
    %cst_30 = arith.constant 0.000000e+00 : f32
    %71 = vector.broadcast %cst_30 : f32 to vector<4x16x32xf32>
    %72 = arith.maximumf %70, %71 : vector<4x16x32xf32>
    %c0_31 = arith.constant 0 : index
    %c224 = arith.constant 224 : index
    %73 = vector.load %arg8[%c0_31, %c224] : memref<32x320xbf16, #tpu.memory_space<vmem>>, vector<32x32xbf16>
    %c2_32 = arith.constant 2 : index
    %c0_33 = arith.constant 0 : index
    %74 = vector.load %arg9[%c2_32, %c0_33] : memref<8x128xf32, #tpu.memory_space<vmem>>, vector<1x32xf32>
    %75 = vector.shape_cast %72 : vector<4x16x32xf32> to vector<64x32xf32>
    %76 = arith.truncf %75 : vector<64x32xf32> to vector<64x32xbf16>
    %cst_34 = arith.constant dense<0.000000e+00> : vector<64x32xf32>
    %77 = tpu.matmul %76, %73, %cst_34 {dimension_numbers = #tpu.dot_dimension_numbers<[1], [0], [0], [1], [0, 0, 1, 1], [], []>} : vector<64x32xbf16>, vector<32x32xbf16>, vector<64x32xf32> -> vector<64x32xf32>
    %78 = vector.broadcast %74 : vector<1x32xf32> to vector<64x32xf32>
    %79 = arith.addf %77, %78 : vector<64x32xf32>
    %80 = vector.shape_cast %79 : vector<64x32xf32> to vector<4x16x32xf32>
    %81 = vector.shape_cast %16 : vector<16x32xf32> to vector<1x16x32xf32>
    %82 = vector.broadcast %81 : vector<1x16x32xf32> to vector<4x16x32xf32>
    %83 = arith.subf %82, %37 : vector<4x16x32xf32>
    %84 = arith.addf %83, %80 : vector<4x16x32xf32>
    %c0_35 = arith.constant 0 : index
    %c256 = arith.constant 256 : index
    %85 = vector.load %arg8[%c0_35, %c256] : memref<32x320xbf16, #tpu.memory_space<vmem>>, vector<32x32xbf16>
    %c3 = arith.constant 3 : index
    %c0_36 = arith.constant 0 : index
    %86 = vector.load %arg9[%c3, %c0_36] : memref<8x128xf32, #tpu.memory_space<vmem>>, vector<1x32xf32>
    %c0_37 = arith.constant 0 : index
    %c288 = arith.constant 288 : index
    %87 = vector.load %arg8[%c0_37, %c288] : memref<32x320xbf16, #tpu.memory_space<vmem>>, vector<32x32xbf16>
    %c4 = arith.constant 4 : index
    %c0_38 = arith.constant 0 : index
    %88 = vector.load %arg9[%c4, %c0_38] : memref<8x128xf32, #tpu.memory_space<vmem>>, vector<1x32xf32>
    %89 = vector.shape_cast %84 : vector<4x16x32xf32> to vector<64x32xf32>
    %90 = arith.truncf %89 : vector<64x32xf32> to vector<64x32xbf16>
    %cst_39 = arith.constant dense<0.000000e+00> : vector<64x32xf32>
    %91 = tpu.matmul %90, %85, %cst_39 {dimension_numbers = #tpu.dot_dimension_numbers<[1], [0], [0], [1], [0, 0, 1, 1], [], []>} : vector<64x32xbf16>, vector<32x32xbf16>, vector<64x32xf32> -> vector<64x32xf32>
    %92 = vector.broadcast %86 : vector<1x32xf32> to vector<64x32xf32>
    %93 = arith.addf %91, %92 : vector<64x32xf32>
    %cst_40 = arith.constant 0.000000e+00 : f32
    %94 = vector.broadcast %cst_40 : f32 to vector<64x32xf32>
    %95 = arith.maximumf %93, %94 : vector<64x32xf32>
    %96 = arith.truncf %95 : vector<64x32xf32> to vector<64x32xbf16>
    %cst_41 = arith.constant dense<0.000000e+00> : vector<64x32xf32>
    %97 = tpu.matmul %96, %87, %cst_41 {dimension_numbers = #tpu.dot_dimension_numbers<[1], [0], [0], [1], [0, 0, 1, 1], [], []>} : vector<64x32xbf16>, vector<32x32xbf16>, vector<64x32xf32> -> vector<64x32xf32>
    %98 = vector.broadcast %88 : vector<1x32xf32> to vector<64x32xf32>
    %99 = arith.addf %97, %98 : vector<64x32xf32>
    %cst_42 = arith.constant 0.176776692 : f32
    %100 = vector.broadcast %cst_42 : f32 to vector<64x32xf32>
    %101 = arith.mulf %99, %100 : vector<64x32xf32>
    %102 = vector.shape_cast %101 : vector<64x32xf32> to vector<4x16x32xf32>
    %cst_43 = arith.constant dense<0xFF800000> : vector<16x32xf32>
    %103 = vector.multi_reduction <maximumf>, %102, %cst_43 [0] : vector<4x16x32xf32> to vector<16x32xf32>
    %104 = vector.shape_cast %103 : vector<16x32xf32> to vector<1x16x32xf32>
    %105 = vector.broadcast %104 : vector<1x16x32xf32> to vector<4x16x32xf32>
    %106 = arith.subf %102, %105 : vector<4x16x32xf32>
    %107 = math.exp %106 : vector<4x16x32xf32>
    %cst_44 = arith.constant dense<0.000000e+00> : vector<16x32xf32>
    %108 = vector.multi_reduction <add>, %107, %cst_44 [0] : vector<4x16x32xf32> to vector<16x32xf32>
    %109 = arith.addf %39, %80 : vector<4x16x32xf32>
    %110 = arith.mulf %107, %109 : vector<4x16x32xf32>
    %cst_45 = arith.constant dense<0.000000e+00> : vector<16x32xf32>
    %111 = vector.multi_reduction <add>, %110, %cst_45 [0] : vector<4x16x32xf32> to vector<16x32xf32>
    %112 = tpu.reciprocal %108 {approx = true} : vector<16x32xf32> -> vector<16x32xf32>
    %113 = arith.mulf %111, %112 : vector<16x32xf32>
    %c0_46 = arith.constant 0 : index
    %c0_47 = arith.constant 0 : index
    %114 = vector.load %arg8[%c0_46, %c0_47] : memref<32x320xbf16, #tpu.memory_space<vmem>>, vector<32x128xbf16>
    %c5 = arith.constant 5 : index
    %c0_48 = arith.constant 0 : index
    %115 = vector.load %arg9[%c5, %c0_48] : memref<8x128xf32, #tpu.memory_space<vmem>>, vector<1x128xf32>
    %116 = arith.truncf %113 : vector<16x32xf32> to vector<16x32xbf16>
    %cst_49 = arith.constant dense<0.000000e+00> : vector<16x128xf32>
    %117 = tpu.matmul %116, %114, %cst_49 {dimension_numbers = #tpu.dot_dimension_numbers<[1], [0], [0], [1], [0, 0, 1, 1], [], []>} : vector<16x32xbf16>, vector<32x128xbf16>, vector<16x128xf32> -> vector<16x128xf32>
    %118 = vector.broadcast %115 : vector<1x128xf32> to vector<16x128xf32>
    %119 = arith.addf %117, %118 : vector<16x128xf32>
    %120 = arith.addf %119, %2 : vector<16x128xf32>
    %c0_50 = arith.constant 0 : index
    %c0_51 = arith.constant 0 : index
    %121 = vector.load %arg10[%c0_50, %c0_51] : memref<16x128xf32, #tpu.memory_space<vmem>>, vector<16x128xf32>
    tpu.vector_store %arg10[%c0_50, %c0_51], %120 {strides = array<i32>} : memref<16x128xf32, #tpu.memory_space<vmem>>, vector<16x128xf32>,
    return
  }
  func.func @transform_0(%arg0: i32) -> (i32, i32) {
    %c0_i32 = arith.constant 0 : i32
    %c0_i32_0 = arith.constant 0 : i32
    return %arg0, %c0_i32 : i32, i32
  }
  func.func @transform_1(%arg0: i32) -> (i32, i32) {
    %c0_i32 = arith.constant 0 : i32
    %c0_i32_0 = arith.constant 0 : i32
    %c0_i32_1 = arith.constant 0 : i32
    return %c0_i32, %c0_i32_0 : i32, i32
  }
  func.func @transform_2(%arg0: i32) -> (i32, i32) {
    %c0_i32 = arith.constant 0 : i32
    %c0_i32_0 = arith.constant 0 : i32
    return %arg0, %c0_i32 : i32, i32
  }
  func.func @transform_3(%arg0: i32) -> (i32, i32) {
    %c0_i32 = arith.constant 0 : i32
    %c0_i32_0 = arith.constant 0 : i32
    %c0_i32_1 = arith.constant 0 : i32
    return %c0_i32, %c0_i32_0 : i32, i32
  }
  func.func @transform_4(%arg0: i32) -> (i32, i32, i32) {
    %c0_i32 = arith.constant 0 : i32
    %c0_i32_0 = arith.constant 0 : i32
    %c0_i32_1 = arith.constant 0 : i32
    return %arg0, %c0_i32, %c0_i32_0 : i32, i32, i32
  }
  func.func @transform_5(%arg0: i32) -> (i32, i32) {
    %c0_i32 = arith.constant 0 : i32
    %c0_i32_0 = arith.constant 0 : i32
    %c0_i32_1 = arith.constant 0 : i32
    return %c0_i32, %c0_i32_0 : i32, i32
  }
  func.func @transform_6(%arg0: i32) -> (i32, i32) {
    %c0_i32 = arith.constant 0 : i32
    %c0_i32_0 = arith.constant 0 : i32
    %c0_i32_1 = arith.constant 0 : i32
    return %c0_i32, %c0_i32_0 : i32, i32
  }
  func.func @transform_7(%arg0: i32) -> (i32, i32) {
    %c0_i32 = arith.constant 0 : i32
    %c0_i32_0 = arith.constant 0 : i32
    %c0_i32_1 = arith.constant 0 : i32
    return %c0_i32, %c0_i32_0 : i32, i32
  }
  func.func @transform_8(%arg0: i32) -> (i32, i32) {
    %c0_i32 = arith.constant 0 : i32
    %c0_i32_0 = arith.constant 0 : i32
    %c0_i32_1 = arith.constant 0 : i32
    return %c0_i32, %c0_i32_0 : i32, i32
  }
  func.func @transform_9(%arg0: i32) -> (i32, i32) {
    %c0_i32 = arith.constant 0 : i32
    %c0_i32_0 = arith.constant 0 : i32
    return %arg0, %c0_i32 : i32, i32
  }
}

module attributes {stable_mosaic.version = 11 : i64} {
  func.func @_td_kernel(%arg0: i32, %arg1: memref<1x32x67xf32, #tpu.memory_space<vmem>>, %arg2: memref<67x128xbf16, #tpu.memory_space<vmem>>, %arg3: memref<1x128xf32, #tpu.memory_space<vmem>>, %arg4: memref<128x128xbf16, #tpu.memory_space<vmem>>, %arg5: memref<1x128xf32, #tpu.memory_space<vmem>>, %arg6: memref<8x128xf32, #tpu.memory_space<vmem>>) attributes {dimension_semantics = [#tpu.dimension_semantics<parallel>], iteration_bounds = array<i64: 1>, scalar_prefetch = 0 : i64, scratch_operands = 0 : i64, tpu.core_type = #tpu.core_type<tc>, window_params = [{transform_indices = @transform_0, window_bounds = array<i64: 1, 32, 67>}, {pipeline_mode = #tpu.pipeline_mode<synchronous>, transform_indices = @transform_1, window_bounds = array<i64: 67, 128>}, {pipeline_mode = #tpu.pipeline_mode<synchronous>, transform_indices = @transform_2, window_bounds = array<i64: 1, 128>}, {pipeline_mode = #tpu.pipeline_mode<synchronous>, transform_indices = @transform_3, window_bounds = array<i64: 128, 128>}, {pipeline_mode = #tpu.pipeline_mode<synchronous>, transform_indices = @transform_4, window_bounds = array<i64: 1, 128>}, {transform_indices = @transform_5, window_bounds = array<i64: 8, 128>}]} {
    %c0 = arith.constant 0 : index
    %c0_0 = arith.constant 0 : index
    %c0_1 = arith.constant 0 : index
    %0 = vector.load %arg1[%c0, %c0_0, %c0_1] : memref<1x32x67xf32, #tpu.memory_space<vmem>>, vector<1x32x67xf32>
    %1 = vector.shape_cast %0 : vector<1x32x67xf32> to vector<32x67xf32>
    %2 = arith.truncf %1 : vector<32x67xf32> to vector<32x67xbf16>
    %c0_2 = arith.constant 0 : index
    %c0_3 = arith.constant 0 : index
    %3 = vector.load %arg2[%c0_2, %c0_3] : memref<67x128xbf16, #tpu.memory_space<vmem>>, vector<67x128xbf16>
    %cst = arith.constant dense<0.000000e+00> : vector<32x128xf32>
    %4 = tpu.matmul %2, %3, %cst {dimension_numbers = #tpu.dot_dimension_numbers<[1], [0], [0], [1], [0, 0, 1, 1], [], []>} : vector<32x67xbf16>, vector<67x128xbf16>, vector<32x128xf32> -> vector<32x128xf32>
    %c0_4 = arith.constant 0 : index
    %c0_5 = arith.constant 0 : index
    %5 = vector.load %arg3[%c0_4, %c0_5] : memref<1x128xf32, #tpu.memory_space<vmem>>, vector<1x128xf32>
    %6 = vector.broadcast %5 : vector<1x128xf32> to vector<32x128xf32>
    %7 = arith.addf %4, %6 : vector<32x128xf32>
    %cst_6 = arith.constant 0.000000e+00 : f32
    %8 = vector.broadcast %cst_6 : f32 to vector<32x128xf32>
    %9 = arith.maximumf %7, %8 : vector<32x128xf32>
    %10 = arith.truncf %9 : vector<32x128xf32> to vector<32x128xbf16>
    %c0_7 = arith.constant 0 : index
    %c0_8 = arith.constant 0 : index
    %11 = vector.load %arg4[%c0_7, %c0_8] : memref<128x128xbf16, #tpu.memory_space<vmem>>, vector<128x128xbf16>
    %cst_9 = arith.constant dense<0.000000e+00> : vector<32x128xf32>
    %12 = tpu.matmul %10, %11, %cst_9 {dimension_numbers = #tpu.dot_dimension_numbers<[1], [0], [0], [1], [0, 0, 1, 1], [], []>} : vector<32x128xbf16>, vector<128x128xbf16>, vector<32x128xf32> -> vector<32x128xf32>
    %c0_10 = arith.constant 0 : index
    %c0_11 = arith.constant 0 : index
    %13 = vector.load %arg5[%c0_10, %c0_11] : memref<1x128xf32, #tpu.memory_space<vmem>>, vector<1x128xf32>
    %14 = vector.broadcast %13 : vector<1x128xf32> to vector<32x128xf32>
    %15 = arith.addf %12, %14 : vector<32x128xf32>
    %cst_12 = arith.constant 0.000000e+00 : f32
    %16 = vector.broadcast %cst_12 : f32 to vector<32x128xf32>
    %17 = arith.maximumf %15, %16 : vector<32x128xf32>
    %18 = vector.shape_cast %17 : vector<32x128xf32> to vector<4x8x128xf32>
    %cst_13 = arith.constant dense<0xFF800000> : vector<8x128xf32>
    %19 = vector.multi_reduction <maximumf>, %18, %cst_13 [0] : vector<4x8x128xf32> to vector<8x128xf32>
    %c0_14 = arith.constant 0 : index
    %c0_15 = arith.constant 0 : index
    %20 = vector.load %arg6[%c0_14, %c0_15] : memref<8x128xf32, #tpu.memory_space<vmem>>, vector<8x128xf32>
    tpu.vector_store %arg6[%c0_14, %c0_15], %19 {strides = array<i32>} : memref<8x128xf32, #tpu.memory_space<vmem>>, vector<8x128xf32>,
    return
  }
  func.func @transform_0(%arg0: i32) -> (i32, i32, i32) {
    %c0_i32 = arith.constant 0 : i32
    %c0_i32_0 = arith.constant 0 : i32
    %c0_i32_1 = arith.constant 0 : i32
    return %arg0, %c0_i32, %c0_i32_0 : i32, i32, i32
  }
  func.func @transform_1(%arg0: i32) -> (i32, i32) {
    %c0_i32 = arith.constant 0 : i32
    %c0_i32_0 = arith.constant 0 : i32
    %c0_i32_1 = arith.constant 0 : i32
    return %c0_i32, %c0_i32_0 : i32, i32
  }
  func.func @transform_2(%arg0: i32) -> (i32, i32) {
    %c0_i32 = arith.constant 0 : i32
    %c0_i32_0 = arith.constant 0 : i32
    %c0_i32_1 = arith.constant 0 : i32
    return %c0_i32, %c0_i32_0 : i32, i32
  }
  func.func @transform_3(%arg0: i32) -> (i32, i32) {
    %c0_i32 = arith.constant 0 : i32
    %c0_i32_0 = arith.constant 0 : i32
    %c0_i32_1 = arith.constant 0 : i32
    return %c0_i32, %c0_i32_0 : i32, i32
  }
  func.func @transform_4(%arg0: i32) -> (i32, i32) {
    %c0_i32 = arith.constant 0 : i32
    %c0_i32_0 = arith.constant 0 : i32
    %c0_i32_1 = arith.constant 0 : i32
    return %c0_i32, %c0_i32_0 : i32, i32
  }
  func.func @transform_5(%arg0: i32) -> (i32, i32) {
    %c0_i32 = arith.constant 0 : i32
    %c0_i32_0 = arith.constant 0 : i32
    return %arg0, %c0_i32 : i32, i32
  }
}

module attributes {stable_mosaic.version = 11 : i64} {
  func.func @_pt_block_kernel(%arg0: i32, %arg1: memref<8x128xf32, #tpu.memory_space<vmem>>, %arg2: memref<8x128xf32, #tpu.memory_space<vmem>>, %arg3: memref<8x8xf32, #tpu.memory_space<vmem>>, %arg4: memref<8x8xf32, #tpu.memory_space<vmem>>, %arg5: memref<1x4x8xi32, #tpu.memory_space<vmem>>, %arg6: memref<128x32xbf16, #tpu.memory_space<vmem>>, %arg7: memref<3x32xf32, #tpu.memory_space<vmem>>, %arg8: memref<32x320xbf16, #tpu.memory_space<vmem>>, %arg9: memref<8x128xf32, #tpu.memory_space<vmem>>, %arg10: memref<8x128xf32, #tpu.memory_space<vmem>>) attributes {dimension_semantics = [#tpu.dimension_semantics<parallel>], iteration_bounds = array<i64: 1>, scalar_prefetch = 0 : i64, scratch_operands = 0 : i64, tpu.core_type = #tpu.core_type<tc>, window_params = [{transform_indices = @transform_0, window_bounds = array<i64: 8, 128>}, {pipeline_mode = #tpu.pipeline_mode<synchronous>, transform_indices = @transform_1, window_bounds = array<i64: 8, 128>}, {transform_indices = @transform_2, window_bounds = array<i64: 8, 8>}, {pipeline_mode = #tpu.pipeline_mode<synchronous>, transform_indices = @transform_3, window_bounds = array<i64: 8, 8>}, {transform_indices = @transform_4, window_bounds = array<i64: 1, 4, 8>}, {pipeline_mode = #tpu.pipeline_mode<synchronous>, transform_indices = @transform_5, window_bounds = array<i64: 128, 32>}, {pipeline_mode = #tpu.pipeline_mode<synchronous>, transform_indices = @transform_6, window_bounds = array<i64: 3, 32>}, {pipeline_mode = #tpu.pipeline_mode<synchronous>, transform_indices = @transform_7, window_bounds = array<i64: 32, 320>}, {pipeline_mode = #tpu.pipeline_mode<synchronous>, transform_indices = @transform_8, window_bounds = array<i64: 8, 128>}, {transform_indices = @transform_9, window_bounds = array<i64: 8, 128>}]} {
    %c0 = arith.constant 0 : index
    %c0_0 = arith.constant 0 : index
    %0 = vector.load %arg6[%c0, %c0_0] : memref<128x32xbf16, #tpu.memory_space<vmem>>, vector<128x32xbf16>
    %c0_1 = arith.constant 0 : index
    %c0_2 = arith.constant 0 : index
    %1 = vector.load %arg9[%c0_1, %c0_2] : memref<8x128xf32, #tpu.memory_space<vmem>>, vector<1x32xf32>
    %c0_3 = arith.constant 0 : index
    %c0_4 = arith.constant 0 : index
    %2 = vector.load %arg1[%c0_3, %c0_4] : memref<8x128xf32, #tpu.memory_space<vmem>>, vector<8x128xf32>
    %3 = arith.truncf %2 : vector<8x128xf32> to vector<8x128xbf16>
    %cst = arith.constant dense<0.000000e+00> : vector<8x32xf32>
    %4 = tpu.matmul %3, %0, %cst {dimension_numbers = #tpu.dot_dimension_numbers<[1], [0], [0], [1], [0, 0, 1, 1], [], []>} : vector<8x128xbf16>, vector<128x32xbf16>, vector<8x32xf32> -> vector<8x32xf32>
    %5 = vector.broadcast %1 : vector<1x32xf32> to vector<8x32xf32>
    %6 = arith.addf %4, %5 : vector<8x32xf32>
    %c0_5 = arith.constant 0 : index
    %c0_6 = arith.constant 0 : index
    %7 = vector.load %arg2[%c0_5, %c0_6] : memref<8x128xf32, #tpu.memory_space<vmem>>, vector<8x128xf32>
    %8 = arith.truncf %7 : vector<8x128xf32> to vector<8x128xbf16>
    %cst_7 = arith.constant dense<0.000000e+00> : vector<8x32xf32>
    %9 = tpu.matmul %8, %0, %cst_7 {dimension_numbers = #tpu.dot_dimension_numbers<[1], [0], [0], [1], [0, 0, 1, 1], [], []>} : vector<8x128xbf16>, vector<128x32xbf16>, vector<8x32xf32> -> vector<8x32xf32>
    %10 = vector.broadcast %1 : vector<1x32xf32> to vector<8x32xf32>
    %11 = arith.addf %9, %10 : vector<8x32xf32>
    %c0_8 = arith.constant 0 : index
    %c128 = arith.constant 128 : index
    %12 = vector.load %arg8[%c0_8, %c128] : memref<32x320xbf16, #tpu.memory_space<vmem>>, vector<32x32xbf16>
    %c0_9 = arith.constant 0 : index
    %c160 = arith.constant 160 : index
    %13 = vector.load %arg8[%c0_9, %c160] : memref<32x320xbf16, #tpu.memory_space<vmem>>, vector<32x32xbf16>
    %c0_10 = arith.constant 0 : index
    %c192 = arith.constant 192 : index
    %14 = vector.load %arg8[%c0_10, %c192] : memref<32x320xbf16, #tpu.memory_space<vmem>>, vector<32x32xbf16>
    %15 = arith.truncf %6 : vector<8x32xf32> to vector<8x32xbf16>
    %cst_11 = arith.constant dense<0.000000e+00> : vector<8x32xf32>
    %16 = tpu.matmul %15, %12, %cst_11 {dimension_numbers = #tpu.dot_dimension_numbers<[1], [0], [0], [1], [0, 0, 1, 1], [], []>} : vector<8x32xbf16>, vector<32x32xbf16>, vector<8x32xf32> -> vector<8x32xf32>
    %17 = arith.truncf %11 : vector<8x32xf32> to vector<8x32xbf16>
    %cst_12 = arith.constant dense<0.000000e+00> : vector<8x32xf32>
    %18 = tpu.matmul %17, %13, %cst_12 {dimension_numbers = #tpu.dot_dimension_numbers<[1], [0], [0], [1], [0, 0, 1, 1], [], []>} : vector<8x32xbf16>, vector<32x32xbf16>, vector<8x32xf32> -> vector<8x32xf32>
    %19 = arith.truncf %18 : vector<8x32xf32> to vector<8x32xbf16>
    %20 = arith.truncf %11 : vector<8x32xf32> to vector<8x32xbf16>
    %cst_13 = arith.constant dense<0.000000e+00> : vector<8x32xf32>
    %21 = tpu.matmul %20, %14, %cst_13 {dimension_numbers = #tpu.dot_dimension_numbers<[1], [0], [0], [1], [0, 0, 1, 1], [], []>} : vector<8x32xbf16>, vector<32x32xbf16>, vector<8x32xf32> -> vector<8x32xf32>
    %22 = arith.truncf %21 : vector<8x32xf32> to vector<8x32xbf16>
    %c0_14 = arith.constant 0 : index
    %c0_15 = arith.constant 0 : index
    %c0_16 = arith.constant 0 : index
    %23 = vector.load %arg5[%c0_14, %c0_15, %c0_16] : memref<1x4x8xi32, #tpu.memory_space<vmem>>, vector<1x4x8xi32>
    %24 = vector.shape_cast %23 : vector<1x4x8xi32> to vector<4x8xi32>
    %25 = tpu.iota {dimensions = array<i32: 2>} : vector<4x8x8xi32>
    %26 = vector.shape_cast %24 : vector<4x8xi32> to vector<4x8x1xi32>
    %27 = vector.broadcast %26 : vector<4x8x1xi32> to vector<4x8x8xi32>
    %28 = arith.cmpi eq, %27, %25 : vector<4x8x8xi32>
    %29 = arith.extui %28 : vector<4x8x8xi1> to vector<4x8x8xi32>
    %30 = arith.sitofp %29 : vector<4x8x8xi32> to vector<4x8x8xf32>
    %31 = arith.truncf %30 : vector<4x8x8xf32> to vector<4x8x8xbf16>
    %32 = vector.shape_cast %31 : vector<4x8x8xbf16> to vector<32x8xbf16>
    %33 = arith.extui %28 : vector<4x8x8xi1> to vector<4x8x8xi32>
    %34 = arith.sitofp %33 : vector<4x8x8xi32> to vector<4x8x8xf32>
    %35 = vector.shape_cast %34 : vector<4x8x8xf32> to vector<32x8xf32>
    %cst_17 = arith.constant dense<0.000000e+00> : vector<32x32xf32>
    %36 = tpu.matmul %32, %19, %cst_17 {dimension_numbers = #tpu.dot_dimension_numbers<[1], [0], [0], [1], [0, 0, 1, 1], [], []>} : vector<32x8xbf16>, vector<8x32xbf16>, vector<32x32xf32> -> vector<32x32xf32>
    %37 = vector.shape_cast %36 : vector<32x32xf32> to vector<4x8x32xf32>
    %cst_18 = arith.constant dense<0.000000e+00> : vector<32x32xf32>
    %38 = tpu.matmul %32, %22, %cst_18 {dimension_numbers = #tpu.dot_dimension_numbers<[1], [0], [0], [1], [0, 0, 1, 1], [], []>} : vector<32x8xbf16>, vector<8x32xbf16>, vector<32x32xf32> -> vector<32x32xf32>
    %39 = vector.shape_cast %38 : vector<32x32xf32> to vector<4x8x32xf32>
    %c0_19 = arith.constant 0 : index
    %c0_20 = arith.constant 0 : index
    %40 = vector.load %arg4[%c0_19, %c0_20] : memref<8x8xf32, #tpu.memory_space<vmem>>, vector<8x8xf32>
    %cst_21 = arith.constant dense<0.000000e+00> : vector<32x8xf32>
    %41 = tpu.matmul %35, %40, %cst_21 {dimension_numbers = #tpu.dot_dimension_numbers<[1], [0], [0], [1], [0, 0, 1, 1], [], []>} : vector<32x8xf32>, vector<8x8xf32>, vector<32x8xf32> -> vector<32x8xf32>
    %42 = vector.shape_cast %41 : vector<32x8xf32> to vector<4x8x8xf32>
    %c0_22 = arith.constant 0 : index
    %c0_23 = arith.constant 0 : index
    %43 = vector.load %arg3[%c0_22, %c0_23] : memref<8x8xf32, #tpu.memory_space<vmem>>, vector<8x8xf32>
    %44 = vector.shape_cast %43 : vector<8x8xf32> to vector<1x8x8xf32>
    %45 = vector.broadcast %44 : vector<1x8x8xf32> to vector<4x8x8xf32>
    %46 = arith.subf %45, %42 : vector<4x8x8xf32>
    %c1 = arith.constant 1 : index
    %c0_24 = arith.constant 0 : index
    %47 = vector.load %arg9[%c1, %c0_24] : memref<8x128xf32, #tpu.memory_space<vmem>>, vector<1x32xf32>
    %48 = vector.shape_cast %47 : vector<1x32xf32> to vector<1x1x32xf32>
    %49 = vector.extract_strided_slice %46 {offsets = [0, 0, 0], sizes = [4, 8, 1], strides = [1, 1, 1]} : vector<4x8x8xf32> to vector<4x8x1xf32>
    %c0_25 = arith.constant 0 : index
    %c0_26 = arith.constant 0 : index
    %50 = vector.load %arg7[%c0_25, %c0_26] : memref<3x32xf32, #tpu.memory_space<vmem>>, vector<1x32xf32>
    %51 = vector.shape_cast %50 : vector<1x32xf32> to vector<1x1x32xf32>
    %52 = vector.broadcast %49 : vector<4x8x1xf32> to vector<4x8x32xf32>
    %53 = vector.broadcast %51 : vector<1x1x32xf32> to vector<4x8x32xf32>
    %54 = arith.mulf %52, %53 : vector<4x8x32xf32>
    %55 = vector.broadcast %48 : vector<1x1x32xf32> to vector<4x8x32xf32>
    %56 = arith.addf %55, %54 : vector<4x8x32xf32>
    %57 = vector.extract_strided_slice %46 {offsets = [0, 0, 1], sizes = [4, 8, 1], strides = [1, 1, 1]} : vector<4x8x8xf32> to vector<4x8x1xf32>
    %c1_27 = arith.constant 1 : index
    %c0_28 = arith.constant 0 : index
    %58 = vector.load %arg7[%c1_27, %c0_28] : memref<3x32xf32, #tpu.memory_space<vmem>>, vector<1x32xf32>
    %59 = vector.shape_cast %58 : vector<1x32xf32> to vector<1x1x32xf32>
    %60 = vector.broadcast %57 : vector<4x8x1xf32> to vector<4x8x32xf32>
    %61 = vector.broadcast %59 : vector<1x1x32xf32> to vector<4x8x32xf32>
    %62 = arith.mulf %60, %61 : vector<4x8x32xf32>
    %63 = arith.addf %56, %62 : vector<4x8x32xf32>
    %64 = vector.extract_strided_slice %46 {offsets = [0, 0, 2], sizes = [4, 8, 1], strides = [1, 1, 1]} : vector<4x8x8xf32> to vector<4x8x1xf32>
    %c2 = arith.constant 2 : index
    %c0_29 = arith.constant 0 : index
    %65 = vector.load %arg7[%c2, %c0_29] : memref<3x32xf32, #tpu.memory_space<vmem>>, vector<1x32xf32>
    %66 = vector.shape_cast %65 : vector<1x32xf32> to vector<1x1x32xf32>
    %67 = vector.broadcast %64 : vector<4x8x1xf32> to vector<4x8x32xf32>
    %68 = vector.broadcast %66 : vector<1x1x32xf32> to vector<4x8x32xf32>
    %69 = arith.mulf %67, %68 : vector<4x8x32xf32>
    %70 = arith.addf %63, %69 : vector<4x8x32xf32>
    %cst_30 = arith.constant 0.000000e+00 : f32
    %71 = vector.broadcast %cst_30 : f32 to vector<4x8x32xf32>
    %72 = arith.maximumf %70, %71 : vector<4x8x32xf32>
    %c0_31 = arith.constant 0 : index
    %c224 = arith.constant 224 : index
    %73 = vector.load %arg8[%c0_31, %c224] : memref<32x320xbf16, #tpu.memory_space<vmem>>, vector<32x32xbf16>
    %c2_32 = arith.constant 2 : index
    %c0_33 = arith.constant 0 : index
    %74 = vector.load %arg9[%c2_32, %c0_33] : memref<8x128xf32, #tpu.memory_space<vmem>>, vector<1x32xf32>
    %75 = vector.shape_cast %72 : vector<4x8x32xf32> to vector<32x32xf32>
    %76 = arith.truncf %75 : vector<32x32xf32> to vector<32x32xbf16>
    %cst_34 = arith.constant dense<0.000000e+00> : vector<32x32xf32>
    %77 = tpu.matmul %76, %73, %cst_34 {dimension_numbers = #tpu.dot_dimension_numbers<[1], [0], [0], [1], [0, 0, 1, 1], [], []>} : vector<32x32xbf16>, vector<32x32xbf16>, vector<32x32xf32> -> vector<32x32xf32>
    %78 = vector.broadcast %74 : vector<1x32xf32> to vector<32x32xf32>
    %79 = arith.addf %77, %78 : vector<32x32xf32>
    %80 = vector.shape_cast %79 : vector<32x32xf32> to vector<4x8x32xf32>
    %81 = vector.shape_cast %16 : vector<8x32xf32> to vector<1x8x32xf32>
    %82 = vector.broadcast %81 : vector<1x8x32xf32> to vector<4x8x32xf32>
    %83 = arith.subf %82, %37 : vector<4x8x32xf32>
    %84 = arith.addf %83, %80 : vector<4x8x32xf32>
    %c0_35 = arith.constant 0 : index
    %c256 = arith.constant 256 : index
    %85 = vector.load %arg8[%c0_35, %c256] : memref<32x320xbf16, #tpu.memory_space<vmem>>, vector<32x32xbf16>
    %c3 = arith.constant 3 : index
    %c0_36 = arith.constant 0 : index
    %86 = vector.load %arg9[%c3, %c0_36] : memref<8x128xf32, #tpu.memory_space<vmem>>, vector<1x32xf32>
    %c0_37 = arith.constant 0 : index
    %c288 = arith.constant 288 : index
    %87 = vector.load %arg8[%c0_37, %c288] : memref<32x320xbf16, #tpu.memory_space<vmem>>, vector<32x32xbf16>
    %c4 = arith.constant 4 : index
    %c0_38 = arith.constant 0 : index
    %88 = vector.load %arg9[%c4, %c0_38] : memref<8x128xf32, #tpu.memory_space<vmem>>, vector<1x32xf32>
    %89 = vector.shape_cast %84 : vector<4x8x32xf32> to vector<32x32xf32>
    %90 = arith.truncf %89 : vector<32x32xf32> to vector<32x32xbf16>
    %cst_39 = arith.constant dense<0.000000e+00> : vector<32x32xf32>
    %91 = tpu.matmul %90, %85, %cst_39 {dimension_numbers = #tpu.dot_dimension_numbers<[1], [0], [0], [1], [0, 0, 1, 1], [], []>} : vector<32x32xbf16>, vector<32x32xbf16>, vector<32x32xf32> -> vector<32x32xf32>
    %92 = vector.broadcast %86 : vector<1x32xf32> to vector<32x32xf32>
    %93 = arith.addf %91, %92 : vector<32x32xf32>
    %cst_40 = arith.constant 0.000000e+00 : f32
    %94 = vector.broadcast %cst_40 : f32 to vector<32x32xf32>
    %95 = arith.maximumf %93, %94 : vector<32x32xf32>
    %96 = arith.truncf %95 : vector<32x32xf32> to vector<32x32xbf16>
    %cst_41 = arith.constant dense<0.000000e+00> : vector<32x32xf32>
    %97 = tpu.matmul %96, %87, %cst_41 {dimension_numbers = #tpu.dot_dimension_numbers<[1], [0], [0], [1], [0, 0, 1, 1], [], []>} : vector<32x32xbf16>, vector<32x32xbf16>, vector<32x32xf32> -> vector<32x32xf32>
    %98 = vector.broadcast %88 : vector<1x32xf32> to vector<32x32xf32>
    %99 = arith.addf %97, %98 : vector<32x32xf32>
    %cst_42 = arith.constant 0.176776692 : f32
    %100 = vector.broadcast %cst_42 : f32 to vector<32x32xf32>
    %101 = arith.mulf %99, %100 : vector<32x32xf32>
    %102 = vector.shape_cast %101 : vector<32x32xf32> to vector<4x8x32xf32>
    %cst_43 = arith.constant dense<0xFF800000> : vector<8x32xf32>
    %103 = vector.multi_reduction <maximumf>, %102, %cst_43 [0] : vector<4x8x32xf32> to vector<8x32xf32>
    %104 = vector.shape_cast %103 : vector<8x32xf32> to vector<1x8x32xf32>
    %105 = vector.broadcast %104 : vector<1x8x32xf32> to vector<4x8x32xf32>
    %106 = arith.subf %102, %105 : vector<4x8x32xf32>
    %107 = math.exp %106 : vector<4x8x32xf32>
    %cst_44 = arith.constant dense<0.000000e+00> : vector<8x32xf32>
    %108 = vector.multi_reduction <add>, %107, %cst_44 [0] : vector<4x8x32xf32> to vector<8x32xf32>
    %109 = arith.addf %39, %80 : vector<4x8x32xf32>
    %110 = arith.mulf %107, %109 : vector<4x8x32xf32>
    %cst_45 = arith.constant dense<0.000000e+00> : vector<8x32xf32>
    %111 = vector.multi_reduction <add>, %110, %cst_45 [0] : vector<4x8x32xf32> to vector<8x32xf32>
    %112 = tpu.reciprocal %108 {approx = true} : vector<8x32xf32> -> vector<8x32xf32>
    %113 = arith.mulf %111, %112 : vector<8x32xf32>
    %c0_46 = arith.constant 0 : index
    %c0_47 = arith.constant 0 : index
    %114 = vector.load %arg8[%c0_46, %c0_47] : memref<32x320xbf16, #tpu.memory_space<vmem>>, vector<32x128xbf16>
    %c5 = arith.constant 5 : index
    %c0_48 = arith.constant 0 : index
    %115 = vector.load %arg9[%c5, %c0_48] : memref<8x128xf32, #tpu.memory_space<vmem>>, vector<1x128xf32>
    %116 = arith.truncf %113 : vector<8x32xf32> to vector<8x32xbf16>
    %cst_49 = arith.constant dense<0.000000e+00> : vector<8x128xf32>
    %117 = tpu.matmul %116, %114, %cst_49 {dimension_numbers = #tpu.dot_dimension_numbers<[1], [0], [0], [1], [0, 0, 1, 1], [], []>} : vector<8x32xbf16>, vector<32x128xbf16>, vector<8x128xf32> -> vector<8x128xf32>
    %118 = vector.broadcast %115 : vector<1x128xf32> to vector<8x128xf32>
    %119 = arith.addf %117, %118 : vector<8x128xf32>
    %120 = arith.addf %119, %2 : vector<8x128xf32>
    %c0_50 = arith.constant 0 : index
    %c0_51 = arith.constant 0 : index
    %121 = vector.load %arg10[%c0_50, %c0_51] : memref<8x128xf32, #tpu.memory_space<vmem>>, vector<8x128xf32>
    tpu.vector_store %arg10[%c0_50, %c0_51], %120 {strides = array<i32>} : memref<8x128xf32, #tpu.memory_space<vmem>>, vector<8x128xf32>,
    return
  }
  func.func @transform_0(%arg0: i32) -> (i32, i32) {
    %c0_i32 = arith.constant 0 : i32
    %c0_i32_0 = arith.constant 0 : i32
    return %arg0, %c0_i32 : i32, i32
  }
  func.func @transform_1(%arg0: i32) -> (i32, i32) {
    %c0_i32 = arith.constant 0 : i32
    %c0_i32_0 = arith.constant 0 : i32
    %c0_i32_1 = arith.constant 0 : i32
    return %c0_i32, %c0_i32_0 : i32, i32
  }
  func.func @transform_2(%arg0: i32) -> (i32, i32) {
    %c0_i32 = arith.constant 0 : i32
    %c0_i32_0 = arith.constant 0 : i32
    return %arg0, %c0_i32 : i32, i32
  }
  func.func @transform_3(%arg0: i32) -> (i32, i32) {
    %c0_i32 = arith.constant 0 : i32
    %c0_i32_0 = arith.constant 0 : i32
    %c0_i32_1 = arith.constant 0 : i32
    return %c0_i32, %c0_i32_0 : i32, i32
  }
  func.func @transform_4(%arg0: i32) -> (i32, i32, i32) {
    %c0_i32 = arith.constant 0 : i32
    %c0_i32_0 = arith.constant 0 : i32
    %c0_i32_1 = arith.constant 0 : i32
    return %arg0, %c0_i32, %c0_i32_0 : i32, i32, i32
  }
  func.func @transform_5(%arg0: i32) -> (i32, i32) {
    %c0_i32 = arith.constant 0 : i32
    %c0_i32_0 = arith.constant 0 : i32
    %c0_i32_1 = arith.constant 0 : i32
    return %c0_i32, %c0_i32_0 : i32, i32
  }
  func.func @transform_6(%arg0: i32) -> (i32, i32) {
    %c0_i32 = arith.constant 0 : i32
    %c0_i32_0 = arith.constant 0 : i32
    %c0_i32_1 = arith.constant 0 : i32
    return %c0_i32, %c0_i32_0 : i32, i32
  }
  func.func @transform_7(%arg0: i32) -> (i32, i32) {
    %c0_i32 = arith.constant 0 : i32
    %c0_i32_0 = arith.constant 0 : i32
    %c0_i32_1 = arith.constant 0 : i32
    return %c0_i32, %c0_i32_0 : i32, i32
  }
  func.func @transform_8(%arg0: i32) -> (i32, i32) {
    %c0_i32 = arith.constant 0 : i32
    %c0_i32_0 = arith.constant 0 : i32
    %c0_i32_1 = arith.constant 0 : i32
    return %c0_i32, %c0_i32_0 : i32, i32
  }
  func.func @transform_9(%arg0: i32) -> (i32, i32) {
    %c0_i32 = arith.constant 0 : i32
    %c0_i32_0 = arith.constant 0 : i32
    return %arg0, %c0_i32 : i32, i32
  }
}

</mosaic_0001>

<bundles_post_ra>
// kernel: custom-call.16
= control target key start
LH: loop header
LB: loop body
LE: loop exit
PB: predicated region body
PF: predicated region fallthrough
CT: control target
= control target key end

     0   :  { %s6_s0 = inlined_call_operand.vmem [shape: f32[2,64], index: 0, kind: output, shape index: {}]  }

// kernel: _lambda_.6
= control target key start
LH: loop header
LB: loop body
LE: loop exit
PB: predicated region body
PF: predicated region fallthrough
CT: control target
= control target key end

     0   :  { %s613_s18 = smov 0   ;;  %s656_s0 = inlined_call_operand.vmem [shape: f32[128,6], index: 0, kind: input, shape index: {}]   ;;  %s657_s1 = inlined_call_operand.vmem [shape: bf16[6,32], index: 1, kind: input, shape index: {}]   ;;  %s658_s2 = inlined_call_operand.vmem [shape: f32[1,32], index: 2, kind: input, shape index: {}]   ;;  %s659_s3 = inlined_call_operand.vmem [shape: bf16[32,128], index: 3, kind: input, shape index: {}]   ;;  %s660_s4 = inlined_call_operand.vmem [shape: f32[1,128], index: 4, kind: input, shape index: {}]   ;;  %s661_s5 = inlined_call_operand.vmem [shape: f32[128,128], index: 5, kind: output, shape index: {}]  }
   0x1 LB: > { %s508_s19 = sadd.s32 4294967295, %s581_s18   ;;  %p512_p0 = scmp.ge.s32.totalorder %s581_s18, 1  ;;  %s581_s18 = sphi %s613_s18, %s15_s18  }
   0x2   : > { %p188_p1 = scmp.lt.s32.totalorder %s581_s18, 3 }
   0x4   : > { %p189_p2 = pnand %p512_p0, %p188_p1 }
   0x5   : > { %v241_v0 = vld [vmem:[%s657_s1] sm:$0x7] (!%p189_p2)  ;;  %vm262_vm0 = vcmask (!%p189_p2), 1042432   ;;  %s513_s22 = sshll.u32 (!%p189_p2), %s508_s19, 3  ;;  %vm249_vm1 = vcmask (!%p189_p2), 48128   ;;  %v574_v15 = vld [vmem:[%s659_s3 + $0x8] sm:$0xff] (!%p189_p2)  }
   0x6   : > { %192 = sbr.rel (%p189_p2) target bundleno = 468 (0x1d4), region = 40  ;;  %564 = vmatprep.subr.msk.bf16.mxu0 (!%p189_p2), %vm262_vm0, %v241_v0  ;;  %v264_v1 = vsel (!%p189_p2), %vm262_vm0, %v241_v0, 0  ;;  %p217_p3 = scmp.lt.s32.totalorder (!%p189_p2), %s513_s22, 15  ;;  %v573_v14 = vld [vmem:[%s659_s3] sm:$0xff] (!%p189_p2)   ;;  %vm366_vm2 = vcmask (!%p189_p2), 261120  }
   0x7   : > { %543 = vmatpush3.bf16.msra.mxu0 (!%p189_p2), %v264_v1  ;;  %552 = vmatprep.subr.bf16.mxu1 (!%p189_p2), %v573_v14  ;;  %v517_v16 = vld [vmem:[%s658_s2] ss:$0 sm:$0xff] (!%p189_p2) }
   0x8   : > { %553 = vmatpush3.bf16.msra.mxu1 (!%p189_p2), %v573_v14  ;;  %v522_v45 = vld [vmem:[%s660_s4] ss:$0 sm:$0xff] (!%p189_p2) }
   0x9   : > { %554 = vmatprep.subr.bf16.mxu1 (!%p189_p2), %v574_v15 }
   0xc   : > { %555 = vmatpush3.bf16.msra.mxu1 (!%p189_p2), %v574_v15 }
   0xd   : > { %s663_s22 = smov (!%p217_p3, %s513_s22), 15 }
   0xe   : > { %s514_s23 = sshll.u32 %s663_s22, 3 }
   0xf   : > { %s220_s26 = scalar_lea.vmem %s656_s0, %s514_s23  ;;  %s226_s12 = scalar_lea.vmem %s661_s5, %s514_s23 }
  0x10   : > { %v229_v2 = vld [vmem:[%s220_s26] sm:$0xff]  ;;  %v230_v3 = vld [vmem:[%s220_s26 + $0x8] sm:$0xff]  ;;  %v231_v4 = vld [vmem:[%s220_s26 + $0x10] sm:$0xff] }
  0x11   : > { %v237_v5 = vpack.c.bf16 %v230_v3, %v229_v2  ;;  %v232_v6 = vld [vmem:[%s220_s26 + $0x18] sm:$0xff]  ;;  %v233_v7 = vld [vmem:[%s220_s26 + $0x20] sm:$0xff]  ;;  %v234_v8 = vld [vmem:[%s220_s26 + $0x28] sm:$0xff] }
  0x12   : > { %v238_v9 = vpack.c.bf16 %v232_v6, %v231_v4  ;;  %v239_v10 = vpack.c.bf16 %v234_v8, %v233_v7  ;;  %v235_v11 = vld [vmem:[%s220_s26 + $0x30] sm:$0xff]  ;;  %v236_v12 = vld [vmem:[%s220_s26 + $0x38] sm:$0xff] }
  0x13   : > { %544 = vmatprep.mubr.msk.bf16.mxu0 %vm249_vm1, %v237_v5  ;;  %v240_v13 = vpack.c.bf16 %v236_v12, %v235_v11 }
  0x14   : > { %545 = vmatmul.mubr.msk.bf16.vlgmr.msra.gmra.mrb[0].mxu0 %vm249_vm1, %v238_v9 }
  0x15   : > { %548 = vmatprep.mubr.msk.bf16.mxu0 %vm249_vm1, %v239_v10 }
  0x1c   : > { %549 = vmatmul.mubr.msk.bf16.gmra.mrb[4].mxu0 %vm249_vm1, %v240_v13 }
  0xe7   : > { %v546_v17 = vpop.f32.mrb[0].mxu0 }
  0xe8   : > { %v309_v18 = vadd.f32 %v546_v17, %v517_v16  ;;  %v300_v19 = vpop.f32.mrb[1].mxu0 }
  0xe9   : > { %v301_v20 = vadd.f32 %v517_v16, %v300_v19  ;;  %v547_v21 = vpop.f32.mrb[2].mxu0 }
  0xea   : > { %v312_v22 = vadd.f32 %v547_v21, %v517_v16  ;;  %v303_v23 = vpop.f32.mrb[3].mxu0  ;;  %v333_v25 = vmax.f32 %v309_v18, 0.0 }
  0xeb   : > { %v304_v24 = vadd.f32 %v517_v16, %v303_v23  ;;  %v331_v27 = vmax.f32 %v301_v20, 0.0 }
  0xec   : > { %v334_v26 = vmax.f32 %v312_v22, 0.0 }
  0xed   : > { %v332_v28 = vmax.f32 %v304_v24, 0.0 }
  0xee   : > { %v340_v29 = vpack.c.bf16 %v334_v26, %v333_v25 }
  0xef   : > { %v550_v30 = vpop.f32.mrb[4].mxu0  ;;  %v339_v31 = vpack.c.bf16 %v332_v28, %v331_v27 }
  0xf0   : > { %v325_v32 = vadd.f32 %v550_v30, %v517_v16  ;;  %v316_v33 = vpop.f32.mrb[5].mxu0 }
  0xf1   : > { %v317_v34 = vadd.f32 %v517_v16, %v316_v33  ;;  %v551_v35 = vpop.f32.mrb[6].mxu0  ;;  %556 = vmatprep.mubr.msk.bf16.mxu1 %vm366_vm2, %v339_v31 }
  0xf2   : > { %v328_v36 = vadd.f32 %v551_v35, %v517_v16  ;;  %v319_v37 = vpop.f32.mrb[7].mxu0  ;;  %557 = vmatmul.mubr.msk.bf16.vlgmr.msra.gmra.mrb[0].mxu1 %vm366_vm2, %v340_v29  ;;  %v337_v39 = vmax.f32 %v325_v32, 0.0 }
  0xf3   : > { %v320_v38 = vadd.f32 %v517_v16, %v319_v37  ;;  %v335_v41 = vmax.f32 %v317_v34, 0.0 }
  0xf4   : > { %v338_v40 = vmax.f32 %v328_v36, 0.0 }
  0xf5   : > { %v336_v42 = vmax.f32 %v320_v38, 0.0 }
  0xf6   : > { %v342_v43 = vpack.c.bf16 %v338_v40, %v337_v39 }
  0xf7   : > { %v341_v44 = vpack.c.bf16 %v336_v42, %v335_v41 }
  0xf9   : > { %560 = vmatprep.mubr.msk.bf16.mxu1 %vm366_vm2, %v341_v44 }
  0xfa   : > { %561 = vmatmul.mubr.msk.bf16.gmra.mrb[4].mxu1 %vm366_vm2, %v342_v43 }
 0x1c5   : > { %v558_v46 = vpop.f32.mrb[0].mxu1 }
 0x1c6   : > { %v422_v47 = vadd.f32 %v558_v46, %v522_v45  ;;  %v413_v48 = vpop.f32.mrb[1].mxu1 }
 0x1c7   : > { %v414_v49 = vadd.f32 %v522_v45, %v413_v48  ;;  %v559_v50 = vpop.f32.mrb[2].mxu1 }
 0x1c8   : > { %446 = vst [vmem:[%s226_s12 + $0x10] sm:$0xff] %v422_v47  ;;  %v425_v51 = vadd.f32 %v559_v50, %v522_v45  ;;  %v416_v52 = vpop.f32.mrb[3].mxu1 }
 0x1c9   : > { %444 = vst [vmem:[%s226_s12] sm:$0xff] %v414_v49  ;;  %v417_v53 = vadd.f32 %v522_v45, %v416_v52 }
 0x1ca   : > { %447 = vst [vmem:[%s226_s12 + $0x18] sm:$0xff] %v425_v51 }
 0x1cb   : > { %445 = vst [vmem:[%s226_s12 + $0x8] sm:$0xff] %v417_v53 }
 0x1cd   : > { %v562_v54 = vpop.f32.mrb[4].mxu1 }
 0x1ce   : > { %v438_v55 = vadd.f32 %v562_v54, %v522_v45  ;;  %v429_v56 = vpop.f32.mrb[5].mxu1 }
 0x1cf   : > { %v430_v57 = vadd.f32 %v522_v45, %v429_v56  ;;  %v563_v58 = vpop.f32.mrb[6].mxu1 }
 0x1d0   : > { %450 = vst [vmem:[%s226_s12 + $0x30] sm:$0xff] %v438_v55  ;;  %v441_v59 = vadd.f32 %v563_v58, %v522_v45  ;;  %v432_v60 = vpop.f32.mrb[7].mxu1 }
 0x1d1   : > { %448 = vst [vmem:[%s226_s12 + $0x20] sm:$0xff] %v430_v57  ;;  %v433_v61 = vadd.f32 %v522_v45, %v432_v60 }
 0x1d2   : > { %451 = vst [vmem:[%s226_s12 + $0x38] sm:$0xff] %v441_v59 }
 0x1d3   : > { %449 = vst [vmem:[%s226_s12 + $0x28] sm:$0xff] %v433_v61 }
 0x1d4 PF: > { %s15_s18 = sadd.s32 1, %s581_s18  }
 0x1d5   : > { %p12_p4 = scmp.ge.s32.totalorder %s15_s18, 4  }
 0x1d7   :  { %14 = sbr.rel (!%p12_p4) target bundleno = 1 (0x1), region = 70 }

// kernel: _lambda_.7
= control target key start
LH: loop header
LB: loop body
LE: loop exit
PB: predicated region body
PF: predicated region fallthrough
CT: control target
= control target key end

     0   :  { %s5054_s30 = smov 0   ;;  %s6986_s0 = inlined_call_operand.vmem [shape: f32[128,128], index: 0, kind: input, shape index: {}, may-alias: {0,1}]   ;;  %s6987_s1 = inlined_call_operand.vmem [shape: f32[128,128], index: 1, kind: input, shape index: {}, may-alias: {0,1}]   ;;  %s6988_s2 = inlined_call_operand.vmem [shape: f32[128,8], index: 2, kind: input, shape index: {}, may-alias: {2,3}]   ;;  %s6989_s3 = inlined_call_operand.vmem [shape: f32[128,8], index: 3, kind: input, shape index: {}, may-alias: {2,3}]   ;;  %s6990_s4 = inlined_call_operand.vmem [shape: s32[2,4,64], index: 4, kind: input, shape index: {}]   ;;  %s6991_s5 = inlined_call_operand.vmem [shape: bf16[128,32], index: 5, kind: input, shape index: {}]   ;;  %s6992_s6 = inlined_call_operand.vmem [shape: f32[3,32], index: 6, kind: input, shape index: {}]   ;;  %s6993_s7 = inlined_call_operand.vmem [shape: bf16[32,320], index: 7, kind: input, shape index: {}]   ;;  %s6994_s8 = inlined_call_operand.vmem [shape: f32[8,128], index: 8, kind: input, shape index: {}]   ;;  %s6995_s9 = inlined_call_operand.vmem [shape: f32[128,128], index: 9, kind: output, shape index: {}]  }
   0x1 LB: > { %s3901_s10 = sadd.s32 4294967295, %s4994_s30   ;;  %p3905_p0 = scmp.ge.s32.totalorder %s4994_s30, 1  ;;  %s4994_s30 = sphi %s5054_s30, %s19_s30  }
   0x2   : > { %p308_p1 = scmp.lt.s32.totalorder %s4994_s30, 3 }
   0x4   : > { %p309_p2 = pnand %p3905_p0, %p308_p1 }
   0x6   : > { %312 = sbr.rel (%p309_p2) target bundleno = 2153 (0x869), region = 56 }
   0xd   : > { %v4886_v0 = vld [vmem:[%s6991_s5] sm:$0xff]   ;;  %s3906_s13 = sshll.u32 %s3901_s10, 3  ;;  %v4887_v1 = vld [vmem:[%s6991_s5 + $0x8] sm:$0xff]   ;;  %v4888_v2 = vld [vmem:[%s6991_s5 + $0x10] sm:$0xff]   ;;  %p365_p4 = scmp.lt.s32.totalorder %s3901_s10, 1  ;;  %v996_v3 = vlaneseq  ;;  %vm6996_vm0 = vcmask 261120  }
   0xe   : > { %p354_p3 = scmp.lt.s32.totalorder %s3906_s13, 15  ;;  %4348 = vmatprep.subr.bf16.mxu0 %v4886_v0  ;;  %4372 = vmatprep.subr.bf16.mxu1 %v4886_v0  ;;  %v4889_v4 = vld [vmem:[%s6991_s5 + $0x18] sm:$0xff]   ;;  %v522_v8 = vld [vmem:[%s6987_s1] sm:$0xff]  ;;  %v523_v9 = vld [vmem:[%s6987_s1 + $0x8] sm:$0xff]  ;;  %s4996_s24 = smov 96  }
   0xf   : > { %4349 = vmatpush3.bf16.msra.mxu0 %v4886_v0  ;;  %4373 = vmatpush3.bf16.msra.mxu1 %v4886_v0  ;;  %s7402_s10 = smov (!%p365_p4, %s3901_s10), 1  ;;  %v538_v10 = vpack.c.bf16 %v523_v9, %v522_v8  ;;  %v5091_v11 = vshrl.u32 %v996_v3, 7  ;;  %v4890_v12 = vld [vmem:[%s6991_s5 + $0x20] sm:$0xff]   ;;  %v4891_v13 = vld [vmem:[%s6991_s5 + $0x28] sm:$0xff]   ;;  %v4892_v17 = vld [vmem:[%s6991_s5 + $0x30] sm:$0xff]   ;;  %s5000_s20 = smov 32  }
  0x10   : > { %s7400_s13 = smov (!%p354_p3, %s3906_s13), 15  ;;  %4350 = vmatprep.subr.bf16.mxu0 %v4887_v1  ;;  %4374 = vmatprep.subr.bf16.mxu1 %v4887_v1  ;;  %s3910_s11 = sshll.u32 %s7402_s10, 2  ;;  %v5106_v15 = vld [vmem:[%s6993_s7 + $0x4] ss:$12 sps:$4 sm:$0xff]   ;;  %v5111_v16 = vld [vmem:[%s6993_s7 + $0x1c] ss:$12 sps:$4 sm:$0xff]  }
  0x11   : > { %s5071_s18 = sshll.u32 %s7400_s13, 3  ;;  %4388 = vmatprep.mubr.bf16.mxu1 %v538_v10  ;;  %s368_s16 = scalar_lea.vmem %s6990_s4, %s3910_s11  ;;  %v1000_v14 = vsub.s32 0, %v5091_v11  ;;  %749 = vrot.lane.b32.xlu0 %v5106_v15, %s4996_s24  ;;  %v4893_v20 = vld [vmem:[%s6991_s5 + $0x38] sm:$0xff]   ;;  %v524_v23 = vld [vmem:[%s6987_s1 + $0x10] sm:$0xff]  ;;  %v526_v27 = vld [vmem:[%s6987_s1 + $0x20] sm:$0xff]  ;;  %v1035_v33 = vsub.s32 1, %v5091_v11 }
  0x12   : > { %s5077_s21 = scalar_lea.vmem %s6986_s0, %s5071_s18  ;;  %v5118_v18 = vld [vmem:[%s368_s16] sm:$0xf]  ;;  %v525_v24 = vld [vmem:[%s6987_s1 + $0x18] sm:$0xff]  ;;  %v527_v28 = vld [vmem:[%s6987_s1 + $0x28] sm:$0xff]  ;;  %v1070_v50 = vsub.s32 2, %v5091_v11  ;;  %s4997_s10 = smov 64  }
  0x13   : > { %4351 = vmatpush3.bf16.msra.mxu0 %v4887_v1  ;;  %4375 = vmatpush3.bf16.msra.mxu1 %v4887_v1  ;;  %v393_v5 = vld [vmem:[%s5077_s21] sm:$0xff]  ;;  %v394_v6 = vld [vmem:[%s5077_s21 + $0x8] sm:$0xff]  ;;  %v1001_v19 = vrot.slane %v5118_v18, %v1000_v14  ;;  %v395_v21 = vld [vmem:[%s5077_s21 + $0x10] sm:$0xff]  ;;  %v539_v30 = vpack.c.bf16 %v525_v24, %v524_v23  ;;  %v540_v32 = vpack.c.bf16 %v527_v28, %v526_v27  ;;  %v1105_v0 = vsub.s32 3, %v5091_v11  ;;  %s5918_s25 = scalar_lea.vmem %s6988_s2, %s5071_s18  ;;  %s6965_s15 = scalar_lea.vmem %s6995_s9, %s5071_s18 }
  0x14   : > { %4352 = vmatprep.subr.bf16.mxu0 %v4888_v2  ;;  %4376 = vmatprep.subr.bf16.mxu1 %v4888_v2  ;;  %v401_v7 = vpack.c.bf16 %v394_v6, %v393_v5  ;;  %v396_v22 = vld [vmem:[%s5077_s21 + $0x18] sm:$0xff]  ;;  %v397_v25 = vld [vmem:[%s5077_s21 + $0x20] sm:$0xff]  ;;  %v398_v26 = vld [vmem:[%s5077_s21 + $0x28] sm:$0xff]  ;;  %v1036_v40 = vrot.slane %v5118_v18, %v1035_v33  ;;  %v1071_v53 = vrot.slane %v5118_v18, %v1070_v50 }
  0x15   : > { %1003 = vbcast.lane.b32.xlu1 %v1001_v19, 256  ;;  %751 = vrot.lane.b32.xlu0 %v5111_v16, %s4996_s24  ;;  %v402_v29 = vpack.c.bf16 %v396_v22, %v395_v21  ;;  %v403_v31 = vpack.c.bf16 %v398_v26, %v397_v25  ;;  %v399_v34 = vld [vmem:[%s5077_s21 + $0x30] sm:$0xff]  ;;  %v400_v35 = vld [vmem:[%s5077_s21 + $0x38] sm:$0xff]  ;;  %v530_v38 = vld [vmem:[%s6987_s1 + $0x40] sm:$0xff]  ;;  %v1106_v1 = vrot.slane %v5118_v18, %v1105_v0 }
  0x16   : > { %4364 = vmatprep.mubr.bf16.mxu0 %v401_v7  ;;  %v528_v36 = vld [vmem:[%s6987_s1 + $0x30] sm:$0xff]  ;;  %v529_v37 = vld [vmem:[%s6987_s1 + $0x38] sm:$0xff]  ;;  %v531_v39 = vld [vmem:[%s6987_s1 + $0x48] sm:$0xff]  ;;  %v404_v41 = vpack.c.bf16 %v400_v35, %v399_v34 }
  0x17   : > { %4353 = vmatpush3.bf16.msra.mxu0 %v4888_v2  ;;  %4377 = vmatpush3.bf16.msra.mxu1 %v4888_v2  ;;  %v541_v42 = vpack.c.bf16 %v529_v37, %v528_v36  ;;  %v542_v43 = vpack.c.bf16 %v531_v39, %v530_v38  ;;  %v532_v44 = vld [vmem:[%s6987_s1 + $0x50] sm:$0xff]  ;;  %v533_v45 = vld [vmem:[%s6987_s1 + $0x58] sm:$0xff]  ;;  %v534_v46 = vld [vmem:[%s6987_s1 + $0x60] sm:$0xff] }
  0x18   : > { %4354 = vmatprep.subr.bf16.mxu0 %v4889_v4  ;;  %4378 = vmatprep.subr.bf16.mxu1 %v4889_v4  ;;  %v535_v47 = vld [vmem:[%s6987_s1 + $0x68] sm:$0xff]  ;;  %v543_v48 = vpack.c.bf16 %v533_v45, %v532_v44  ;;  %v536_v51 = vld [vmem:[%s6987_s1 + $0x70] sm:$0xff]  ;;  %v537_v52 = vld [vmem:[%s6987_s1 + $0x78] sm:$0xff] }
  0x19   : > { %1007 = vbcast.lane.b32.xlu1 %v1001_v19, 264  ;;  %1011 = vbcast.lane.b32.xlu0 %v1001_v19, 272  ;;  %v544_v49 = vpack.c.bf16 %v535_v47, %v534_v46  ;;  %v545_v54 = vpack.c.bf16 %v537_v52, %v536_v51  ;;  %v5247_v23 = vld [vmem:[%s6994_s8] ss:$0 sm:$0xff] }
  0x1b   : > { %4355 = vmatpush3.bf16.msra.mxu0 %v4889_v4  ;;  %4379 = vmatpush3.bf16.msra.mxu1 %v4889_v4 }
  0x1c   : > { %4356 = vmatprep.subr.bf16.mxu0 %v4890_v12  ;;  %4380 = vmatprep.subr.bf16.mxu1 %v4890_v12 }
  0x1d   : > { %1015 = vbcast.lane.b32.xlu1 %v1001_v19, 280  ;;  %1019 = vbcast.lane.b32.xlu0 %v1001_v19, 288 }
  0x1f   : > { %4357 = vmatpush3.bf16.msra.mxu0 %v4890_v12  ;;  %4381 = vmatpush3.bf16.msra.mxu1 %v4890_v12 }
  0x20   : > { %4358 = vmatprep.subr.bf16.mxu0 %v4891_v13  ;;  %4382 = vmatprep.subr.bf16.mxu1 %v4891_v13 }
  0x21   : > { %1023 = vbcast.lane.b32.xlu1 %v1001_v19, 296  ;;  %1027 = vbcast.lane.b32.xlu0 %v1001_v19, 304 }
  0x23   : > { %4359 = vmatpush3.bf16.msra.mxu0 %v4891_v13  ;;  %4383 = vmatpush3.bf16.msra.mxu1 %v4891_v13 }
  0x24   : > { %4360 = vmatprep.subr.bf16.mxu0 %v4892_v17  ;;  %4384 = vmatprep.subr.bf16.mxu1 %v4892_v17 }
  0x25   : > { %1031 = vbcast.lane.b32.xlu1 %v1001_v19, 312  ;;  %1038 = vbcast.lane.b32.xlu0 %v1036_v40, 256 }
  0x27   : > { %4361 = vmatpush3.bf16.msra.mxu0 %v4892_v17  ;;  %4385 = vmatpush3.bf16.msra.mxu1 %v4892_v17 }
  0x28   : > { %4362 = vmatprep.subr.bf16.mxu0 %v4893_v20  ;;  %4386 = vmatprep.subr.bf16.mxu1 %v4893_v20 }
  0x29   : > { %1042 = vbcast.lane.b32.xlu1 %v1036_v40, 264  ;;  %1046 = vbcast.lane.b32.xlu0 %v1036_v40, 272 }
  0x2b   : > { %4363 = vmatpush3.bf16.msra.mxu0 %v4893_v20  ;;  %4387 = vmatpush3.bf16.msra.mxu1 %v4893_v20 }
  0x2c   : > { %4404 = vmatprep.subr.bf16.mxu0 %v5106_v15  ;;  %4784 = vmatprep.subr.bf16.mxu1 %v5106_v15 }
  0x2d   : > { %1050 = vbcast.lane.b32.xlu1 %v1036_v40, 280  ;;  %1054 = vbcast.lane.b32.xlu0 %v1036_v40, 288 }
  0x2e   : > { %4365 = vmatmul.mubr.bf16.vlgmr.msra.gmra.mrb[0].mxu0 %v402_v29  ;;  %4389 = vmatmul.mubr.bf16.vlgmr.msra.gmra.mrb[0].mxu1 %v539_v30 }
  0x2f   : > { %4368 = vmatprep.mubr.bf16.mxu0 %v403_v31  ;;  %4392 = vmatprep.mubr.bf16.mxu1 %v540_v32 }
  0x30   : > { %4405 = vmatpush3.bf16.msra.mxu0 %v5106_v15  ;;  %4786 = vmatpush3.bf16.msra.mxu1 %v5106_v15 }
  0x31   : > { %4406 = vmatprep.subr.bf16.mxu0 %v5111_v16  ;;  %4785 = vmatprep.subr.bf16.mxu1 %v5111_v16 }
  0x32   : > { %1058 = vbcast.lane.b32.xlu1 %v1036_v40, 296  ;;  %1062 = vbcast.lane.b32.xlu0 %v1036_v40, 304 }
  0x34   : > { %4407 = vmatpush3.bf16.msra.mxu0 %v5111_v16  ;;  %4787 = vmatpush3.bf16.msra.mxu1 %v5111_v16 }
  0x36   : > { %4369 = vmatmul.mubr.bf16.gmra.mrb[4].mxu0 %v404_v41  ;;  %4393 = vmatmul.mubr.bf16.gmra.mrb[4].mxu1 %v541_v42 }
  0x37   : > { %4396 = vmatprep.mubr.bf16.mxu1 %v542_v43  ;;  %1066 = vbcast.lane.b32.xlu1 %v1036_v40, 312 }
  0x38   : > { %1073 = vbcast.lane.b32.xlu0 %v1071_v53, 256 }
  0x3b   : > { %1077 = vbcast.lane.b32.xlu1 %v1071_v53, 264 }
  0x3c   : > { %1081 = vbcast.lane.b32.xlu0 %v1071_v53, 272 }
  0x3e   : > { %4397 = vmatmul.mubr.bf16.gmra.mrb[8].mxu1 %v543_v48 }
  0x3f   : > { %4400 = vmatprep.mubr.bf16.mxu1 %v544_v49  ;;  %1085 = vbcast.lane.b32.xlu1 %v1071_v53, 280 }
  0x40   : > { %1089 = vbcast.lane.b32.xlu0 %v1071_v53, 288 }
  0x43   : > { %1093 = vbcast.lane.b32.xlu1 %v1071_v53, 296 }
  0x44   : > { %1097 = vbcast.lane.b32.xlu0 %v1071_v53, 304 }
  0x46   : > { %4401 = vmatmul.mubr.bf16.gmra.mrb[12].mxu1 %v545_v54 }
  0x47   : > { %1101 = vbcast.lane.b32.xlu1 %v1071_v53, 312 }
  0x48   : > { %884 = vrot.lane.b32.xlu0 %v5106_v15, %s4997_s10 }
  0x4b   : > { %886 = vrot.lane.b32.xlu1 %v5111_v16, %s4997_s10 }
  0x4c   : > { %1108 = vbcast.lane.b32.xlu0 %v1106_v1, 256 }
  0x4f   : > { %1112 = vbcast.lane.b32.xlu1 %v1106_v1, 264 }
  0x50   : > { %1116 = vbcast.lane.b32.xlu0 %v1106_v1, 272 }
  0x53   : > { %1120 = vbcast.lane.b32.xlu1 %v1106_v1, 280 }
  0x54   : > { %1124 = vbcast.lane.b32.xlu0 %v1106_v1, 288 }
  0x57   : > { %1128 = vbcast.lane.b32.xlu1 %v1106_v1, 296 }
  0x58   : > { %1132 = vbcast.lane.b32.xlu0 %v1106_v1, 304 }
  0x5b   : > { %1136 = vbcast.lane.b32.xlu1 %v1106_v1, 312 }
  0x5f   : > { %2534 = vrot.lane.b32.xlu1 %v5106_v15, %s5000_s20 }
  0x63   : > { %2536 = vrot.lane.b32.xlu1 %v5111_v16, %s5000_s20 }
  0x83   : > { %v5188_v55 = vpop.permute.xlu0 %749 }
  0x84   : > { %4416 = vmatprep.subr.bf16.mxu0 %v5188_v55 }
  0x87   : > { %v5191_v56 = vpop.permute.xlu0 %751  ;;  %v5213_v5 = vpop.permute.xlu1 %1003 }
  0x8b   : > { %v5193_v57 = vpop.permute.xlu0 %1011  ;;  %v5219_v8 = vpop.permute.xlu1 %1007 }
  0x8f   : > { %v5195_v58 = vpop.permute.xlu0 %1019  ;;  %v5224_v10 = vpop.permute.xlu1 %1015 }
  0x93   : > { %v5197_v59 = vpop.permute.xlu0 %1027  ;;  %v5226_v11 = vpop.permute.xlu1 %1023 }
  0x97   : > { %v5199_v60 = vpop.permute.xlu0 %1038  ;;  %v5228_v12 = vpop.permute.xlu1 %1031 }
  0x9b   : > { %v5201_v61 = vpop.permute.xlu0 %1046  ;;  %v5230_v13 = vpop.permute.xlu1 %1042 }
  0x9f   : > { %v5203_v62 = vpop.permute.xlu0 %1054  ;;  %v5232_v14 = vpop.permute.xlu1 %1050 }
  0xa4   : > { %v5205_v63 = vpop.permute.xlu0 %1062  ;;  %v5234_v17 = vpop.permute.xlu1 %1058 }
  0xa9   : > { %v5236_v18 = vpop.permute.xlu1 %1066 }
  0xaa   : > { %v5209_v2 = vpop.permute.xlu0 %1073 }
  0xad   : > { %v5238_v19 = vpop.permute.xlu1 %1077 }
  0xae   : > { %v5211_v4 = vpop.permute.xlu0 %1081 }
  0xb1   : > { %v5240_v20 = vpop.permute.xlu1 %1085 }
  0xb2   : > { %v5215_v6 = vpop.permute.xlu0 %1089 }
  0xb5   : > { %v5242_v21 = vpop.permute.xlu1 %1093 }
  0xb6   : > { %v5217_v7 = vpop.permute.xlu0 %1097 }
  0xb9   : > { %v5257_v43 = vpop.permute.xlu1 %1101 }
  0xba   : > { %v5221_v9 = vpop.permute.xlu0 %884 }
  0xbb   : > { %4436 = vmatprep.subr.bf16.mxu1 %v5221_v9 }
 0x101   : > { %v4366_v22 = vpop.f32.mrb[0].mxu0  ;;  %v4390_v24 = vpop.f32.mrb[0].mxu1 }
 0x102   : > { %v491_v25 = vpop.f32.mrb[1].mxu0  ;;  %v589_v26 = vadd.f32 %v4390_v24, %v5247_v23  ;;  %v580_v27 = vpop.f32.mrb[1].mxu1  ;;  %v500_v31 = vadd.f32 %v4366_v22, %v5247_v23 }
 0x103   : > { %v4367_v28 = vpop.f32.mrb[2].mxu0  ;;  %v581_v29 = vadd.f32 %v5247_v23, %v580_v27  ;;  %v4391_v30 = vpop.f32.mrb[2].mxu1  ;;  %v492_v36 = vadd.f32 %v5247_v23, %v491_v25 }
 0x104   : > { %v503_v32 = vadd.f32 %v4367_v28, %v5247_v23  ;;  %v494_v33 = vpop.f32.mrb[3].mxu0  ;;  %v592_v34 = vadd.f32 %v4391_v30, %v5247_v23  ;;  %v583_v35 = vpop.f32.mrb[3].mxu1 }
 0x105   : > { %v495_v37 = vadd.f32 %v5247_v23, %v494_v33  ;;  %v584_v38 = vadd.f32 %v5247_v23, %v583_v35 }
 0x106   : > { %v648_v39 = vpack.c.bf16 %v503_v32, %v500_v31  ;;  %v742_v40 = vpack.c.bf16 %v592_v34, %v589_v26 }
 0x107   : > { %v647_v41 = vpack.c.bf16 %v495_v37, %v492_v36  ;;  %v741_v42 = vpack.c.bf16 %v584_v38, %v581_v29  ;;  %v887_v29 = vpop.permute.xlu1 %886 }
 0x109   : > { %v4370_v44 = vpop.f32.mrb[4].mxu0  ;;  %4408 = vmatprep.mubr.msk.bf16.mxu0 %vm6996_vm0, %v647_v41  ;;  %v4394_v45 = vpop.f32.mrb[4].mxu1 }
 0x10a   : > { %v516_v46 = vadd.f32 %v4370_v44, %v5247_v23  ;;  %v507_v47 = vpop.f32.mrb[5].mxu0  ;;  %4409 = vmatmul.mubr.msk.bf16.vlgmr.msra.gmra.mrb[8].mxu0 %vm6996_vm0, %v648_v39  ;;  %v605_v48 = vadd.f32 %v4394_v45, %v5247_v23  ;;  %v596_v49 = vpop.f32.mrb[5].mxu1 }
 0x10b   : > { %v508_v50 = vadd.f32 %v5247_v23, %v507_v47  ;;  %4417 = vmatpush3.bf16.msra.mxu0 %v5188_v55  ;;  %v4371_v51 = vpop.f32.mrb[6].mxu0  ;;  %4420 = vmatprep.mubr.msk.bf16.mxu0 %vm6996_vm0, %v741_v42  ;;  %v597_v52 = vadd.f32 %v5247_v23, %v596_v49  ;;  %v4395_v53 = vpop.f32.mrb[6].mxu1 }
 0x10c   : > { %v519_v54 = vadd.f32 %v4371_v51, %v5247_v23  ;;  %v510_v0 = vpop.f32.mrb[7].mxu0  ;;  %4418 = vmatprep.subr.bf16.mxu0 %v5191_v56  ;;  %v608_v1 = vadd.f32 %v4395_v53, %v5247_v23  ;;  %v599_v22 = vpop.f32.mrb[7].mxu1 }
 0x10d   : > { %v511_v24 = vadd.f32 %v5247_v23, %v510_v0  ;;  %v600_v25 = vadd.f32 %v5247_v23, %v599_v22 }
 0x10e   : > { %v650_v26 = vpack.c.bf16 %v519_v54, %v516_v46  ;;  %v744_v55 = vpack.c.bf16 %v608_v1, %v605_v48 }
 0x10f   : > { %v649_v27 = vpack.c.bf16 %v511_v24, %v508_v50  ;;  %4419 = vmatpush3.bf16.msra.mxu0 %v5191_v56  ;;  %v743_v28 = vpack.c.bf16 %v600_v25, %v597_v52 }
 0x111   : > { %4412 = vmatprep.mubr.msk.bf16.mxu1 %vm6996_vm0, %v649_v27  ;;  %v4398_v30 = vpop.f32.mrb[8].mxu1 }
 0x112   : > { %4413 = vmatmul.mubr.msk.bf16.vlgmr.msra.gmra.mrb[16].mxu1 %vm6996_vm0, %v650_v26  ;;  %4421 = vmatmul.mubr.msk.bf16.vlgmr.msra.gmra.mrb[12].mxu0 %vm6996_vm0, %v742_v40  ;;  %v621_v31 = vadd.f32 %v4398_v30, %v5247_v23  ;;  %v612_v32 = vpop.f32.mrb[9].mxu1 }
 0x113   : > { %4437 = vmatpush3.bf16.msra.mxu1 %v5221_v9  ;;  %4440 = vmatprep.mubr.msk.bf16.mxu1 %vm6996_vm0, %v741_v42  ;;  %v613_v33 = vadd.f32 %v5247_v23, %v612_v32  ;;  %v4399_v34 = vpop.f32.mrb[10].mxu1 }
 0x114   : > { %4424 = vmatprep.mubr.msk.bf16.mxu0 %vm6996_vm0, %v743_v28  ;;  %4438 = vmatprep.subr.bf16.mxu1 %v887_v29  ;;  %v624_v56 = vadd.f32 %v4399_v34, %v5247_v23  ;;  %v615_v35 = vpop.f32.mrb[11].mxu1 }
 0x115   : > { %v616_v36 = vadd.f32 %v5247_v23, %v615_v35 }
 0x116   : > { %v746_v37 = vpack.c.bf16 %v624_v56, %v621_v31 }
 0x117   : > { %4439 = vmatpush3.bf16.msra.mxu1 %v887_v29  ;;  %v745_v38 = vpack.c.bf16 %v616_v36, %v613_v33 }
 0x119   : > { %v4402_v39 = vpop.f32.mrb[12].mxu1 }
 0x11a   : > { %4425 = vmatmul.mubr.msk.bf16.gmra.mrb[16].mxu0 %vm6996_vm0, %v744_v55  ;;  %4441 = vmatmul.mubr.msk.bf16.vlgmr.msra.gmra.mrb[20].mxu1 %vm6996_vm0, %v742_v40  ;;  %v637_v9 = vadd.f32 %v4402_v39, %v5247_v23  ;;  %v628_v41 = vpop.f32.mrb[13].mxu1  ;;  %v4998_v40 = vmov 1.0|1.0  }
 0x11b   : > { %4444 = vmatprep.mubr.msk.bf16.mxu1 %vm6996_vm0, %v743_v28  ;;  %4428 = vmatprep.mubr.msk.bf16.mxu0 %vm6996_vm0, %v745_v38  ;;  %v629_v42 = vadd.f32 %v5247_v23, %v628_v41  ;;  %v4403_v44 = vpop.f32.mrb[14].mxu1 }
 0x11c   : > { %v640_v45 = vadd.f32 %v4403_v44, %v5247_v23  ;;  %v631_v46 = vpop.f32.mrb[15].mxu1 }
 0x11d   : > { %v632_v47 = vadd.f32 %v5247_v23, %v631_v46  ;;  %v5300_v23 = vand.u32 127, %v996_v3 }
 0x11e   : > { %v748_v48 = vpack.c.bf16 %v640_v45, %v637_v9 }
 0x11f   : > { %v747_v49 = vpack.c.bf16 %v632_v47, %v629_v42  ;;  %vm1138_vm1 = vcmp.eq.s32.totalorder %v5213_v5, %v5300_v23  ;;  %vm1139_vm2 = vcmp.eq.s32.totalorder %v5219_v8, %v5300_v23  ;;  %vm1142_vm4 = vcmp.eq.s32.totalorder %v5195_v58, %v5300_v23 }
 0x120   : > { %vm3976_vm3 = vmpackc.low %vm1139_vm2, %vm1138_vm1  ;;  %vm1143_vm5 = vcmp.eq.s32.totalorder %v5226_v11, %v5300_v23  ;;  %vm1140_vm6 = vcmp.eq.s32.totalorder %v5193_v57, %v5300_v23  ;;  %vm1141_vm7 = vcmp.eq.s32.totalorder %v5224_v10, %v5300_v23  ;;  %vm6998_vm10 = vcmp.eq.s32.totalorder %v5199_v60, %v5300_v23 }
 0x121   : > { %vm5356_vm8 = vmpackc.low %vm1143_vm5, %vm1142_vm4  ;;  %vm6997_vm11 = vcmp.eq.s32.totalorder %v5230_v13, %v5300_v23  ;;  %vm1144_vm12 = vcmp.eq.s32.totalorder %v5197_v59, %v5300_v23  ;;  %vm1145_vm13 = vcmp.eq.s32.totalorder %v5228_v12, %v5300_v23  ;;  %v7018_v57 = vmov 1  }
 0x122   : > { %4429 = vmatmul.mubr.msk.bf16.gmra.mrb[20].mxu0 %vm6996_vm0, %v746_v37  ;;  %4445 = vmatmul.mubr.msk.bf16.gmra.mrb[24].mxu1 %vm6996_vm0, %v744_v55  ;;  %vm5366_vm9 = vmpackc.low %vm1141_vm7, %vm1140_vm6  ;;  %v7020_v58 = vmov 0  }
 0x123   : > { %4448 = vmatprep.mubr.msk.bf16.mxu1 %vm6996_vm0, %v745_v38  ;;  %4432 = vmatprep.mubr.msk.bf16.mxu0 %vm6996_vm0, %v747_v49  ;;  %vm5402_vm14 = vmpackc.low %vm6997_vm11, %vm6998_vm10  ;;  %vm7001_vm11 = vcmp.eq.s32.totalorder %v5232_v14, %v5300_v23 }
 0x124   : > { %vm5412_vm15 = vmpackc.low %vm1145_vm13, %vm1144_vm12  ;;  %4805 = vset.pattern.permute.xlu0 %v7018_v57  ;;  %4804 = vset.pattern.permute.xlu1 %v7020_v58 }
 0x12a   : > { %4433 = vmatmul.mubr.msk.bf16.gmra.mrb[24].mxu0 %vm6996_vm0, %v748_v48  ;;  %4449 = vmatmul.mubr.msk.bf16.gmra.mrb[28].mxu1 %vm6996_vm0, %v746_v37 }
 0x12b   : > { %4452 = vmatprep.mubr.msk.bf16.mxu1 %vm6996_vm0, %v747_v49  ;;  %4472 = vmatprep.mubr.msk.bf16.mxu0 %vm3976_vm3, %v4998_v40 }
 0x132   : > { %4453 = vmatmul.mubr.msk.bf16.gmra.mrb[32].mxu1 %vm6996_vm0, %v748_v48  ;;  %vm7002_vm0 = vcmp.eq.s32.totalorder %v5201_v61, %v5300_v23 }
 0x133   : > { %4520 = vmatprep.mubr.msk.bf16.mxu1 %vm3976_vm3, %v4998_v40  ;;  %vm7000_vm3 = vcmp.eq.s32.totalorder %v5203_v62, %v5300_v23  ;;  %vm5464_vm10 = vmpackc.low %vm7001_vm11, %vm7002_vm0  ;;  %vm7005_vm11 = vcmp.eq.s32.totalorder %v5236_v18, %v5300_v23 }
 0x1dd   : > { %v5314_v3 = vpop.f32.mrb[8].mxu0 }
 0x1de   : > { %v5316_v50 = vpop.f32.mrb[9].mxu0 }
 0x1df   : > { %v5318_v51 = vpop.f32.mrb[10].mxu0 }
 0x1e0   : > { %v5320_v52 = vpop.f32.mrb[11].mxu0 }
 0x1e5   : > { %v4422_v53 = vpop.f32.mrb[12].mxu0  ;;  %v5322_v54 = vpop.f32.mrb[16].mxu1 }
 0x1e6   : > { %v813_v0 = vpop.f32.mrb[13].mxu0  ;;  %v5324_v1 = vpop.f32.mrb[17].mxu1 }
 0x1e7   : > { %v4423_v22 = vpop.f32.mrb[14].mxu0  ;;  %v5326_v24 = vpop.f32.mrb[18].mxu1 }
 0x1e8   : > { %v877_v25 = vpack.c.bf16 %v4423_v22, %v4422_v53  ;;  %v816_v26 = vpop.f32.mrb[15].mxu0  ;;  %v5328_v55 = vpop.f32.mrb[19].mxu1 }
 0x1e9   : > { %v876_v27 = vpack.c.bf16 %v816_v26, %v813_v0 }
 0x1eb   : > { %4456 = vmatprep.subr.bf16.mxu0 %v876_v27 }
 0x1ec   : > { %4457 = vmatpush3.bf16.msra.mxu0 %v876_v27 }
 0x1ed   : > { %v4426_v28 = vpop.f32.mrb[16].mxu0  ;;  %v4442_v29 = vpop.f32.mrb[20].mxu1  ;;  %4458 = vmatprep.subr.bf16.mxu0 %v877_v25 }
 0x1ee   : > { %v829_v30 = vpop.f32.mrb[17].mxu0  ;;  %v924_v31 = vpop.f32.mrb[21].mxu1 }
 0x1ef   : > { %v4427_v32 = vpop.f32.mrb[18].mxu0  ;;  %v4443_v33 = vpop.f32.mrb[22].mxu1 }
 0x1f0   : > { %v879_v34 = vpack.c.bf16 %v4427_v32, %v4426_v28  ;;  %v988_v56 = vpack.c.bf16 %v4443_v33, %v4442_v29  ;;  %v832_v35 = vpop.f32.mrb[19].mxu0  ;;  %v927_v36 = vpop.f32.mrb[23].mxu1  ;;  %4459 = vmatpush3.bf16.msra.mxu0 %v877_v25 }
 0x1f1   : > { %v878_v37 = vpack.c.bf16 %v832_v35, %v829_v30  ;;  %v987_v38 = vpack.c.bf16 %v927_v36, %v924_v31  ;;  %v1572_v35 = vld [vmem:[%s6989_s3] sm:$0xff]  ;;  %v1573_v36 = vld [vmem:[%s6989_s3 + $0x8] sm:$0xff] }
 0x1f3   : > { %4460 = vmatprep.subr.bf16.mxu0 %v878_v37  ;;  %4504 = vmatprep.subr.bf16.mxu1 %v987_v38 }
 0x1f4   : > { %4461 = vmatpush3.bf16.msra.mxu0 %v878_v37  ;;  %4505 = vmatpush3.bf16.msra.mxu1 %v987_v38  ;;  %v4752_v38 = vpack.c.bf16 %v1573_v36, %v1572_v35 }
 0x1f5   : > { %v4430_v39 = vpop.f32.mrb[20].mxu0  ;;  %v4446_v9 = vpop.f32.mrb[24].mxu1  ;;  %4462 = vmatprep.subr.bf16.mxu0 %v879_v34  ;;  %4506 = vmatprep.subr.bf16.mxu1 %v988_v56 }
 0x1f6   : > { %v845_v41 = vpop.f32.mrb[21].mxu0  ;;  %v940_v42 = vpop.f32.mrb[25].mxu1 }
 0x1f7   : > { %v4431_v44 = vpop.f32.mrb[22].mxu0  ;;  %v4447_v45 = vpop.f32.mrb[26].mxu1 }
 0x1f8   : > { %v881_v46 = vpack.c.bf16 %v4431_v44, %v4430_v39  ;;  %v990_v47 = vpack.c.bf16 %v4447_v45, %v4446_v9  ;;  %v848_v48 = vpop.f32.mrb[23].mxu0  ;;  %v943_v49 = vpop.f32.mrb[27].mxu1  ;;  %4463 = vmatpush3.bf16.msra.mxu0 %v879_v34  ;;  %4507 = vmatpush3.bf16.msra.mxu1 %v988_v56 }
 0x1f9   : > { %v880_v53 = vpack.c.bf16 %v848_v48, %v845_v41  ;;  %v989_v0 = vpack.c.bf16 %v943_v49, %v940_v42  ;;  %v1574_v41 = vld [vmem:[%s6989_s3 + $0x10] sm:$0xff]  ;;  %v1575_v42 = vld [vmem:[%s6989_s3 + $0x18] sm:$0xff] }
 0x1fa   : > { %v4756_v49 = vpack.c.bf16 %v1575_v42, %v1574_v41  ;;  %v1587_v41 = vld [vmem:[%s6989_s3 + $0x78] sm:$0xff] }
 0x1fb   : > { %4464 = vmatprep.subr.bf16.mxu0 %v880_v53  ;;  %4508 = vmatprep.subr.bf16.mxu1 %v989_v0 }
 0x1fc   : > { %4465 = vmatpush3.bf16.msra.mxu0 %v880_v53  ;;  %4509 = vmatpush3.bf16.msra.mxu1 %v989_v0  ;;  %v1576_v53 = vld [vmem:[%s6989_s3 + $0x20] sm:$0xff]  ;;  %v1577_v0 = vld [vmem:[%s6989_s3 + $0x28] sm:$0xff] }
 0x1fd   : > { %v4434_v22 = vpop.f32.mrb[24].mxu0  ;;  %v4450_v25 = vpop.f32.mrb[28].mxu1  ;;  %4466 = vmatprep.subr.bf16.mxu0 %v881_v46  ;;  %4510 = vmatprep.subr.bf16.mxu1 %v990_v47 }
 0x1fe   : > { %v861_v26 = vpop.f32.mrb[25].mxu0  ;;  %v956_v27 = vpop.f32.mrb[29].mxu1 }
 0x1ff   : > { %v4435_v28 = vpop.f32.mrb[26].mxu0  ;;  %v4451_v29 = vpop.f32.mrb[30].mxu1 }
 0x200   : > { %v883_v30 = vpack.c.bf16 %v4435_v28, %v4434_v22  ;;  %v992_v31 = vpack.c.bf16 %v4451_v29, %v4450_v25  ;;  %v864_v32 = vpop.f32.mrb[27].mxu0  ;;  %v959_v33 = vpop.f32.mrb[31].mxu1  ;;  %4467 = vmatpush3.bf16.msra.mxu0 %v881_v46  ;;  %4511 = vmatpush3.bf16.msra.mxu1 %v990_v47  ;;  %v4760_v22 = vpack.c.bf16 %v1577_v0, %v1576_v53  ;;  %v1578_v25 = vld [vmem:[%s6989_s3 + $0x30] sm:$0xff] }
 0x201   : > { %v882_v34 = vpack.c.bf16 %v864_v32, %v861_v26  ;;  %v991_v56 = vpack.c.bf16 %v959_v33, %v956_v27  ;;  %v1579_v26 = vld [vmem:[%s6989_s3 + $0x38] sm:$0xff]  ;;  %v1582_v33 = vld [vmem:[%s6989_s3 + $0x50] sm:$0xff]  ;;  %v5540_v46 = vpop.permute.xlu0 %1108 }
 0x202   : > { %v4764_v29 = vpack.c.bf16 %v1579_v26, %v1578_v25 }
 0x203   : > { %4468 = vmatprep.subr.bf16.mxu0 %v882_v34  ;;  %4512 = vmatprep.subr.bf16.mxu1 %v991_v56 }
 0x204   : > { %4469 = vmatpush3.bf16.msra.mxu0 %v882_v34  ;;  %4513 = vmatpush3.bf16.msra.mxu1 %v991_v56  ;;  %v1583_v34 = vld [vmem:[%s6989_s3 + $0x58] sm:$0xff] }
 0x205   : > { %v4454_v37 = vpop.f32.mrb[32].mxu1  ;;  %4470 = vmatprep.subr.bf16.mxu0 %v883_v30  ;;  %4514 = vmatprep.subr.bf16.mxu1 %v992_v31  ;;  %v4772_v36 = vpack.c.bf16 %v1583_v34, %v1582_v33 }
 0x206   : > { %v972_v39 = vpop.f32.mrb[33].mxu1 }
 0x207   : > { %v4455_v9 = vpop.f32.mrb[34].mxu1 }
 0x208   : > { %v994_v44 = vpack.c.bf16 %v4455_v9, %v4454_v37  ;;  %v975_v45 = vpop.f32.mrb[35].mxu1  ;;  %4471 = vmatpush3.bf16.msra.mxu0 %v883_v30  ;;  %4515 = vmatpush3.bf16.msra.mxu1 %v992_v31  ;;  %v1580_v30 = vld [vmem:[%s6989_s3 + $0x40] sm:$0xff]  ;;  %v1581_v31 = vld [vmem:[%s6989_s3 + $0x48] sm:$0xff]  ;;  %v1586_v9 = vld [vmem:[%s6989_s3 + $0x70] sm:$0xff] }
 0x209   : > { %v993_v47 = vpack.c.bf16 %v975_v45, %v972_v39  ;;  %4753 = vmatprep.subr.bf16.mxu0 %v4752_v38  ;;  %v4768_v32 = vpack.c.bf16 %v1581_v31, %v1580_v30  ;;  %v1584_v37 = vld [vmem:[%s6989_s3 + $0x60] sm:$0xff]  ;;  %v4780_v45 = vpack.c.bf16 %v1587_v41, %v1586_v9 }
 0x20b   : > { %4473 = vmatmul.mubr.msk.bf16.vlgmr.msra.gmra.mrb[28].mxu0 %vm5366_vm9, %v4998_v40  ;;  %4516 = vmatprep.subr.bf16.mxu1 %v993_v47 }
 0x20c   : > { %4476 = vmatprep.mubr.msk.bf16.mxu0 %vm5356_vm8, %v4998_v40  ;;  %4517 = vmatpush3.bf16.msra.mxu1 %v993_v47  ;;  %v5542_v47 = vpop.permute.xlu1 %1112 }
 0x20d   : > { %4755 = vmatpush3.bf16.msra.mxu0 %v4752_v38  ;;  %4518 = vmatprep.subr.bf16.mxu1 %v994_v44  ;;  %v1585_v38 = vld [vmem:[%s6989_s3 + $0x68] sm:$0xff] }
 0x20e   : > { %4757 = vmatprep.subr.bf16.mxu0 %v4756_v49  ;;  %v4776_v39 = vpack.c.bf16 %v1585_v38, %v1584_v37 }
 0x210   : > { %4519 = vmatpush3.bf16.msra.mxu1 %v994_v44  ;;  %v1121_v53 = vpop.permute.xlu1 %1120 }
 0x211   : > { %4759 = vmatpush3.bf16.msra.mxu0 %v4756_v49  ;;  %v1117_v49 = vpop.permute.xlu0 %1116 }
 0x212   : > { %4761 = vmatprep.subr.bf16.mxu0 %v4760_v22 }
 0x213   : > { %4477 = vmatmul.mubr.msk.bf16.gmra.mrb[32].mxu0 %vm5412_vm15, %v4998_v40  ;;  %4521 = vmatmul.mubr.msk.bf16.vlgmr.msra.gmra.mrb[36].mxu1 %vm5366_vm9, %v4998_v40  ;;  %vm6999_vm9 = vcmp.eq.s32.totalorder %v5234_v17, %v5300_v23 }
 0x214   : > { %4480 = vmatprep.mubr.msk.bf16.mxu0 %vm5402_vm14, %v4998_v40  ;;  %4524 = vmatprep.mubr.msk.bf16.mxu1 %vm5356_vm8, %v4998_v40  ;;  %vm5454_vm8 = vmpackc.low %vm6999_vm9, %vm7000_vm3  ;;  %vm7003_vm9 = vcmp.eq.s32.totalorder %v5238_v19, %v5300_v23  ;;  %vm7006_vm3 = vcmp.eq.s32.totalorder %v5205_v63, %v5300_v23  ;;  %v1129_v26 = vpop.permute.xlu1 %1128 }
 0x215   : > { %4763 = vmatpush3.bf16.msra.mxu0 %v4760_v22  ;;  %vm5516_vm0 = vmpackc.low %vm7005_vm11, %vm7006_vm3  ;;  %vm7010_vm11 = vcmp.eq.s32.totalorder %v5211_v4, %v5300_v23  ;;  %v1125_v25 = vpop.permute.xlu0 %1124 }
 0x216   : > { %4765 = vmatprep.subr.bf16.mxu0 %v4764_v29 }
 0x218   : > { %v1137_v28 = vpop.permute.xlu1 %1136 }
 0x219   : > { %4767 = vmatpush3.bf16.msra.mxu0 %v4764_v29  ;;  %v1133_v27 = vpop.permute.xlu0 %1132  ;;  %v4999_v29 = vmov 1.0  }
 0x21a   : > { %4769 = vmatprep.subr.bf16.mxu0 %v4768_v32 }
 0x21b   : > { %4481 = vmatmul.mubr.msk.bf16.gmra.mrb[36].mxu0 %vm5464_vm10, %v4998_v40  ;;  %4525 = vmatmul.mubr.msk.bf16.gmra.mrb[40].mxu1 %vm5412_vm15, %v4998_v40  ;;  %vm7004_vm15 = vcmp.eq.s32.totalorder %v5209_v2, %v5300_v23 }
 0x21c   : > { %4484 = vmatprep.mubr.msk.bf16.mxu0 %vm5454_vm8, %v4998_v40  ;;  %4528 = vmatprep.mubr.msk.bf16.mxu1 %vm5402_vm14, %v4998_v40  ;;  %vm5506_vm14 = vmpackc.low %vm7003_vm9, %vm7004_vm15  ;;  %vm7008_vm9 = vcmp.eq.s32.totalorder %v5215_v6, %v5300_v23  ;;  %vm7007_vm15 = vcmp.eq.s32.totalorder %v5242_v21, %v5300_v23 }
 0x21d   : > { %4771 = vmatpush3.bf16.msra.mxu0 %v4768_v32 }
 0x21e   : > { %4773 = vmatprep.subr.bf16.mxu0 %v4772_v36 }
 0x221   : > { %4775 = vmatpush3.bf16.msra.mxu0 %v4772_v36 }
 0x222   : > { %4777 = vmatprep.subr.bf16.mxu0 %v4776_v39 }
 0x223   : > { %4485 = vmatmul.mubr.msk.bf16.gmra.mrb[40].mxu0 %vm5516_vm0, %v4998_v40  ;;  %4529 = vmatmul.mubr.msk.bf16.gmra.mrb[44].mxu1 %vm5464_vm10, %v4998_v40  ;;  %vm7009_vm10 = vcmp.eq.s32.totalorder %v5240_v20, %v5300_v23 }
 0x224   : > { %4488 = vmatprep.mubr.msk.bf16.mxu0 %vm5506_vm14, %v4998_v40  ;;  %4532 = vmatprep.mubr.msk.bf16.mxu1 %vm5454_vm8, %v4998_v40  ;;  %vm5550_vm8 = vmpackc.low %vm7007_vm15, %vm7008_vm9  ;;  %vm7012_vm15 = vcmp.eq.s32.totalorder %v5540_v46, %v5300_v23  ;;  %vm7011_vm9 = vcmp.eq.s32.totalorder %v5542_v47, %v5300_v23 }
 0x225   : > { %4779 = vmatpush3.bf16.msra.mxu0 %v4776_v39  ;;  %vm3994_vm3 = vmpackc.low %vm7009_vm10, %vm7010_vm11  ;;  %vm7014_vm10 = vcmp.eq.s32.totalorder %v5217_v7, %v5300_v23 }
 0x226   : > { %4781 = vmatprep.subr.bf16.mxu0 %v4780_v45 }
 0x229   : > { %4783 = vmatpush3.bf16.msra.mxu0 %v4780_v45 }
 0x22b   : > { %4489 = vmatmul.mubr.msk.bf16.gmra.mrb[44].mxu0 %vm3994_vm3, %v4998_v40  ;;  %4533 = vmatmul.mubr.msk.bf16.gmra.mrb[48].mxu1 %vm5516_vm0, %v4998_v40  ;;  %vm7013_vm0 = vcmp.eq.s32.totalorder %v5257_v43, %v5300_v23 }
 0x22c   : > { %4492 = vmatprep.mubr.msk.bf16.mxu0 %vm5550_vm8, %v4998_v40  ;;  %4536 = vmatprep.mubr.msk.bf16.mxu1 %vm5506_vm14, %v4998_v40  ;;  %vm5584_vm14 = vmpackc.low %vm7011_vm9, %vm7012_vm15  ;;  %vm7016_vm9 = vcmp.eq.s32.totalorder %v1117_v49, %v5300_v23  ;;  %vm7015_vm15 = vcmp.eq.s32.totalorder %v1121_v53, %v5300_v23 }
 0x22d   : > { %vm5594_vm11 = vmpackc.low %vm7013_vm0, %vm7014_vm10  ;;  %vm1166_vm0 = vcmp.eq.s32.totalorder %v1125_v25, %v5300_v23  ;;  %vm7017_vm10 = vcmp.eq.s32.totalorder %v1129_v26, %v5300_v23 }
 0x233   : > { %4493 = vmatmul.mubr.msk.bf16.gmra.mrb[48].mxu0 %vm5594_vm11, %v4998_v40  ;;  %4537 = vmatmul.mubr.msk.bf16.gmra.mrb[52].mxu1 %vm3994_vm3, %v4998_v40  ;;  %vm4002_vm3 = vmpackc.low %vm7015_vm15, %vm7016_vm9  ;;  %vm1168_vm15 = vcmp.eq.s32.totalorder %v1133_v27, %v5300_v23  ;;  %vm1169_vm9 = vcmp.eq.s32.totalorder %v1137_v28, %v5300_v23 }
 0x234   : > { %4540 = vmatprep.mubr.msk.bf16.mxu1 %vm5550_vm8, %v4998_v40  ;;  %4496 = vmatprep.mubr.msk.bf16.mxu0 %vm5584_vm14, %v4998_v40  ;;  %vm4004_vm8 = vmpackc.low %vm7017_vm10, %vm1166_vm0 }
 0x235   : > { %vm4006_vm10 = vmpackc.low %vm1169_vm9, %vm1168_vm15 }
 0x23b   : > { %4497 = vmatmul.mubr.msk.bf16.gmra.mrb[52].mxu0 %vm4002_vm3, %v4998_v40  ;;  %4541 = vmatmul.mubr.msk.bf16.gmra.mrb[56].mxu1 %vm5594_vm11, %v4998_v40  ;;  %vm7078_vm11 = vcmp.eq.s32.totalorder %v5205_v63, %v5300_v23 }
 0x23c   : > { %4544 = vmatprep.mubr.msk.bf16.mxu1 %vm5584_vm14, %v4998_v40  ;;  %4500 = vmatprep.mubr.msk.bf16.mxu0 %vm4004_vm8, %v4998_v40  ;;  %vm7082_vm14 = vcmp.eq.s32.totalorder %v5211_v4, %v5300_v23 }
 0x243   : > { %4501 = vmatmul.mubr.msk.bf16.gmra.mrb[56].mxu0 %vm4006_vm10, %v4998_v40  ;;  %4545 = vmatmul.mubr.msk.bf16.gmra.mrb[60].mxu1 %vm4002_vm3, %v4998_v40  ;;  %vm7083_vm3 = vcmp.eq.s32.totalorder %v5240_v20, %v5300_v23 }
 0x244   : > { %4548 = vmatprep.mubr.msk.bf16.mxu1 %vm4004_vm8, %v4998_v40  ;;  %4584 = vmatprep.mubr.msk.f32.mxu0 %vm1138_vm1, %v4999_v29  ;;  %vm7072_vm1 = vcmp.eq.s32.totalorder %v5199_v60, %v5300_v23  ;;  %vm7084_vm8 = vcmp.eq.s32.totalorder %v5215_v6, %v5300_v23 }
 0x24b   : > { %4549 = vmatmul.mubr.msk.bf16.gmra.mrb[64].mxu1 %vm4006_vm10, %v4998_v40  ;;  %4585 = vmatmul.mubr.msk.f32.vlgmr.msra.gmra.mrb[60].mxu0 %vm1139_vm2, %v4999_v29  ;;  %vm7073_vm2 = vcmp.eq.s32.totalorder %v5230_v13, %v5300_v23  ;;  %vm7081_vm10 = vcmp.eq.s32.totalorder %v5238_v19, %v5300_v23  ;;  %v2535_v13 = vpop.permute.xlu1 %2534 }
 0x24c   : > { %4587 = vmatprep.mubr.msk.f32.mxu0 %vm1140_vm6, %v4999_v29  ;;  %vm7076_vm6 = vcmp.eq.s32.totalorder %v5203_v62, %v5300_v23  ;;  %4632 = vmatprep.subr.bf16.mxu1 %v2535_v13 }
 0x24d   : > { %4633 = vmatpush3.bf16.msra.mxu1 %v2535_v13 }
 0x24f   : > { %4588 = vmatmul.mubr.msk.f32.gmra.mrb[62].mxu0 %vm1141_vm7, %v4999_v29  ;;  %vm7077_vm7 = vcmp.eq.s32.totalorder %v5234_v17, %v5300_v23  ;;  %v2537_v58 = vpop.permute.xlu1 %2536 }
 0x250   : > { %4590 = vmatprep.mubr.msk.f32.mxu0 %vm1142_vm4, %v4999_v29  ;;  %vm7074_vm4 = vcmp.eq.s32.totalorder %v5201_v61, %v5300_v23  ;;  %4634 = vmatprep.subr.bf16.mxu1 %v2537_v58 }
 0x251   : > { %4635 = vmatpush3.bf16.msra.mxu1 %v2537_v58 }
 0x253   : > { %4591 = vmatmul.mubr.msk.f32.gmra.mrb[64].mxu0 %vm1143_vm5, %v4999_v29  ;;  %vm7075_vm5 = vcmp.eq.s32.totalorder %v5232_v14, %v5300_v23 }
 0x254   : > { %4593 = vmatprep.mubr.msk.f32.mxu0 %vm1144_vm12, %v4999_v29  ;;  %vm7079_vm12 = vcmp.eq.s32.totalorder %v5236_v18, %v5300_v23 }
 0x257   : > { %4594 = vmatmul.mubr.msk.f32.gmra.mrb[66].mxu0 %vm1145_vm13, %v4999_v29  ;;  %vm7080_vm13 = vcmp.eq.s32.totalorder %v5209_v2, %v5300_v23 }
 0x258   : > { %4596 = vmatprep.mubr.msk.f32.mxu0 %vm7072_vm1, %v4999_v29  ;;  %vm7085_vm1 = vcmp.eq.s32.totalorder %v5242_v21, %v5300_v23 }
 0x25b   : > { %4597 = vmatmul.mubr.msk.f32.gmra.mrb[68].mxu0 %vm7073_vm2, %v4999_v29  ;;  %vm7086_vm2 = vcmp.eq.s32.totalorder %v5217_v7, %v5300_v23 }
 0x25c   : > { %4599 = vmatprep.mubr.msk.f32.mxu0 %vm7074_vm4, %v4999_v29  ;;  %vm7087_vm4 = vcmp.eq.s32.totalorder %v5257_v43, %v5300_v23 }
 0x25f   : > { %4600 = vmatmul.mubr.msk.f32.gmra.mrb[70].mxu0 %vm7075_vm5, %v4999_v29  ;;  %vm7088_vm5 = vcmp.eq.s32.totalorder %v5540_v46, %v5300_v23 }
 0x260   : > { %4602 = vmatprep.mubr.msk.f32.mxu0 %vm7076_vm6, %v4999_v29  ;;  %vm7089_vm6 = vcmp.eq.s32.totalorder %v5542_v47, %v5300_v23 }
 0x263   : > { %4603 = vmatmul.mubr.msk.f32.gmra.mrb[72].mxu0 %vm7077_vm7, %v4999_v29  ;;  %vm7090_vm7 = vcmp.eq.s32.totalorder %v1117_v49, %v5300_v23 }
 0x264   : > { %4605 = vmatprep.mubr.msk.f32.mxu0 %vm7078_vm11, %v4999_v29  ;;  %vm7091_vm11 = vcmp.eq.s32.totalorder %v1121_v53, %v5300_v23 }
 0x267   : > { %4606 = vmatmul.mubr.msk.f32.gmra.mrb[74].mxu0 %vm7079_vm12, %v4999_v29  ;;  %vm7092_vm12 = vcmp.eq.s32.totalorder %v1129_v26, %v5300_v23 }
 0x268   : > { %4608 = vmatprep.mubr.msk.f32.mxu0 %vm7080_vm13, %v4999_v29 }
 0x26b   : > { %4609 = vmatmul.mubr.msk.f32.gmra.mrb[76].mxu0 %vm7081_vm10, %v4999_v29 }
 0x26c   : > { %4611 = vmatprep.mubr.msk.f32.mxu0 %vm7082_vm14, %v4999_v29 }
 0x26f   : > { %4612 = vmatmul.mubr.msk.f32.gmra.mrb[78].mxu0 %vm7083_vm3, %v4999_v29 }
 0x270   : > { %4614 = vmatprep.mubr.msk.f32.mxu0 %vm7084_vm8, %v4999_v29 }
 0x273   : > { %4615 = vmatmul.mubr.msk.f32.gmra.mrb[80].mxu0 %vm7085_vm1, %v4999_v29 }
 0x274   : > { %4617 = vmatprep.mubr.msk.f32.mxu0 %vm7086_vm2, %v4999_v29 }
 0x277   : > { %4618 = vmatmul.mubr.msk.f32.gmra.mrb[82].mxu0 %vm7087_vm4, %v4999_v29 }
 0x278   : > { %4620 = vmatprep.mubr.msk.f32.mxu0 %vm7088_vm5, %v4999_v29 }
 0x27b   : > { %4621 = vmatmul.mubr.msk.f32.gmra.mrb[84].mxu0 %vm7089_vm6, %v4999_v29 }
 0x27c   : > { %4623 = vmatprep.mubr.msk.f32.mxu0 %vm7090_vm7, %v4999_v29 }
 0x27f   : > { %4624 = vmatmul.mubr.msk.f32.gmra.mrb[86].mxu0 %vm7091_vm11, %v4999_v29 }
 0x280   : > { %4626 = vmatprep.mubr.msk.f32.mxu0 %vm1166_vm0, %v4999_v29 }
 0x283   : > { %4627 = vmatmul.mubr.msk.f32.gmra.mrb[88].mxu0 %vm7092_vm12, %v4999_v29 }
 0x284   : > { %4629 = vmatprep.mubr.msk.f32.mxu0 %vm1168_vm15, %v4999_v29 }
 0x287   : > { %4630 = vmatmul.mubr.msk.f32.gmra.mrb[90].mxu0 %vm1169_vm9, %v4999_v29  ;;  %vm7142_vm9 = vcmask 261120  }
 0x288   : > { %vm7143_vm15 = vmmov %vm7142_vm9 }
 0x289   : > { %vm7144_vm0 = vmmov %vm7142_vm9 }
 0x28a   : > { %vm7145_vm13 = vmmov %vm7144_vm0 }
 0x28b   : > { %vm7146_vm10 = vmmov %vm7144_vm0 }
 0x28c   : > { %vm7147_vm14 = vmmov %vm7144_vm0 }
 0x28d   : > { %vm7148_vm3 = vmmov %vm7144_vm0 }
 0x28e   : > { %vm7149_vm8 = vmmov %vm7144_vm0 }
 0x28f   : > { %vm7150_vm1 = vmmov %vm7144_vm0 }
 0x290   : > { %vm7151_vm2 = vmmov %vm7144_vm0 }
 0x291   : > { %vm7152_vm4 = vmmov %vm7144_vm0 }
 0x292   : > { %vm7153_vm5 = vmmov %vm7144_vm0 }
 0x293   : > { %vm7154_vm6 = vmmov %vm7144_vm0 }
 0x294   : > { %vm7157_vm7 = vmmov %vm7144_vm0 }
 0x295   : > { %vm7160_vm11 = vmmov %vm7144_vm0 }
 0x296   : > { %vm7161_vm12 = vmmov %vm7144_vm0 }
 0x2de   : > { %v5732_v59 = vpop.f32.mrb[28].mxu0 }
 0x2df   : > { %v5736_v61 = vpop.f32.mrb[29].mxu0 }
 0x2e0   : > { %v5740_v63 = vpop.f32.mrb[30].mxu0 }
 0x2e1   : > { %v5744_v16 = vpop.f32.mrb[31].mxu0 }
 0x2e6   : > { %v5748_v4 = vpop.f32.mrb[32].mxu0  ;;  %v5750_v5 = vpop.f32.mrb[36].mxu1 }
 0x2e7   : > { %v5754_v7 = vpop.f32.mrb[33].mxu0  ;;  %v5756_v8 = vpop.f32.mrb[37].mxu1 }
 0x2e8   : > { %v5760_v11 = vpop.f32.mrb[34].mxu0  ;;  %v5762_v12 = vpop.f32.mrb[38].mxu1 }
 0x2e9   : > { %v5766_v14 = vpop.f32.mrb[35].mxu0  ;;  %v5768_v17 = vpop.f32.mrb[39].mxu1 }
 0x2ee   : > { %v5772_v19 = vpop.f32.mrb[36].mxu0  ;;  %v5774_v20 = vpop.f32.mrb[40].mxu1 }
 0x2ef   : > { %v5778_v43 = vpop.f32.mrb[37].mxu0  ;;  %v5780_v23 = vpop.f32.mrb[41].mxu1 }
 0x2f0   : > { %7093 = vst [vmem:[#allocation2_spill] sm:$0xff] %v5778_v43  ;;  %v5784_v30 = vpop.f32.mrb[38].mxu0  ;;  %v5786_v31 = vpop.f32.mrb[42].mxu1 }
 0x2f1   : > { %7094 = vst [vmem:[#allocation3_spill] sm:$0xff] %v5784_v30  ;;  %v5790_v33 = vpop.f32.mrb[39].mxu0  ;;  %v5792_v34 = vpop.f32.mrb[43].mxu1 }
 0x2f2   : > { %7095 = vst [vmem:[#allocation4_spill] sm:$0xff] %v5790_v33 }
 0x2f6   : > { %v5796_v35 = vpop.f32.mrb[40].mxu0  ;;  %v5798_v36 = vpop.f32.mrb[44].mxu1 }
 0x2f7   : > { %7096 = vst [vmem:[#allocation5_spill] sm:$0xff] %v5796_v35  ;;  %v5802_v38 = vpop.f32.mrb[41].mxu0  ;;  %v5804_v39 = vpop.f32.mrb[45].mxu1 }
 0x2f8   : > { %7097 = vst [vmem:[#allocation6_spill] sm:$0xff] %v5802_v38  ;;  %7098 = vst [vmem:[#allocation7_spill] sm:$0xff] %v5804_v39  ;;  %v5808_v41 = vpop.f32.mrb[42].mxu0  ;;  %v5810_v42 = vpop.f32.mrb[46].mxu1  ;;  %v5996_v38 = vld [vmem:[%s5918_s25 + $0x38] sm:$0xff] }
 0x2f9   : > { %7099 = vst [vmem:[#allocation8_spill] sm:$0xff] %v5808_v41  ;;  %7100 = vst [vmem:[#allocation9_spill] sm:$0xff] %v5810_v42  ;;  %v5814_v45 = vpop.f32.mrb[43].mxu0  ;;  %v5816_v46 = vpop.f32.mrb[47].mxu1 }
 0x2fa   : > { %7101 = vst [vmem:[#allocation10_spill] sm:$0xff] %v5814_v45  ;;  %7102 = vst [vmem:[#allocation11_spill] sm:$0xff] %v5816_v46 }
 0x2fe   : > { %v5820_v48 = vpop.f32.mrb[44].mxu0  ;;  %v5822_v49 = vpop.f32.mrb[48].mxu1 }
 0x2ff   : > { %7103 = vst [vmem:[#allocation12_spill] sm:$0xff] %v5820_v48  ;;  %7104 = vst [vmem:[#allocation13_spill] sm:$0xff] %v5822_v49  ;;  %v5826_v0 = vpop.f32.mrb[45].mxu0  ;;  %v5828_v22 = vpop.f32.mrb[49].mxu1 }
 0x300   : > { %7105 = vst [vmem:[#allocation14_spill] sm:$0xff] %v5826_v0  ;;  %7106 = vst [vmem:[#allocation15_spill] sm:$0xff] %v5828_v22  ;;  %v5832_v26 = vpop.f32.mrb[46].mxu0  ;;  %v5834_v27 = vpop.f32.mrb[50].mxu1 }
 0x301   : > { %7107 = vst [vmem:[#allocation16_spill] sm:$0xff] %v5832_v26  ;;  %7108 = vst [vmem:[#allocation17_spill] sm:$0xff] %v5834_v27  ;;  %v5838_v29 = vpop.f32.mrb[47].mxu0  ;;  %v5840_v47 = vpop.f32.mrb[51].mxu1  ;;  %v5965_v26 = vld [vmem:[%s5918_s25 + $0x28] sm:$0xff] }
 0x302   : > { %7109 = vst [vmem:[#allocation18_spill] sm:$0xff] %v5838_v29  ;;  %7110 = vst [vmem:[#allocation19_spill] sm:$0xff] %v5840_v47  ;;  %v5985_v47 = vld [vmem:[%s5918_s25 + $0x20] sm:$0xff] }
 0x306   : > { %v5844_v44 = vpop.f32.mrb[48].mxu0  ;;  %v5846_v9 = vpop.f32.mrb[52].mxu1 }
 0x307   : > { %7111 = vst [vmem:[#allocation20_spill] sm:$0xff] %v5844_v44  ;;  %7112 = vst [vmem:[#allocation21_spill] sm:$0xff] %v5846_v9  ;;  %v5850_v37 = vpop.f32.mrb[49].mxu0  ;;  %v5852_v56 = vpop.f32.mrb[53].mxu1  ;;  %v5977_v9 = vld [vmem:[%s5918_s25 + $0x30] sm:$0xff] }
 0x308   : > { %7113 = vst [vmem:[#allocation22_spill] sm:$0xff] %v5850_v37  ;;  %7114 = vst [vmem:[#allocation23_spill] sm:$0xff] %v5852_v56  ;;  %v5856_v32 = vpop.f32.mrb[50].mxu0  ;;  %v5858_v40 = vpop.f32.mrb[54].mxu1  ;;  %v7140_v37 = vmov 1  }
 0x309   : > { %7115 = vst [vmem:[#allocation24_spill] sm:$0xff] %v5856_v32  ;;  %7116 = vst [vmem:[#allocation25_spill] sm:$0xff] %v5858_v40  ;;  %v5862_v21 = vpop.f32.mrb[51].mxu0  ;;  %v5864_v18 = vpop.f32.mrb[55].mxu1  ;;  %v7141_v40 = vmov 2  }
 0x30a   : > { %7117 = vst [vmem:[#allocation26_spill] sm:$0xff] %v5862_v21  ;;  %7118 = vst [vmem:[#allocation27_spill] sm:$0xff] %v5864_v18 }
 0x30e   : > { %v5868_v10 = vpop.f32.mrb[52].mxu0  ;;  %v5870_v28 = vpop.f32.mrb[56].mxu1 }
 0x30f   : > { %7119 = vst [vmem:[#allocation28_spill] sm:$0xff] %v5868_v10  ;;  %7120 = vst [vmem:[#allocation29_spill] sm:$0xff] %v5870_v28  ;;  %v5874_v2 = vpop.f32.mrb[53].mxu0  ;;  %v5876_v53 = vpop.f32.mrb[57].mxu1 }
 0x310   : > { %7121 = vst [vmem:[#allocation30_spill] sm:$0xff] %v5874_v2  ;;  %7122 = vst [vmem:[#allocation31_spill] sm:$0xff] %v5876_v53  ;;  %v5880_v62 = vpop.f32.mrb[54].mxu0  ;;  %v5882_v25 = vpop.f32.mrb[58].mxu1  ;;  %v5923_v2 = vld [vmem:[%s5918_s25 + $0x8] sm:$0xff]  ;;  %v5941_v53 = vld [vmem:[%s5918_s25 + $0x18] sm:$0xff] }
 0x311   : > { %7123 = vst [vmem:[#allocation32_spill] sm:$0xff] %v5880_v62  ;;  %7124 = vst [vmem:[#allocation33_spill] sm:$0xff] %v5882_v25  ;;  %v5886_v60 = vpop.f32.mrb[55].mxu0  ;;  %v5888_v57 = vpop.f32.mrb[59].mxu1 }
 0x312   : > { %7125 = vst [vmem:[#allocation34_spill] sm:$0xff] %v5886_v60  ;;  %7126 = vst [vmem:[#allocation35_spill] sm:$0xff] %v5888_v57 }
 0x316   : > { %v5892_v10 = vpop.f32.mrb[56].mxu0  ;;  %v5894_v15 = vpop.f32.mrb[60].mxu1 }
 0x317   : > { %7127 = vst [vmem:[#allocation36_spill] sm:$0xff] %v5892_v10  ;;  %7128 = vst [vmem:[#allocation37_spill] sm:$0xff] %v5894_v15  ;;  %v5898_v21 = vpop.f32.mrb[57].mxu0  ;;  %v5900_v13 = vpop.f32.mrb[61].mxu1 }
 0x318   : > { %7129 = vst [vmem:[#allocation38_spill] sm:$0xff] %v5898_v21  ;;  %7130 = vst [vmem:[#allocation39_spill] sm:$0xff] %v5900_v13  ;;  %v5904_v57 = vpop.f32.mrb[58].mxu0  ;;  %v5906_v6 = vpop.f32.mrb[62].mxu1  ;;  %v5933_v13 = vld [vmem:[%s5918_s25] sm:$0xff] }
 0x319   : > { %7131 = vst [vmem:[#allocation40_spill] sm:$0xff] %v5904_v57  ;;  %7132 = vst [vmem:[#allocation41_spill] sm:$0xff] %v5906_v6  ;;  %v5910_v60 = vpop.f32.mrb[59].mxu0  ;;  %v5912_v15 = vpop.f32.mrb[63].mxu1 }
 0x31a   : > { %7133 = vst [vmem:[#allocation42_spill] sm:$0xff] %v5910_v60  ;;  %7134 = vst [vmem:[#allocation43_spill] sm:$0xff] %v5912_v15 }
 0x31e   : > { %v5925_v21 = vpop.f32.mrb[64].mxu1  ;;  %v4586_v10 = vpop.f32.mrb[60].mxu0 }
 0x31f   : > { %7135 = vst [vmem:[#allocation44_spill] sm:$0xff] %v5925_v21  ;;  %v1822_v58 = vsub.f32 %v5923_v2, %v4586_v10  ;;  %v5928_v57 = vpop.f32.mrb[65].mxu1  ;;  %v1654_v15 = vpop.f32.mrb[61].mxu0  ;;  %v7139_v21 = vmov 0   ;;  %v7034_v10 = vmov 2  }
 0x320   : > { %7136 = vst [vmem:[#allocation45_spill] sm:$0xff] %v5928_v57  ;;  %v5930_v6 = vpop.f32.mrb[66].mxu1  ;;  %v1821_v32 = vsub.f32 %v5933_v13, %v1654_v15 }
 0x321   : > { %7137 = vst [vmem:[#allocation46_spill] sm:$0xff] %v5930_v6  ;;  %v5935_v25 = vpop.f32.mrb[67].mxu1  ;;  %2093 = vperm.xlu0 %4805, %v1822_v58   ;;  %1862 = vperm.xlu1 %4804, %v1822_v58  }
 0x322   : > { %7138 = vst [vmem:[#allocation47_spill] sm:$0xff] %v5935_v25  ;;  %v4589_v62 = vpop.f32.mrb[62].mxu0 }
 0x323   : > { %v1664_v60 = vpop.f32.mrb[63].mxu0  ;;  %v1824_v28 = vsub.f32 %v5941_v53, %v4589_v62 }
 0x325   : > { %4807 = vset.pattern.permute.xlu0 %v7139_v21  ;;  %4806 = vset.pattern.permute.xlu1 %v7034_v10 }
 0x326   : > { %2290 = vperm.xlu1 %4806, %v1822_v58   ;;  %1857 = vperm.xlu0 %4807, %v1821_v32   ;;  %v4592_v57 = vpop.f32.mrb[64].mxu0  ;;  %v5951_v58 = vld [vmem:[%s5918_s25 + $0x10] sm:$0xff] }
 0x327   : > { %v1674_v6 = vpop.f32.mrb[65].mxu0 }
 0x328   : > { %v1825_v22 = vsub.f32 %v5985_v47, %v1674_v6 }
 0x32a   : > { %4808 = vset.pattern.permute.xlu1 %v7140_v37  ;;  %4809 = vset.pattern.permute.xlu0 %v7034_v10  ;;  %v4595_v25 = vpop.f32.mrb[66].mxu0  ;;  %v1823_v10 = vsub.f32 %v5951_v58, %v1664_v60  ;;  %v1826_v60 = vsub.f32 %v5965_v26, %v4592_v57 }
 0x32b   : > { %2089 = vperm.xlu1 %4808, %v1821_v32   ;;  %2286 = vperm.xlu0 %4809, %v1821_v32   ;;  %v5945_v15 = vpop.f32.mrb[67].mxu0 }
 0x32e   : > { %v5948_v44 = vpop.f32.mrb[68].mxu0 }
 0x32f   : > { %4810 = vset.pattern.permute.xlu0 %v7139_v21  ;;  %2101 = vperm.xlu1 %4808, %v1824_v28   ;;  %v5954_v18 = vpop.f32.mrb[69].mxu0  ;;  %v1830_v30 = vsub.f32 %v5923_v2, %v5948_v44 }
 0x330   : > { %1872 = vperm.xlu0 %4810, %v1824_v28  }
 0x332   : > { %v5957_v29 = vpop.f32.mrb[70].mxu0 }
 0x333   : > { %4812 = vset.pattern.permute.xlu1 %v7139_v21  ;;  %v1704_v32 = vpop.f32.mrb[71].mxu0 }
 0x334   : > { %v5961_v62 = vsub.f32 %v5951_v58, %v1704_v32  ;;  %4811 = vset.pattern.permute.xlu0 %v7141_v40  ;;  %1867 = vperm.xlu1 %4812, %v1823_v10  }
 0x335   : > { %2298 = vperm.xlu0 %4811, %v1824_v28  }
 0x336   : > { %v5967_v56 = vpop.f32.mrb[72].mxu0 }
 0x337   : > { %v5969_v0 = vpop.f32.mrb[73].mxu0 }
 0x338   : > { %4813 = vset.pattern.permute.xlu1 %v7140_v37 }
 0x339   : > { %4815 = vset.pattern.permute.xlu0 %v7139_v21  ;;  %2097 = vperm.xlu1 %4813, %v1823_v10  }
 0x33a   : > { %1882 = vperm.xlu0 %4815, %v1826_v60   ;;  %v5974_v32 = vpop.f32.mrb[74].mxu0 }
 0x33b   : > { %v1724_v48 = vpop.f32.mrb[75].mxu0 }
 0x33c   : > { %v5980_v28 = vsub.f32 %v5977_v9, %v1724_v48 }
 0x33d   : > { %4814 = vset.pattern.permute.xlu1 %v7141_v40 }
 0x33e   : > { %2294 = vperm.xlu1 %4814, %v1823_v10   ;;  %4817 = vset.pattern.permute.xlu0 %v7141_v40  ;;  %v4610_v57 = vpop.f32.mrb[76].mxu0 }
 0x33f   : > { %v5988_v45 = vsub.f32 %v5923_v2, %v4610_v57  ;;  %2306 = vperm.xlu0 %4817, %v1826_v60   ;;  %v1734_v27 = vpop.f32.mrb[77].mxu0 }
 0x340   : > { %v5991_v41 = vsub.f32 %v5933_v13, %v1734_v27  ;;  %v1828_v27 = vsub.f32 %v5996_v38, %v4595_v25 }
 0x342   : > { %4816 = vset.pattern.permute.xlu1 %v7140_v37  ;;  %v4613_v48 = vpop.f32.mrb[78].mxu0 }
 0x343   : > { %v5999_v10 = vsub.f32 %v5941_v53, %v4613_v48  ;;  %2109 = vperm.xlu1 %4816, %v1826_v60   ;;  %4819 = vset.pattern.permute.xlu0 %v7140_v37  ;;  %v1744_v57 = vpop.f32.mrb[79].mxu0 }
 0x344   : > { %v6003_v49 = vsub.f32 %v5951_v58, %v1744_v57  ;;  %2105 = vperm.xlu0 %4819, %v1825_v22  }
 0x346   : > { %v4616_v35 = vpop.f32.mrb[80].mxu0 }
 0x347   : > { %v6007_v6 = vsub.f32 %v5965_v26, %v4616_v35  ;;  %4818 = vset.pattern.permute.xlu1 %v7139_v21  ;;  %v1754_v46 = vpop.f32.mrb[81].mxu0 }
 0x348   : > { %v6011_v48 = vsub.f32 %v5985_v47, %v1754_v46  ;;  %1877 = vperm.xlu1 %4818, %v1825_v22   ;;  %2117 = vperm.xlu0 %4819, %v1828_v27  }
 0x34a   : > { %v4619_v60 = vpop.f32.mrb[82].mxu0 }
 0x34b   : > { %v6014_v33 = vsub.f32 %v5996_v38, %v4619_v60  ;;  %v1764_v57 = vpop.f32.mrb[83].mxu0 }
 0x34c   : > { %v6017_v42 = vsub.f32 %v5977_v9, %v1764_v57  ;;  %4820 = vset.pattern.permute.xlu1 %v7141_v40  ;;  %4822 = vset.pattern.permute.xlu0 %v7141_v40 }
 0x34d   : > { %2302 = vperm.xlu1 %4820, %v1825_v22   ;;  %2314 = vperm.xlu0 %4822, %v1828_v27  }
 0x34e   : > { %v4622_v35 = vpop.f32.mrb[84].mxu0 }
 0x34f   : > { %v6022_v46 = vsub.f32 %v5923_v2, %v4622_v35  ;;  %v1774_v25 = vpop.f32.mrb[85].mxu0  ;;  %v1827_v35 = vsub.f32 %v5977_v9, %v5945_v15 }
 0x350   : > { %v6027_v60 = vsub.f32 %v5933_v13, %v1774_v25 }
 0x351   : > { %4821 = vset.pattern.permute.xlu1 %v7139_v21  ;;  %4825 = vset.pattern.permute.xlu0 %v7139_v21 }
 0x352   : > { %1892 = vperm.xlu1 %4821, %v1828_v27   ;;  %1902 = vperm.xlu0 %4825, %v1830_v30   ;;  %v4625_v57 = vpop.f32.mrb[86].mxu0 }
 0x353   : > { %v6032_v22 = vsub.f32 %v5941_v53, %v4625_v57  ;;  %v1784_v39 = vpop.f32.mrb[87].mxu0  ;;  %v1829_v57 = vsub.f32 %v5933_v13, %v5954_v18  ;;  %v1834_v18 = vsub.f32 %v5965_v26, %v5967_v56  ;;  %v1836_v56 = vsub.f32 %v5996_v38, %v5974_v32  ;;  %v6123_v32 = vld [vmem:[%s6992_s6 + $0x2] ss:$0 sm:$0xff] }
 0x354   : > { %v6037_v43 = vsub.f32 %v5951_v58, %v1784_v39 }
 0x356   : > { %1887 = vperm.xlu1 %4821, %v1827_v35   ;;  %4826 = vset.pattern.permute.xlu0 %v7140_v37  ;;  %v4628_v2 = vpop.f32.mrb[88].mxu0 }
 0x357   : > { %v6041_v44 = vsub.f32 %v5965_v26, %v4628_v2  ;;  %2125 = vperm.xlu0 %4826, %v1830_v30   ;;  %v1794_v27 = vpop.f32.mrb[89].mxu0  ;;  %v6115_v26 = vld [vmem:[%s6992_s6 + $0x1] ss:$0 sm:$0xff] }
 0x358   : > { %v6044_v25 = vsub.f32 %v5985_v47, %v1794_v27  ;;  %v1832_v27 = vsub.f32 %v5941_v53, %v5957_v29 }
 0x35a   : > { %4823 = vset.pattern.permute.xlu1 %v7140_v37  ;;  %v4631_v15 = vpop.f32.mrb[90].mxu0 }
 0x35b   : > { %v6050_v39 = vsub.f32 %v5996_v38, %v4631_v15  ;;  %2113 = vperm.xlu1 %4823, %v1827_v35   ;;  %4829 = vset.pattern.permute.xlu0 %v7141_v40  ;;  %v1804_v58 = vpop.f32.mrb[91].mxu0  ;;  %v6100_v38 = vld [vmem:[%s6992_s6] ss:$0 sm:$0xff] }
 0x35c   : > { %v6054_v2 = vsub.f32 %v5977_v9, %v1804_v58  ;;  %2318 = vperm.xlu0 %4829, %v1829_v57  }
 0x35f   : > { %4824 = vset.pattern.permute.xlu1 %v7141_v40 }
 0x360   : > { %2310 = vperm.xlu1 %4824, %v1827_v35   ;;  %4830 = vset.pattern.permute.xlu0 %v7139_v21 }
 0x361   : > { %1912 = vperm.xlu0 %4830, %v1832_v27  }
 0x364   : > { %2322 = vperm.xlu1 %4824, %v1830_v30   ;;  %v1833_v30 = vsub.f32 %v5985_v47, %v5969_v0  ;;  %v6109_v0 = vld [vmem:[%s6994_s8 + $0x1] ss:$0 sm:$0xff] }
 0x365   : > { %4831 = vset.pattern.permute.xlu0 %v7141_v40 }
 0x366   : > { %2330 = vperm.xlu0 %4831, %v1832_v27  }
 0x368   : > { %4827 = vset.pattern.permute.xlu1 %v7139_v21 }
 0x369   : > { %1897 = vperm.xlu1 %4827, %v1829_v57  }
 0x36a   : > { %4835 = vset.pattern.permute.xlu0 %v7139_v21 }
 0x36b   : > { %1922 = vperm.xlu0 %4835, %v1834_v18  }
 0x36d   : > { %4828 = vset.pattern.permute.xlu1 %v7140_v37 }
 0x36e   : > { %2121 = vperm.xlu1 %4828, %v1829_v57  }
 0x36f   : > { %4837 = vset.pattern.permute.xlu0 %v7141_v40 }
 0x370   : > { %2338 = vperm.xlu0 %4837, %v1834_v18  }
 0x372   : > { %2133 = vperm.xlu1 %4828, %v1832_v27  }
 0x374   : > { %4839 = vset.pattern.permute.xlu0 %v7140_v37 }
 0x375   : > { %2137 = vperm.xlu0 %4839, %v1833_v30  }
 0x376   : > { %4832 = vset.pattern.permute.xlu1 %v7139_v21 }
 0x377   : > { %1907 = vperm.xlu1 %4832, %v5961_v62  }
 0x379   : > { %2149 = vperm.xlu0 %4839, %v1836_v56  }
 0x37b   : > { %4833 = vset.pattern.permute.xlu1 %v7140_v37 }
 0x37c   : > { %2129 = vperm.xlu1 %4833, %v5961_v62  }
 0x37d   : > { %2157 = vperm.xlu0 %4839, %v5988_v45  }
 0x380   : > { %4834 = vset.pattern.permute.xlu1 %v7141_v40 }
 0x381   : > { %2326 = vperm.xlu1 %4834, %v5961_v62   ;;  %4848 = vset.pattern.permute.xlu0 %v7139_v21 }
 0x382   : > { %1937 = vperm.xlu0 %4848, %v5991_v41  }
 0x385   : > { %4836 = vset.pattern.permute.xlu1 %v7140_v37 }
 0x386   : > { %2141 = vperm.xlu1 %4836, %v1834_v18   ;;  %4850 = vset.pattern.permute.xlu0 %v7141_v40 }
 0x387   : > { %2350 = vperm.xlu0 %4850, %v5991_v41  }
 0x38a   : > { %4838 = vset.pattern.permute.xlu1 %v7139_v21 }
 0x38b   : > { %1917 = vperm.xlu1 %4838, %v1833_v30   ;;  %4851 = vset.pattern.permute.xlu0 %v7139_v21 }
 0x38c   : > { %1952 = vperm.xlu0 %4851, %v5999_v10  }
 0x38f   : > { %4840 = vset.pattern.permute.xlu1 %v7141_v40 }
 0x390   : > { %2334 = vperm.xlu1 %4840, %v1833_v30   ;;  %4852 = vset.pattern.permute.xlu0 %v7141_v40 }
 0x391   : > { %2362 = vperm.xlu0 %4852, %v5999_v10  }
 0x394   : > { %4841 = vset.pattern.permute.xlu1 %v7139_v21 }
 0x395   : > { %1932 = vperm.xlu1 %4841, %v1836_v56   ;;  %4856 = vset.pattern.permute.xlu0 %v7139_v21 }
 0x396   : > { %1962 = vperm.xlu0 %4856, %v6007_v6  }
 0x399   : > { %4842 = vset.pattern.permute.xlu1 %v7141_v40 }
 0x39a   : > { %2346 = vperm.xlu1 %4842, %v1836_v56   ;;  %4858 = vset.pattern.permute.xlu0 %v7141_v40 }
 0x39b   : > { %2370 = vperm.xlu0 %4858, %v6007_v6  }
 0x39e   : > { %4843 = vset.pattern.permute.xlu1 %v7139_v21 }
 0x39f   : > { %1927 = vperm.xlu1 %4843, %v5980_v28   ;;  %4860 = vset.pattern.permute.xlu0 %v7140_v37 }
 0x3a0   : > { %v2094_v9 = vpop.permute.xlu0 %2093  ;;  %v1863_v47 = vpop.permute.xlu1 %1862  ;;  %2169 = vperm.xlu0 %4860, %v6011_v48  }
 0x3a1   : > { %v2020_v53 = vmul.f32 %v6100_v38, %v1863_v47  ;;  %v2221_v35 = vmul.f32 %v6115_v26, %v2094_v9 }
 0x3a3   : > { %4844 = vset.pattern.permute.xlu1 %v7140_v37  ;;  %v2056_v29 = vadd.f32 %v6109_v0, %v2020_v53 }
 0x3a4   : > { %2145 = vperm.xlu1 %4844, %v5980_v28   ;;  %2181 = vperm.xlu0 %4860, %v6014_v33  }
 0x3a5   : > { %v2291_v13 = vpop.permute.xlu1 %2290  ;;  %v1858_v62 = vpop.permute.xlu0 %1857  ;;  %v2253_v15 = vadd.f32 %v2221_v35, %v2056_v29 }
 0x3a6   : > { %v2019_v57 = vmul.f32 %v6100_v38, %v1858_v62  ;;  %v2418_v58 = vmul.f32 %v6123_v32, %v2291_v13 }
 0x3a8   : > { %4845 = vset.pattern.permute.xlu1 %v7141_v40  ;;  %2189 = vperm.xlu0 %4860, %v6022_v46   ;;  %v2055_v30 = vadd.f32 %v6109_v0, %v2019_v57  ;;  %v2450_v9 = vadd.f32 %v2418_v58, %v2253_v15 }
 0x3a9   : > { %2342 = vperm.xlu1 %4845, %v5980_v28  }
 0x3aa   : > { %v2090_v27 = vpop.permute.xlu1 %2089  ;;  %v2287_v18 = vpop.permute.xlu0 %2286  ;;  %v2482_v62 = vmax.f32 %v2450_v9, 0.0 }
 0x3ab   : > { %v2220_v56 = vmul.f32 %v6115_v26, %v2090_v27  ;;  %v2417_v53 = vmul.f32 %v6123_v32, %v2287_v18 }
 0x3ac   : > { %4869 = vset.pattern.permute.xlu0 %v7139_v21 }
 0x3ad   : > { %v2252_v47 = vadd.f32 %v2220_v56, %v2055_v30  ;;  %4846 = vset.pattern.permute.xlu1 %v7139_v21  ;;  %1977 = vperm.xlu0 %4869, %v6027_v60  }
 0x3ae   : > { %v2102_v29 = vpop.permute.xlu1 %2101  ;;  %1942 = vperm.xlu1 %4846, %v5988_v45  }
 0x3af   : > { %v2449_v28 = vadd.f32 %v2417_v53, %v2252_v47  ;;  %v1873_v13 = vpop.permute.xlu0 %1872  ;;  %v2223_v30 = vmul.f32 %v6115_v26, %v2102_v29 }
 0x3b0   : > { %v2022_v57 = vmul.f32 %v6100_v38, %v1873_v13 }
 0x3b1   : > { %v2481_v35 = vmax.f32 %v2449_v28, 0.0  ;;  %4871 = vset.pattern.permute.xlu0 %v7141_v40 }
 0x3b2   : > { %4847 = vset.pattern.permute.xlu1 %v7141_v40  ;;  %2382 = vperm.xlu0 %4871, %v6027_v60   ;;  %v2058_v18 = vadd.f32 %v6109_v0, %v2022_v57 }
 0x3b3   : > { %v2514_v15 = vpack.c.bf16 %v2482_v62, %v2481_v35  ;;  %v1868_v58 = vpop.permute.xlu1 %1867  ;;  %2354 = vperm.xlu1 %4847, %v5988_v45  }
 0x3b4   : > { %v2299_v27 = vpop.permute.xlu0 %2298  ;;  %v2021_v56 = vmul.f32 %v6100_v38, %v1868_v58  ;;  %v2255_v47 = vadd.f32 %v2223_v30, %v2058_v18 }
 0x3b5   : > { %4636 = vmatprep.mubr.msk.bf16.mxu1 %vm7142_vm9, %v2514_v15  ;;  %v2420_v45 = vmul.f32 %v6123_v32, %v2299_v27  ;;  %vm7162_vm9 = vmmov %vm7144_vm0 }
 0x3b6   : > { %4872 = vset.pattern.permute.xlu0 %v7139_v21  ;;  %v2057_v13 = vadd.f32 %v6109_v0, %v2021_v56 }
 0x3b7   : > { %4849 = vset.pattern.permute.xlu1 %v7140_v37  ;;  %1992 = vperm.xlu0 %4872, %v6032_v22   ;;  %v2452_v62 = vadd.f32 %v2420_v45, %v2255_v47 }
 0x3b8   : > { %v2098_v9 = vpop.permute.xlu1 %2097  ;;  %2153 = vperm.xlu1 %4849, %v5991_v41  }
 0x3b9   : > { %v2222_v53 = vmul.f32 %v6115_v26, %v2098_v9  ;;  %v1883_v28 = vpop.permute.xlu0 %1882  ;;  %v2484_v58 = vmax.f32 %v2452_v62, 0.0 }
 0x3ba   : > { %v2024_v18 = vmul.f32 %v6100_v38, %v1883_v28 }
 0x3bb   : > { %4873 = vset.pattern.permute.xlu0 %v7141_v40  ;;  %v2254_v35 = vadd.f32 %v2222_v53, %v2057_v13 }
 0x3bc   : > { %2165 = vperm.xlu1 %4849, %v5999_v10   ;;  %2394 = vperm.xlu0 %4873, %v6032_v22   ;;  %v2060_v9 = vadd.f32 %v6109_v0, %v2024_v18 }
 0x3bd   : > { %v2295_v29 = vpop.permute.xlu1 %2294 }
 0x3be   : > { %v2419_v57 = vmul.f32 %v6123_v32, %v2295_v29  ;;  %v2307_v15 = vpop.permute.xlu0 %2306 }
 0x3bf   : > { %v2422_v62 = vmul.f32 %v6123_v32, %v2307_v15 }
 0x3c0   : > { %v2451_v41 = vadd.f32 %v2419_v57, %v2254_v35  ;;  %4853 = vset.pattern.permute.xlu1 %v7139_v21  ;;  %4877 = vset.pattern.permute.xlu0 %v7139_v21 }
 0x3c1   : > { %1947 = vperm.xlu1 %4853, %v6003_v49   ;;  %2002 = vperm.xlu0 %4877, %v6041_v44  }
 0x3c2   : > { %v2483_v27 = vmax.f32 %v2451_v41, 0.0  ;;  %v2110_v10 = vpop.permute.xlu1 %2109 }
 0x3c3   : > { %v2225_v56 = vmul.f32 %v6115_v26, %v2110_v10  ;;  %v2106_v47 = vpop.permute.xlu0 %2105 }
 0x3c4   : > { %v2515_v30 = vpack.c.bf16 %v2484_v58, %v2483_v27  ;;  %v2224_v13 = vmul.f32 %v6115_v26, %v2106_v47 }
 0x3c5   : > { %4854 = vset.pattern.permute.xlu1 %v7140_v37  ;;  %4880 = vset.pattern.permute.xlu0 %v7140_v37  ;;  %v2257_v28 = vadd.f32 %v2225_v56, %v2060_v9 }
 0x3c6   : > { %4637 = vmatmul.mubr.msk.bf16.vlgmr.msra.gmra.mrb[68].mxu1 %vm7143_vm15, %v2515_v30  ;;  %2161 = vperm.xlu1 %4854, %v6003_v49   ;;  %vm7171_vm15 = vmmov %vm7144_vm0 }
 0x3c7   : > { %2201 = vperm.xlu0 %4880, %v6044_v25   ;;  %v1878_v45 = vpop.permute.xlu1 %1877  ;;  %v2454_v41 = vadd.f32 %v2422_v62, %v2257_v28  ;;  %v2118_v56 = vpop.permute.xlu0 %2117 }
 0x3c8   : > { %v2023_v53 = vmul.f32 %v6100_v38, %v1878_v45 }
 0x3c9   : > { %v2486_v10 = vmax.f32 %v2454_v41, 0.0 }
 0x3ca   : > { %v2059_v29 = vadd.f32 %v6109_v0, %v2023_v53  ;;  %4855 = vset.pattern.permute.xlu1 %v7141_v40 }
 0x3cb   : > { %2213 = vperm.xlu0 %4880, %v6050_v39   ;;  %2358 = vperm.xlu1 %4855, %v6003_v49  }
 0x3cc   : > { %v2256_v35 = vadd.f32 %v2224_v13, %v2059_v29  ;;  %v2303_v57 = vpop.permute.xlu1 %2302  ;;  %v2315_v45 = vpop.permute.xlu0 %2314 }
 0x3cd   : > { %v2421_v58 = vmul.f32 %v6123_v32, %v2303_v57  ;;  %v2424_v62 = vmul.f32 %v6123_v32, %v2315_v45 }
 0x3cf   : > { %v2453_v27 = vadd.f32 %v2421_v58, %v2256_v35  ;;  %4883 = vset.pattern.permute.xlu0 %v7141_v40  ;;  %4857 = vset.pattern.permute.xlu1 %v7140_v37 }
 0x3d0   : > { %2402 = vperm.xlu0 %4883, %v6041_v44   ;;  %2173 = vperm.xlu1 %4857, %v6007_v6   ;;  %v2227_v6 = vmul.f32 %v6115_v26, %v2118_v56 }
 0x3d1   : > { %v2485_v15 = vmax.f32 %v2453_v27, 0.0  ;;  %v1893_v18 = vpop.permute.xlu1 %1892  ;;  %v1903_v41 = vpop.permute.xlu0 %1902 }
 0x3d2   : > { %v2026_v49 = vmul.f32 %v6100_v38, %v1893_v18 }
 0x3d3   : > { %v2516_v30 = vpack.c.bf16 %v2486_v10, %v2485_v15 }
 0x3d4   : > { %4859 = vset.pattern.permute.xlu1 %v7139_v21  ;;  %v2062_v47 = vadd.f32 %v6109_v0, %v2026_v49 }
 0x3d5   : > { %4640 = vmatprep.mubr.msk.bf16.mxu1 %vm7144_vm0, %v2516_v30  ;;  %v1888_v9 = vpop.permute.xlu1 %1887  ;;  %1957 = vperm.xlu1 %4859, %v6011_v48  }
 0x3d6   : > { %v2025_v53 = vmul.f32 %v6100_v38, %v1888_v9  ;;  %v2259_v13 = vadd.f32 %v2227_v6, %v2062_v47  ;;  %v2126_v56 = vpop.permute.xlu0 %2125  ;;  %v2028_v9 = vmul.f32 %v6100_v38, %v1903_v41 }
 0x3d7   : > { %v2229_v6 = vmul.f32 %v6115_v26, %v2126_v56 }
 0x3d8   : > { %v2061_v35 = vadd.f32 %v6109_v0, %v2025_v53  ;;  %v2456_v27 = vadd.f32 %v2424_v62, %v2259_v13  ;;  %v2064_v53 = vadd.f32 %v6109_v0, %v2028_v9 }
 0x3d9   : > { %4861 = vset.pattern.permute.xlu1 %v7141_v40 }
 0x3da   : > { %v2114_v28 = vpop.permute.xlu1 %2113  ;;  %2366 = vperm.xlu1 %4861, %v6011_v48   ;;  %v2488_v48 = vmax.f32 %v2456_v27, 0.0 }
 0x3db   : > { %v2226_v29 = vmul.f32 %v6115_v26, %v2114_v28  ;;  %v2319_v28 = vpop.permute.xlu0 %2318 }
 0x3dd   : > { %v2258_v58 = vadd.f32 %v2226_v29, %v2061_v35  ;;  %v2261_v29 = vadd.f32 %v2229_v6, %v2064_v53 }
 0x3de   : > { %4862 = vset.pattern.permute.xlu1 %v7139_v21 }
 0x3df   : > { %v2311_v57 = vpop.permute.xlu1 %2310  ;;  %1972 = vperm.xlu1 %4862, %v6014_v33  }
 0x3e0   : > { %v2423_v10 = vmul.f32 %v6123_v32, %v2311_v57  ;;  %v2425_v57 = vmul.f32 %v6123_v32, %v2319_v28 }
 0x3e2   : > { %v2455_v15 = vadd.f32 %v2423_v10, %v2258_v58  ;;  %v1913_v10 = vpop.permute.xlu0 %1912 }
 0x3e3   : > { %v2323_v18 = vpop.permute.xlu1 %2322  ;;  %4863 = vset.pattern.permute.xlu1 %v7141_v40 }
 0x3e4   : > { %v2487_v30 = vmax.f32 %v2455_v15, 0.0  ;;  %2378 = vperm.xlu1 %4863, %v6014_v33   ;;  %v2426_v33 = vmul.f32 %v6123_v32, %v2323_v18 }
 0x3e6   : > { %v2517_v49 = vpack.c.bf16 %v2488_v48, %v2487_v30  ;;  %v2458_v41 = vadd.f32 %v2426_v33, %v2261_v29  ;;  %v2331_v9 = vpop.permute.xlu0 %2330 }
 0x3e8   : > { %4641 = vmatmul.mubr.msk.bf16.gmra.mrb[72].mxu1 %vm7145_vm13, %v2517_v49  ;;  %v1898_v47 = vpop.permute.xlu1 %1897  ;;  %4864 = vset.pattern.permute.xlu1 %v7139_v21  ;;  %v2490_v18 = vmax.f32 %v2458_v41, 0.0  ;;  %v2030_v49 = vmul.f32 %v6100_v38, %v1913_v10  ;;  %vm7172_vm13 = vmmov %vm7144_vm0 }
 0x3e9   : > { %1967 = vperm.xlu1 %4864, %v6017_v42   ;;  %v2027_v45 = vmul.f32 %v6100_v38, %v1898_v47 }
 0x3ea   : > { %v2066_v6 = vadd.f32 %v6109_v0, %v2030_v49  ;;  %v1923_v33 = vpop.permute.xlu0 %1922 }
 0x3eb   : > { %v2063_v62 = vadd.f32 %v6109_v0, %v2027_v45 }
 0x3ed   : > { %v2122_v13 = vpop.permute.xlu1 %2121  ;;  %4865 = vset.pattern.permute.xlu1 %v7140_v37 }
 0x3ee   : > { %v2228_v35 = vmul.f32 %v6115_v26, %v2122_v13  ;;  %2177 = vperm.xlu1 %4865, %v6017_v42   ;;  %v2428_v13 = vmul.f32 %v6123_v32, %v2331_v9 }
 0x3f0   : > { %v2260_v58 = vadd.f32 %v2228_v35, %v2063_v62 }
 0x3f1   : > { %v2134_v27 = vpop.permute.xlu1 %2133 }
 0x3f2   : > { %v2457_v15 = vadd.f32 %v2425_v57, %v2260_v58  ;;  %4866 = vset.pattern.permute.xlu1 %v7141_v40  ;;  %v2231_v47 = vmul.f32 %v6115_v26, %v2134_v27  ;;  %v2339_v27 = vpop.permute.xlu0 %2338 }
 0x3f3   : > { %2374 = vperm.xlu1 %4866, %v6017_v42  }
 0x3f4   : > { %v2489_v48 = vmax.f32 %v2457_v15, 0.0  ;;  %v2263_v53 = vadd.f32 %v2231_v47, %v2066_v6 }
 0x3f6   : > { %v2518_v30 = vpack.c.bf16 %v2490_v18, %v2489_v48  ;;  %v1908_v56 = vpop.permute.xlu1 %1907  ;;  %v2460_v35 = vadd.f32 %v2428_v13, %v2263_v53  ;;  %v2138_v49 = vpop.permute.xlu0 %2137 }
 0x3f7   : > { %4867 = vset.pattern.permute.xlu1 %v7139_v21  ;;  %v2029_v45 = vmul.f32 %v6100_v38, %v1908_v56  ;;  %v2232_v6 = vmul.f32 %v6115_v26, %v2138_v49 }
 0x3f8   : > { %4644 = vmatprep.mubr.msk.bf16.mxu1 %vm7146_vm10, %v2518_v30  ;;  %1982 = vperm.xlu1 %4867, %v6022_v46   ;;  %v2492_v10 = vmax.f32 %v2460_v35, 0.0  ;;  %vm7183_vm10 = vmmov %vm7144_vm0 }
 0x3f9   : > { %v2065_v29 = vadd.f32 %v6109_v0, %v2029_v45  ;;  %v2430_v45 = vmul.f32 %v6123_v32, %v2339_v27 }
 0x3fb   : > { %v2130_v42 = vpop.permute.xlu1 %2129 }
 0x3fc   : > { %4868 = vset.pattern.permute.xlu1 %v7141_v40  ;;  %v2230_v28 = vmul.f32 %v6115_v26, %v2130_v42 }
 0x3fd   : > { %2386 = vperm.xlu1 %4868, %v6022_v46   ;;  %v2032_v46 = vmul.f32 %v6100_v38, %v1923_v33 }
 0x3fe   : > { %v2262_v57 = vadd.f32 %v2230_v28, %v2065_v29 }
 0x3ff   : > { %v2068_v56 = vadd.f32 %v6109_v0, %v2032_v46 }
 0x400   : > { %v2327_v62 = vpop.permute.xlu1 %2326 }
 0x401   : > { %v2427_v41 = vmul.f32 %v6123_v32, %v2327_v62  ;;  %4870 = vset.pattern.permute.xlu1 %v7140_v37 }
 0x402   : > { %2185 = vperm.xlu1 %4870, %v6027_v60  }
 0x403   : > { %v2459_v58 = vadd.f32 %v2427_v41, %v2262_v57 }
 0x405   : > { %v2491_v15 = vmax.f32 %v2459_v58, 0.0  ;;  %v2142_v18 = vpop.permute.xlu1 %2141  ;;  %v4896_v58 = vld [vmem:[%s6993_s7 + $0x8] ss:$12 sps:$4 sm:$0xff]  }
 0x406   : > { %2197 = vperm.xlu1 %4870, %v6032_v22   ;;  %v2233_v30 = vmul.f32 %v6115_v26, %v2142_v18  ;;  %4668 = vmatprep.subr.bf16.mxu0 %v4896_v58 }
 0x407   : > { %v2519_v48 = vpack.c.bf16 %v2492_v10, %v2491_v15  ;;  %3112 = vrot.lane.b32.xlu0 %v4896_v58, %s4996_s24  ;;  %4669 = vmatpush3.bf16.msra.mxu0 %v4896_v58 }
 0x408   : > { %v2265_v47 = vadd.f32 %v2233_v30, %v2068_v56 }
 0x409   : > { %4645 = vmatmul.mubr.msk.bf16.gmra.mrb[76].mxu1 %vm7147_vm14, %v2519_v48  ;;  %vm7184_vm14 = vmmov %vm7144_vm0 }
 0x40a   : > { %v1918_v9 = vpop.permute.xlu1 %1917  ;;  %4874 = vset.pattern.permute.xlu1 %v7139_v21  ;;  %v2462_v28 = vadd.f32 %v2430_v45, %v2265_v47 }
 0x40b   : > { %v2031_v60 = vmul.f32 %v6100_v38, %v1918_v9  ;;  %1987 = vperm.xlu1 %4874, %v6037_v43  }
 0x40c   : > { %v2494_v29 = vmax.f32 %v2462_v28, 0.0 }
 0x40d   : > { %v2067_v22 = vadd.f32 %v6109_v0, %v2031_v60 }
 0x40f   : > { %v2264_v42 = vadd.f32 %v2232_v6, %v2067_v22  ;;  %v2335_v53 = vpop.permute.xlu1 %2334  ;;  %4875 = vset.pattern.permute.xlu1 %v7140_v37 }
 0x410   : > { %v2429_v33 = vmul.f32 %v6123_v32, %v2335_v53  ;;  %2193 = vperm.xlu1 %4875, %v6037_v43  }
 0x412   : > { %v2461_v13 = vadd.f32 %v2429_v33, %v2264_v42 }
 0x414   : > { %v2493_v62 = vmax.f32 %v2461_v13, 0.0  ;;  %v1933_v35 = vpop.permute.xlu1 %1932  ;;  %4876 = vset.pattern.permute.xlu1 %v7141_v40 }
 0x415   : > { %2390 = vperm.xlu1 %4876, %v6037_v43   ;;  %v2034_v27 = vmul.f32 %v6100_v38, %v1933_v35  ;;  %v4897_v43 = vld [vmem:[%s6993_s7 + $0x20] ss:$12 sps:$4 sm:$0xff]  }
 0x416   : > { %v2520_v57 = vpack.c.bf16 %v2494_v29, %v2493_v62  ;;  %4670 = vmatprep.subr.bf16.mxu0 %v4897_v43 }
 0x417   : > { %v2070_v15 = vadd.f32 %v6109_v0, %v2034_v27  ;;  %4671 = vmatpush3.bf16.msra.mxu0 %v4897_v43 }
 0x418   : > { %4648 = vmatprep.mubr.msk.bf16.mxu1 %vm7148_vm3, %v2520_v57  ;;  %vm7201_vm3 = vmmov %vm7144_vm0 }
 0x419   : > { %v2347_v41 = vpop.permute.xlu1 %2346  ;;  %4878 = vset.pattern.permute.xlu1 %v7140_v37 }
 0x41a   : > { %2205 = vperm.xlu1 %4878, %v6041_v44   ;;  %v2150_v44 = vpop.permute.xlu0 %2149  ;;  %v2432_v56 = vmul.f32 %v6123_v32, %v2347_v41 }
 0x41b   : > { %v2235_v18 = vmul.f32 %v6115_v26, %v2150_v44 }
 0x41d   : > { %v2267_v30 = vadd.f32 %v2235_v18, %v2070_v15 }
 0x41e   : > { %v1928_v10 = vpop.permute.xlu1 %1927  ;;  %4879 = vset.pattern.permute.xlu1 %v7139_v21  ;;  %v2158_v45 = vpop.permute.xlu0 %2157 }
 0x41f   : > { %1997 = vperm.xlu1 %4879, %v6044_v25   ;;  %v2033_v46 = vmul.f32 %v6100_v38, %v1928_v10  ;;  %v2464_v47 = vadd.f32 %v2432_v56, %v2267_v30  ;;  %v2237_v35 = vmul.f32 %v6115_v26, %v2158_v45 }
 0x421   : > { %v2069_v9 = vadd.f32 %v6109_v0, %v2033_v46  ;;  %v2496_v53 = vmax.f32 %v2464_v47, 0.0 }
 0x422   : > { %v1938_v29 = vpop.permute.xlu0 %1937 }
 0x423   : > { %v2146_v48 = vpop.permute.xlu1 %2145  ;;  %4881 = vset.pattern.permute.xlu1 %v7141_v40  ;;  %v2035_v57 = vmul.f32 %v6100_v38, %v1938_v29 }
 0x424   : > { %2398 = vperm.xlu1 %4881, %v6044_v25   ;;  %v2234_v49 = vmul.f32 %v6115_v26, %v2146_v48 }
 0x426   : > { %v2266_v6 = vadd.f32 %v2234_v49, %v2069_v9  ;;  %v2351_v41 = vpop.permute.xlu0 %2350 }
 0x427   : > { %v2433_v15 = vmul.f32 %v6123_v32, %v2351_v41 }
 0x428   : > { %v2343_v60 = vpop.permute.xlu1 %2342  ;;  %4882 = vset.pattern.permute.xlu1 %v7139_v21 }
 0x429   : > { %v2431_v22 = vmul.f32 %v6123_v32, %v2343_v60  ;;  %2012 = vperm.xlu1 %4882, %v6050_v39  }
 0x42a   : > { %v1953_v30 = vpop.permute.xlu0 %1952 }
 0x42b   : > { %v2463_v42 = vadd.f32 %v2431_v22, %v2266_v6 }
 0x42d   : > { %v2495_v25 = vmax.f32 %v2463_v42, 0.0  ;;  %v1943_v28 = vpop.permute.xlu1 %1942  ;;  %2007 = vperm.xlu1 %4882, %v6054_v2  }
 0x42e   : > { %v2036_v33 = vmul.f32 %v6100_v38, %v1943_v28  ;;  %v2363_v47 = vpop.permute.xlu0 %2362 }
 0x42f   : > { %v2521_v13 = vpack.c.bf16 %v2496_v53, %v2495_v25 }
 0x430   : > { %v2072_v21 = vadd.f32 %v6109_v0, %v2036_v33 }
 0x431   : > { %4649 = vmatmul.mubr.msk.bf16.gmra.mrb[80].mxu1 %vm7149_vm8, %v2521_v13  ;;  %4884 = vset.pattern.permute.xlu1 %v7140_v37  ;;  %v2071_v37 = vadd.f32 %v6109_v0, %v2035_v57  ;;  %vm7202_vm8 = vmmov %vm7144_vm0 }
 0x432   : > { %v2355_v62 = vpop.permute.xlu1 %2354  ;;  %2209 = vperm.xlu1 %4884, %v6054_v2   ;;  %v2269_v58 = vadd.f32 %v2237_v35, %v2072_v21  ;;  %v1963_v25 = vpop.permute.xlu0 %1962 }
 0x433   : > { %v2434_v27 = vmul.f32 %v6123_v32, %v2355_v62 }
 0x435   : > { %v2466_v18 = vadd.f32 %v2434_v27, %v2269_v58  ;;  %v2040_v27 = vmul.f32 %v6100_v38, %v1963_v25 }
 0x436   : > { %4885 = vset.pattern.permute.xlu1 %v7141_v40  ;;  %v2371_v35 = vpop.permute.xlu0 %2370 }
 0x437   : > { %v2154_v10 = vpop.permute.xlu1 %2153  ;;  %2406 = vperm.xlu1 %4885, %v6054_v2   ;;  %v2498_v49 = vmax.f32 %v2466_v18, 0.0  ;;  %v2038_v2 = vmul.f32 %v6100_v38, %v1953_v30 }
 0x438   : > { %v2236_v44 = vmul.f32 %v6115_v26, %v2154_v10 }
 0x439   : > { %v2074_v22 = vadd.f32 %v6109_v0, %v2038_v2 }
 0x43a   : > { %v2268_v46 = vadd.f32 %v2236_v44, %v2071_v37  ;;  %v2076_v44 = vadd.f32 %v6109_v0, %v2040_v27 }
 0x43b   : > { %v2166_v48 = vpop.permute.xlu1 %2165  ;;  %2410 = vperm.xlu1 %4885, %v6050_v39  }
 0x43c   : > { %v2465_v56 = vadd.f32 %v2433_v15, %v2268_v46  ;;  %v2239_v6 = vmul.f32 %v6115_v26, %v2166_v48  ;;  %v2170_v15 = vpop.permute.xlu0 %2169 }
 0x43d   : > { %v2240_v30 = vmul.f32 %v6115_v26, %v2170_v15 }
 0x43e   : > { %v2497_v9 = vmax.f32 %v2465_v56, 0.0  ;;  %v2271_v42 = vadd.f32 %v2239_v6, %v2074_v22 }
 0x43f   : > { %3114 = vrot.lane.b32.xlu1 %v4897_v43, %s4996_s24  ;;  %v2436_v43 = vmul.f32 %v6123_v32, %v2363_v47 }
 0x440   : > { %v2522_v40 = vpack.c.bf16 %v2498_v49, %v2497_v9  ;;  %v1948_v60 = vpop.permute.xlu1 %1947  ;;  %v2438_v49 = vmul.f32 %v6123_v32, %v2371_v35  ;;  %v2182_v25 = vpop.permute.xlu0 %2181 }
 0x441   : > { %v2037_v45 = vmul.f32 %v6100_v38, %v1948_v60  ;;  %v2468_v13 = vadd.f32 %v2436_v43, %v2271_v42 }
 0x442   : > { %4652 = vmatprep.mubr.msk.bf16.mxu1 %vm7150_vm1, %v2522_v40  ;;  %vm7215_vm1 = vmmov %vm7144_vm0 }
 0x443   : > { %v2073_v28 = vadd.f32 %v6109_v0, %v2037_v45  ;;  %v2500_v57 = vmax.f32 %v2468_v13, 0.0 }
 0x445   : > { %v2162_v39 = vpop.permute.xlu1 %2161 }
 0x446   : > { %v2238_v53 = vmul.f32 %v6115_v26, %v2162_v39 }
 0x448   : > { %v2270_v29 = vadd.f32 %v2238_v53, %v2073_v28 }
 0x44a   : > { %v2359_v33 = vpop.permute.xlu1 %2358 }
 0x44b   : > { %v2435_v21 = vmul.f32 %v6123_v32, %v2359_v33  ;;  %v2243_v33 = vmul.f32 %v6115_v26, %v2182_v25 }
 0x44d   : > { %v2467_v62 = vadd.f32 %v2435_v21, %v2270_v29  ;;  %v2190_v21 = vpop.permute.xlu0 %2189 }
 0x44f   : > { %v2499_v41 = vmax.f32 %v2467_v62, 0.0  ;;  %v2174_v58 = vpop.permute.xlu1 %2173 }
 0x450   : > { %v2241_v37 = vmul.f32 %v6115_v26, %v2174_v58 }
 0x451   : > { %v2523_v10 = vpack.c.bf16 %v2500_v57, %v2499_v41 }
 0x452   : > { %v2273_v48 = vadd.f32 %v2241_v37, %v2076_v44  ;;  %v1978_v44 = vpop.permute.xlu0 %1977 }
 0x453   : > { %4653 = vmatmul.mubr.msk.bf16.gmra.mrb[84].mxu1 %vm7151_vm2, %v2523_v10  ;;  %vm7216_vm2 = vmmov %vm7144_vm0 }
 0x454   : > { %v1958_v18 = vpop.permute.xlu1 %1957  ;;  %v2470_v60 = vadd.f32 %v2438_v49, %v2273_v48 }
 0x455   : > { %v2039_v46 = vmul.f32 %v6100_v38, %v1958_v18 }
 0x456   : > { %v2502_v6 = vmax.f32 %v2470_v60, 0.0  ;;  %v2383_v49 = vpop.permute.xlu0 %2382  ;;  %v2245_v60 = vmul.f32 %v6115_v26, %v2190_v21 }
 0x457   : > { %v2075_v56 = vadd.f32 %v6109_v0, %v2039_v46 }
 0x459   : > { %v2272_v9 = vadd.f32 %v2240_v30, %v2075_v56  ;;  %v2367_v40 = vpop.permute.xlu1 %2366 }
 0x45a   : > { %v2437_v2 = vmul.f32 %v6123_v32, %v2367_v40 }
 0x45c   : > { %v2469_v47 = vadd.f32 %v2437_v2, %v2272_v9  ;;  %v2043_v2 = vmul.f32 %v6100_v38, %v1978_v44 }
 0x45e   : > { %v2501_v22 = vmax.f32 %v2469_v47, 0.0  ;;  %v1973_v45 = vpop.permute.xlu1 %1972  ;;  %v1993_v47 = vpop.permute.xlu0 %1992 }
 0x45f   : > { %v2042_v53 = vmul.f32 %v6100_v38, %v1973_v45 }
 0x460   : > { %v2524_v39 = vpack.c.bf16 %v2502_v6, %v2501_v22 }
 0x461   : > { %v2078_v28 = vadd.f32 %v6109_v0, %v2042_v53  ;;  %v2441_v53 = vmul.f32 %v6123_v32, %v2383_v49 }
 0x462   : > { %4656 = vmatprep.mubr.msk.bf16.mxu1 %vm7152_vm4, %v2524_v39  ;;  %v2079_v39 = vadd.f32 %v6109_v0, %v2043_v2  ;;  %vm7233_vm4 = vmmov %vm7144_vm0 }
 0x463   : > { %v2379_v42 = vpop.permute.xlu1 %2378  ;;  %v2275_v62 = vadd.f32 %v2243_v33, %v2078_v28  ;;  %v2395_v33 = vpop.permute.xlu0 %2394 }
 0x464   : > { %v2440_v35 = vmul.f32 %v6123_v32, %v2379_v42 }
 0x466   : > { %v2472_v27 = vadd.f32 %v2440_v35, %v2275_v62 }
 0x468   : > { %v1968_v43 = vpop.permute.xlu1 %1967  ;;  %v2504_v18 = vmax.f32 %v2472_v27, 0.0 }
 0x469   : > { %v2041_v13 = vmul.f32 %v6100_v38, %v1968_v43 }
 0x46b   : > { %v2077_v41 = vadd.f32 %v6109_v0, %v2041_v13 }
 0x46d   : > { %v2178_v29 = vpop.permute.xlu1 %2177 }
 0x46e   : > { %v2242_v57 = vmul.f32 %v6115_v26, %v2178_v29 }
 0x470   : > { %v2274_v10 = vadd.f32 %v2242_v57, %v2077_v41  ;;  %v2046_v57 = vmul.f32 %v6100_v38, %v1993_v47  ;;  %v2003_v41 = vpop.permute.xlu0 %2002 }
 0x472   : > { %v2375_v58 = vpop.permute.xlu1 %2374  ;;  %v2082_v27 = vadd.f32 %v6109_v0, %v2046_v57  ;;  %v7156_v57 = vsub.f32 %v5316_v50, %v5736_v61  ;;  %v7159_v61 = vsub.f32 %v5320_v52, %v5744_v16 }
 0x473   : > { %v2439_v37 = vmul.f32 %v6123_v32, %v2375_v58 }
 0x475   : > { %v2471_v15 = vadd.f32 %v2439_v37, %v2274_v10 }
 0x477   : > { %v2503_v46 = vmax.f32 %v2471_v15, 0.0  ;;  %v1983_v48 = vpop.permute.xlu1 %1982 }
 0x478   : > { %v2044_v30 = vmul.f32 %v6100_v38, %v1983_v48 }
 0x479   : > { %v2525_v56 = vpack.c.bf16 %v2504_v18, %v2503_v46  ;;  %v2202_v18 = vpop.permute.xlu0 %2201  ;;  %v2444_v46 = vmul.f32 %v6123_v32, %v2395_v33  ;;  %v7155_v33 = vsub.f32 %v5314_v3, %v5732_v59 }
 0x47a   : > { %v2080_v9 = vadd.f32 %v6109_v0, %v2044_v30 }
 0x47b   : > { %4657 = vmatmul.mubr.msk.bf16.gmra.mrb[88].mxu1 %vm7153_vm5, %v2525_v56  ;;  %vm7234_vm5 = vmmov %vm7144_vm0 }
 0x47c   : > { %v2387_v40 = vpop.permute.xlu1 %2386  ;;  %v2277_v6 = vadd.f32 %v2245_v60, %v2080_v9  ;;  %v6333_v60 = vld [vmem:[%s6994_s8 + $0x2] ss:$0 sm:$0xff] }
 0x47d   : > { %v2442_v22 = vmul.f32 %v6123_v32, %v2387_v40  ;;  %v2214_v2 = vpop.permute.xlu0 %2213 }
 0x47f   : > { %v2474_v25 = vadd.f32 %v2442_v22, %v2277_v6 }
 0x481   : > { %v2186_v45 = vpop.permute.xlu1 %2185  ;;  %v2506_v29 = vmax.f32 %v2474_v25, 0.0 }
 0x482   : > { %v2244_v42 = vmul.f32 %v6115_v26, %v2186_v45 }
 0x484   : > { %v2276_v43 = vadd.f32 %v2244_v42, %v2079_v39  ;;  %v2048_v39 = vmul.f32 %v6100_v38, %v2003_v41 }
 0x485   : > { %v2198_v28 = vpop.permute.xlu1 %2197 }
 0x486   : > { %v2473_v13 = vadd.f32 %v2441_v53, %v2276_v43  ;;  %v2247_v58 = vmul.f32 %v6115_v26, %v2198_v28  ;;  %v2084_v59 = vadd.f32 %v6109_v0, %v2048_v39 }
 0x488   : > { %v2505_v21 = vmax.f32 %v2473_v13, 0.0  ;;  %v2279_v44 = vadd.f32 %v2247_v58, %v2082_v27 }
 0x48a   : > { %v2526_v62 = vpack.c.bf16 %v2506_v29, %v2505_v21  ;;  %v1988_v35 = vpop.permute.xlu1 %1987  ;;  %v2476_v56 = vadd.f32 %v2444_v46, %v2279_v44 }
 0x48b   : > { %v2045_v10 = vmul.f32 %v6100_v38, %v1988_v35 }
 0x48c   : > { %4660 = vmatprep.mubr.msk.bf16.mxu1 %vm7154_vm6, %v2526_v62  ;;  %v2508_v47 = vmax.f32 %v2476_v56, 0.0  ;;  %vm7247_vm6 = vmmov %vm7144_vm0 }
 0x48d   : > { %v2081_v48 = vadd.f32 %v6109_v0, %v2045_v10 }
 0x48f   : > { %v2194_v37 = vpop.permute.xlu1 %2193 }
 0x490   : > { %v2246_v15 = vmul.f32 %v6115_v26, %v2194_v37 }
 0x492   : > { %v2278_v49 = vadd.f32 %v2246_v15, %v2081_v48  ;;  %v2403_v15 = vpop.permute.xlu0 %2402 }
 0x494   : > { %v2391_v30 = vpop.permute.xlu1 %2390 }
 0x495   : > { %v2443_v9 = vmul.f32 %v6123_v32, %v2391_v30 }
 0x497   : > { %v2475_v40 = vadd.f32 %v2443_v9, %v2278_v49  ;;  %v2248_v49 = vmul.f32 %v6115_v26, %v2202_v18 }
 0x499   : > { %v2507_v6 = vmax.f32 %v2475_v40, 0.0  ;;  %v4638_v22 = vpop.f32.mrb[68].mxu1  ;;  %v2206_v45 = vpop.permute.xlu1 %2205 }
 0x49a   : > { %v2631_v42 = vadd.f32 %v4638_v22, %v6333_v60  ;;  %v2622_v53 = vpop.f32.mrb[69].mxu1  ;;  %v2249_v21 = vmul.f32 %v6115_v26, %v2206_v45 }
 0x49b   : > { %v2527_v25 = vpack.c.bf16 %v2508_v47, %v2507_v6  ;;  %v2623_v43 = vadd.f32 %v6333_v60, %v2622_v53  ;;  %v4639_v28 = vpop.f32.mrb[70].mxu1 }
 0x49c   : > { %v2783_v13 = vadd.f32 %v7155_v33, %v2631_v42  ;;  %v6342_v29 = vadd.f32 %v5750_v5, %v2631_v42  ;;  %v2634_v62 = vadd.f32 %v4639_v28, %v6333_v60  ;;  %v2625_v35 = vpop.f32.mrb[71].mxu1  ;;  %v7158_v5 = vsub.f32 %v5318_v51, %v5740_v63 }
 0x49d   : > { %v2781_v41 = vadd.f32 %v7156_v57, %v2623_v43  ;;  %v6350_v58 = vadd.f32 %v2623_v43, %v5756_v8  ;;  %v2626_v27 = vadd.f32 %v6333_v60, %v2625_v35  ;;  %4661 = vmatmul.mubr.msk.bf16.gmra.mrb[92].mxu1 %vm7157_vm7, %v2527_v25  ;;  %v2281_v30 = vadd.f32 %v2249_v21, %v2084_v59  ;;  %vm7248_vm7 = vmmov %vm7144_vm0 }
 0x49e   : > { %v2784_v10 = vadd.f32 %v7158_v5, %v2634_v62  ;;  %v6359_v37 = vadd.f32 %v5762_v12, %v2634_v62  ;;  %v1998_v44 = vpop.permute.xlu1 %1997  ;;  %v2446_v12 = vmul.f32 %v6123_v32, %v2403_v15  ;;  %v2251_v57 = vmul.f32 %v6115_v26, %v2214_v2 }
 0x49f   : > { %v2782_v8 = vadd.f32 %v7159_v61, %v2626_v27  ;;  %v6365_v46 = vadd.f32 %v2626_v27, %v5768_v17  ;;  %v2047_v48 = vmul.f32 %v6100_v38, %v1998_v44 }
 0x4a0   : > { %v2820_v56 = vpack.c.bf16 %v2784_v10, %v2783_v13  ;;  %v2478_v16 = vadd.f32 %v2446_v12, %v2281_v30 }
 0x4a1   : > { %v2819_v63 = vpack.c.bf16 %v2782_v8, %v2781_v41  ;;  %v2083_v9 = vadd.f32 %v6109_v0, %v2047_v48 }
 0x4a2   : > { %v2510_v22 = vmax.f32 %v2478_v16, 0.0  ;;  %v7169_v16 = vsub.f32 %v5328_v55, %v5766_v14  ;;  %v7173_v14 = vsub.f32 %v5314_v3, %v5772_v19 }
 0x4a3   : > { %4672 = vmatprep.mubr.msk.bf16.mxu0 %vm7160_vm11, %v2819_v63  ;;  %v2280_v40 = vadd.f32 %v2248_v49, %v2083_v9  ;;  %v2399_v47 = vpop.permute.xlu1 %2398  ;;  %v7165_v49 = vsub.f32 %v5324_v1, %v5754_v7  ;;  %vm7249_vm11 = vmmov %vm7144_vm0 }
 0x4a4   : > { %v2445_v6 = vmul.f32 %v6123_v32, %v2399_v47  ;;  %4673 = vmatmul.mubr.msk.bf16.vlgmr.msra.gmra.mrb[92].mxu0 %vm7161_vm12, %v2820_v56  ;;  %vm7250_vm12 = vmmov %vm7144_vm0 }
 0x4a6   : > { %v2477_v17 = vadd.f32 %v2445_v6, %v2280_v40 }
 0x4a8   : > { %v2509_v45 = vmax.f32 %v2477_v17, 0.0  ;;  %v2013_v39 = vpop.permute.xlu1 %2012 }
 0x4a9   : > { %v2050_v43 = vmul.f32 %v6100_v38, %v2013_v39 }
 0x4aa   : > { %v2528_v42 = vpack.c.bf16 %v2510_v22, %v2509_v45 }
 0x4ab   : > { %v2086_v21 = vadd.f32 %v6109_v0, %v2050_v43 }
 0x4ac   : > { %4664 = vmatprep.mubr.msk.bf16.mxu1 %vm7162_vm9, %v2528_v42  ;;  %v2008_v18 = vpop.permute.xlu1 %2007  ;;  %vm7267_vm9 = vmmov %vm7144_vm0 }
 0x4ad   : > { %v2049_v25 = vmul.f32 %v6100_v38, %v2008_v18  ;;  %v2283_v59 = vadd.f32 %v2251_v57, %v2086_v21  ;;  %v7179_v57 = vld [vmem:[#allocation9_spill] sm:$0xff] }
 0x4af   : > { %v2085_v33 = vadd.f32 %v6109_v0, %v2049_v25  ;;  %v7163_v0 = vsub.f32 %v5322_v54, %v5748_v4  ;;  %v7167_v4 = vsub.f32 %v5326_v24, %v5760_v11  ;;  %v7174_v25 = vld [vmem:[#allocation2_spill] sm:$0xff] }
 0x4b0   : > { %v7175_v43 = vsub.f32 %v5316_v50, %v7174_v25  ;;  %v7199_v25 = vld [vmem:[#allocation19_spill] sm:$0xff] }
 0x4b1   : > { %v2210_v53 = vpop.permute.xlu1 %2209 }
 0x4b2   : > { %v2250_v28 = vmul.f32 %v6115_v26, %v2210_v53 }
 0x4b4   : > { %v2282_v35 = vadd.f32 %v2250_v28, %v2085_v33  ;;  %v7176_v33 = vld [vmem:[#allocation7_spill] sm:$0xff] }
 0x4b6   : > { %v2407_v13 = vpop.permute.xlu1 %2406 }
 0x4b7   : > { %v2447_v62 = vmul.f32 %v6123_v32, %v2407_v13 }
 0x4b9   : > { %v2479_v41 = vadd.f32 %v2447_v62, %v2282_v35  ;;  %v7177_v62 = vld [vmem:[#allocation3_spill] sm:$0xff] }
 0x4ba   : > { %v2411_v27 = vpop.permute.xlu1 %2410  ;;  %v7178_v35 = vsub.f32 %v5318_v51, %v7177_v62 }
 0x4bb   : > { %v2448_v5 = vmul.f32 %v6123_v32, %v2411_v27  ;;  %v4642_v10 = vpop.f32.mrb[72].mxu1  ;;  %v2511_v48 = vmax.f32 %v2479_v41, 0.0 }
 0x4bc   : > { %v2647_v38 = vadd.f32 %v4642_v10, %v6333_v60  ;;  %v2638_v44 = vpop.f32.mrb[73].mxu1 }
 0x4bd   : > { %v2480_v15 = vadd.f32 %v2448_v5, %v2283_v59  ;;  %v2639_v61 = vadd.f32 %v6333_v60, %v2638_v44  ;;  %v4643_v8 = vpop.f32.mrb[74].mxu1  ;;  %v7182_v5 = vld [vmem:[#allocation11_spill] sm:$0xff] }
 0x4be   : > { %v2787_v30 = vadd.f32 %v7163_v0, %v2647_v38  ;;  %v6389_v26 = vadd.f32 %v5774_v20, %v2647_v38  ;;  %v2650_v2 = vadd.f32 %v4643_v8, %v6333_v60  ;;  %v2641_v56 = vpop.f32.mrb[75].mxu1 }
 0x4bf   : > { %v2512_v32 = vmax.f32 %v2480_v15, 0.0  ;;  %v2785_v63 = vadd.f32 %v7165_v49, %v2639_v61  ;;  %v6396_v9 = vadd.f32 %v2639_v61, %v5780_v23  ;;  %v2642_v12 = vadd.f32 %v6333_v60, %v2641_v56  ;;  %v3113_v15 = vpop.permute.xlu0 %3112  ;;  %v3115_v61 = vpop.permute.xlu1 %3114  ;;  %v7185_v56 = vld [vmem:[#allocation5_spill] sm:$0xff] }
 0x4c0   : > { %7164 = vst [vmem:[#allocation48_spill] sm:$0xff] %v6389_v26  ;;  %v2788_v40 = vadd.f32 %v7167_v4, %v2650_v2  ;;  %v6403_v20 = vadd.f32 %v5786_v31, %v2650_v2  ;;  %4704 = vmatprep.subr.bf16.mxu1 %v3113_v15 }
 0x4c1   : > { %7166 = vst [vmem:[#allocation49_spill] sm:$0xff] %v6396_v9  ;;  %v2529_v47 = vpack.c.bf16 %v2512_v32, %v2511_v48  ;;  %v2786_v6 = vadd.f32 %v7169_v16, %v2642_v12  ;;  %v6409_v7 = vadd.f32 %v2642_v12, %v5792_v34  ;;  %4705 = vmatpush3.bf16.msra.mxu1 %v3113_v15 }
 0x4c2   : > { %7168 = vst [vmem:[#allocation50_spill] sm:$0xff] %v6403_v20  ;;  %v2822_v17 = vpack.c.bf16 %v2788_v40, %v2787_v30  ;;  %4706 = vmatprep.subr.bf16.mxu1 %v3115_v61  ;;  %v7186_v32 = vsub.f32 %v5322_v54, %v7185_v56  ;;  %v7209_v56 = vld [vmem:[#allocation16_spill] sm:$0xff] }
 0x4c3   : > { %7170 = vst [vmem:[#allocation51_spill] sm:$0xff] %v6409_v7  ;;  %v2821_v23 = vpack.c.bf16 %v2786_v6, %v2785_v63  ;;  %4665 = vmatmul.mubr.msk.bf16.gmra.mrb[96].mxu1 %vm7171_vm15, %v2529_v47  ;;  %v7187_v63 = vld [vmem:[#allocation13_spill] sm:$0xff]  ;;  %v7189_v47 = vld [vmem:[#allocation6_spill] sm:$0xff]  ;;  %vm7268_vm15 = vmmov %vm7144_vm0 }
 0x4c4   : > { %v7190_v16 = vsub.f32 %v5324_v1, %v7189_v47 }
 0x4c5   : > { %4676 = vmatprep.mubr.msk.bf16.mxu0 %vm7144_vm0, %v2821_v23  ;;  %4707 = vmatpush3.bf16.msra.mxu1 %v3115_v61  ;;  %v7206_v61 = vld [vmem:[#allocation14_spill] sm:$0xff] }
 0x4c6   : > { %4677 = vmatmul.mubr.msk.bf16.gmra.mrb[96].mxu0 %vm7172_vm13, %v2822_v17  ;;  %v7191_v17 = vld [vmem:[#allocation15_spill] sm:$0xff]  ;;  %vm7269_vm13 = vmmov %vm7144_vm0 }
 0x4dc   : > { %v4646_v11 = vpop.f32.mrb[76].mxu1 }
 0x4dd   : > { %v2663_v31 = vadd.f32 %v4646_v11, %v6333_v60  ;;  %v2654_v22 = vpop.f32.mrb[77].mxu1 }
 0x4de   : > { %v2655_v45 = vadd.f32 %v6333_v60, %v2654_v22  ;;  %v4647_v39 = vpop.f32.mrb[78].mxu1 }
 0x4df   : > { %v2791_v34 = vadd.f32 %v7173_v14, %v2663_v31  ;;  %v6420_v42 = vadd.f32 %v5798_v36, %v2663_v31  ;;  %v2666_v18 = vadd.f32 %v4647_v39, %v6333_v60  ;;  %v2657_v53 = vpop.f32.mrb[79].mxu1  ;;  %v7180_v36 = vld [vmem:[#allocation4_spill] sm:$0xff]  ;;  %v7195_v39 = vld [vmem:[#allocation17_spill] sm:$0xff] }
 0x4e0   : > { %v2789_v28 = vadd.f32 %v7175_v43, %v2655_v45  ;;  %v6427_v13 = vadd.f32 %v2655_v45, %v7176_v33  ;;  %v2658_v21 = vadd.f32 %v6333_v60, %v2657_v53  ;;  %v7181_v27 = vsub.f32 %v5320_v52, %v7180_v36  ;;  %v7193_v31 = vld [vmem:[#allocation8_spill] sm:$0xff] }
 0x4e1   : > { %v2792_v19 = vadd.f32 %v7178_v35, %v2666_v18  ;;  %v6434_v41 = vadd.f32 %v7179_v57, %v2666_v18  ;;  %v7194_v22 = vsub.f32 %v5326_v24, %v7193_v31  ;;  %v7203_v36 = vld [vmem:[#allocation12_spill] sm:$0xff] }
 0x4e2   : > { %v2790_v59 = vadd.f32 %v7181_v27, %v2658_v21  ;;  %v6440_v10 = vadd.f32 %v2658_v21, %v7182_v5  ;;  %v7204_v27 = vsub.f32 %v5314_v3, %v7203_v36  ;;  %v7205_v5 = vld [vmem:[#allocation21_spill] sm:$0xff] }
 0x4e3   : > { %v2824_v38 = vpack.c.bf16 %v2792_v19, %v2791_v34  ;;  %v7197_v34 = vld [vmem:[#allocation10_spill] sm:$0xff] }
 0x4e4   : > { %v2823_v44 = vpack.c.bf16 %v2790_v59, %v2789_v28  ;;  %v7198_v18 = vsub.f32 %v5328_v55, %v7197_v34 }
 0x4e6   : > { %4680 = vmatprep.mubr.msk.bf16.mxu0 %vm7183_vm10, %v2823_v44  ;;  %vm7270_vm10 = vmmov %vm7144_vm0 }
 0x4e7   : > { %4681 = vmatmul.mubr.msk.bf16.gmra.mrb[100].mxu0 %vm7184_vm14, %v2824_v38  ;;  %vm7271_vm14 = vmmov %vm7144_vm0 }
 0x504   : > { %v4650_v8 = vpop.f32.mrb[80].mxu1 }
 0x505   : > { %v2679_v48 = vadd.f32 %v4650_v8, %v6333_v60  ;;  %v2670_v0 = vpop.f32.mrb[81].mxu1  ;;  %v7207_v8 = vsub.f32 %v5316_v50, %v7206_v61 }
 0x506   : > { %v2671_v30 = vadd.f32 %v6333_v60, %v2670_v0  ;;  %v4651_v2 = vpop.f32.mrb[82].mxu1  ;;  %v7208_v0 = vld [vmem:[#allocation23_spill] sm:$0xff] }
 0x507   : > { %v2795_v49 = vadd.f32 %v7186_v32, %v2679_v48  ;;  %v6450_v12 = vadd.f32 %v7187_v63, %v2679_v48  ;;  %v2682_v4 = vadd.f32 %v4651_v2, %v6333_v60  ;;  %v2673_v40 = vpop.f32.mrb[83].mxu1  ;;  %v7210_v32 = vsub.f32 %v5318_v51, %v7209_v56  ;;  %v7211_v63 = vld [vmem:[#allocation25_spill] sm:$0xff] }
 0x508   : > { %v2793_v6 = vadd.f32 %v7190_v16, %v2671_v30  ;;  %v6457_v23 = vadd.f32 %v2671_v30, %v7191_v17  ;;  %v2674_v11 = vadd.f32 %v6333_v60, %v2673_v40  ;;  %v7212_v40 = vld [vmem:[#allocation18_spill] sm:$0xff] }
 0x509   : > { %7188 = vst [vmem:[#allocation2_spill] sm:$0xff] %v6450_v12  ;;  %v2796_v45 = vadd.f32 %v7194_v22, %v2682_v4  ;;  %v6464_v14 = vadd.f32 %v7195_v39, %v2682_v4  ;;  %v7213_v47 = vsub.f32 %v5320_v52, %v7212_v40 }
 0x50a   : > { %7192 = vst [vmem:[#allocation7_spill] sm:$0xff] %v6457_v23  ;;  %v2794_v53 = vadd.f32 %v7198_v18, %v2674_v11  ;;  %v6470_v43 = vadd.f32 %v2674_v11, %v7199_v25 }
 0x50b   : > { %7196 = vst [vmem:[#allocation3_spill] sm:$0xff] %v6464_v14  ;;  %v2826_v28 = vpack.c.bf16 %v2796_v45, %v2795_v49 }
 0x50c   : > { %7200 = vst [vmem:[#allocation9_spill] sm:$0xff] %v6470_v43  ;;  %v2825_v33 = vpack.c.bf16 %v2794_v53, %v2793_v6  ;;  %v7214_v6 = vld [vmem:[#allocation27_spill] sm:$0xff]  ;;  %v7217_v53 = vld [vmem:[#allocation20_spill] sm:$0xff] }
 0x50d   : > { %v7218_v25 = vsub.f32 %v5322_v54, %v7217_v53 }
 0x50e   : > { %4684 = vmatprep.mubr.msk.bf16.mxu0 %vm7201_vm3, %v2825_v33  ;;  %v7219_v33 = vld [vmem:[#allocation29_spill] sm:$0xff]  ;;  %vm7272_vm3 = vmmov %vm7144_vm0 }
 0x50f   : > { %4685 = vmatmul.mubr.msk.bf16.gmra.mrb[104].mxu0 %vm7202_vm8, %v2826_v28  ;;  %vm7273_vm8 = vmmov %vm7144_vm0 }
 0x526   : > { %v4654_v21 = vpop.f32.mrb[84].mxu1 }
 0x527   : > { %v2695_v62 = vadd.f32 %v4654_v21, %v6333_v60  ;;  %v2686_v35 = vpop.f32.mrb[85].mxu1 }
 0x528   : > { %v2687_v19 = vadd.f32 %v6333_v60, %v2686_v35  ;;  %v4655_v57 = vpop.f32.mrb[86].mxu1 }
 0x529   : > { %v2799_v59 = vadd.f32 %v7204_v27, %v2695_v62  ;;  %v6480_v38 = vadd.f32 %v7205_v5, %v2695_v62  ;;  %v2698_v44 = vadd.f32 %v4655_v57, %v6333_v60  ;;  %v2689_v15 = vpop.f32.mrb[87].mxu1  ;;  %v7223_v27 = vld [vmem:[#allocation31_spill] sm:$0xff] }
 0x52a   : > { %v2797_v48 = vadd.f32 %v7207_v8, %v2687_v19  ;;  %v6487_v30 = vadd.f32 %v2687_v19, %v7208_v0  ;;  %v2690_v2 = vadd.f32 %v6333_v60, %v2689_v15  ;;  %v7221_v19 = vld [vmem:[#allocation22_spill] sm:$0xff]  ;;  %v7227_v8 = vld [vmem:[#allocation33_spill] sm:$0xff] }
 0x52b   : > { %v2800_v49 = vadd.f32 %v7210_v32, %v2698_v44  ;;  %v6494_v4 = vadd.f32 %v7211_v63, %v2698_v44  ;;  %v7222_v57 = vsub.f32 %v5324_v1, %v7221_v19  ;;  %v7225_v44 = vld [vmem:[#allocation24_spill] sm:$0xff]  ;;  %v7229_v0 = vld [vmem:[#allocation26_spill] sm:$0xff]  ;;  %v7231_v32 = vld [vmem:[#allocation35_spill] sm:$0xff] }
 0x52c   : > { %v2798_v16 = vadd.f32 %v7213_v47, %v2690_v2  ;;  %v6500_v17 = vadd.f32 %v2690_v2, %v7214_v6  ;;  %v7226_v15 = vsub.f32 %v5326_v24, %v7225_v44  ;;  %v7230_v2 = vsub.f32 %v5328_v55, %v7229_v0  ;;  %v7246_v0 = vld [vmem:[#allocation43_spill] sm:$0xff] }
 0x52d   : > { %v2828_v11 = vpack.c.bf16 %v2800_v49, %v2799_v59 }
 0x52e   : > { %v2827_v31 = vpack.c.bf16 %v2798_v16, %v2797_v48 }
 0x530   : > { %4688 = vmatprep.mubr.msk.bf16.mxu0 %vm7215_vm1, %v2827_v31  ;;  %vm7274_vm1 = vmmov %vm7144_vm0 }
 0x531   : > { %4689 = vmatmul.mubr.msk.bf16.gmra.mrb[108].mxu0 %vm7216_vm2, %v2828_v11  ;;  %vm7275_vm2 = vmmov %vm7144_vm0 }
 0x54e   : > { %v4658_v22 = vpop.f32.mrb[88].mxu1 }
 0x54f   : > { %v2711_v45 = vadd.f32 %v4658_v22, %v6333_v60  ;;  %v2702_v39 = vpop.f32.mrb[89].mxu1  ;;  %v7235_v22 = vld [vmem:[#allocation28_spill] sm:$0xff] }
 0x550   : > { %v2703_v34 = vadd.f32 %v6333_v60, %v2702_v39  ;;  %v4659_v18 = vpop.f32.mrb[90].mxu1 }
 0x551   : > { %v2803_v28 = vadd.f32 %v7218_v25, %v2711_v45  ;;  %v6510_v21 = vadd.f32 %v7219_v33, %v2711_v45  ;;  %v2714_v62 = vadd.f32 %v4659_v18, %v6333_v60  ;;  %v2705_v35 = vpop.f32.mrb[91].mxu1  ;;  %v7236_v45 = vsub.f32 %v5314_v3, %v7235_v22 }
 0x552   : > { %v2801_v36 = vadd.f32 %v7222_v57, %v2703_v34  ;;  %v6517_v59 = vadd.f32 %v2703_v34, %v7223_v27  ;;  %v2706_v5 = vadd.f32 %v6333_v60, %v2705_v35  ;;  %v7237_v34 = vld [vmem:[#allocation37_spill] sm:$0xff]  ;;  %v7240_v35 = vld [vmem:[#allocation39_spill] sm:$0xff] }
 0x553   : > { %7220 = vst [vmem:[#allocation4_spill] sm:$0xff] %v6510_v21  ;;  %v2804_v61 = vadd.f32 %v7226_v15, %v2714_v62  ;;  %v6524_v48 = vadd.f32 %v7227_v8, %v2714_v62  ;;  %v6559_v15 = vld [vmem:[%s6994_s8 + $0x3] ss:$0 sm:$0xff] }
 0x554   : > { %7224 = vst [vmem:[#allocation11_spill] sm:$0xff] %v6517_v59  ;;  %v2802_v56 = vadd.f32 %v7230_v2, %v2706_v5  ;;  %v6530_v49 = vadd.f32 %v2706_v5, %v7231_v32  ;;  %v7243_v5 = vld [vmem:[#allocation41_spill] sm:$0xff] }
 0x555   : > { %7228 = vst [vmem:[#allocation5_spill] sm:$0xff] %v6524_v48  ;;  %v2830_v63 = vpack.c.bf16 %v2804_v61, %v2803_v28  ;;  %v7238_v28 = vld [vmem:[#allocation30_spill] sm:$0xff] }
 0x556   : > { %7232 = vst [vmem:[#allocation13_spill] sm:$0xff] %v6530_v49  ;;  %v2829_v40 = vpack.c.bf16 %v2802_v56, %v2801_v36  ;;  %v7239_v33 = vsub.f32 %v5316_v50, %v7238_v28  ;;  %v7241_v36 = vld [vmem:[#allocation32_spill] sm:$0xff]  ;;  %v7244_v50 = vld [vmem:[#allocation34_spill] sm:$0xff] }
 0x557   : > { %v7242_v27 = vsub.f32 %v5318_v51, %v7241_v36  ;;  %v7245_v61 = vsub.f32 %v5320_v52, %v7244_v50 }
 0x558   : > { %4692 = vmatprep.mubr.msk.bf16.mxu0 %vm7233_vm4, %v2829_v40  ;;  %vm7276_vm4 = vmmov %vm7144_vm0 }
 0x559   : > { %4693 = vmatmul.mubr.msk.bf16.gmra.mrb[112].mxu0 %vm7234_vm5, %v2830_v63  ;;  %vm7277_vm5 = vmmov %vm7144_vm0 }
 0x570   : > { %v4662_v47 = vpop.f32.mrb[92].mxu1 }
 0x571   : > { %v2727_v16 = vadd.f32 %v4662_v47, %v6333_v60  ;;  %v2718_v6 = vpop.f32.mrb[93].mxu1 }
 0x572   : > { %v2719_v11 = vadd.f32 %v6333_v60, %v2718_v6  ;;  %v4663_v31 = vpop.f32.mrb[94].mxu1 }
 0x573   : > { %v2807_v39 = vadd.f32 %v7236_v45, %v2727_v16  ;;  %v6540_v18 = vadd.f32 %v7237_v34, %v2727_v16  ;;  %v2730_v53 = vadd.f32 %v4663_v31, %v6333_v60  ;;  %v2721_v25 = vpop.f32.mrb[95].mxu1 }
 0x574   : > { %v2805_v62 = vadd.f32 %v7239_v33, %v2719_v11  ;;  %v6547_v19 = vadd.f32 %v2719_v11, %v7240_v35  ;;  %v2722_v57 = vadd.f32 %v6333_v60, %v2721_v25 }
 0x575   : > { %v2808_v3 = vadd.f32 %v7242_v27, %v2730_v53  ;;  %v6554_v44 = vadd.f32 %v7243_v5, %v2730_v53 }
 0x576   : > { %v2806_v8 = vadd.f32 %v7245_v61, %v2722_v57  ;;  %v6565_v2 = vadd.f32 %v2722_v57, %v7246_v0  ;;  %v7251_v57 = vld [vmem:[#allocation36_spill] sm:$0xff]  ;;  %v7255_v0 = vld [vmem:[#allocation38_spill] sm:$0xff] }
 0x577   : > { %v2832_v56 = vpack.c.bf16 %v2808_v3, %v2807_v39  ;;  %v4674_v32 = vpop.f32.mrb[92].mxu0  ;;  %v7252_v36 = vsub.f32 %v5322_v54, %v7251_v57  ;;  %v7253_v3 = vld [vmem:[#allocation44_spill] sm:$0xff] }
 0x578   : > { %v2831_v63 = vpack.c.bf16 %v2806_v8, %v2805_v62  ;;  %v2942_v51 = vadd.f32 %v4674_v32, %v6559_v15  ;;  %v2933_v40 = vpop.f32.mrb[93].mxu0 }
 0x579   : > { %v2934_v47 = vadd.f32 %v6559_v15, %v2933_v40  ;;  %v4675_v16 = vpop.f32.mrb[94].mxu0 }
 0x57a   : > { %v2945_v6 = vadd.f32 %v4675_v16, %v6559_v15  ;;  %v2936_v11 = vpop.f32.mrb[95].mxu0  ;;  %4696 = vmatprep.mubr.msk.bf16.mxu0 %vm7247_vm6, %v2831_v63  ;;  %v3062_v31 = vmax.f32 %v2942_v51, 0.0  ;;  %v7257_v63 = vld [vmem:[#allocation45_spill] sm:$0xff]  ;;  %v7259_v16 = vld [vmem:[#allocation40_spill] sm:$0xff]  ;;  %vm7278_vm6 = vmmov %vm7144_vm0 }
 0x57b   : > { %v2937_v52 = vadd.f32 %v6559_v15, %v2936_v11  ;;  %4697 = vmatmul.mubr.msk.bf16.gmra.mrb[116].mxu0 %vm7248_vm7, %v2832_v56  ;;  %v3060_v45 = vmax.f32 %v2934_v47, 0.0  ;;  %v7256_v56 = vsub.f32 %v5324_v1, %v7255_v0  ;;  %v7263_v1 = vld [vmem:[#allocation42_spill] sm:$0xff]  ;;  %vm7279_vm7 = vmmov %vm7144_vm0 }
 0x57c   : > { %v3063_v22 = vmax.f32 %v2945_v6, 0.0  ;;  %v7260_v6 = vsub.f32 %v5326_v24, %v7259_v16 }
 0x57d   : > { %v3061_v39 = vmax.f32 %v2937_v52, 0.0  ;;  %v7261_v52 = vld [vmem:[#allocation46_spill] sm:$0xff] }
 0x57e   : > { %v3093_v34 = vpack.c.bf16 %v3063_v22, %v3062_v31 }
 0x57f   : > { %v3092_v53 = vpack.c.bf16 %v3061_v39, %v3060_v45  ;;  %v7264_v39 = vsub.f32 %v5328_v55, %v7263_v1 }
 0x581   : > { %4708 = vmatprep.mubr.msk.bf16.mxu1 %vm7249_vm11, %v3092_v53  ;;  %v7265_v53 = vld [vmem:[#allocation47_spill] sm:$0xff]  ;;  %vm7280_vm11 = vmmov %vm7144_vm0 }
 0x582   : > { %4709 = vmatmul.mubr.msk.bf16.vlgmr.msra.gmra.mrb[100].mxu1 %vm7250_vm12, %v3093_v34  ;;  %vm7281_vm12 = vmmov %vm7144_vm0 }
 0x596   : > { %v4666_v25 = vpop.f32.mrb[96].mxu1 }
 0x597   : > { %v2743_v28 = vadd.f32 %v4666_v25, %v6333_v60  ;;  %v2734_v33 = vpop.f32.mrb[97].mxu1 }
 0x598   : > { %v2735_v62 = vadd.f32 %v6333_v60, %v2734_v33  ;;  %v4667_v35 = vpop.f32.mrb[98].mxu1 }
 0x599   : > { %v2811_v27 = vadd.f32 %v7252_v36, %v2743_v28  ;;  %v6581_v5 = vadd.f32 %v7253_v3, %v2743_v28  ;;  %v2746_v50 = vadd.f32 %v4667_v35, %v6333_v60  ;;  %v2737_v61 = vpop.f32.mrb[99].mxu1  ;;  %v4678_v8 = vpop.f32.mrb[96].mxu0 }
 0x59a   : > { %v2809_v32 = vadd.f32 %v7256_v56, %v2735_v62  ;;  %v6588_v51 = vadd.f32 %v2735_v62, %v7257_v63  ;;  %v2738_v40 = vadd.f32 %v6333_v60, %v2737_v61  ;;  %v2958_v47 = vadd.f32 %v4678_v8, %v6559_v15  ;;  %v2949_v54 = vpop.f32.mrb[97].mxu0 }
 0x59b   : > { %7254 = vst [vmem:[#allocation6_spill] sm:$0xff] %v6581_v5  ;;  %v2812_v11 = vadd.f32 %v7260_v6, %v2746_v50  ;;  %v6596_v31 = vadd.f32 %v7261_v52, %v2746_v50  ;;  %v2950_v22 = vadd.f32 %v6559_v15, %v2949_v54  ;;  %v4679_v45 = vpop.f32.mrb[98].mxu0 }
 0x59c   : > { %7258 = vst [vmem:[#allocation15_spill] sm:$0xff] %v6588_v51  ;;  %v2810_v34 = vadd.f32 %v7264_v39, %v2738_v40  ;;  %v6603_v25 = vadd.f32 %v2738_v40, %v7265_v53  ;;  %v2961_v60 = vadd.f32 %v4679_v45, %v6559_v15  ;;  %v2952_v28 = vpop.f32.mrb[99].mxu0  ;;  %v3066_v35 = vmax.f32 %v2958_v47, 0.0 }
 0x59d   : > { %7262 = vst [vmem:[#allocation8_spill] sm:$0xff] %v6596_v31  ;;  %v2834_v33 = vpack.c.bf16 %v2812_v11, %v2811_v27  ;;  %v2953_v24 = vadd.f32 %v6559_v15, %v2952_v28  ;;  %v3064_v36 = vmax.f32 %v2950_v22, 0.0 }
 0x59e   : > { %7266 = vst [vmem:[#allocation17_spill] sm:$0xff] %v6603_v25  ;;  %v2833_v62 = vpack.c.bf16 %v2810_v34, %v2809_v32  ;;  %v3067_v57 = vmax.f32 %v2961_v60, 0.0 }
 0x59f   : > { %v3065_v3 = vmax.f32 %v2953_v24, 0.0 }
 0x5a0   : > { %v3095_v50 = vpack.c.bf16 %v3067_v57, %v3066_v35  ;;  %4700 = vmatprep.mubr.msk.bf16.mxu0 %vm7267_vm9, %v2833_v62  ;;  %vm7282_vm9 = vmmov %vm7144_vm0 }
 0x5a1   : > { %v3094_v61 = vpack.c.bf16 %v3065_v3, %v3064_v36  ;;  %4701 = vmatmul.mubr.msk.bf16.gmra.mrb[120].mxu0 %vm7268_vm15, %v2834_v33  ;;  %vm7283_vm15 = vmmov %vm7144_vm0 }
 0x5a3   : > { %4712 = vmatprep.mubr.msk.bf16.mxu1 %vm7144_vm0, %v3094_v61 }
 0x5a4   : > { %4713 = vmatmul.mubr.msk.bf16.gmra.mrb[104].mxu1 %vm7269_vm13, %v3095_v50  ;;  %vm7284_vm13 = vmmov %vm7144_vm0 }
 0x5ba   : > { %v4682_v55 = vpop.f32.mrb[100].mxu0 }
 0x5bb   : > { %v2974_v27 = vadd.f32 %v4682_v55, %v6559_v15  ;;  %v2965_v8 = vpop.f32.mrb[101].mxu0 }
 0x5bc   : > { %v2966_v0 = vadd.f32 %v6559_v15, %v2965_v8  ;;  %v4683_v56 = vpop.f32.mrb[102].mxu0 }
 0x5bd   : > { %v2977_v32 = vadd.f32 %v4683_v56, %v6559_v15  ;;  %v2968_v63 = vpop.f32.mrb[103].mxu0  ;;  %v3070_v47 = vmax.f32 %v2974_v27, 0.0 }
 0x5be   : > { %v2969_v40 = vadd.f32 %v6559_v15, %v2968_v63  ;;  %v3068_v16 = vmax.f32 %v2966_v0, 0.0 }
 0x5bf   : > { %v3071_v54 = vmax.f32 %v2977_v32, 0.0 }
 0x5c0   : > { %v3069_v6 = vmax.f32 %v2969_v40, 0.0 }
 0x5c1   : > { %v3097_v11 = vpack.c.bf16 %v3071_v54, %v3070_v47 }
 0x5c2   : > { %v3096_v52 = vpack.c.bf16 %v3069_v6, %v3068_v16 }
 0x5c4   : > { %4716 = vmatprep.mubr.msk.bf16.mxu1 %vm7270_vm10, %v3096_v52  ;;  %vm7285_vm10 = vmmov %vm7144_vm0 }
 0x5c5   : > { %4717 = vmatmul.mubr.msk.bf16.gmra.mrb[108].mxu1 %vm7271_vm14, %v3097_v11  ;;  %vm7286_vm14 = vmmov %vm7144_vm0 }
 0x5e2   : > { %v4686_v22 = vpop.f32.mrb[104].mxu0 }
 0x5e3   : > { %v2990_v45 = vadd.f32 %v4686_v22, %v6559_v15  ;;  %v2981_v1 = vpop.f32.mrb[105].mxu0 }
 0x5e4   : > { %v2982_v39 = vadd.f32 %v6559_v15, %v2981_v1  ;;  %v4687_v34 = vpop.f32.mrb[106].mxu0 }
 0x5e5   : > { %v2993_v53 = vadd.f32 %v4687_v34, %v6559_v15  ;;  %v2984_v60 = vpop.f32.mrb[107].mxu0  ;;  %v3074_v33 = vmax.f32 %v2990_v45, 0.0 }
 0x5e6   : > { %v2985_v28 = vadd.f32 %v6559_v15, %v2984_v60  ;;  %v3072_v62 = vmax.f32 %v2982_v39, 0.0 }
 0x5e7   : > { %v3075_v24 = vmax.f32 %v2993_v53, 0.0 }
 0x5e8   : > { %v3073_v35 = vmax.f32 %v2985_v28, 0.0 }
 0x5e9   : > { %v3099_v57 = vpack.c.bf16 %v3075_v24, %v3074_v33 }
 0x5ea   : > { %v3098_v36 = vpack.c.bf16 %v3073_v35, %v3072_v62 }
 0x5ec   : > { %4720 = vmatprep.mubr.msk.bf16.mxu1 %vm7272_vm3, %v3098_v36  ;;  %vm7287_vm3 = vmmov %vm7144_vm0 }
 0x5ed   : > { %4721 = vmatmul.mubr.msk.bf16.gmra.mrb[112].mxu1 %vm7273_vm8, %v3099_v57  ;;  %vm7288_vm8 = vmmov %vm7144_vm0 }
 0x604   : > { %v4690_v3 = vpop.f32.mrb[108].mxu0 }
 0x605   : > { %v3006_v50 = vadd.f32 %v4690_v3, %v6559_v15  ;;  %v2997_v61 = vpop.f32.mrb[109].mxu0 }
 0x606   : > { %v2998_v55 = vadd.f32 %v6559_v15, %v2997_v61  ;;  %v4691_v27 = vpop.f32.mrb[110].mxu0 }
 0x607   : > { %v3009_v8 = vadd.f32 %v4691_v27, %v6559_v15  ;;  %v3000_v0 = vpop.f32.mrb[111].mxu0  ;;  %v3078_v32 = vmax.f32 %v3006_v50, 0.0 }
 0x608   : > { %v3001_v56 = vadd.f32 %v6559_v15, %v3000_v0  ;;  %v3076_v40 = vmax.f32 %v2998_v55, 0.0 }
 0x609   : > { %v3079_v63 = vmax.f32 %v3009_v8, 0.0 }
 0x60a   : > { %v3077_v47 = vmax.f32 %v3001_v56, 0.0 }
 0x60b   : > { %v3101_v54 = vpack.c.bf16 %v3079_v63, %v3078_v32 }
 0x60c   : > { %v3100_v16 = vpack.c.bf16 %v3077_v47, %v3076_v40 }
 0x60e   : > { %4724 = vmatprep.mubr.msk.bf16.mxu1 %vm7274_vm1, %v3100_v16  ;;  %vm7290_vm1 = vmmov %vm7144_vm0 }
 0x60f   : > { %4725 = vmatmul.mubr.msk.bf16.gmra.mrb[116].mxu1 %vm7275_vm2, %v3101_v54  ;;  %vm7291_vm2 = vmmov %vm7144_vm0 }
 0x62c   : > { %v4694_v6 = vpop.f32.mrb[112].mxu0 }
 0x62d   : > { %v3022_v11 = vadd.f32 %v4694_v6, %v6559_v15  ;;  %v3013_v52 = vpop.f32.mrb[113].mxu0 }
 0x62e   : > { %v3014_v22 = vadd.f32 %v6559_v15, %v3013_v52  ;;  %v4695_v45 = vpop.f32.mrb[114].mxu0 }
 0x62f   : > { %v3025_v1 = vadd.f32 %v4695_v45, %v6559_v15  ;;  %v3016_v39 = vpop.f32.mrb[115].mxu0  ;;  %v3082_v53 = vmax.f32 %v3022_v11, 0.0 }
 0x630   : > { %v3017_v34 = vadd.f32 %v6559_v15, %v3016_v39  ;;  %v3080_v28 = vmax.f32 %v3014_v22, 0.0 }
 0x631   : > { %v3083_v60 = vmax.f32 %v3025_v1, 0.0 }
 0x632   : > { %v3081_v33 = vmax.f32 %v3017_v34, 0.0 }
 0x633   : > { %v3103_v24 = vpack.c.bf16 %v3083_v60, %v3082_v53 }
 0x634   : > { %v3102_v62 = vpack.c.bf16 %v3081_v33, %v3080_v28 }
 0x636   : > { %4728 = vmatprep.mubr.msk.bf16.mxu1 %vm7276_vm4, %v3102_v62  ;;  %vm7292_vm4 = vmmov %vm7144_vm0 }
 0x637   : > { %4729 = vmatmul.mubr.msk.bf16.gmra.mrb[120].mxu1 %vm7277_vm5, %v3103_v24  ;;  %vm7293_vm5 = vmmov %vm7144_vm0 }
 0x64e   : > { %v4698_v35 = vpop.f32.mrb[116].mxu0 }
 0x64f   : > { %v3038_v57 = vadd.f32 %v4698_v35, %v6559_v15  ;;  %v3029_v36 = vpop.f32.mrb[117].mxu0 }
 0x650   : > { %v3030_v3 = vadd.f32 %v6559_v15, %v3029_v36  ;;  %v4699_v50 = vpop.f32.mrb[118].mxu0 }
 0x651   : > { %v3041_v61 = vadd.f32 %v4699_v50, %v6559_v15  ;;  %v3032_v55 = vpop.f32.mrb[119].mxu0  ;;  %v3086_v8 = vmax.f32 %v3038_v57, 0.0 }
 0x652   : > { %v3033_v27 = vadd.f32 %v6559_v15, %v3032_v55  ;;  %v3084_v56 = vmax.f32 %v3030_v3, 0.0 }
 0x653   : > { %v3087_v0 = vmax.f32 %v3041_v61, 0.0  ;;  %v6650_v61 = vld [vmem:[%s6994_s8 + $0x4] ss:$0 sm:$0xff] }
 0x654   : > { %v3085_v32 = vmax.f32 %v3033_v27, 0.0 }
 0x655   : > { %v3105_v63 = vpack.c.bf16 %v3087_v0, %v3086_v8  ;;  %v4710_v40 = vpop.f32.mrb[100].mxu1 }
 0x656   : > { %v3104_v47 = vpack.c.bf16 %v3085_v32, %v3084_v56  ;;  %v3200_v54 = vpop.f32.mrb[101].mxu1 }
 0x657   : > { %v4711_v16 = vpop.f32.mrb[102].mxu1  ;;  %v3201_v55 = vadd.f32 %v6650_v61, %v3200_v54 }
 0x658   : > { %v3203_v6 = vpop.f32.mrb[103].mxu1  ;;  %4732 = vmatprep.mubr.msk.bf16.mxu1 %vm7278_vm6, %v3104_v47  ;;  %v3212_v27 = vadd.f32 %v4711_v16, %v6650_v61  ;;  %vm7295_vm6 = vmmov %vm7144_vm0 }
 0x659   : > { %4733 = vmatmul.mubr.msk.bf16.gmra.mrb[124].mxu1 %vm7279_vm7, %v3105_v63  ;;  %v3204_v8 = vadd.f32 %v6650_v61, %v3203_v6  ;;  %v6659_v47 = vmul.f32 0.17677669, %v3201_v55  ;;  %vm7296_vm7 = vmmov %vm7144_vm0 }
 0x674   : > { %v4702_v11 = vpop.f32.mrb[120].mxu0 }
 0x675   : > { %v3054_v52 = vadd.f32 %v4702_v11, %v6559_v15  ;;  %v3045_v22 = vpop.f32.mrb[121].mxu0 }
 0x676   : > { %v3046_v45 = vadd.f32 %v6559_v15, %v3045_v22  ;;  %v4703_v1 = vpop.f32.mrb[122].mxu0  ;;  %v6662_v22 = vmul.f32 0.17677669, %v3212_v27 }
 0x677   : > { %v3057_v39 = vadd.f32 %v4703_v1, %v6559_v15  ;;  %v3048_v34 = vpop.f32.mrb[123].mxu0  ;;  %v4714_v53 = vpop.f32.mrb[104].mxu1  ;;  %v3090_v33 = vmax.f32 %v3054_v52, 0.0 }
 0x678   : > { %v3049_v60 = vadd.f32 %v6559_v15, %v3048_v34  ;;  %v3216_v28 = vpop.f32.mrb[105].mxu1  ;;  %v3088_v35 = vmax.f32 %v3046_v45, 0.0  ;;  %v3209_v15 = vadd.f32 %v4710_v40, %v6650_v61  ;;  %v6667_v45 = vmul.f32 0.17677669, %v3204_v8 }
 0x679   : > { %v3091_v24 = vmax.f32 %v3057_v39, 0.0  ;;  %v4715_v62 = vpop.f32.mrb[106].mxu1 }
 0x67a   : > { %v3089_v57 = vmax.f32 %v3049_v60, 0.0  ;;  %v3219_v36 = vpop.f32.mrb[107].mxu1  ;;  %v6656_v56 = vmul.f32 0.17677669, %v3209_v15  ;;  %v3366_v55 = vsel %vm7287_vm3, %v6667_v45, -inf  ;;  %vm7305_vm3 = vmmov %vm7144_vm0 }
 0x67b   : > { %v3107_v3 = vpack.c.bf16 %v3091_v24, %v3090_v33  ;;  %v6682_v33 = vsel %vm7144_vm0, %v6659_v47, -inf }
 0x67c   : > { %v3106_v50 = vpack.c.bf16 %v3089_v57, %v3088_v35  ;;  %v6674_v39 = vsel %vm7282_vm9, %v6656_v56, -inf  ;;  %vm7299_vm9 = vmmov %vm7144_vm0 }
 0x67e   : > { %4736 = vmatprep.mubr.msk.bf16.mxu1 %vm7280_vm11, %v3106_v50  ;;  %vm7297_vm11 = vmmov %vm7144_vm0 }
 0x67f   : > { %4737 = vmatmul.mubr.msk.bf16.gmra.mrb[128].mxu1 %vm7281_vm12, %v3107_v3  ;;  %v6691_v3 = vsel %vm7285_vm10, %v6662_v22, -inf  ;;  %vm7298_vm12 = vmmov %vm7144_vm0 }
 0x680   : > { %vm7302_vm10 = vmmov %vm7144_vm0 }
 0x698   : > { %v4718_v0 = vpop.f32.mrb[108].mxu1 }
 0x699   : > { %v3241_v32 = vadd.f32 %v4718_v0, %v6650_v61  ;;  %v3232_v63 = vpop.f32.mrb[109].mxu1 }
 0x69a   : > { %v3233_v11 = vadd.f32 %v6650_v61, %v3232_v63  ;;  %v4719_v52 = vpop.f32.mrb[110].mxu1  ;;  %v3217_v63 = vadd.f32 %v6650_v61, %v3216_v28 }
 0x69b   : > { %v6664_v40 = vmul.f32 0.17677669, %v3241_v32  ;;  %v3244_v54 = vadd.f32 %v4719_v52, %v6650_v61  ;;  %v3235_v16 = vpop.f32.mrb[111].mxu1  ;;  %v3225_v32 = vadd.f32 %v4714_v53, %v6650_v61  ;;  %v3220_v52 = vadd.f32 %v6650_v61, %v3219_v36 }
 0x69c   : > { %v6669_v6 = vmul.f32 0.17677669, %v3233_v11  ;;  %v3236_v1 = vadd.f32 %v6650_v61, %v3235_v16  ;;  %v3228_v11 = vadd.f32 %v4715_v62, %v6650_v61 }
 0x69d   : > { %v3374_v34 = vsel %vm7283_vm15, %v6664_v40, -inf  ;;  %v6678_v60 = vmul.f32 0.17677669, %v3244_v54  ;;  %v6705_v16 = vmul.f32 0.17677669, %v3225_v32  ;;  %vm7300_vm15 = vmmov %vm7144_vm0 }
 0x69e   : > { %v3375_v24 = vmax.f32 %v6674_v39, %v3374_v34  ;;  %v3360_v35 = vsel %vm7284_vm13, %v6669_v6, -inf  ;;  %v6687_v57 = vmul.f32 0.17677669, %v3236_v1  ;;  %v6708_v34 = vmul.f32 0.17677669, %v3217_v63  ;;  %vm7301_vm13 = vmmov %vm7144_vm0 }
 0x69f   : > { %v3361_v50 = vmax.f32 %v6682_v33, %v3360_v35  ;;  %v3381_v15 = vsel %vm7286_vm14, %v6678_v60, -inf  ;;  %vm7303_vm14 = vmmov %vm7144_vm0 }
 0x6a0   : > { %v3382_v27 = vmax.f32 %v6691_v3, %v3381_v15  ;;  %v3367_v8 = vsel %vm7288_vm8, %v6687_v57, -inf  ;;  %v6711_v3 = vmul.f32 0.17677669, %v3228_v11  ;;  %v6716_v15 = vmul.f32 0.17677669, %v3220_v52  ;;  %vm7306_vm8 = vmmov %vm7144_vm0 }
 0x6a1   : > { %v3368_v0 = vmax.f32 %v3366_v55, %v3367_v8  ;;  %v3401_v8 = vsel %vm7290_vm1, %v6705_v16, -inf  ;;  %v3387_v11 = vsel %vm7292_vm4, %v6708_v34, -inf  ;;  %vm7308_vm1 = vmmov %vm7144_vm0 }
 0x6a2   : > { %7289 = vst [vmem:[#allocation10_spill] sm:$0xff] %v6716_v15  ;;  %vm7310_vm4 = vmmov %vm7144_vm0 }
 0x6c0   : > { %v4722_v54 = vpop.f32.mrb[112].mxu1 }
 0x6c1   : > { %v3257_v1 = vadd.f32 %v4722_v54, %v6650_v61  ;;  %v3248_v39 = vpop.f32.mrb[113].mxu1 }
 0x6c2   : > { %v3249_v33 = vadd.f32 %v6650_v61, %v3248_v39  ;;  %v4723_v35 = vpop.f32.mrb[114].mxu1  ;;  %v3408_v39 = vsel %vm7295_vm6, %v6711_v3, -inf  ;;  %vm7312_vm6 = vmmov %vm7144_vm0 }
 0x6c3   : > { %v6713_v53 = vmul.f32 0.17677669, %v3257_v1  ;;  %v3260_v28 = vadd.f32 %v4723_v35, %v6650_v61  ;;  %v3251_v62 = vpop.f32.mrb[115].mxu1 }
 0x6c4   : > { %v6718_v36 = vmul.f32 0.17677669, %v3249_v33  ;;  %v3252_v55 = vadd.f32 %v6650_v61, %v3251_v62 }
 0x6c5   : > { %v3402_v32 = vsel %vm7291_vm2, %v6713_v53, -inf  ;;  %v6725_v63 = vmul.f32 0.17677669, %v3260_v28  ;;  %v3394_v28 = vsel %vm7297_vm11, %v6716_v15, -inf  ;;  %vm7309_vm2 = vmmov %vm7144_vm0 }
 0x6c6   : > { %v3403_v54 = vmax.f32 %v3401_v8, %v3402_v32  ;;  %v3388_v52 = vsel %vm7293_vm5, %v6718_v36, -inf  ;;  %v6731_v1 = vmul.f32 0.17677669, %v3252_v55  ;;  %v4898_v55 = vld [vmem:[%s6993_s7] ss:$12 sps:$4 sm:$0xff]   ;;  %vm7311_vm5 = vmmov %vm7144_vm0 }
 0x6c7   : > { %v3389_v33 = vmax.f32 %v3387_v11, %v3388_v52  ;;  %v3409_v35 = vsel %vm7296_vm7, %v6725_v63, -inf  ;;  %4740 = vmatprep.subr.bf16.mxu0 %v4898_v55  ;;  %vm7313_vm7 = vmmov %vm7144_vm0 }
 0x6c8   : > { %7294 = vst [vmem:[#allocation19_spill] sm:$0xff] %v6731_v1  ;;  %v3410_v62 = vmax.f32 %v3408_v39, %v3409_v35  ;;  %v3395_v25 = vsel %vm7298_vm12, %v6731_v1, -inf  ;;  %4741 = vmatpush3.bf16.msra.mxu0 %v4898_v55  ;;  %vm7314_vm11 = vmmov %vm7144_vm0 }
 0x6c9   : > { %v3396_v8 = vmax.f32 %v3394_v28, %v3395_v25  ;;  %v4899_v28 = vld [vmem:[%s6993_s7 + $0x18] ss:$12 sps:$4 sm:$0xff]   ;;  %vm7315_vm12 = vmmov %vm7144_vm0 }
 0x6ca   : > { %4742 = vmatprep.subr.bf16.mxu0 %v4899_v28 }
 0x6cc   : > { %4743 = vmatpush3.bf16.msra.mxu0 %v4899_v28 }
 0x6e2   : > { %v4726_v32 = vpop.f32.mrb[116].mxu1 }
 0x6e3   : > { %v3273_v11 = vadd.f32 %v4726_v32, %v6650_v61  ;;  %v3264_v52 = vpop.f32.mrb[117].mxu1 }
 0x6e4   : > { %v3265_v49 = vadd.f32 %v6650_v61, %v3264_v52  ;;  %v4727_v43 = vpop.f32.mrb[118].mxu1 }
 0x6e5   : > { %v6746_v7 = vmul.f32 0.17677669, %v3273_v11  ;;  %v3276_v39 = vadd.f32 %v4727_v43, %v6650_v61  ;;  %v3267_v35 = vpop.f32.mrb[119].mxu1 }
 0x6e6   : > { %v6749_v31 = vmul.f32 0.17677669, %v3265_v49  ;;  %v3268_v25 = vadd.f32 %v6650_v61, %v3267_v35 }
 0x6e7   : > { %v3376_v55 = vsel %vm7299_vm9, %v6746_v7, -inf  ;;  %v6757_v32 = vmul.f32 0.17677669, %v3276_v39  ;;  %vm7316_vm9 = vmmov %vm7144_vm0 }
 0x6e8   : > { %v3377_v52 = vmax.f32 %v3375_v24, %v3376_v55  ;;  %v3362_v11 = vsel %vm7300_vm15, %v6749_v31, -inf  ;;  %v6761_v48 = vmul.f32 0.17677669, %v3268_v25  ;;  %vm7317_vm15 = vmmov %vm7144_vm0 }
 0x6e9   : > { %v3363_v43 = vmax.f32 %v3361_v50, %v3362_v11  ;;  %v3383_v49 = vsel %vm7144_vm0, %v6757_v32, -inf }
 0x6ea   : > { %v3384_v35 = vmax.f32 %v3382_v27, %v3383_v49  ;;  %v3369_v14 = vsel %vm7301_vm13, %v6761_v48, -inf  ;;  %vm7318_vm13 = vmmov %vm7144_vm0 }
 0x6eb   : > { %v6767_v20 = vmax.f32 %v3368_v0, %v3369_v14 }
 0x70a   : > { %v4730_v39 = vpop.f32.mrb[120].mxu1 }
 0x70b   : > { %v3289_v24 = vadd.f32 %v4730_v39, %v6650_v61  ;;  %v3280_v55 = vpop.f32.mrb[121].mxu1 }
 0x70c   : > { %v3281_v51 = vadd.f32 %v6650_v61, %v3280_v55  ;;  %v4731_v25 = vpop.f32.mrb[122].mxu1 }
 0x70d   : > { %v6771_v59 = vmul.f32 0.17677669, %v3289_v24  ;;  %v3292_v50 = vadd.f32 %v4731_v25, %v6650_v61  ;;  %v3283_v11 = vpop.f32.mrb[123].mxu1 }
 0x70e   : > { %v6774_v23 = vmul.f32 0.17677669, %v3281_v51  ;;  %v3284_v27 = vadd.f32 %v6650_v61, %v3283_v11 }
 0x70f   : > { %v3404_v14 = vsel %vm7302_vm10, %v6771_v59, -inf  ;;  %v6779_v0 = vmul.f32 0.17677669, %v3292_v50  ;;  %vm7319_vm10 = vmmov %vm7144_vm0 }
 0x710   : > { %v6781_v28 = vmax.f32 %v3403_v54, %v3404_v14  ;;  %v3390_v49 = vsel %vm7303_vm14, %v6774_v23, -inf  ;;  %v6785_v39 = vmul.f32 0.17677669, %v3284_v27  ;;  %vm7320_vm14 = vmmov %vm7144_vm0 }
 0x711   : > { %v6787_v24 = vmax.f32 %v3389_v33, %v3390_v49  ;;  %v3411_v51 = vsel %vm7305_vm3, %v6779_v0, -inf  ;;  %vm7321_vm3 = vmmov %vm7144_vm0 }
 0x712   : > { %7304 = vst [vmem:[#allocation12_spill] sm:$0xff] %v6785_v39  ;;  %v6791_v55 = vmax.f32 %v3410_v62, %v3411_v51  ;;  %v3397_v25 = vsel %vm7306_vm8, %v6785_v39, -inf  ;;  %vm7322_vm8 = vmmov %vm7144_vm0 }
 0x713   : > { %v6795_v11 = vmax.f32 %v3396_v8, %v3397_v25 }
 0x715   : > { %7307 = vst [vmem:[#allocation21_spill] sm:$0xff] %v6795_v11 }
 0x72c   : > { %v4734_v50 = vpop.f32.mrb[124].mxu1 }
 0x72d   : > { %v3305_v54 = vadd.f32 %v4734_v50, %v6650_v61  ;;  %v3296_v14 = vpop.f32.mrb[125].mxu1 }
 0x72e   : > { %v3297_v9 = vadd.f32 %v6650_v61, %v3296_v14  ;;  %v4735_v27 = vpop.f32.mrb[126].mxu1 }
 0x72f   : > { %v3353_v5 = vmul.f32 0.17677669, %v3305_v54  ;;  %v3308_v33 = vadd.f32 %v4735_v27, %v6650_v61  ;;  %v3299_v49 = vpop.f32.mrb[127].mxu1 }
 0x730   : > { %v3351_v21 = vmul.f32 0.17677669, %v3297_v9  ;;  %v3300_v62 = vadd.f32 %v6650_v61, %v3299_v49 }
 0x731   : > { %v3378_v51 = vsel %vm7308_vm1, %v3353_v5, -inf  ;;  %v3354_v12 = vmul.f32 0.17677669, %v3308_v33  ;;  %vm7323_vm1 = vmmov %vm7144_vm0 }
 0x732   : > { %v3379_v26 = vmax.f32 %v3377_v52, %v3378_v51  ;;  %v3364_v8 = vsel %vm7309_vm2, %v3351_v21, -inf  ;;  %v3352_v39 = vmul.f32 0.17677669, %v3300_v62  ;;  %vm7324_vm2 = vmmov %vm7144_vm0 }
 0x733   : > { %v3365_v25 = vmax.f32 %v3363_v43, %v3364_v8  ;;  %v3385_v50 = vsel %vm7310_vm4, %v3354_v12, -inf  ;;  %vm7325_vm4 = vmmov %vm7144_vm0 }
 0x734   : > { %v3417_v14 = vsub.f32 %v6656_v56, %v3379_v26  ;;  %v3425_v54 = vsub.f32 %v6664_v40, %v3379_v26  ;;  %v3433_v27 = vsub.f32 %v6746_v7, %v3379_v26  ;;  %v3441_v1 = vsub.f32 %v3353_v5, %v3379_v26 }
 0x735   : > { %v3415_v9 = vsub.f32 %v6659_v47, %v3365_v25  ;;  %v3423_v49 = vsub.f32 %v6669_v6, %v3365_v25  ;;  %v3431_v33 = vsub.f32 %v6749_v31, %v3365_v25  ;;  %v3439_v52 = vsub.f32 %v3351_v21, %v3365_v25 }
 0x736   : > { %v3451_v51 = vmul.f32 1.442695, %v3417_v14  ;;  %v3467_v15 = vmul.f32 1.442695, %v3425_v54  ;;  %v3483_v43 = vmul.f32 1.442695, %v3433_v27  ;;  %v3386_v8 = vmax.f32 %v3384_v35, %v3385_v50 }
 0x737   : > { %v3499_v11 = vmul.f32 1.442695, %v3441_v1  ;;  %v3447_v62 = vmul.f32 1.442695, %v3415_v9  ;;  %v3463_v56 = vmul.f32 1.442695, %v3423_v49 }
 0x738   : > { %4900 = vpow2.f32 %v3451_v51  ;;  %v3418_v40 = vsub.f32 %v6662_v22, %v3386_v8  ;;  %v3426_v26 = vsub.f32 %v6678_v60, %v3386_v8  ;;  %v3434_v7 = vsub.f32 %v6757_v32, %v3386_v8 }
 0x739   : > { %4902 = vpow2.f32 %v3467_v15  ;;  %v3442_v5 = vsub.f32 %v3354_v12, %v3386_v8  ;;  %v3479_v47 = vmul.f32 1.442695, %v3431_v33  ;;  %v3371_v21 = vsel %vm7311_vm5, %v3352_v39, -inf  ;;  %vm7326_vm5 = vmmov %vm7144_vm0 }
 0x73a   : > { %4904 = vpow2.f32 %v3483_v43  ;;  %v3495_v31 = vmul.f32 1.442695, %v3439_v52  ;;  %v3453_v6 = vmul.f32 1.442695, %v3418_v40  ;;  %v3372_v1 = vmax.f32 %v6767_v20, %v3371_v21 }
 0x73b   : > { %4906 = vpow2.f32 %v3499_v11  ;;  %v3469_v35 = vmul.f32 1.442695, %v3426_v26  ;;  %v3485_v25 = vmul.f32 1.442695, %v3434_v7  ;;  %v3501_v15 = vmul.f32 1.442695, %v3442_v5 }
 0x73c   : > { %4908 = vpow2.f32 %v3447_v62  ;;  %v3416_v22 = vsub.f32 %v6667_v45, %v3372_v1  ;;  %v3424_v60 = vsub.f32 %v6687_v57, %v3372_v1  ;;  %v3432_v12 = vsub.f32 %v6761_v48, %v3372_v1 }
 0x73d   : > { %4910 = vpow2.f32 %v3463_v56  ;;  %v3440_v32 = vsub.f32 %v3352_v39, %v3372_v1 }
 0x73e   : > { %4912 = vpow2.f32 %v3479_v47  ;;  %v3449_v11 = vmul.f32 1.442695, %v3416_v22  ;;  %v3465_v14 = vmul.f32 1.442695, %v3424_v60  ;;  %v3481_v45 = vmul.f32 1.442695, %v3432_v12 }
 0x73f   : > { %4914 = vpow2.f32 %v3495_v31  ;;  %v3497_v39 = vmul.f32 1.442695, %v3440_v32 }
 0x740   : > { %4916 = vpow2.f32 %v3453_v6 }
 0x741   : > { %4918 = vpow2.f32 %v3469_v35 }
 0x742   : > { %v4901_v50 = vpop.eup %4900  ;;  %4920 = vpow2.f32 %v3485_v25 }
 0x743   : > { %v4903_v20 = vpop.eup %4902  ;;  %v3525_v54 = vsel %vm7312_vm6, %v4901_v50, 0.0  ;;  %v3601_v27 = vmul.f32 %v4901_v50, %v6342_v29  ;;  %4922 = vpow2.f32 %v3501_v15  ;;  %vm7327_vm6 = vmmov %vm7144_vm0 }
 0x744   : > { %v4905_v9 = vpop.eup %4904  ;;  %v3526_v57 = vsel %vm7313_vm7, %v4903_v20, 0.0  ;;  %v3609_v48 = vmul.f32 %v4903_v20, %v6420_v42  ;;  %4924 = vpow2.f32 %v3449_v11  ;;  %vm7328_vm7 = vmmov %vm7144_vm0 }
 0x745   : > { %v4907_v49 = vpop.eup %4906  ;;  %v3527_v33 = vadd.f32 %v3526_v57, %v3525_v54  ;;  %v3528_v52 = vsel %vm7314_vm11, %v4905_v9, 0.0  ;;  %v3617_v51 = vmul.f32 %v4905_v9, %v6480_v38  ;;  %v3645_v43 = vsel %vm7315_vm12, %v3601_v27, 0.0  ;;  %vm7329_vm11 = vmmov %vm7144_vm0 }
 0x746   : > { %v4909_v8 = vpop.eup %4908  ;;  %v3530_v29 = vsel %vm7316_vm9, %v4907_v49, 0.0  ;;  %v3625_v62 = vmul.f32 %v4907_v49, %v6540_v18  ;;  %v3646_v56 = vsel %vm7317_vm15, %v3609_v48, 0.0  ;;  %4926 = vpow2.f32 %v3465_v14  ;;  %vm7330_vm12 = vmmov %vm7144_vm0 }
 0x747   : > { %v4911_v40 = vpop.eup %4910  ;;  %v3529_v42 = vadd.f32 %v3528_v52, %v3527_v33  ;;  %v3647_v26 = vadd.f32 %v3646_v56, %v3645_v43  ;;  %v3648_v7 = vsel %vm7144_vm0, %v3617_v51, 0.0  ;;  %v3511_v5 = vsel %vm7318_vm13, %v4909_v8, 0.0  ;;  %vm7331_vm9 = vmmov %vm7144_vm0 }
 0x748   : > { %v4913_v47 = vpop.eup %4912  ;;  %v3650_v38 = vsel %vm7319_vm10, %v3625_v62, 0.0  ;;  %v3512_v21 = vsel %vm7320_vm14, %v4911_v40, 0.0  ;;  %4928 = vpow2.f32 %v3481_v45  ;;  %v3599_v31 = vmul.f32 %v4909_v8, %v6350_v58  ;;  %vm7332_vm15 = vmmov %vm7144_vm0 }
 0x749   : > { %v4915_v6 = vpop.eup %4914  ;;  %v3531_v18 = vadd.f32 %v3530_v29, %v3529_v42  ;;  %v3649_v1 = vadd.f32 %v3648_v7, %v3647_v26  ;;  %v3513_v35 = vadd.f32 %v3512_v21, %v3511_v5  ;;  %v3514_v25 = vsel %vm7321_vm3, %v4913_v47, 0.0  ;;  %vm7333_vm13 = vmmov %vm7144_vm0 }
 0x74a   : > { %v4917_v22 = vpop.eup %4916  ;;  %v3516_v60 = vsel %vm7322_vm8, %v4915_v6, 0.0  ;;  %4930 = vpow2.f32 %v3497_v39  ;;  %v3607_v12 = vmul.f32 %v4911_v40, %v6427_v13  ;;  %v3615_v15 = vmul.f32 %v4913_v47, %v6487_v30  ;;  %vm7334_vm10 = vmmov %vm7144_vm0 }
 0x74b   : > { %v4919_v32 = vpop.eup %4918  ;;  %v6837_v11 = vadd.f32 %v3650_v38, %v3649_v1  ;;  %4932 = vrcp.f32 %v3531_v18  ;;  %v3515_v50 = vadd.f32 %v3514_v25, %v3513_v35  ;;  %v3532_v58 = vsel %vm7323_vm1, %v4917_v22, 0.0  ;;  %vm7335_vm14 = vmmov %vm7144_vm0 }
 0x74c   : > { %v4921_v14 = vpop.eup %4920  ;;  %v3533_v20 = vsel %vm7324_vm2, %v4919_v32, 0.0  ;;  %v3602_v54 = vmul.f32 %v4917_v22, %v6359_v37  ;;  %v3610_v27 = vmul.f32 %v4919_v32, %v6434_v41  ;;  %v3623_v45 = vmul.f32 %v4915_v6, %v6547_v19  ;;  %vm7336_vm3 = vmmov %vm7144_vm0 }
 0x74d   : > { %v4923_v9 = vpop.eup %4922  ;;  %v3517_v13 = vadd.f32 %v3516_v60, %v3515_v50  ;;  %v3534_v57 = vadd.f32 %v3533_v20, %v3532_v58  ;;  %v3535_v30 = vsel %vm7325_vm4, %v4921_v14, 0.0  ;;  %v3618_v48 = vmul.f32 %v4921_v14, %v6494_v4  ;;  %vm7337_vm8 = vmmov %vm7144_vm0 }
 0x74e   : > { %v4925_v39 = vpop.eup %4924  ;;  %v3537_v49 = vsel %vm7326_vm5, %v4923_v9, 0.0  ;;  %v3626_v33 = vmul.f32 %v4923_v9, %v6554_v44  ;;  %v3652_v52 = vsel %vm7327_vm6, %v3602_v54, 0.0  ;;  %v3653_v37 = vsel %vm7328_vm7, %v3610_v27, 0.0  ;;  %vm7338_vm1 = vmmov %vm7144_vm0 }
 0x74f   : > { %4934 = vrcp.f32 %v3517_v13  ;;  %v3536_v41 = vadd.f32 %v3535_v30, %v3534_v57  ;;  %v3654_v51 = vadd.f32 %v3653_v37, %v3652_v52  ;;  %v3655_v19 = vsel %vm7329_vm11, %v3618_v48, 0.0  ;;  %vm7339_vm2 = vmmov %vm7144_vm0 }
 0x750   : > { %v4927_v43 = vpop.eup %4926  ;;  %v3657_v8 = vsel %vm7330_vm12, %v3626_v33, 0.0  ;;  %v3518_v29 = vsel %vm7331_vm9, %v4925_v39, 0.0  ;;  %v3600_v4 = vmul.f32 %v4925_v39, %v6365_v46  ;;  %v3631_v62 = vsel %vm7332_vm15, %v3599_v31, 0.0  ;;  %vm7340_vm4 = vmmov %vm7144_vm0 }
 0x751   : > { %v3538_v56 = vadd.f32 %v3537_v49, %v3536_v41  ;;  %v3656_v44 = vadd.f32 %v3655_v19, %v3654_v51  ;;  %v3519_v40 = vsel %vm7144_vm0, %v4927_v43, 0.0  ;;  %v3608_v42 = vmul.f32 %v4927_v43, %v6440_v10  ;;  %vm7341_vm5 = vmmov %vm7144_vm0 }
 0x752   : > { %v4929_v26 = vpop.eup %4928  ;;  %v3520_v7 = vadd.f32 %v3519_v40, %v3518_v29  ;;  %v4738_v5 = vpop.f32.mrb[128].mxu1  ;;  %v3632_v47 = vsel %vm7333_vm13, %v3607_v12, 0.0  ;;  %v3634_v38 = vsel %vm7334_vm10, %v3615_v15, 0.0  ;;  %v3636_v21 = vsel %vm7335_vm14, %v3623_v45, 0.0  ;;  %vm7342_vm6 = vmmov %vm7144_vm0 }
 0x753   : > { %v6860_v6 = vadd.f32 %v3657_v8, %v3656_v44  ;;  %4936 = vrcp.f32 %v3538_v56  ;;  %v3521_v46 = vsel %vm7336_vm3, %v4929_v26, 0.0  ;;  %v3321_v31 = vadd.f32 %v4738_v5, %v6650_v61  ;;  %v3312_v18 = vpop.f32.mrb[129].mxu1  ;;  %vm7343_vm7 = vmmov %vm7144_vm0 }
 0x754   : > { %v4931_v1 = vpop.eup %4930  ;;  %v3522_v35 = vadd.f32 %v3521_v46, %v3520_v7  ;;  %v3313_v10 = vadd.f32 %v6650_v61, %v3312_v18  ;;  %v4739_v25 = vpop.f32.mrb[130].mxu1  ;;  %v3616_v22 = vmul.f32 %v4929_v26, %v6500_v17  ;;  %v3633_v60 = vadd.f32 %v3632_v47, %v3631_v62  ;;  %vm7344_vm11 = vmmov %vm7144_vm0 }
 0x755   : > { %v4933_v12 = vpop.eup %4932  ;;  %v3523_v15 = vsel %vm7337_vm8, %v4931_v1, 0.0  ;;  %v3357_v32 = vmul.f32 0.17677669, %v3321_v31  ;;  %v3324_v50 = vadd.f32 %v4739_v25, %v6650_v61  ;;  %v3315_v58 = vpop.f32.mrb[131].mxu1  ;;  %v3624_v14 = vmul.f32 %v4931_v1, %v6565_v2  ;;  %v7345_v31 = vld [vmem:[#allocation21_spill] sm:$0xff]  ;;  %vm7346_vm12 = vmmov %vm7144_vm0 }
 0x756   : > { %v3524_v20 = vadd.f32 %v3523_v15, %v3522_v35  ;;  %v3355_v54 = vmul.f32 0.17677669, %v3313_v10  ;;  %v3316_v27 = vadd.f32 %v6650_v61, %v3315_v58  ;;  %v3635_v45 = vadd.f32 %v3634_v38, %v3633_v60  ;;  %v7347_v10 = vld [vmem:[#allocation10_spill] sm:$0xff]  ;;  %v7348_v60 = vld [vmem:[#allocation19_spill] sm:$0xff]  ;;  %vm7350_vm9 = vmmov %vm7144_vm0 }
 0x757   : > { %v3406_v9 = vsel %vm7338_vm1, %v3357_v32, -inf  ;;  %v3358_v13 = vmul.f32 0.17677669, %v3324_v50  ;;  %v3638_v17 = vsel %vm7339_vm2, %v3600_v4, 0.0  ;;  %v3639_v57 = vsel %vm7340_vm4, %v3608_v42, 0.0  ;;  %vm7352_vm15 = vmmov %vm7144_vm0 }
 0x758   : > { %4938 = vrcp.f32 %v3524_v20  ;;  %v3407_v30 = vmax.f32 %v6781_v28, %v3406_v9  ;;  %v3392_v48 = vsel %vm7341_vm5, %v3355_v54, -inf  ;;  %v6875_v39 = vmul.f32 0.17677669, %v3316_v27  ;;  %vm7355_vm13 = vmmov %vm7144_vm0 }
 0x759   : > { %v4935_v2 = vpop.eup %4934  ;;  %v3393_v49 = vmax.f32 %v6787_v24, %v3392_v48  ;;  %v3413_v61 = vsel %vm7342_vm6, %v3358_v13, -inf  ;;  %v3637_v33 = vadd.f32 %v3636_v21, %v3635_v45  ;;  %v3640_v52 = vadd.f32 %v3639_v57, %v3638_v17  ;;  %v7351_v17 = vld [vmem:[#allocation48_spill] sm:$0xff]  ;;  %vm7356_vm10 = vmmov %vm7144_vm0 }
 0x75a   : > { %v3421_v37 = vsub.f32 %v6705_v16, %v3407_v30  ;;  %v3429_v41 = vsub.f32 %v6713_v53, %v3407_v30  ;;  %v3437_v51 = vsub.f32 %v6771_v59, %v3407_v30  ;;  %v3445_v19 = vsub.f32 %v3357_v32, %v3407_v30  ;;  %v7349_v32 = vld [vmem:[#allocation12_spill] sm:$0xff]  ;;  %vm7357_vm14 = vmmov %vm7144_vm0 }
 0x75b   : > { %v3419_v28 = vsub.f32 %v6708_v34, %v3393_v49  ;;  %v3427_v43 = vsub.f32 %v6718_v36, %v3393_v49  ;;  %v3435_v8 = vsub.f32 %v6774_v23, %v3393_v49  ;;  %v3443_v29 = vsub.f32 %v3355_v54, %v3393_v49  ;;  %vm7359_vm3 = vmmov %vm7144_vm0 }
 0x75c   : > { %v3459_v4 = vmul.f32 1.442695, %v3421_v37  ;;  %v3475_v24 = vmul.f32 1.442695, %v3429_v41  ;;  %v3491_v62 = vmul.f32 1.442695, %v3437_v51  ;;  %v3414_v56 = vmax.f32 %v6791_v55, %v3413_v61  ;;  %vm7361_vm8 = vmmov %vm7144_vm0 }
 0x75d   : > { %v4937_v44 = vpop.eup %4936  ;;  %v3507_v40 = vmul.f32 1.442695, %v3445_v19  ;;  %v3455_v16 = vmul.f32 1.442695, %v3419_v28  ;;  %v3695_v42 = vmul.f32 %v4935_v2, %v3637_v33  ;;  %v3471_v53 = vmul.f32 1.442695, %v3427_v43  ;;  %vm7363_vm1 = vmmov %vm7144_vm0 }
 0x75e   : > { %4940 = vpow2.f32 %v3459_v4  ;;  %v3487_v59 = vmul.f32 1.442695, %v3435_v8  ;;  %v3422_v26 = vsub.f32 %v6711_v3, %v3414_v56  ;;  %v3430_v34 = vsub.f32 %v6725_v63, %v3414_v56  ;;  %v7354_v33 = vld [vmem:[#allocation4_spill] sm:$0xff]  ;;  %v7358_v19 = vld [vmem:[#allocation6_spill] sm:$0xff]  ;;  %v7360_v4 = vld [vmem:[#allocation49_spill] sm:$0xff] }
 0x75f   : > { %4942 = vpow2.f32 %v3475_v24  ;;  %v3438_v23 = vsub.f32 %v6779_v0, %v3414_v56  ;;  %v3446_v36 = vsub.f32 %v3358_v13, %v3414_v56  ;;  %v3503_v7 = vmul.f32 1.442695, %v3443_v29  ;;  %vm7364_vm2 = vmmov %vm7144_vm0 }
 0x760   : > { %4944 = vpow2.f32 %v3491_v62  ;;  %v3461_v5 = vmul.f32 1.442695, %v3422_v26  ;;  %v3399_v55 = vsel %vm7343_vm7, %v6875_v39, -inf  ;;  %v3477_v47 = vmul.f32 1.442695, %v3430_v34  ;;  %vm7365_vm4 = vmmov %vm7144_vm0 }
 0x761   : > { %4946 = vpow2.f32 %v3507_v40  ;;  %v3493_v38 = vmul.f32 1.442695, %v3438_v23  ;;  %v3641_v21 = vsel %vm7344_vm11, %v3616_v22, 0.0  ;;  %v3509_v3 = vmul.f32 1.442695, %v3446_v36  ;;  %v7366_v23 = vld [vmem:[#allocation11_spill] sm:$0xff]  ;;  %vm7367_vm5 = vmmov %vm7144_vm0 }
 0x762   : > { %v4939_v46 = vpop.eup %4938  ;;  %4948 = vpow2.f32 %v3455_v16  ;;  %v3400_v18 = vmax.f32 %v7345_v31, %v3399_v55  ;;  %v3642_v63 = vadd.f32 %v3641_v21, %v3640_v52  ;;  %v3643_v0 = vsel %vm7346_vm12, %v3624_v14, 0.0  ;;  %v7368_v55 = vld [vmem:[#allocation15_spill] sm:$0xff]  ;;  %vm7369_vm6 = vmmov %vm7144_vm0 }
 0x763   : > { %4950 = vpow2.f32 %v3471_v53  ;;  %v3697_v1 = vmul.f32 %v4933_v12, %v6837_v11  ;;  %v3698_v35 = vmul.f32 %v4937_v44, %v6860_v6  ;;  %v7362_v44 = vld [vmem:[#allocation7_spill] sm:$0xff]  ;;  %vm7370_vm7 = vmmov %vm7144_vm0 }
 0x764   : > { %4952 = vpow2.f32 %v3487_v59  ;;  %v3420_v25 = vsub.f32 %v7347_v10, %v3400_v18  ;;  %v3428_v15 = vsub.f32 %v7348_v60, %v3400_v18  ;;  %v3436_v22 = vsub.f32 %v7349_v32, %v3400_v18  ;;  %vm7371_vm11 = vmmov %vm7144_vm0  ;;  %v7375_v10 = vld [vmem:[#allocation50_spill] sm:$0xff] }
 0x765   : > { %4954 = vpow2.f32 %v3503_v7  ;;  %v3444_v50 = vsub.f32 %v6875_v39, %v3400_v18  ;;  %v3644_v58 = vadd.f32 %v3643_v0, %v3642_v63  ;;  %v3709_v20 = vpack.c.bf16 %v3698_v35, %v3697_v1  ;;  %v7353_v39 = vld [vmem:[#allocation2_spill] sm:$0xff]  ;;  %vm7372_vm12 = vmmov %vm7144_vm0 }
 0x766   : > { %4956 = vpow2.f32 %v3461_v5  ;;  %v3457_v54 = vmul.f32 1.442695, %v3420_v25  ;;  %v3473_v14 = vmul.f32 1.442695, %v3428_v15  ;;  %v3489_v6 = vmul.f32 1.442695, %v3436_v22 }
 0x767   : > { %4958 = vpow2.f32 %v3477_v47  ;;  %v3696_v27 = vmul.f32 %v4939_v46, %v3644_v58  ;;  %v3505_v12 = vmul.f32 1.442695, %v3444_v50 }
 0x768   : > { %v4941_v11 = vpop.eup %4940  ;;  %4960 = vpow2.f32 %v3493_v38 }
 0x769   : > { %v4943_v45 = vpop.eup %4942  ;;  %v3553_v9 = vsel %vm7350_vm9, %v4941_v11, 0.0  ;;  %4962 = vpow2.f32 %v3509_v3  ;;  %v3708_v13 = vpack.c.bf16 %v3696_v27, %v3695_v42  ;;  %v3605_v57 = vmul.f32 %v4941_v11, %v7351_v17  ;;  %vm7373_vm9 = vmmov %vm7144_vm0  ;;  %v7378_v27 = vld [vmem:[#allocation5_spill] sm:$0xff]  ;;  %v7381_v17 = vld [vmem:[#allocation51_spill] sm:$0xff] }
 0x76a   : > { %v4945_v30 = vpop.eup %4944  ;;  %v3554_v48 = vsel %vm7352_vm15, %v4943_v45, 0.0  ;;  %4964 = vpow2.f32 %v3457_v54  ;;  %v3613_v2 = vmul.f32 %v4943_v45, %v7353_v39  ;;  %vm7374_vm15 = vmmov %vm7144_vm0  ;;  %v7377_v54 = vld [vmem:[#allocation3_spill] sm:$0xff]  ;;  %v7383_v39 = vld [vmem:[#allocation9_spill] sm:$0xff] }
 0x76b   : > { %v4947_v49 = vpop.eup %4946  ;;  %v3555_v61 = vadd.f32 %v3554_v48, %v3553_v9  ;;  %4966 = vpow2.f32 %v3473_v14  ;;  %4744 = vmatprep.mubr.msk.bf16.mxu0 %vm7144_vm0, %v3708_v13  ;;  %v6906_v52 = vmul.f32 %v4945_v30, %v7354_v33  ;;  %v3556_v41 = vsel %vm7355_vm13, %v4945_v30, 0.0  ;;  %vm7376_vm13 = vmmov %vm7144_vm0 }
 0x76c   : > { %v4949_v37 = vpop.eup %4948  ;;  %v3558_v51 = vsel %vm7356_vm10, %v4947_v49, 0.0  ;;  %4968 = vpow2.f32 %v3489_v6  ;;  %4745 = vmatmul.mubr.msk.bf16.vlgmr.msra.gmra.mrb[124].mxu0 %vm7357_vm14, %v3709_v20  ;;  %v6912_v28 = vmul.f32 %v4947_v49, %v7358_v19  ;;  %v3673_v16 = vsel %vm7363_vm1, %v3605_v57, 0.0  ;;  %v7379_v6 = vld [vmem:[#allocation8_spill] sm:$0xff]  ;;  %vm7380_vm10 = vmmov %vm7144_vm0 }
 0x76d   : > { %v4951_v43 = vpop.eup %4950  ;;  %v3557_v8 = vadd.f32 %v3556_v41, %v3555_v61  ;;  %v3539_v29 = vsel %vm7359_vm3, %v4949_v37, 0.0  ;;  %4970 = vpow2.f32 %v3505_v12  ;;  %v3603_v24 = vmul.f32 %v4949_v37, %v7360_v4  ;;  %vm7382_vm14 = vmmov %vm7144_vm0 }
 0x76e   : > { %v4953_v62 = vpop.eup %4952  ;;  %v3540_v56 = vsel %vm7361_vm8, %v4951_v43, 0.0  ;;  %v3611_v40 = vmul.f32 %v4951_v43, %v7362_v44  ;;  %v3674_v42 = vsel %vm7364_vm2, %v3613_v2, 0.0  ;;  %vm7385_vm3 = vmmov %vm7144_vm0 }
 0x76f   : > { %v4955_v53 = vpop.eup %4954  ;;  %v3559_v59 = vadd.f32 %v3558_v51, %v3557_v8  ;;  %v3541_v26 = vadd.f32 %v3540_v56, %v3539_v29  ;;  %v3542_v34 = vsel %vm7365_vm4, %v4953_v62, 0.0  ;;  %v3619_v36 = vmul.f32 %v4953_v62, %v7366_v23  ;;  %v7384_v51 = vld [vmem:[#allocation13_spill] sm:$0xff]  ;;  %vm7387_vm8 = vmmov %vm7144_vm0 }
 0x770   : > { %v4957_v7 = vpop.eup %4956  ;;  %v3544_v5 = vsel %vm7367_vm5, %v4955_v53, 0.0  ;;  %v3627_v47 = vmul.f32 %v4955_v53, %v7368_v55  ;;  %v3659_v38 = vsel %vm7369_vm6, %v3603_v24, 0.0  ;;  %v3660_v21 = vsel %vm7370_vm7, %v3611_v40, 0.0  ;;  %v7386_v8 = vld [vmem:[#allocation17_spill] sm:$0xff]  ;;  %vm7388_vm1 = vmmov %vm7144_vm0 }
 0x771   : > { %v4959_v46 = vpop.eup %4958  ;;  %4972 = vrcp.f32 %v3559_v59  ;;  %v3543_v3 = vadd.f32 %v3542_v34, %v3541_v26  ;;  %v3560_v31 = vsel %vm7371_vm11, %v4957_v7, 0.0  ;;  %v3661_v18 = vadd.f32 %v3660_v21, %v3659_v38  ;;  %vm7389_vm2 = vmmov %vm7144_vm0 }
 0x772   : > { %v4961_v63 = vpop.eup %4960  ;;  %v3561_v0 = vsel %vm7372_vm12, %v4959_v46, 0.0  ;;  %v3662_v1 = vsel %vm7373_vm9, %v3619_v36, 0.0  ;;  %v3664_v35 = vsel %vm7374_vm15, %v3627_v47, 0.0  ;;  %v3606_v25 = vmul.f32 %v4957_v7, %v7375_v10  ;;  %vm7390_vm4 = vmmov %vm7144_vm0 }
 0x773   : > { %v4963_v60 = vpop.eup %4962  ;;  %v3545_v15 = vadd.f32 %v3544_v5, %v3543_v3  ;;  %v3562_v32 = vadd.f32 %v3561_v0, %v3560_v31  ;;  %v3563_v22 = vsel %vm7144_vm0, %v4961_v63, 0.0  ;;  %v3663_v50 = vadd.f32 %v3662_v1, %v3661_v18  ;;  %vm7391_vm5 = vmmov %vm7144_vm0 }
 0x774   : > { %v4965_v58 = vpop.eup %4964  ;;  %v3565_v20 = vsel %vm7376_vm13, %v4963_v60, 0.0  ;;  %v3614_v14 = vmul.f32 %v4959_v46, %v7377_v54  ;;  %v3622_v11 = vmul.f32 %v4961_v63, %v7378_v27  ;;  %v3630_v12 = vmul.f32 %v4963_v60, %v7379_v6  ;;  %vm7392_vm6 = vmmov %vm7144_vm0  ;;  %v4981_v27 = vld [vmem:[%s5077_s21] sm:$0xff] }
 0x775   : > { %v4967_v45 = vpop.eup %4966  ;;  %4974 = vrcp.f32 %v3545_v15  ;;  %v3564_v9 = vadd.f32 %v3563_v22, %v3562_v32  ;;  %v3546_v13 = vsel %vm7380_vm10, %v4965_v58, 0.0  ;;  %v3604_v57 = vmul.f32 %v4965_v58, %v7381_v17  ;;  %vm7393_vm7 = vmmov %vm7144_vm0  ;;  %v4980_v58 = vld [vmem:[%s5077_s21 + $0x10] sm:$0xff] }
 0x776   : > { %v4969_v30 = vpop.eup %4968  ;;  %v3547_v48 = vsel %vm7382_vm14, %v4967_v45, 0.0  ;;  %v3612_v2 = vmul.f32 %v4967_v45, %v7383_v39  ;;  %v3665_v49 = vadd.f32 %v3664_v35, %v3663_v50  ;;  %v3675_v61 = vadd.f32 %v3674_v42, %v3673_v16  ;;  %vm7394_vm11 = vmmov %vm7144_vm0 }
 0x777   : > { %v4971_v33 = vpop.eup %4970  ;;  %v3566_v37 = vadd.f32 %v3565_v20, %v3564_v9  ;;  %v3548_v41 = vadd.f32 %v3547_v48, %v3546_v13  ;;  %v3620_v19 = vmul.f32 %v4969_v30, %v7384_v51  ;;  %v3549_v43 = vsel %vm7385_vm3, %v4969_v30, 0.0  ;;  %vm7395_vm12 = vmmov %vm7144_vm0  ;;  %v4983_v9 = vld [vmem:[%s5077_s21 + $0x8] sm:$0xff] }
 0x778   : > { %v3628_v29 = vmul.f32 %v4971_v33, %v7386_v8  ;;  %v3666_v4 = vsel %vm7387_vm8, %v3604_v57, 0.0  ;;  %v3667_v24 = vsel %vm7388_vm1, %v3612_v2, 0.0  ;;  %v3676_v44 = vsel %vm7389_vm2, %v6906_v52, 0.0  ;;  %vm7396_vm9 = vmmov %vm7144_vm0  ;;  %v4984_v2 = vld [vmem:[%s5077_s21 + $0x30] sm:$0xff]  ;;  %v4987_v8 = vld [vmem:[%s5077_s21 + $0x28] sm:$0xff] }
 0x779   : > { %4976 = vrcp.f32 %v3566_v37  ;;  %v3550_v62 = vadd.f32 %v3549_v43, %v3548_v41  ;;  %v3668_v56 = vadd.f32 %v3667_v24, %v3666_v4  ;;  %v3551_v40 = vsel %vm7390_vm4, %v4971_v33, 0.0  ;;  %vm7397_vm15 = vmmov %vm7144_vm0  ;;  %v4985_v37 = vld [vmem:[%s5077_s21 + $0x20] sm:$0xff] }
 0x77a   : > { %v3669_v16 = vsel %vm7391_vm5, %v3620_v19, 0.0  ;;  %v3677_v42 = vadd.f32 %v3676_v44, %v3675_v61  ;;  %v3680_v53 = vsel %vm7392_vm6, %v3606_v25, 0.0  ;;  %v3678_v23 = vsel %vm7393_vm7, %v6912_v28, 0.0  ;;  %vm7398_vm13 = vmmov %vm7144_vm0  ;;  %v4129_v25 = vld [vmem:[%s6994_s8 + $0x5] ss:$0 sm:$0xff]  ;;  %v4986_v19 = vld [vmem:[%s5077_s21 + $0x38] sm:$0xff] }
 0x77b   : > { %v4973_v59 = vpop.eup %4972  ;;  %v3552_v26 = vadd.f32 %v3551_v40, %v3550_v62  ;;  %v3670_v34 = vadd.f32 %v3669_v16, %v3668_v56  ;;  %v3681_v36 = vsel %vm7394_vm11, %v3614_v14, 0.0  ;;  %v3671_v7 = vsel %vm7395_vm12, %v3628_v29, 0.0 }
 0x77c   : > { %v3679_v5 = vadd.f32 %v3678_v23, %v3677_v42  ;;  %v3682_v55 = vadd.f32 %v3681_v36, %v3680_v53  ;;  %v3683_v47 = vsel %vm7396_vm9, %v3622_v11, 0.0  ;;  %v3685_v3 = vsel %vm7397_vm15, %v3630_v12, 0.0  ;;  %v4982_v12 = vld [vmem:[%s5077_s21 + $0x18] sm:$0xff] }
 0x77d   : > { %4978 = vrcp.f32 %v3552_v26  ;;  %v3672_v52 = vadd.f32 %v3671_v7, %v3670_v34 }
 0x77e   : > { %v3684_v38 = vadd.f32 %v3683_v47, %v3682_v55  ;;  %v3701_v21 = vmul.f32 %v4973_v59, %v3679_v5 }
 0x77f   : > { %v4975_v46 = vpop.eup %4974 }
 0x780   : > { %v3699_v31 = vmul.f32 %v4975_v46, %v3665_v49  ;;  %v3686_v18 = vadd.f32 %v3685_v3, %v3684_v38 }
 0x783   : > { %v4977_v28 = vpop.eup %4976 }
 0x784   : > { %v3702_v63 = vmul.f32 %v4977_v28, %v3686_v18 }
 0x786   : > { %v3711_v0 = vpack.c.bf16 %v3702_v63, %v3701_v21 }
 0x787   : > { %v4979_v1 = vpop.eup %4978 }
 0x788   : > { %v3700_v35 = vmul.f32 %v4979_v1, %v3672_v52 }
 0x78a   : > { %v3710_v10 = vpack.c.bf16 %v3700_v35, %v3699_v31 }
 0x78c   : > { %4748 = vmatprep.mubr.msk.bf16.mxu0 %vm7144_vm0, %v3710_v10 }
 0x78d   : > { %4749 = vmatmul.mubr.msk.bf16.gmra.mrb[128].mxu0 %vm7398_vm13, %v3711_v0 }
 0x83f   : > { %v4746_v60 = vpop.f32.mrb[124].mxu0 }
 0x840   : > { %v3783_v15 = vadd.f32 %v4746_v60, %v4129_v25  ;;  %v3774_v32 = vpop.f32.mrb[125].mxu0 }
 0x841   : > { %v3775_v22 = vadd.f32 %v4129_v25, %v3774_v32  ;;  %v4747_v50 = vpop.f32.mrb[126].mxu0 }
 0x842   : > { %v3807_v20 = vadd.f32 %v4980_v58, %v3783_v15  ;;  %v3786_v54 = vadd.f32 %v4747_v50, %v4129_v25  ;;  %v3777_v14 = vpop.f32.mrb[127].mxu0 }
 0x843   : > { %v3805_v11 = vadd.f32 %v4981_v27, %v3775_v22  ;;  %v3778_v6 = vadd.f32 %v4129_v25, %v3777_v14 }
 0x844   : > { %3815 = vst [vmem:[%s6965_s15 + $0x10] sm:$0xff] %v3807_v20  ;;  %v3808_v45 = vadd.f32 %v4982_v12, %v3786_v54 }
 0x845   : > { %3813 = vst [vmem:[%s6965_s15] sm:$0xff] %v3805_v11  ;;  %v3806_v13 = vadd.f32 %v4983_v9, %v3778_v6 }
 0x846   : > { %3816 = vst [vmem:[%s6965_s15 + $0x18] sm:$0xff] %v3808_v45 }
 0x847   : > { %3814 = vst [vmem:[%s6965_s15 + $0x8] sm:$0xff] %v3806_v13 }
 0x860   : > { %v4750_v17 = vpop.f32.mrb[128].mxu0 }
 0x861   : > { %v3799_v57 = vadd.f32 %v4750_v17, %v4129_v25  ;;  %v3790_v30 = vpop.f32.mrb[129].mxu0 }
 0x862   : > { %v3791_v48 = vadd.f32 %v4129_v25, %v3790_v30  ;;  %v4751_v39 = vpop.f32.mrb[130].mxu0 }
 0x863   : > { %v3811_v49 = vadd.f32 %v4984_v2, %v3799_v57  ;;  %v3802_v61 = vadd.f32 %v4751_v39, %v4129_v25  ;;  %v3793_v33 = vpop.f32.mrb[131].mxu0 }
 0x864   : > { %v3809_v41 = vadd.f32 %v4985_v37, %v3791_v48  ;;  %v3794_v51 = vadd.f32 %v4129_v25, %v3793_v33 }
 0x865   : > { %3819 = vst [vmem:[%s6965_s15 + $0x30] sm:$0xff] %v3811_v49  ;;  %v3812_v43 = vadd.f32 %v4986_v19, %v3802_v61 }
 0x866   : > { %3817 = vst [vmem:[%s6965_s15 + $0x20] sm:$0xff] %v3809_v41  ;;  %v3810_v29 = vadd.f32 %v4987_v8, %v3794_v51 }
 0x867   : > { %3820 = vst [vmem:[%s6965_s15 + $0x38] sm:$0xff] %v3812_v43 }
 0x868   : > { %3818 = vst [vmem:[%s6965_s15 + $0x28] sm:$0xff] %v3810_v29 }
 0x869 PF: > { %s19_s30 = sadd.s32 1, %s4994_s30  }
 0x86a   : > { %p16_p5 = scmp.ge.s32.totalorder %s19_s30, 4  }
 0x86c   :  { %18 = sbr.rel (!%p16_p5) target bundleno = 1 (0x1), region = 92 }

// kernel: _lambda_.8
= control target key start
LH: loop header
LB: loop body
LE: loop exit
PB: predicated region body
PF: predicated region fallthrough
CT: control target
= control target key end

     0   :  { %s681_s18 = smov 0   ;;  %s738_s0 = inlined_call_operand.vmem [shape: f32[2,64,35], index: 0, kind: input, shape index: {}]   ;;  %s739_s1 = inlined_call_operand.vmem [shape: bf16[35,64], index: 1, kind: input, shape index: {}]   ;;  %s740_s2 = inlined_call_operand.vmem [shape: f32[1,64], index: 2, kind: input, shape index: {}]   ;;  %s741_s3 = inlined_call_operand.vmem [shape: bf16[64,128], index: 3, kind: input, shape index: {}]   ;;  %s742_s4 = inlined_call_operand.vmem [shape: f32[1,128], index: 4, kind: input, shape index: {}]   ;;  %s743_s5 = inlined_call_operand.vmem [shape: f32[32,128], index: 5, kind: output, shape index: {}]  }
   0x1 LB: > { %s687_s19 = sadd.s32 4294967295, %s648_s18   ;;  %p556_p0 = scmp.ge.s32.totalorder %s648_s18, 1  ;;  %s648_s18 = sphi %s681_s18, %s15_s18  }
   0x2   : > { %p187_p1 = scmp.lt.s32.totalorder %s648_s18, 3 }
   0x4   : > { %p188_p2 = pnand %p556_p0, %p187_p1 }
   0x5   : > { %v635_v0 = vld [vmem:[%s739_s1] sm:$0xff] (!%p188_p2)   ;;  %vm279_vm0 = vcmask (!%p188_p2), 1040384   ;;  %v636_v1 = vld [vmem:[%s739_s1 + $0x8] sm:$0xff] (!%p188_p2)   ;;  %vm280_vm1 = vcmask (!%p188_p2), 1041408   ;;  %v650_v3 = vmov (!%p188_p2), 65535   ;;  %p215_p3 = scmp.lt.s32.totalorder (!%p188_p2), %s687_s19, 1 }
   0x6   : > { %191 = sbr.rel (%p188_p2) target bundleno = 475 (0x1db), region = 40  ;;  %596 = vmatprep.subr.bf16.mxu0 (!%p188_p2), %v635_v0  ;;  %v637_v2 = vld [vmem:[%s739_s1 + $0x10] ss:$0 sps:$4 sm:$0x33] (!%p188_p2)   ;;  %v281_v4 = vsel (!%p188_p2), %vm279_vm0, 4294967295, %v650_v3  ;;  %v638_v5 = vld [vmem:[%s741_s3] sm:$0xff] (!%p188_p2)  }
   0x7   : > { %597 = vmatpush3.bf16.msra.mxu0 (!%p188_p2), %v635_v0  ;;  %v282_v6 = vsel (!%p188_p2), %vm280_vm1, %v281_v4, 0  ;;  %v639_v7 = vld [vmem:[%s741_s3 + $0x8] sm:$0xff] (!%p188_p2)   ;;  %610 = vmatprep.subr.bf16.mxu1 (!%p188_p2), %v638_v5  ;;  %vm266_vm2 = vcmask (!%p188_p2), 285696   ;;  %v640_v21 = vld [vmem:[%s741_s3 + $0x10] sm:$0xff] (!%p188_p2)   ;;  %v641_v22 = vld [vmem:[%s741_s3 + $0x18] sm:$0xff] (!%p188_p2)   ;;  %vm402_vm3 = vcmask (!%p188_p2), 523264  }
   0x8   : > { %598 = vmatprep.subr.bf16.mxu0 (!%p188_p2), %v636_v1  ;;  %v284_v8 = vand.u32 (!%p188_p2), %v637_v2, %v282_v6  ;;  %611 = vmatpush3.bf16.msra.mxu1 (!%p188_p2), %v638_v5  ;;  %v561_v23 = vld [vmem:[%s740_s2] ss:$0 sm:$0xff] (!%p188_p2)  ;;  %s559_s16 = sshll.u32 (!%p188_p2), %s687_s19, 1 }
   0x9   : > { %612 = vmatprep.subr.bf16.mxu1 (!%p188_p2), %v639_v7  ;;  %v569_v56 = vld [vmem:[%s742_s4] ss:$0 sm:$0xff] (!%p188_p2)  ;;  %p221_p4 = scmp.lt.s32.totalorder (!%p188_p2), %s559_s16, 3 }
   0xb   : > { %599 = vmatpush3.bf16.msra.mxu0 (!%p188_p2), %v636_v1 }
   0xc   : > { %600 = vmatprep.subr.bf16.mxu0 (!%p188_p2), %v284_v8  ;;  %613 = vmatpush3.bf16.msra.mxu1 (!%p188_p2), %v639_v7 }
   0xd   : > { %s216_s30 = scalar_select %p215_p3, %s687_s19, 1  ;;  %614 = vmatprep.subr.bf16.mxu1 %v640_v21 }
   0xe   : > { %s745_s16 = smov (!%p221_p4, %s559_s16), 3 }
   0xf   : > { %s580_s6 = sshll.u32 %s216_s30, 6  ;;  %601 = vmatpush3.bf16.msra.mxu0 %v284_v8  ;;  %s560_s19 = sshll.u32 %s745_s16, 3 }
  0x10   : > { %s219_s9 = scalar_lea.vmem %s738_s0, %s580_s6  ;;  %615 = vmatpush3.bf16.msra.mxu1 %v640_v21  ;;  %s224_s23 = scalar_lea.vmem %s743_s5, %s560_s19 }
  0x11   : > { %v227_v9 = vld [vmem:[%s219_s9] sm:$0xff]  ;;  %v228_v10 = vld [vmem:[%s219_s9 + $0x8] sm:$0xff]  ;;  %v229_v11 = vld [vmem:[%s219_s9 + $0x10] sm:$0xff]  ;;  %616 = vmatprep.subr.bf16.mxu1 %v641_v22 }
  0x12   : > { %v235_v12 = vpack.c.bf16 %v228_v10, %v227_v9  ;;  %v230_v13 = vld [vmem:[%s219_s9 + $0x18] sm:$0xff]  ;;  %v231_v14 = vld [vmem:[%s219_s9 + $0x20] sm:$0xff]  ;;  %v232_v15 = vld [vmem:[%s219_s9 + $0x28] sm:$0xff] }
  0x13   : > { %v236_v16 = vpack.c.bf16 %v230_v13, %v229_v11  ;;  %v237_v17 = vpack.c.bf16 %v232_v15, %v231_v14  ;;  %v233_v18 = vld [vmem:[%s219_s9 + $0x30] sm:$0xff]  ;;  %v234_v19 = vld [vmem:[%s219_s9 + $0x38] sm:$0xff] }
  0x14   : > { %602 = vmatprep.mubr.msk.bf16.mxu0 %vm266_vm2, %v235_v12  ;;  %v238_v20 = vpack.c.bf16 %v234_v19, %v233_v18  ;;  %617 = vmatpush3.bf16.msra.mxu1 %v641_v22 }
  0x15   : > { %603 = vmatmul.mubr.msk.bf16.vlgmr.msra.gmra.mrb[0].mxu0 %vm266_vm2, %v236_v16 }
  0x16   : > { %606 = vmatprep.mubr.msk.bf16.mxu0 %vm266_vm2, %v237_v17 }
  0x1d   : > { %607 = vmatmul.mubr.msk.bf16.gmra.mrb[4].mxu0 %vm266_vm2, %v238_v20 }
  0xe8   : > { %v604_v24 = vpop.f32.mrb[0].mxu0 }
  0xe9   : > { %v329_v25 = vadd.f32 %v604_v24, %v561_v23  ;;  %v320_v26 = vpop.f32.mrb[1].mxu0 }
  0xea   : > { %v321_v27 = vadd.f32 %v561_v23, %v320_v26  ;;  %v605_v28 = vpop.f32.mrb[2].mxu0 }
  0xeb   : > { %v332_v29 = vadd.f32 %v605_v28, %v561_v23  ;;  %v323_v30 = vpop.f32.mrb[3].mxu0  ;;  %v353_v32 = vmax.f32 %v329_v25, 0.0 }
  0xec   : > { %v324_v31 = vadd.f32 %v561_v23, %v323_v30  ;;  %v351_v34 = vmax.f32 %v321_v27, 0.0 }
  0xed   : > { %v354_v33 = vmax.f32 %v332_v29, 0.0 }
  0xee   : > { %v352_v35 = vmax.f32 %v324_v31, 0.0 }
  0xef   : > { %v360_v36 = vpack.c.bf16 %v354_v33, %v353_v32 }
  0xf0   : > { %v608_v37 = vpop.f32.mrb[4].mxu0  ;;  %v359_v38 = vpack.c.bf16 %v352_v35, %v351_v34 }
  0xf1   : > { %v345_v39 = vadd.f32 %v608_v37, %v561_v23  ;;  %v336_v40 = vpop.f32.mrb[5].mxu0 }
  0xf2   : > { %v337_v41 = vadd.f32 %v561_v23, %v336_v40  ;;  %v609_v42 = vpop.f32.mrb[6].mxu0  ;;  %618 = vmatprep.mubr.msk.bf16.mxu1 %vm402_vm3, %v359_v38 }
  0xf3   : > { %v348_v43 = vadd.f32 %v609_v42, %v561_v23  ;;  %v339_v44 = vpop.f32.mrb[7].mxu0  ;;  %619 = vmatmul.mubr.msk.bf16.vlgmr.msra.gmra.mrb[0].mxu1 %vm402_vm3, %v360_v36  ;;  %v357_v46 = vmax.f32 %v345_v39, 0.0 }
  0xf4   : > { %v340_v45 = vadd.f32 %v561_v23, %v339_v44  ;;  %v355_v48 = vmax.f32 %v337_v41, 0.0 }
  0xf5   : > { %v358_v47 = vmax.f32 %v348_v43, 0.0 }
  0xf6   : > { %v356_v49 = vmax.f32 %v340_v45, 0.0 }
  0xf7   : > { %v362_v50 = vpack.c.bf16 %v358_v47, %v357_v46 }
  0xf8   : > { %v361_v51 = vpack.c.bf16 %v356_v49, %v355_v48 }
  0xfa   : > { %622 = vmatprep.mubr.msk.bf16.mxu1 %vm402_vm3, %v361_v51 }
  0xfb   : > { %623 = vmatmul.mubr.msk.bf16.gmra.mrb[4].mxu1 %vm402_vm3, %v362_v50 }
 0x1c6   : > { %v620_v52 = vpop.f32.mrb[0].mxu1 }
 0x1c7   : > { %v449_v53 = vpop.f32.mrb[1].mxu1  ;;  %v458_v57 = vadd.f32 %v620_v52, %v569_v56 }
 0x1c8   : > { %v621_v54 = vpop.f32.mrb[2].mxu1  ;;  %v450_v58 = vadd.f32 %v569_v56, %v449_v53 }
 0x1c9   : > { %v452_v55 = vpop.f32.mrb[3].mxu1  ;;  %v461_v60 = vadd.f32 %v621_v54, %v569_v56  ;;  %v482_v2 = vmax.f32 %v458_v57, 0.0 }
 0x1ca   : > { %v453_v63 = vadd.f32 %v569_v56, %v452_v55  ;;  %v480_v6 = vmax.f32 %v450_v58, 0.0 }
 0x1cb   : > { %v483_v9 = vmax.f32 %v461_v60, 0.0 }
 0x1cc   : > { %v481_v12 = vmax.f32 %v453_v63, 0.0 }
 0x1ce   : > { %v624_v59 = vpop.f32.mrb[4].mxu1 }
 0x1cf   : > { %v474_v61 = vadd.f32 %v624_v59, %v569_v56  ;;  %v465_v62 = vpop.f32.mrb[5].mxu1 }
 0x1d0   : > { %v466_v0 = vadd.f32 %v569_v56, %v465_v62  ;;  %v625_v1 = vpop.f32.mrb[6].mxu1 }
 0x1d1   : > { %v486_v3 = vmax.f32 %v474_v61, 0.0  ;;  %v477_v4 = vadd.f32 %v625_v1, %v569_v56  ;;  %v468_v5 = vpop.f32.mrb[7].mxu1 }
 0x1d2   : > { %v484_v7 = vmax.f32 %v466_v0, 0.0  ;;  %v469_v8 = vadd.f32 %v569_v56, %v468_v5 }
 0x1d3   : > { %v489_v10 = vmax.f32 %v482_v2, %v486_v3  ;;  %v487_v11 = vmax.f32 %v477_v4, 0.0 }
 0x1d4   : > { %v488_v13 = vmax.f32 %v480_v6, %v484_v7  ;;  %v485_v14 = vmax.f32 %v469_v8, 0.0 }
 0x1d5   : > { %v492_v15 = vmax.f32 %v483_v9, %v487_v11 }
 0x1d6   : > { %v490_v16 = vmax.f32 %v488_v13, %v489_v10  ;;  %v491_v17 = vmax.f32 %v481_v12, %v485_v14 }
 0x1d8   : > { %494 = vst [vmem:[%s224_s23] sm:$0xff] %v490_v16  ;;  %v493_v18 = vmax.f32 %v491_v17, %v492_v15 }
 0x1da   : > { %495 = vst [vmem:[%s224_s23 + $0x8] sm:$0xff] %v493_v18 }
 0x1db PF: > { %s15_s18 = sadd.s32 1, %s648_s18  }
 0x1dc   : > { %p12_p5 = scmp.ge.s32.totalorder %s15_s18, 4  }
 0x1de   :  { %14 = sbr.rel (!%p12_p5) target bundleno = 1 (0x1), region = 70 }

// kernel: custom-call.17
= control target key start
LH: loop header
LB: loop body
LE: loop exit
PB: predicated region body
PF: predicated region fallthrough
CT: control target
= control target key end

     0   :  { %s6_s0 = inlined_call_operand.vmem [shape: f32[2,16], index: 0, kind: output, shape index: {}]  }

// kernel: _lambda_.9
= control target key start
LH: loop header
LB: loop body
LE: loop exit
PB: predicated region body
PF: predicated region fallthrough
CT: control target
= control target key end

     0   :  { %s2275_s30 = smov 0   ;;  %s2714_s0 = inlined_call_operand.vmem [shape: f32[32,128], index: 0, kind: input, shape index: {}, may-alias: {0,1}]   ;;  %s2715_s1 = inlined_call_operand.vmem [shape: f32[32,128], index: 1, kind: input, shape index: {}, may-alias: {0,1}]   ;;  %s2716_s2 = inlined_call_operand.vmem [shape: f32[32,8], index: 2, kind: input, shape index: {}, may-alias: {2,3}]   ;;  %s2717_s3 = inlined_call_operand.vmem [shape: f32[32,8], index: 3, kind: input, shape index: {}, may-alias: {2,3}]   ;;  %s2718_s4 = inlined_call_operand.vmem [shape: s32[2,4,16], index: 4, kind: input, shape index: {}]   ;;  %s2719_s5 = inlined_call_operand.vmem [shape: bf16[128,32], index: 5, kind: input, shape index: {}]   ;;  %s2720_s6 = inlined_call_operand.vmem [shape: f32[3,32], index: 6, kind: input, shape index: {}]   ;;  %s2721_s7 = inlined_call_operand.vmem [shape: bf16[32,320], index: 7, kind: input, shape index: {}]   ;;  %s2722_s8 = inlined_call_operand.vmem [shape: f32[8,128], index: 8, kind: input, shape index: {}]   ;;  %s2723_s9 = inlined_call_operand.vmem [shape: f32[32,128], index: 9, kind: output, shape index: {}]  }
   0x1 LB: > { %s2281_s10 = sadd.s32 4294967295, %s2215_s30   ;;  %p1826_p0 = scmp.ge.s32.totalorder %s2215_s30, 1  ;;  %s2215_s30 = sphi %s2275_s30, %s19_s30  }
   0x2   : > { %p308_p1 = scmp.lt.s32.totalorder %s2215_s30, 3 }
   0x4   : > { %p309_p2 = pnand %p1826_p0, %p308_p1 }
   0x5   : > { %v2173_v0 = vld [vmem:[%s2719_s5] sm:$0xff] (!%p309_p2)   ;;  %v2217_v1 = vmov (!%p309_p2), 0.0   ;;  %v2174_v2 = vld [vmem:[%s2719_s5 + $0x8] sm:$0xff] (!%p309_p2)   ;;  %v2175_v3 = vld [vmem:[%s2719_s5 + $0x10] sm:$0xff] (!%p309_p2)   ;;  %vm2218_vm0 = vmmov (!%p309_p2), 0   ;;  %v729_v4 = vlaneseq (!%p309_p2)  ;;  %p365_p3 = scmp.lt.s32.totalorder (!%p309_p2), %s2281_s10, 1 }
   0x6   : > { %312 = sbr.rel (%p309_p2) target bundleno = 1847 (0x737), region = 56  ;;  %1976 = vmatprep.subr.bf16.mxu0 (!%p309_p2), %v2217_v1  ;;  %1996 = vmatprep.subr.bf16.mxu1 (!%p309_p2), %v2173_v0  ;;  %v2176_v5 = vld [vmem:[%s2719_s5 + $0x18] sm:$0xff] (!%p309_p2)   ;;  %s1827_s19 = sshll.u32 (!%p309_p2), %s2281_s10, 1  ;;  %v489_v6 = vld [vmem:[%s2715_s1] sm:$0xff] (!%p309_p2)  ;;  %v490_v7 = vld [vmem:[%s2715_s1 + $0x8] sm:$0xff] (!%p309_p2)  ;;  %vm561_vm9 = vcmask (!%p309_p2), 261120  }
   0x7   : > { %1977 = vmatpush3.bf16.msra.mxu0 (!%p309_p2), %v2173_v0  ;;  %1997 = vmatpush3.bf16.msra.mxu1 (!%p309_p2), %v2173_v0  ;;  %v732_v8 = vshrl.u32 (!%p309_p2), %v729_v4, 7  ;;  %v493_v9 = vpack.c.bf16 (!%p309_p2), %v490_v7, %v489_v6  ;;  %v2315_v10 = vld [vmem:[%s2721_s7 + $0x4] ss:$12 sps:$4 sm:$0xff] (!%p309_p2)   ;;  %p2318_p4 = scmp.lt.s32.totalorder (!%p309_p2), %s1827_s19, 3  ;;  %v2328_v12 = vld [vmem:[%s2721_s7 + $0x1c] ss:$12 sps:$4 sm:$0xff] (!%p309_p2)  }
   0x8   : > { %1978 = vmatprep.subr.bf16.mxu0 (!%p309_p2), %v2217_v1  ;;  %1998 = vmatprep.subr.bf16.mxu1 (!%p309_p2), %v2174_v2  ;;  %v2177_v11 = vld [vmem:[%s2719_s5 + $0x20] sm:$0xff] (!%p309_p2)   ;;  %s2219_s13 = smov (!%p309_p2), 96   ;;  %v2178_v17 = vld [vmem:[%s2719_s5 + $0x28] sm:$0xff] (!%p309_p2)   ;;  %v2179_v20 = vld [vmem:[%s2719_s5 + $0x30] sm:$0xff] (!%p309_p2)   ;;  %s2220_s11 = smov (!%p309_p2), 64   ;;  %v730_v34 = vand.u32 (!%p309_p2), 127, %v729_v4 }
   0x9   : > { %1992 = vmatprep.mubr.msk.bf16.mxu0 (!%p309_p2), %vm2218_vm0, %v2217_v1  ;;  %2012 = vmatprep.mubr.bf16.mxu1 (!%p309_p2), %v493_v9  ;;  %v733_v13 = vsub.s32 (!%p309_p2), 0, %v732_v8  ;;  %v744_v14 = vsub.s32 (!%p309_p2), 1, %v732_v8  ;;  %v755_v19 = vsub.s32 (!%p309_p2), 2, %v732_v8  ;;  %v766_v22 = vsub.s32 (!%p309_p2), 3, %v732_v8  ;;  %v2180_v23 = vld [vmem:[%s2719_s5 + $0x38] sm:$0xff] (!%p309_p2)   ;;  %v491_v27 = vld [vmem:[%s2715_s1 + $0x10] sm:$0xff] (!%p309_p2) }
   0xa   : > { %608 = vrot.lane.b32.xlu0 (!%p309_p2), %v2315_v10, %s2219_s13  ;;  %v492_v28 = vld [vmem:[%s2715_s1 + $0x18] sm:$0xff] (!%p309_p2)  ;;  %v1834_v52 = vld [vmem:[%s2722_s8] ss:$0 sm:$0xff] (!%p309_p2)  ;;  %s2221_s25 = smov (!%p309_p2), 32  }
   0xb   : > { %1979 = vmatpush3.bf16.msra.mxu0 (!%p309_p2), %v2174_v2  ;;  %1999 = vmatpush3.bf16.msra.mxu1 (!%p309_p2), %v2174_v2  ;;  %v494_v30 = vpack.c.bf16 (!%p309_p2), %v492_v28, %v491_v27 }
   0xc   : > { %1980 = vmatprep.subr.bf16.mxu0 (!%p309_p2), %v2217_v1  ;;  %2000 = vmatprep.subr.bf16.mxu1 (!%p309_p2), %v2175_v3 }
   0xd   : > { %s2726_s10 = smov (!%p365_p3, %s2281_s10), 1  ;;  %s2728_s19 = smov (!%p2318_p4, %s1827_s19), 3 }
   0xe   : > { %s1831_s12 = sshll.u32 %s2726_s10, 2  ;;  %610 = vrot.lane.b32.xlu0 %v2328_v12, %s2219_s13  ;;  %s2347_s21 = sshll.u32 %s2728_s19, 3 }
   0xf   : > { %1981 = vmatpush3.bf16.msra.mxu0 %v2175_v3  ;;  %2001 = vmatpush3.bf16.msra.mxu1 %v2175_v3  ;;  %s368_s16 = scalar_lea.vmem %s2718_s4, %s1831_s12  ;;  %s2354_s24 = scalar_lea.vmem %s2714_s0, %s2347_s21 }
  0x10   : > { %1982 = vmatprep.subr.bf16.mxu0 %v2217_v1  ;;  %2002 = vmatprep.subr.bf16.mxu1 %v2176_v5  ;;  %v728_v15 = vld [vmem:[%s368_s16] sm:$0xf]  ;;  %v394_v26 = vld [vmem:[%s2354_s24 + $0x8] sm:$0xff]  ;;  %s363_s27 = scalar_lea.vmem %s2716_s2, %s2347_s21  ;;  %s373_s18 = scalar_lea.vmem %s2723_s9, %s2347_s21 }
  0x11   : > { %v734_v16 = vrot.slane %v728_v15, %v733_v13  ;;  %v745_v18 = vrot.slane %v728_v15, %v744_v14  ;;  %v756_v21 = vrot.slane %v728_v15, %v755_v19  ;;  %v767_v24 = vrot.slane %v728_v15, %v766_v22  ;;  %v393_v25 = vld [vmem:[%s2354_s24] sm:$0xff] }
  0x12   : > { %v395_v29 = vpack.c.bf16 %v394_v26, %v393_v25  ;;  %v946_v25 = vld [vmem:[%s2717_s3 + $0x8] sm:$0xff] }
  0x13   : > { %1983 = vmatpush3.bf16.msra.mxu0 %v2176_v5  ;;  %2003 = vmatpush3.bf16.msra.mxu1 %v2176_v5 }
  0x14   : > { %1984 = vmatprep.subr.bf16.mxu0 %v2217_v1  ;;  %2004 = vmatprep.subr.bf16.mxu1 %v2177_v11 }
  0x15   : > { %736 = vbcast.lane.b32.xlu1 %v734_v16, 256  ;;  %747 = vbcast.lane.b32.xlu0 %v745_v18, 256 }
  0x17   : > { %1985 = vmatpush3.bf16.msra.mxu0 %v2177_v11  ;;  %2005 = vmatpush3.bf16.msra.mxu1 %v2177_v11 }
  0x18   : > { %1986 = vmatprep.subr.bf16.mxu0 %v2217_v1  ;;  %2006 = vmatprep.subr.bf16.mxu1 %v2178_v17 }
  0x19   : > { %740 = vbcast.lane.b32.xlu1 %v734_v16, 264  ;;  %758 = vbcast.lane.b32.xlu0 %v756_v21, 256 }
  0x1b   : > { %1987 = vmatpush3.bf16.msra.mxu0 %v2178_v17  ;;  %2007 = vmatpush3.bf16.msra.mxu1 %v2178_v17 }
  0x1c   : > { %1988 = vmatprep.subr.bf16.mxu0 %v2217_v1  ;;  %2008 = vmatprep.subr.bf16.mxu1 %v2179_v20 }
  0x1d   : > { %751 = vbcast.lane.b32.xlu1 %v745_v18, 264  ;;  %769 = vbcast.lane.b32.xlu0 %v767_v24, 256 }
  0x1f   : > { %1989 = vmatpush3.bf16.msra.mxu0 %v2179_v20  ;;  %2009 = vmatpush3.bf16.msra.mxu1 %v2179_v20 }
  0x20   : > { %1990 = vmatprep.subr.bf16.mxu0 %v2217_v1  ;;  %2010 = vmatprep.subr.bf16.mxu1 %v2180_v23 }
  0x21   : > { %762 = vbcast.lane.b32.xlu1 %v756_v21, 264  ;;  %671 = vrot.lane.b32.xlu0 %v2315_v10, %s2220_s11 }
  0x23   : > { %1991 = vmatpush3.bf16.msra.mxu0 %v2180_v23  ;;  %2011 = vmatpush3.bf16.msra.mxu1 %v2180_v23 }
  0x24   : > { %2016 = vmatprep.subr.bf16.mxu0 %v2217_v1 }
  0x25   : > { %773 = vbcast.lane.b32.xlu1 %v767_v24, 264  ;;  %v945_v24 = vld [vmem:[%s2717_s3] sm:$0xff] }
  0x26   : > { %1993 = vmatmul.mubr.bf16.vlgmr.msra.gmra.mrb[0].mxu0 %v395_v29  ;;  %2013 = vmatmul.mubr.bf16.vlgmr.msra.gmra.mrb[0].mxu1 %v494_v30  ;;  %v2128_v30 = vpack.c.bf16 %v946_v25, %v945_v24 }
  0x27   : > { %2017 = vmatpush3.bf16.msra.mxu0 %v2315_v10  ;;  %2020 = vmatprep.mubr.msk.bf16.mxu0 %vm2218_vm0, %v2217_v1 }
  0x28   : > { %2018 = vmatprep.subr.bf16.mxu0 %v2217_v1 }
  0x29   : > { %673 = vrot.lane.b32.xlu1 %v2328_v12, %s2220_s11 }
  0x2b   : > { %2019 = vmatpush3.bf16.msra.mxu0 %v2328_v12 }
  0x2d   : > { %1277 = vrot.lane.b32.xlu1 %v2315_v10, %s2221_s25 }
  0x7c   : > { %v609_v31 = vpop.permute.xlu0 %608 }
  0x7d   : > { %2024 = vmatprep.subr.bf16.mxu1 %v609_v31 }
  0x7e   : > { %2025 = vmatpush3.bf16.msra.mxu1 %v609_v31 }
  0x80   : > { %v611_v32 = vpop.permute.xlu0 %610 }
  0x81   : > { %2026 = vmatprep.subr.bf16.mxu1 %v611_v32 }
  0x82   : > { %2027 = vmatpush3.bf16.msra.mxu1 %v611_v32  ;;  %v947_v32 = vld [vmem:[%s2717_s3 + $0x10] sm:$0xff] }
  0x87   : > { %v737_v33 = vpop.permute.xlu1 %736  ;;  %v748_v35 = vpop.permute.xlu0 %747 }
  0x88   : > { %vm777_vm1 = vcmp.eq.s32.totalorder %v748_v35, %v730_v34  ;;  %vm775_vm7 = vcmp.eq.s32.totalorder %v737_v33, %v730_v34  ;;  %v948_v33 = vld [vmem:[%s2717_s3 + $0x18] sm:$0xff]  ;;  %v2222_v35 = vmov 1  }
  0x89   : > { %v2378_v37 = vsel %vm777_vm1, 1.0, %v2217_v1  ;;  %v1850_v62 = vsel %vm775_vm7, 1.0, %v2217_v1  ;;  %2153 = vset.pattern.permute.xlu0 %v2222_v35 }
  0x8b   : > { %v741_v36 = vpop.permute.xlu1 %740  ;;  %v759_v38 = vpop.permute.xlu0 %758 }
  0x8c   : > { %vm779_vm2 = vcmp.eq.s32.totalorder %v759_v38, %v730_v34  ;;  %vm776_vm8 = vcmp.eq.s32.totalorder %v741_v36, %v730_v34  ;;  %v2223_v36 = vmov 0  }
  0x8d   : > { %v2388_v42 = vsel %vm779_vm2, 1.0, %v2217_v1  ;;  %v1851_v63 = vsel %vm776_vm8, 1.0, %v2217_v1  ;;  %2152 = vset.pattern.permute.xlu1 %v2223_v36 }
  0x8e   : > { %v799_v8 = vpack.c.bf16 %v1851_v63, %v1850_v62 }
  0x8f   : > { %v752_v39 = vpop.permute.xlu1 %751  ;;  %v770_v43 = vpop.permute.xlu0 %769 }
  0x90   : > { %vm778_vm3 = vcmp.eq.s32.totalorder %v752_v39, %v730_v34  ;;  %vm781_vm4 = vcmp.eq.s32.totalorder %v770_v43, %v730_v34 }
  0x91   : > { %v2381_v40 = vsel %vm778_vm3, 1.0, %v2217_v1  ;;  %v2398_v48 = vsel %vm781_vm4, 1.0, %v2217_v1 }
  0x92   : > { %v2385_v41 = vpack.c.bf16 %v2381_v40, %v2378_v37 }
  0x93   : > { %v763_v44 = vpop.permute.xlu1 %762  ;;  %v672_v47 = vpop.permute.xlu0 %671 }
  0x94   : > { %vm780_vm5 = vcmp.eq.s32.totalorder %v763_v44, %v730_v34  ;;  %2032 = vmatprep.subr.bf16.mxu0 %v672_v47 }
  0x95   : > { %v2391_v45 = vsel %vm780_vm5, 1.0, %v2217_v1 }
  0x96   : > { %v2395_v46 = vpack.c.bf16 %v2391_v45, %v2388_v42 }
  0x97   : > { %v774_v49 = vpop.permute.xlu1 %773 }
  0x98   : > { %vm782_vm6 = vcmp.eq.s32.totalorder %v774_v49, %v730_v34  ;;  %v2132_v34 = vpack.c.bf16 %v948_v33, %v947_v32 }
  0x99   : > { %v2401_v50 = vsel %vm782_vm6, 1.0, %v2217_v1 }
  0x9a   : > { %v2405_v51 = vpack.c.bf16 %v2401_v50, %v2398_v48 }
  0x9b   : > { %v674_v11 = vpop.permute.xlu1 %673 }
  0x9f   : > { %v1278_v38 = vpop.permute.xlu1 %1277 }
  0xf9   : > { %v482_v53 = vpop.f32.mrb[0].mxu0  ;;  %v2014_v56 = vpop.f32.mrb[0].mxu1 }
  0xfa   : > { %v483_v54 = vadd.f32 %v1834_v52, %v482_v53  ;;  %v1994_v55 = vpop.f32.mrb[1].mxu0  ;;  %v529_v57 = vpop.f32.mrb[1].mxu1  ;;  %v538_v0 = vadd.f32 %v2014_v56, %v1834_v52 }
  0xfb   : > { %v485_v58 = vpop.f32.mrb[2].mxu0  ;;  %v2015_v60 = vpop.f32.mrb[2].mxu1  ;;  %v530_v4 = vadd.f32 %v1834_v52, %v529_v57 }
  0xfc   : > { %v486_v59 = vadd.f32 %v1834_v52, %v485_v58  ;;  %v1995_v61 = vpop.f32.mrb[3].mxu0  ;;  %v541_v2 = vadd.f32 %v2015_v60, %v1834_v52  ;;  %v532_v3 = vpop.f32.mrb[3].mxu1 }
  0xfd   : > { %v533_v6 = vadd.f32 %v1834_v52, %v532_v3 }
  0xfe   : > { %v548_v5 = vpack.c.bf16 %v486_v59, %v483_v54  ;;  %v607_v7 = vpack.c.bf16 %v541_v2, %v538_v0  ;;  %v1079_v59 = vld [vmem:[%s363_s27 + $0x8] sm:$0xff]  ;;  %v1078_v2 = vld [vmem:[%s363_s27] sm:$0xff] }
  0xff   : > { %v606_v9 = vpack.c.bf16 %v533_v6, %v530_v4  ;;  %v2224_v6 = vmov 2  }
 0x100   : > { %2021 = vmatmul.mubr.msk.bf16.vlgmr.msra.gmra.mrb[4].mxu0 %vm561_vm9, %v548_v5 }
 0x101   : > { %2033 = vmatpush3.bf16.msra.mxu0 %v672_v47  ;;  %2028 = vmatprep.mubr.msk.bf16.mxu1 %vm561_vm9, %v606_v9 }
 0x102   : > { %2036 = vmatprep.mubr.msk.bf16.mxu0 %vm561_vm9, %v606_v9  ;;  %2029 = vmatmul.mubr.msk.bf16.vlgmr.msra.gmra.mrb[4].mxu1 %vm561_vm9, %v607_v7 }
 0x103   : > { %2034 = vmatprep.subr.bf16.mxu0 %v674_v11  ;;  %2044 = vmatprep.mubr.msk.bf16.mxu1 %vm561_vm9, %v799_v8 }
 0x105   : > { %2035 = vmatpush3.bf16.msra.mxu0 %v674_v11 }
 0x108   : > { %2037 = vmatmul.mubr.msk.bf16.vlgmr.msra.gmra.mrb[8].mxu0 %vm561_vm9, %v607_v7 }
 0x109   : > { %2056 = vmatprep.mubr.msk.bf16.mxu0 %vm561_vm9, %v799_v8 }
 0x1d3   : > { %v2419_v13 = vpop.f32.mrb[4].mxu0 }
 0x1d4   : > { %v2022_v14 = vpop.f32.mrb[5].mxu0 }
 0x1d5   : > { %v2421_v15 = vpop.f32.mrb[6].mxu0  ;;  %v2030_v16 = vpop.f32.mrb[4].mxu1 }
 0x1d6   : > { %v2023_v17 = vpop.f32.mrb[7].mxu0  ;;  %v654_v18 = vpop.f32.mrb[5].mxu1 }
 0x1d7   : > { %v2031_v19 = vpop.f32.mrb[6].mxu1 }
 0x1d8   : > { %v670_v20 = vpack.c.bf16 %v2031_v19, %v2030_v16  ;;  %v657_v21 = vpop.f32.mrb[7].mxu1 }
 0x1d9   : > { %v669_v22 = vpack.c.bf16 %v657_v21, %v654_v18  ;;  %v2183_v21 = vld [vmem:[%s2721_s7 + $0x8] ss:$12 sps:$4 sm:$0xff]  }
 0x1db   : > { %v2038_v23 = vpop.f32.mrb[8].mxu0  ;;  %2040 = vmatprep.subr.bf16.mxu1 %v669_v22 }
 0x1dc   : > { %v711_v26 = vpop.f32.mrb[9].mxu0  ;;  %2041 = vmatpush3.bf16.msra.mxu1 %v669_v22  ;;  %v2537_v22 = vld [vmem:[%s2720_s6] ss:$0 sm:$0xff] }
 0x1dd   : > { %v2039_v27 = vpop.f32.mrb[10].mxu0  ;;  %2042 = vmatprep.subr.bf16.mxu1 %v670_v20 }
 0x1de   : > { %v727_v28 = vpack.c.bf16 %v2039_v27, %v2038_v23  ;;  %v714_v29 = vpop.f32.mrb[11].mxu0 }
 0x1df   : > { %v726_v31 = vpack.c.bf16 %v714_v29, %v711_v26  ;;  %v2548_v26 = vld [vmem:[%s2720_s6 + $0x1] ss:$0 sm:$0xff] }
 0x1e0   : > { %2043 = vmatpush3.bf16.msra.mxu1 %v670_v20 }
 0x1e1   : > { %2052 = vmatprep.subr.bf16.mxu0 %v726_v31  ;;  %2129 = vmatprep.subr.bf16.mxu1 %v2128_v30 }
 0x1e2   : > { %2053 = vmatpush3.bf16.msra.mxu0 %v726_v31 }
 0x1e3   : > { %2054 = vmatprep.subr.bf16.mxu0 %v727_v28  ;;  %2045 = vmatmul.mubr.msk.bf16.vlgmr.msra.gmra.mrb[8].mxu1 %vm561_vm9, %v2385_v41 }
 0x1e4   : > { %2048 = vmatprep.mubr.msk.bf16.mxu1 %vm561_vm9, %v2395_v46  ;;  %2131 = vmatpush3.bf16.msra.mxu1 %v2128_v30  ;;  %v2554_v30 = vld [vmem:[%s2720_s6 + $0x2] ss:$0 sm:$0xff] }
 0x1e5   : > { %2133 = vmatprep.subr.bf16.mxu1 %v2132_v34 }
 0x1e6   : > { %2055 = vmatpush3.bf16.msra.mxu0 %v727_v28 }
 0x1e7   : > { %2084 = vmatprep.subr.bf16.mxu0 %v1278_v38 }
 0x1e8   : > { %2135 = vmatpush3.bf16.msra.mxu1 %v2132_v34 }
 0x1e9   : > { %2057 = vmatmul.mubr.msk.bf16.vlgmr.msra.gmra.mrb[12].mxu0 %vm561_vm9, %v2385_v41  ;;  %2096 = vmatprep.subr.bf16.mxu1 %v2183_v21 }
 0x1ea   : > { %2060 = vmatprep.mubr.msk.bf16.mxu0 %vm561_vm9, %v2395_v46  ;;  %2085 = vmatpush3.bf16.msra.mxu0 %v1278_v38 }
 0x1eb   : > { %2049 = vmatmul.mubr.msk.bf16.gmra.mrb[12].mxu1 %vm561_vm9, %v2405_v51 }
 0x1ec   : > { %2072 = vmatprep.mubr.msk.f32.mxu1 %vm561_vm9, %v1850_v62 }
 0x1f1   : > { %2061 = vmatmul.mubr.msk.bf16.gmra.mrb[16].mxu0 %vm561_vm9, %v2405_v51 }
 0x1f3   : > { %2073 = vmatmul.mubr.msk.f32.vlgmr.msra.gmra.mrb[16].mxu1 %vm561_vm9, %v1851_v63 }
 0x1f4   : > { %2075 = vmatprep.mubr.msk.f32.mxu1 %vm561_vm9, %v2378_v37  ;;  %2097 = vmatpush3.bf16.msra.mxu1 %v2183_v21 }
 0x1f7   : > { %2076 = vmatmul.mubr.msk.f32.gmra.mrb[18].mxu1 %vm561_vm9, %v2381_v40 }
 0x1f8   : > { %2078 = vmatprep.mubr.msk.f32.mxu1 %vm561_vm9, %v2388_v42 }
 0x1fb   : > { %2079 = vmatmul.mubr.msk.f32.gmra.mrb[20].mxu1 %vm561_vm9, %v2391_v45 }
 0x1fc   : > { %2081 = vmatprep.mubr.msk.f32.mxu1 %vm561_vm9, %v2398_v48 }
 0x1ff   : > { %2082 = vmatmul.mubr.msk.f32.gmra.mrb[22].mxu1 %vm561_vm9, %v2401_v50 }
 0x2b6   : > { %v2465_v37 = vpop.f32.mrb[8].mxu1 }
 0x2b7   : > { %v1362_v39 = vsub.f32 %v2419_v13, %v2465_v37  ;;  %v2469_v40 = vpop.f32.mrb[9].mxu1 }
 0x2b8   : > { %v1360_v41 = vsub.f32 %v2419_v13, %v2469_v40  ;;  %v2473_v42 = vpop.f32.mrb[10].mxu1 }
 0x2b9   : > { %v1363_v10 = vsub.f32 %v2421_v15, %v2473_v42  ;;  %v2477_v43 = vpop.f32.mrb[11].mxu1 }
 0x2ba   : > { %v1361_v44 = vsub.f32 %v2421_v15, %v2477_v43 }
 0x2bc   : > { %v2481_v45 = vpop.f32.mrb[12].mxu0 }
 0x2bd   : > { %v2483_v46 = vpop.f32.mrb[13].mxu0 }
 0x2be   : > { %v2485_v47 = vpop.f32.mrb[14].mxu0  ;;  %v2487_v48 = vpop.f32.mrb[12].mxu1 }
 0x2bf   : > { %v2489_v49 = vpop.f32.mrb[15].mxu0  ;;  %v1366_v50 = vsub.f32 %v2419_v13, %v2487_v48  ;;  %v2493_v51 = vpop.f32.mrb[13].mxu1 }
 0x2c0   : > { %v1364_v52 = vsub.f32 %v2419_v13, %v2493_v51  ;;  %v2497_v53 = vpop.f32.mrb[14].mxu1 }
 0x2c1   : > { %v1367_v54 = vsub.f32 %v2421_v15, %v2497_v53  ;;  %v2501_v55 = vpop.f32.mrb[15].mxu1 }
 0x2c2   : > { %v1365_v56 = vsub.f32 %v2421_v15, %v2501_v55  ;;  %v1883_v15 = vld [vmem:[%s2722_s8 + $0x3] ss:$0 sm:$0xff] }
 0x2c4   : > { %v2509_v57 = vpop.f32.mrb[16].mxu0 }
 0x2c5   : > { %v2511_v58 = vpop.f32.mrb[17].mxu0 }
 0x2c6   : > { %v2513_v60 = vpop.f32.mrb[18].mxu0  ;;  %v2074_v62 = vpop.f32.mrb[16].mxu1 }
 0x2c7   : > { %v2515_v61 = vpop.f32.mrb[19].mxu0  ;;  %v1081_v63 = vsub.f32 %v1079_v59, %v2074_v62  ;;  %v1039_v0 = vpop.f32.mrb[17].mxu1 }
 0x2c8   : > { %v1080_v5 = vsub.f32 %v1078_v2, %v1039_v0 }
 0x2c9   : > { %1160 = vperm.xlu0 %2153, %v1081_v63   ;;  %1097 = vperm.xlu1 %2152, %v1081_v63  }
 0x2ca   : > { %v2077_v3 = vpop.f32.mrb[18].mxu1 }
 0x2cb   : > { %v1049_v4 = vpop.f32.mrb[19].mxu1  ;;  %v1083_v14 = vsub.f32 %v1079_v59, %v2077_v3 }
 0x2cc   : > { %v1082_v16 = vsub.f32 %v1078_v2, %v1049_v4 }
 0x2cd   : > { %2155 = vset.pattern.permute.xlu0 %v2223_v36  ;;  %2154 = vset.pattern.permute.xlu1 %v2224_v6 }
 0x2ce   : > { %v2080_v7 = vpop.f32.mrb[20].mxu1  ;;  %1213 = vperm.xlu1 %2154, %v1081_v63   ;;  %1092 = vperm.xlu0 %2155, %v1080_v5  }
 0x2cf   : > { %v1059_v8 = vpop.f32.mrb[21].mxu1  ;;  %v1085_v17 = vsub.f32 %v1079_v59, %v2080_v7 }
 0x2d0   : > { %v1084_v18 = vsub.f32 %v1078_v2, %v1059_v8 }
 0x2d2   : > { %v2083_v9 = vpop.f32.mrb[22].mxu1  ;;  %2156 = vset.pattern.permute.xlu1 %v2222_v35  ;;  %2157 = vset.pattern.permute.xlu0 %v2224_v6 }
 0x2d3   : > { %v1069_v11 = vpop.f32.mrb[23].mxu1  ;;  %1156 = vperm.xlu1 %2156, %v1080_v5   ;;  %1209 = vperm.xlu0 %2157, %v1080_v5   ;;  %v1087_v19 = vsub.f32 %v1079_v59, %v2083_v9 }
 0x2d4   : > { %v1086_v20 = vsub.f32 %v1078_v2, %v1069_v11 }
 0x2d7   : > { %1168 = vperm.xlu1 %2156, %v1083_v14   ;;  %2158 = vset.pattern.permute.xlu0 %v2223_v36 }
 0x2d8   : > { %1107 = vperm.xlu0 %2158, %v1083_v14  }
 0x2db   : > { %2160 = vset.pattern.permute.xlu1 %v2223_v36 }
 0x2dc   : > { %1102 = vperm.xlu1 %2160, %v1082_v16   ;;  %2159 = vset.pattern.permute.xlu0 %v2224_v6 }
 0x2dd   : > { %1221 = vperm.xlu0 %2159, %v1083_v14  }
 0x2e0   : > { %2161 = vset.pattern.permute.xlu1 %v2222_v35 }
 0x2e1   : > { %1164 = vperm.xlu1 %2161, %v1082_v16   ;;  %2163 = vset.pattern.permute.xlu0 %v2223_v36 }
 0x2e2   : > { %1117 = vperm.xlu0 %2163, %v1085_v17  }
 0x2e5   : > { %2162 = vset.pattern.permute.xlu1 %v2224_v6 }
 0x2e6   : > { %1217 = vperm.xlu1 %2162, %v1082_v16   ;;  %2165 = vset.pattern.permute.xlu0 %v2224_v6 }
 0x2e7   : > { %1229 = vperm.xlu0 %2165, %v1085_v17  }
 0x2ea   : > { %2164 = vset.pattern.permute.xlu1 %v2222_v35 }
 0x2eb   : > { %1176 = vperm.xlu1 %2164, %v1085_v17   ;;  %2167 = vset.pattern.permute.xlu0 %v2222_v35 }
 0x2ec   : > { %1172 = vperm.xlu0 %2167, %v1084_v18  }
 0x2ef   : > { %2166 = vset.pattern.permute.xlu1 %v2223_v36 }
 0x2f0   : > { %1112 = vperm.xlu1 %2166, %v1084_v18   ;;  %1184 = vperm.xlu0 %2167, %v1087_v19  }
 0x2f4   : > { %2168 = vset.pattern.permute.xlu1 %v2224_v6  ;;  %2170 = vset.pattern.permute.xlu0 %v2224_v6 }
 0x2f5   : > { %1225 = vperm.xlu1 %2168, %v1084_v18   ;;  %1237 = vperm.xlu0 %2170, %v1087_v19  }
 0x2f9   : > { %2169 = vset.pattern.permute.xlu1 %v2223_v36  ;;  %1495 = vrot.lane.b32.xlu0 %v2183_v21, %s2219_s13 }
 0x2fa   : > { %1127 = vperm.xlu1 %2169, %v1087_v19  }
 0x2fe   : > { %1122 = vperm.xlu1 %2169, %v1086_v20  }
 0x302   : > { %2171 = vset.pattern.permute.xlu1 %v2222_v35 }
 0x303   : > { %1180 = vperm.xlu1 %2171, %v1086_v20  }
 0x307   : > { %2172 = vset.pattern.permute.xlu1 %v2224_v6 }
 0x308   : > { %1233 = vperm.xlu1 %2172, %v1086_v20  }
 0x30c   : > { %1279 = vrot.lane.b32.xlu1 %v2328_v12, %s2221_s25  ;;  %v2543_v12 = vld [vmem:[%s2722_s8 + $0x1] ss:$0 sm:$0xff] }
 0x348   : > { %v1161_v23 = vpop.permute.xlu0 %1160  ;;  %v1098_v24 = vpop.permute.xlu1 %1097 }
 0x349   : > { %v1135_v25 = vmul.f32 %v2537_v22, %v1098_v24  ;;  %v1192_v31 = vmul.f32 %v2548_v26, %v1161_v23 }
 0x34b   : > { %v1147_v27 = vadd.f32 %v2543_v12, %v1135_v25 }
 0x34d   : > { %v1214_v28 = vpop.permute.xlu1 %1213  ;;  %v1093_v29 = vpop.permute.xlu0 %1092  ;;  %v1200_v33 = vadd.f32 %v1192_v31, %v1147_v27 }
 0x34e   : > { %v1134_v32 = vmul.f32 %v2537_v22, %v1093_v29  ;;  %v1245_v34 = vmul.f32 %v2554_v30, %v1214_v28 }
 0x350   : > { %v1146_v38 = vadd.f32 %v2543_v12, %v1134_v32  ;;  %v1253_v62 = vadd.f32 %v1245_v34, %v1200_v33 }
 0x352   : > { %v1157_v35 = vpop.permute.xlu1 %1156  ;;  %v1210_v36 = vpop.permute.xlu0 %1209  ;;  %v1261_v4 = vmax.f32 %v1253_v62, 0.0 }
 0x353   : > { %v1191_v59 = vmul.f32 %v2548_v26, %v1157_v35  ;;  %v1244_v0 = vmul.f32 %v2554_v30, %v1210_v36 }
 0x355   : > { %v1199_v63 = vadd.f32 %v1191_v59, %v1146_v38 }
 0x356   : > { %v1169_v2 = vpop.permute.xlu1 %1168 }
 0x357   : > { %v1252_v3 = vadd.f32 %v1244_v0, %v1199_v63  ;;  %v1108_v11 = vpop.permute.xlu0 %1107  ;;  %v1194_v36 = vmul.f32 %v2548_v26, %v1169_v2 }
 0x358   : > { %v1137_v24 = vmul.f32 %v2537_v22, %v1108_v11 }
 0x359   : > { %v1260_v5 = vmax.f32 %v1252_v3, 0.0 }
 0x35a   : > { %v1149_v32 = vadd.f32 %v2543_v12, %v1137_v24 }
 0x35b   : > { %v1269_v6 = vpack.c.bf16 %v1261_v4, %v1260_v5  ;;  %v1103_v7 = vpop.permute.xlu1 %1102 }
 0x35c   : > { %v1222_v16 = vpop.permute.xlu0 %1221  ;;  %v1136_v27 = vmul.f32 %v2537_v22, %v1103_v7  ;;  %v1202_v4 = vadd.f32 %v1194_v36, %v1149_v32 }
 0x35d   : > { %2088 = vmatprep.mubr.msk.bf16.mxu0 %vm561_vm9, %v1269_v6  ;;  %v1247_v5 = vmul.f32 %v2554_v30, %v1222_v16 }
 0x35e   : > { %v1148_v38 = vadd.f32 %v2543_v12, %v1136_v27 }
 0x360   : > { %v1165_v8 = vpop.permute.xlu1 %1164 }
 0x361   : > { %v1118_v18 = vpop.permute.xlu0 %1117  ;;  %v1193_v33 = vmul.f32 %v2548_v26, %v1165_v8 }
 0x362   : > { %v1139_v29 = vmul.f32 %v2537_v22, %v1118_v18 }
 0x363   : > { %v1201_v6 = vadd.f32 %v1193_v33, %v1148_v38 }
 0x364   : > { %v1151_v63 = vadd.f32 %v2543_v12, %v1139_v29 }
 0x365   : > { %v1218_v9 = vpop.permute.xlu1 %1217 }
 0x366   : > { %v1230_v20 = vpop.permute.xlu0 %1229  ;;  %v1246_v59 = vmul.f32 %v2554_v30, %v1218_v9 }
 0x36a   : > { %v1177_v14 = vpop.permute.xlu1 %1176 }
 0x36b   : > { %v1173_v28 = vpop.permute.xlu0 %1172  ;;  %v1196_v34 = vmul.f32 %v2548_v26, %v1177_v14  ;;  %v1254_v14 = vadd.f32 %v1246_v59, %v1201_v6 }
 0x36c   : > { %v1195_v35 = vmul.f32 %v2548_v26, %v1173_v28 }
 0x36d   : > { %v1204_v8 = vadd.f32 %v1196_v34, %v1151_v63  ;;  %v1262_v28 = vmax.f32 %v1254_v14, 0.0 }
 0x36f   : > { %v1113_v17 = vpop.permute.xlu1 %1112  ;;  %v1185_v11 = vpop.permute.xlu0 %1184 }
 0x370   : > { %v1138_v23 = vmul.f32 %v2537_v22, %v1113_v17  ;;  %v1249_v17 = vmul.f32 %v2554_v30, %v1230_v20  ;;  %v1198_v16 = vmul.f32 %v2548_v26, %v1185_v11 }
 0x372   : > { %v1150_v31 = vadd.f32 %v2543_v12, %v1138_v23  ;;  %v1255_v23 = vadd.f32 %v1247_v5, %v1202_v4  ;;  %v1257_v27 = vadd.f32 %v1249_v17, %v1204_v8 }
 0x374   : > { %v1226_v19 = vpop.permute.xlu1 %1225  ;;  %v1203_v0 = vadd.f32 %v1195_v35, %v1150_v31  ;;  %v1238_v32 = vpop.permute.xlu0 %1237  ;;  %v1265_v34 = vmax.f32 %v1257_v27, 0.0 }
 0x375   : > { %v1248_v3 = vmul.f32 %v2554_v30, %v1226_v19  ;;  %v1251_v36 = vmul.f32 %v2554_v30, %v1238_v32 }
 0x377   : > { %v1256_v9 = vadd.f32 %v1248_v3, %v1203_v0  ;;  %v2184_v0 = vld [vmem:[%s2721_s7 + $0x20] ss:$12 sps:$4 sm:$0xff]  }
 0x378   : > { %2098 = vmatprep.subr.bf16.mxu1 %v2184_v0  ;;  %1497 = vrot.lane.b32.xlu1 %v2184_v0, %s2219_s13  ;;  %v1878_v3 = vld [vmem:[%s2722_s8 + $0x2] ss:$0 sm:$0xff] }
 0x379   : > { %v1128_v21 = vpop.permute.xlu1 %1127  ;;  %v1264_v31 = vmax.f32 %v1256_v9, 0.0  ;;  %2099 = vmatpush3.bf16.msra.mxu1 %v2184_v0 }
 0x37a   : > { %v1141_v7 = vmul.f32 %v2537_v22, %v1128_v21  ;;  %2120 = vmatprep.subr.bf16.mxu1 %v2217_v1 }
 0x37b   : > { %v1271_v59 = vpack.c.bf16 %v1265_v34, %v1264_v31 }
 0x37c   : > { %v1153_v24 = vadd.f32 %v2543_v12, %v1141_v7 }
 0x37d   : > { %v1123_v25 = vpop.permute.xlu1 %1122 }
 0x37e   : > { %v1140_v2 = vmul.f32 %v2537_v22, %v1123_v25  ;;  %v1263_v25 = vmax.f32 %v1255_v23, 0.0  ;;  %v1206_v20 = vadd.f32 %v1198_v16, %v1153_v24 }
 0x380   : > { %v1152_v21 = vadd.f32 %v2543_v12, %v1140_v2  ;;  %v1270_v35 = vpack.c.bf16 %v1263_v25, %v1262_v28 }
 0x382   : > { %v1181_v62 = vpop.permute.xlu1 %1180 }
 0x383   : > { %v1197_v19 = vmul.f32 %v2548_v26, %v1181_v62  ;;  %v1259_v62 = vadd.f32 %v1251_v36, %v1206_v20 }
 0x385   : > { %v1205_v33 = vadd.f32 %v1197_v19, %v1152_v21  ;;  %v1267_v26 = vmax.f32 %v1259_v62, 0.0 }
 0x387   : > { %v1234_v18 = vpop.permute.xlu1 %1233 }
 0x388   : > { %v1250_v29 = vmul.f32 %v2554_v30, %v1234_v18  ;;  %v1496_v30 = vpop.permute.xlu0 %1495 }
 0x38a   : > { %v1258_v38 = vadd.f32 %v1250_v29, %v1205_v33 }
 0x38b   : > { %v1280_v22 = vpop.permute.xlu1 %1279 }
 0x38c   : > { %2086 = vmatprep.subr.bf16.mxu0 %v1280_v22  ;;  %v1266_v12 = vmax.f32 %v1258_v38, 0.0 }
 0x38d   : > { %2087 = vmatpush3.bf16.msra.mxu0 %v1280_v22 }
 0x38e   : > { %v1272_v63 = vpack.c.bf16 %v1267_v26, %v1266_v12  ;;  %2108 = vmatprep.subr.bf16.mxu0 %v1496_v30 }
 0x390   : > { %2089 = vmatmul.mubr.msk.bf16.vlgmr.msra.gmra.mrb[20].mxu0 %vm561_vm9, %v1270_v35 }
 0x391   : > { %2092 = vmatprep.mubr.msk.bf16.mxu0 %vm561_vm9, %v1271_v59  ;;  %2109 = vmatpush3.bf16.msra.mxu0 %v1496_v30 }
 0x398   : > { %2093 = vmatmul.mubr.msk.bf16.gmra.mrb[24].mxu0 %vm561_vm9, %v1272_v63 }
 0x463   : > { %v2090_v4 = vpop.f32.mrb[20].mxu0 }
 0x464   : > { %v1338_v5 = vadd.f32 %v2090_v4, %v1878_v3  ;;  %v1329_v6 = vpop.f32.mrb[21].mxu0 }
 0x465   : > { %v1330_v7 = vadd.f32 %v1878_v3, %v1329_v6  ;;  %v2091_v8 = vpop.f32.mrb[22].mxu0 }
 0x466   : > { %v1370_v11 = vadd.f32 %v1362_v39, %v1338_v5  ;;  %v2602_v14 = vadd.f32 %v2481_v45, %v1338_v5  ;;  %v1341_v2 = vadd.f32 %v2091_v8, %v1878_v3  ;;  %v1332_v17 = vpop.f32.mrb[23].mxu0  ;;  %v2186_v8 = vld [vmem:[%s2721_s7 + $0x18] ss:$12 sps:$4 sm:$0xff]  }
 0x467   : > { %v1368_v9 = vadd.f32 %v1360_v41, %v1330_v7  ;;  %v2608_v18 = vadd.f32 %v1330_v7, %v2483_v46  ;;  %v1333_v23 = vadd.f32 %v1878_v3, %v1332_v17  ;;  %v2185_v7 = vld [vmem:[%s2721_s7] ss:$12 sps:$4 sm:$0xff]   ;;  %v1890_v17 = vld [vmem:[%s2722_s8 + $0x4] ss:$0 sm:$0xff] }
 0x468   : > { %v1371_v24 = vadd.f32 %v1363_v10, %v1341_v2  ;;  %v2614_v37 = vadd.f32 %v2485_v47, %v1341_v2 }
 0x469   : > { %v1369_v39 = vadd.f32 %v1361_v44, %v1333_v23  ;;  %v2620_v45 = vadd.f32 %v1333_v23, %v2489_v49 }
 0x46a   : > { %v1383_v40 = vpack.c.bf16 %v1371_v24, %v1370_v11 }
 0x46b   : > { %v1382_v41 = vpack.c.bf16 %v1369_v39, %v1368_v9  ;;  %v2094_v19 = vpop.f32.mrb[24].mxu0 }
 0x46c   : > { %v1354_v46 = vadd.f32 %v2094_v19, %v1878_v3  ;;  %v1345_v27 = vpop.f32.mrb[25].mxu0 }
 0x46d   : > { %v1346_v28 = vadd.f32 %v1878_v3, %v1345_v27  ;;  %v2095_v16 = vpop.f32.mrb[26].mxu0  ;;  %2100 = vmatprep.mubr.msk.bf16.mxu1 %vm561_vm9, %v1382_v41 }
 0x46e   : > { %v1374_v42 = vadd.f32 %v1366_v50, %v1354_v46  ;;  %v2627_v10 = vadd.f32 %v2509_v57, %v1354_v46  ;;  %v1357_v43 = vadd.f32 %v2095_v16, %v1878_v3  ;;  %v1348_v44 = vpop.f32.mrb[27].mxu0  ;;  %2101 = vmatmul.mubr.msk.bf16.vlgmr.msra.gmra.mrb[24].mxu1 %vm561_vm9, %v1383_v40 }
 0x46f   : > { %v1372_v47 = vadd.f32 %v1364_v52, %v1346_v28  ;;  %v2634_v49 = vadd.f32 %v1346_v28, %v2511_v58  ;;  %v1349_v21 = vadd.f32 %v1878_v3, %v1348_v44  ;;  %v1498_v52 = vpop.permute.xlu1 %1497  ;;  %2121 = vmatpush3.bf16.msra.mxu1 %v2185_v7 }
 0x470   : > { %v1375_v48 = vadd.f32 %v1367_v54, %v1357_v43  ;;  %v2640_v50 = vadd.f32 %v2513_v60, %v1357_v43  ;;  %2110 = vmatprep.subr.bf16.mxu0 %v1498_v52  ;;  %2122 = vmatprep.subr.bf16.mxu1 %v2217_v1 }
 0x471   : > { %v1373_v57 = vadd.f32 %v1365_v56, %v1349_v21  ;;  %v2646_v29 = vadd.f32 %v1349_v21, %v2515_v61  ;;  %2111 = vmatpush3.bf16.msra.mxu0 %v1498_v52 }
 0x472   : > { %v1385_v13 = vpack.c.bf16 %v1375_v48, %v1374_v42 }
 0x473   : > { %v1384_v51 = vpack.c.bf16 %v1373_v57, %v1372_v47  ;;  %2123 = vmatpush3.bf16.msra.mxu1 %v2186_v8 }
 0x475   : > { %2104 = vmatprep.mubr.msk.bf16.mxu1 %vm561_vm9, %v1384_v51 }
 0x476   : > { %2105 = vmatmul.mubr.msk.bf16.gmra.mrb[28].mxu1 %vm561_vm9, %v1385_v13 }
 0x477   : > { %2124 = vmatprep.mubr.msk.bf16.mxu1 %vm2218_vm0, %v2217_v1 }
 0x541   : > { %v2102_v53 = vpop.f32.mrb[24].mxu1 }
 0x542   : > { %v1457_v54 = vadd.f32 %v2102_v53, %v1883_v15  ;;  %v1448_v55 = vpop.f32.mrb[25].mxu1 }
 0x543   : > { %v1449_v56 = vadd.f32 %v1883_v15, %v1448_v55  ;;  %v2103_v58 = vpop.f32.mrb[26].mxu1 }
 0x544   : > { %v1460_v60 = vadd.f32 %v2103_v58, %v1883_v15  ;;  %v1451_v61 = vpop.f32.mrb[27].mxu1  ;;  %v1481_v32 = vmax.f32 %v1457_v54, 0.0 }
 0x545   : > { %v1452_v31 = vadd.f32 %v1883_v15, %v1451_v61  ;;  %v1479_v25 = vmax.f32 %v1449_v56, 0.0 }
 0x546   : > { %v1482_v22 = vmax.f32 %v1460_v60, 0.0 }
 0x547   : > { %v1480_v20 = vmax.f32 %v1452_v31, 0.0 }
 0x548   : > { %v1488_v33 = vpack.c.bf16 %v1482_v22, %v1481_v32 }
 0x549   : > { %v1487_v34 = vpack.c.bf16 %v1480_v20, %v1479_v25  ;;  %v2106_v35 = vpop.f32.mrb[28].mxu1 }
 0x54a   : > { %v1473_v36 = vadd.f32 %v2106_v35, %v1883_v15  ;;  %v1464_v38 = vpop.f32.mrb[29].mxu1 }
 0x54b   : > { %v1465_v59 = vadd.f32 %v1883_v15, %v1464_v38  ;;  %v2107_v62 = vpop.f32.mrb[30].mxu1  ;;  %2112 = vmatprep.mubr.msk.bf16.mxu0 %vm561_vm9, %v1487_v34 }
 0x54c   : > { %v1476_v12 = vadd.f32 %v2107_v62, %v1883_v15  ;;  %v1467_v26 = vpop.f32.mrb[31].mxu1  ;;  %2113 = vmatmul.mubr.msk.bf16.vlgmr.msra.gmra.mrb[28].mxu0 %vm561_vm9, %v1488_v33  ;;  %v1485_v0 = vmax.f32 %v1473_v36, 0.0 }
 0x54d   : > { %v1468_v63 = vadd.f32 %v1883_v15, %v1467_v26  ;;  %v1483_v3 = vmax.f32 %v1465_v59, 0.0 }
 0x54e   : > { %v1486_v30 = vmax.f32 %v1476_v12, 0.0 }
 0x54f   : > { %v1484_v4 = vmax.f32 %v1468_v63, 0.0 }
 0x550   : > { %v1490_v5 = vpack.c.bf16 %v1486_v30, %v1485_v0 }
 0x551   : > { %v1489_v6 = vpack.c.bf16 %v1484_v4, %v1483_v3 }
 0x553   : > { %2116 = vmatprep.mubr.msk.bf16.mxu0 %vm561_vm9, %v1489_v6 }
 0x554   : > { %2117 = vmatmul.mubr.msk.bf16.gmra.mrb[32].mxu0 %vm561_vm9, %v1490_v5 }
 0x61f   : > { %v2114_v11 = vpop.f32.mrb[28].mxu0 }
 0x620   : > { %v1547_v2 = vpop.f32.mrb[29].mxu0  ;;  %v1556_v24 = vadd.f32 %v2114_v11, %v1890_v17 }
 0x621   : > { %v2115_v9 = vpop.f32.mrb[30].mxu0  ;;  %v1548_v39 = vadd.f32 %v1890_v17, %v1547_v2 }
 0x622   : > { %v1550_v23 = vpop.f32.mrb[31].mxu0  ;;  %v1559_v40 = vadd.f32 %v2115_v9, %v1890_v17  ;;  %v1580_v46 = vmul.f32 0.17677669, %v1556_v24 }
 0x623   : > { %v1551_v41 = vadd.f32 %v1890_v17, %v1550_v23  ;;  %v1578_v16 = vmul.f32 0.17677669, %v1548_v39 }
 0x624   : > { %v1581_v43 = vmul.f32 0.17677669, %v1559_v40  ;;  %v1587_v51 = vsel %vm561_vm9, %v1580_v46, -inf }
 0x625   : > { %v1579_v48 = vmul.f32 0.17677669, %v1551_v41  ;;  %v1586_v53 = vsel %vm561_vm9, %v1578_v16, -inf }
 0x626   : > { %v1594_v58 = vsel %vm561_vm9, %v1581_v43, -inf }
 0x627   : > { %v2118_v19 = vpop.f32.mrb[32].mxu0  ;;  %v1593_v31 = vsel %vm561_vm9, %v1579_v48, -inf }
 0x628   : > { %v1572_v27 = vadd.f32 %v2118_v19, %v1890_v17  ;;  %v1563_v28 = vpop.f32.mrb[33].mxu0 }
 0x629   : > { %v1564_v42 = vadd.f32 %v1890_v17, %v1563_v28  ;;  %v2119_v1 = vpop.f32.mrb[34].mxu0 }
 0x62a   : > { %v1584_v44 = vmul.f32 0.17677669, %v1572_v27  ;;  %v1575_v47 = vadd.f32 %v2119_v1, %v1890_v17  ;;  %v1566_v21 = vpop.f32.mrb[35].mxu0 }
 0x62b   : > { %v1582_v57 = vmul.f32 0.17677669, %v1564_v42  ;;  %v1567_v13 = vadd.f32 %v1890_v17, %v1566_v21 }
 0x62c   : > { %v1590_v52 = vsel %vm561_vm9, %v1584_v44, -inf  ;;  %v1585_v15 = vmul.f32 0.17677669, %v1575_v47 }
 0x62d   : > { %v1591_v54 = vmax.f32 %v1587_v51, %v1590_v52  ;;  %v1588_v55 = vsel %vm561_vm9, %v1582_v57, -inf  ;;  %v1583_v56 = vmul.f32 0.17677669, %v1567_v13 }
 0x62e   : > { %v1589_v60 = vmax.f32 %v1586_v53, %v1588_v55  ;;  %v1597_v61 = vsel %vm561_vm9, %v1585_v15, -inf }
 0x62f   : > { %v1598_v32 = vmax.f32 %v1594_v58, %v1597_v61  ;;  %v1595_v22 = vsel %vm561_vm9, %v1583_v56, -inf }
 0x630   : > { %v1592_v25 = vmax.f32 %v1589_v60, %v1591_v54  ;;  %v1596_v20 = vmax.f32 %v1593_v31, %v1595_v22 }
 0x632   : > { %v1600_v33 = vsub.f32 %v1578_v16, %v1592_v25  ;;  %v1602_v34 = vsub.f32 %v1580_v46, %v1592_v25  ;;  %v1604_v35 = vsub.f32 %v1582_v57, %v1592_v25  ;;  %v1606_v36 = vsub.f32 %v1584_v44, %v1592_v25 }
 0x633   : > { %v1599_v38 = vmax.f32 %v1596_v20, %v1598_v32 }
 0x634   : > { %v1608_v59 = vmul.f32 1.442695, %v1600_v33  ;;  %v1612_v62 = vmul.f32 1.442695, %v1602_v34  ;;  %v1616_v12 = vmul.f32 1.442695, %v1604_v35 }
 0x635   : > { %v1620_v26 = vmul.f32 1.442695, %v1606_v36  ;;  %v1601_v63 = vsub.f32 %v1579_v48, %v1599_v38  ;;  %v1603_v0 = vsub.f32 %v1581_v43, %v1599_v38  ;;  %v1605_v30 = vsub.f32 %v1583_v56, %v1599_v38  ;;  %v1895_v35 = vld [vmem:[%s2722_s8 + $0x5] ss:$0 sm:$0xff] }
 0x636   : > { %2187 = vpow2.f32 %v1608_v59  ;;  %v1607_v3 = vsub.f32 %v1585_v15, %v1599_v38 }
 0x637   : > { %2189 = vpow2.f32 %v1612_v62  ;;  %v1610_v4 = vmul.f32 1.442695, %v1601_v63  ;;  %v1614_v5 = vmul.f32 1.442695, %v1603_v0  ;;  %v1618_v6 = vmul.f32 1.442695, %v1605_v30 }
 0x638   : > { %2191 = vpow2.f32 %v1616_v12  ;;  %v1622_v7 = vmul.f32 1.442695, %v1607_v3  ;;  %v2207_v12 = vld [vmem:[%s2354_s24] sm:$0xff]  ;;  %v2208_v30 = vld [vmem:[%s2354_s24 + $0x8] sm:$0xff] }
 0x639   : > { %2193 = vpow2.f32 %v1620_v26 }
 0x63a   : > { %2195 = vpow2.f32 %v1610_v4 }
 0x63b   : > { %2197 = vpow2.f32 %v1614_v5 }
 0x63c   : > { %2199 = vpow2.f32 %v1618_v6 }
 0x63d   : > { %2201 = vpow2.f32 %v1622_v7 }
 0x640   : > { %v2188_v8 = vpop.eup %2187 }
 0x641   : > { %v2190_v11 = vpop.eup %2189  ;;  %v1624_v2 = vsel %vm561_vm9, %v2188_v8, 0.0  ;;  %v1646_v17 = vmul.f32 %v2188_v8, %v2608_v18 }
 0x642   : > { %v2192_v9 = vpop.eup %2191  ;;  %v1625_v23 = vsel %vm561_vm9, %v2190_v11, 0.0  ;;  %v1648_v24 = vmul.f32 %v2190_v11, %v2602_v14 }
 0x643   : > { %v2194_v39 = vpop.eup %2193  ;;  %v1626_v40 = vadd.f32 %v1625_v23, %v1624_v2  ;;  %v1650_v41 = vmul.f32 %v2192_v9, %v2634_v49  ;;  %v1654_v19 = vsel %vm561_vm9, %v1646_v17, 0.0  ;;  %v1627_v27 = vsel %vm561_vm9, %v2192_v9, 0.0 }
 0x644   : > { %v2196_v46 = vpop.eup %2195  ;;  %v1652_v28 = vmul.f32 %v2194_v39, %v2627_v10  ;;  %v1655_v16 = vsel %vm561_vm9, %v1648_v24, 0.0  ;;  %v1629_v1 = vsel %vm561_vm9, %v2194_v39, 0.0 }
 0x645   : > { %v2198_v42 = vpop.eup %2197  ;;  %v1628_v18 = vadd.f32 %v1627_v27, %v1626_v40  ;;  %v1656_v43 = vadd.f32 %v1655_v16, %v1654_v19  ;;  %v1631_v14 = vsel %vm561_vm9, %v2196_v46, 0.0  ;;  %v1657_v47 = vsel %vm561_vm9, %v1650_v41, 0.0 }
 0x646   : > { %v2200_v44 = vpop.eup %2199  ;;  %v1632_v49 = vsel %vm561_vm9, %v2198_v42, 0.0  ;;  %v1647_v21 = vmul.f32 %v2196_v46, %v2620_v45  ;;  %v1649_v48 = vmul.f32 %v2198_v42, %v2614_v37  ;;  %v1659_v51 = vsel %vm561_vm9, %v1652_v28, 0.0 }
 0x647   : > { %v2202_v57 = vpop.eup %2201  ;;  %v1630_v10 = vadd.f32 %v1629_v1, %v1628_v18  ;;  %v1658_v13 = vadd.f32 %v1657_v47, %v1656_v43  ;;  %v1633_v52 = vadd.f32 %v1632_v49, %v1631_v14  ;;  %v1634_v15 = vsel %vm561_vm9, %v2200_v44, 0.0 }
 0x648   : > { %v1651_v53 = vmul.f32 %v2200_v44, %v2646_v29  ;;  %v1653_v54 = vmul.f32 %v2202_v57, %v2640_v50  ;;  %v1661_v55 = vsel %vm561_vm9, %v1647_v21, 0.0  ;;  %v1662_v45 = vsel %vm561_vm9, %v1649_v48, 0.0 }
 0x649   : > { %v1660_v56 = vadd.f32 %v1659_v51, %v1658_v13  ;;  %2203 = vrcp.f32 %v1630_v10  ;;  %v1635_v58 = vadd.f32 %v1634_v15, %v1633_v52  ;;  %v1636_v37 = vsel %vm561_vm9, %v2202_v57, 0.0 }
 0x64a   : > { %v1663_v60 = vadd.f32 %v1662_v45, %v1661_v55  ;;  %v1664_v31 = vsel %vm561_vm9, %v1651_v53, 0.0  ;;  %v1666_v29 = vsel %vm561_vm9, %v1653_v54, 0.0 }
 0x64b   : > { %v1637_v61 = vadd.f32 %v1636_v37, %v1635_v58 }
 0x64c   : > { %v1665_v32 = vadd.f32 %v1664_v31, %v1663_v60 }
 0x64d   : > { %2205 = vrcp.f32 %v1637_v61 }
 0x64e   : > { %v1667_v50 = vadd.f32 %v1666_v29, %v1665_v32 }
 0x653   : > { %v2204_v22 = vpop.eup %2203 }
 0x654   : > { %v1670_v25 = vmul.f32 %v2204_v22, %v1660_v56 }
 0x657   : > { %v2206_v20 = vpop.eup %2205 }
 0x658   : > { %v1671_v33 = vmul.f32 %v2206_v20, %v1667_v50 }
 0x65a   : > { %v1677_v34 = vpack.c.bf16 %v1671_v33, %v1670_v25 }
 0x65c   : > { %2125 = vmatmul.mubr.msk.bf16.vlgmr.msra.gmra.mrb[32].mxu1 %vm561_vm9, %v1677_v34 }
 0x72f   : > { %v1731_v36 = vpop.f32.mrb[32].mxu1 }
 0x730   : > { %v1732_v38 = vadd.f32 %v1895_v35, %v1731_v36  ;;  %v2126_v59 = vpop.f32.mrb[33].mxu1 }
 0x731   : > { %v1734_v62 = vpop.f32.mrb[34].mxu1 }
 0x732   : > { %v1738_v26 = vadd.f32 %v2207_v12, %v1732_v38  ;;  %v1735_v63 = vadd.f32 %v1895_v35, %v1734_v62  ;;  %v2127_v0 = vpop.f32.mrb[35].mxu1 }
 0x734   : > { %1740 = vst [vmem:[%s373_s18] sm:$0xff] %v1738_v26  ;;  %v1739_v3 = vadd.f32 %v2208_v30, %v1735_v63 }
 0x736   : > { %1741 = vst [vmem:[%s373_s18 + $0x8] sm:$0xff] %v1739_v3 }
 0x737 PF: > { %s19_s30 = sadd.s32 1, %s2215_s30  }
 0x738   : > { %p16_p5 = scmp.ge.s32.totalorder %s19_s30, 4  }
 0x73a   :  { %18 = sbr.rel (!%p16_p5) target bundleno = 1 (0x1), region = 92 }

// kernel: _lambda_.10
= control target key start
LH: loop header
LB: loop body
LE: loop exit
PB: predicated region body
PF: predicated region fallthrough
CT: control target
= control target key end

     0   :  { %vm77_vm0 = vcmask 1040384   ;;  %vm78_vm1 = vcmask 1041408   ;;  %vm70_vm2 = vcmask 547840   ;;  %v353_v6 = vmov 65535   ;;  %s446_s1 = inlined_call_operand.vmem [shape: bf16[67,128], index: 1, kind: input, shape index: {}]   ;;  %s447_s0 = inlined_call_operand.vmem [shape: f32[1,32,67], index: 0, kind: input, shape index: {}]   ;;  %s448_s3 = inlined_call_operand.vmem [shape: bf16[128,128], index: 3, kind: input, shape index: {}]   ;;  %s449_s2 = inlined_call_operand.vmem [shape: f32[1,128], index: 2, kind: input, shape index: {}]   ;;  %s450_s4 = inlined_call_operand.vmem [shape: f32[1,128], index: 4, kind: input, shape index: {}]   ;;  %s451_s5 = inlined_call_operand.vmem [shape: f32[8,128], index: 5, kind: output, shape index: {}]  }
   0x1   :  { %v340_v0 = vld [vmem:[%s446_s1] sm:$0xff]   ;;  %v341_v1 = vld [vmem:[%s446_s1 + $0x8] sm:$0xff]   ;;  %v342_v2 = vld [vmem:[%s446_s1 + $0x10] sm:$0xff]   ;;  %v79_v7 = vsel %vm77_vm0, 4294967295, %v353_v6 }
   0x2   :  { %305 = vmatprep.subr.bf16.mxu0 %v340_v0  ;;  %v21_v3 = vld [vmem:[%s447_s0] sm:$0xff]  ;;  %v22_v4 = vld [vmem:[%s447_s0 + $0x8] sm:$0xff]  ;;  %v343_v11 = vld [vmem:[%s446_s1 + $0x18] sm:$0xff]   ;;  %v80_v12 = vsel %vm78_vm1, %v79_v7, 0 }
   0x3   :  { %306 = vmatpush3.bf16.msra.mxu0 %v340_v0  ;;  %v344_v5 = vld [vmem:[%s446_s1 + $0x20] ss:$0 sps:$4 sm:$0x33]   ;;  %v25_v8 = vpack.c.bf16 %v22_v4, %v21_v3  ;;  %v346_v10 = vld [vmem:[%s448_s3 + $0x8] sm:$0xff]   ;;  %v347_v13 = vld [vmem:[%s448_s3 + $0x10] sm:$0xff]  }
   0x4   :  { %307 = vmatprep.subr.bf16.mxu0 %v341_v1  ;;  %v345_v9 = vld [vmem:[%s448_s3] sm:$0xff]   ;;  %v82_v14 = vand.u32 %v344_v5, %v80_v12  ;;  %v23_v15 = vld [vmem:[%s447_s0 + $0x10] sm:$0xff]  ;;  %v24_v16 = vld [vmem:[%s447_s0 + $0x18] sm:$0xff] }
   0x5   :  { %315 = vmatprep.mubr.msk.bf16.mxu0 %vm70_vm2, %v25_v8  ;;  %319 = vmatprep.subr.bf16.mxu1 %v345_v9  ;;  %v348_v17 = vld [vmem:[%s448_s3 + $0x18] sm:$0xff]   ;;  %v26_v18 = vpack.c.bf16 %v24_v16, %v23_v15  ;;  %v349_v19 = vld [vmem:[%s448_s3 + $0x20] sm:$0xff]   ;;  %v350_v20 = vld [vmem:[%s448_s3 + $0x28] sm:$0xff]  }
   0x6   :  { %320 = vmatpush3.bf16.msra.mxu1 %v345_v9  ;;  %v351_v21 = vld [vmem:[%s448_s3 + $0x30] sm:$0xff]   ;;  %v352_v22 = vld [vmem:[%s448_s3 + $0x38] sm:$0xff]   ;;  %v271_v23 = vld [vmem:[%s449_s2] ss:$0 sm:$0xff] }
   0x7   :  { %308 = vmatpush3.bf16.msra.mxu0 %v341_v1  ;;  %321 = vmatprep.subr.bf16.mxu1 %v346_v10  ;;  %v279_v38 = vld [vmem:[%s450_s4] ss:$0 sm:$0xff] }
   0x8   :  { %309 = vmatprep.subr.bf16.mxu0 %v342_v2 }
   0xa   :  { %322 = vmatpush3.bf16.msra.mxu1 %v346_v10 }
   0xb   :  { %310 = vmatpush3.bf16.msra.mxu0 %v342_v2  ;;  %323 = vmatprep.subr.bf16.mxu1 %v347_v13 }
   0xc   :  { %311 = vmatprep.subr.bf16.mxu0 %v343_v11 }
   0xe   :  { %324 = vmatpush3.bf16.msra.mxu1 %v347_v13 }
   0xf   :  { %312 = vmatpush3.bf16.msra.mxu0 %v343_v11  ;;  %325 = vmatprep.subr.bf16.mxu1 %v348_v17 }
  0x10   :  { %313 = vmatprep.subr.bf16.mxu0 %v82_v14 }
  0x12   :  { %326 = vmatpush3.bf16.msra.mxu1 %v348_v17 }
  0x13   :  { %314 = vmatpush3.bf16.msra.mxu0 %v82_v14  ;;  %327 = vmatprep.subr.bf16.mxu1 %v349_v19 }
  0x16   :  { %316 = vmatmul.mubr.msk.bf16.vlgmr.msra.gmra.mrb[0].mxu0 %vm70_vm2, %v26_v18  ;;  %328 = vmatpush3.bf16.msra.mxu1 %v349_v19 }
  0x17   :  { %329 = vmatprep.subr.bf16.mxu1 %v350_v20 }
  0x1a   :  { %330 = vmatpush3.bf16.msra.mxu1 %v350_v20 }
  0x1b   :  { %331 = vmatprep.subr.bf16.mxu1 %v351_v21 }
  0x1e   :  { %332 = vmatpush3.bf16.msra.mxu1 %v351_v21 }
  0x1f   :  { %333 = vmatprep.subr.bf16.mxu1 %v352_v22 }
  0x22   :  { %334 = vmatpush3.bf16.msra.mxu1 %v352_v22 }
  0xe9   :  { %v317_v24 = vpop.f32.mrb[0].mxu0 }
  0xea   :  { %v127_v25 = vadd.f32 %v317_v24, %v271_v23  ;;  %v118_v26 = vpop.f32.mrb[1].mxu0 }
  0xeb   :  { %v119_v27 = vadd.f32 %v271_v23, %v118_v26  ;;  %v318_v28 = vpop.f32.mrb[2].mxu0 }
  0xec   :  { %v130_v29 = vadd.f32 %v318_v28, %v271_v23  ;;  %v121_v30 = vpop.f32.mrb[3].mxu0  ;;  %v135_v32 = vmax.f32 %v127_v25, 0.0 }
  0xed   :  { %v122_v31 = vadd.f32 %v271_v23, %v121_v30  ;;  %v133_v34 = vmax.f32 %v119_v27, 0.0 }
  0xee   :  { %v136_v33 = vmax.f32 %v130_v29, 0.0 }
  0xef   :  { %v134_v35 = vmax.f32 %v122_v31, 0.0 }
  0xf0   :  { %v138_v36 = vpack.c.bf16 %v136_v33, %v135_v32 }
  0xf1   :  { %v137_v37 = vpack.c.bf16 %v134_v35, %v133_v34 }
  0xf3   :  { %335 = vmatprep.mubr.bf16.mxu1 %v137_v37 }
  0xf4   :  { %336 = vmatmul.mubr.bf16.vlgmr.msra.gmra.mrb[0].mxu1 %v138_v36 }
 0x1c7   :  { %v337_v39 = vpop.f32.mrb[0].mxu1 }
 0x1c8   :  { %v253_v40 = vadd.f32 %v337_v39, %v279_v38  ;;  %v244_v41 = vpop.f32.mrb[1].mxu1 }
 0x1c9   :  { %v245_v42 = vadd.f32 %v279_v38, %v244_v41  ;;  %v338_v43 = vpop.f32.mrb[2].mxu1 }
 0x1ca   :  { %v256_v44 = vadd.f32 %v338_v43, %v279_v38  ;;  %v247_v45 = vpop.f32.mrb[3].mxu1  ;;  %v261_v47 = vmax.f32 %v253_v40, 0.0 }
 0x1cb   :  { %v248_v46 = vadd.f32 %v279_v38, %v247_v45  ;;  %v259_v49 = vmax.f32 %v245_v42, 0.0 }
 0x1cc   :  { %v262_v48 = vmax.f32 %v256_v44, 0.0 }
 0x1cd   :  { %v260_v50 = vmax.f32 %v248_v46, 0.0 }
 0x1ce   :  { %v264_v51 = vmax.f32 %v261_v47, %v262_v48 }
 0x1cf   :  { %v263_v52 = vmax.f32 %v259_v49, %v260_v50 }
 0x1d1   :  { %v265_v53 = vmax.f32 %v263_v52, %v264_v51 }
 0x1d3   :  { %266 = vst [vmem:[%s451_s5] sm:$0xff] %v265_v53 }

// kernel: _lambda_.11
= control target key start
LH: loop header
LB: loop body
LE: loop exit
PB: predicated region body
PF: predicated region fallthrough
CT: control target
= control target key end

     0   :  { %v346_v0 = vlaneseq  ;;  %v1324_v1 = vmov 0.0   ;;  %vm1325_vm0 = vmmov 0   ;;  %s1326_s23 = smov 96   ;;  %s1327_s29 = smov 64   ;;  %vm203_vm5 = vcmask 261120   ;;  %s1626_s5 = inlined_call_operand.vmem [shape: bf16[128,32], index: 5, kind: input, shape index: {}]   ;;  %s1627_s7 = inlined_call_operand.vmem [shape: bf16[32,320], index: 7, kind: input, shape index: {}]   ;;  %s1628_s4 = inlined_call_operand.vmem [shape: s32[1,4,8], index: 4, kind: input, shape index: {}]   ;;  %s1629_s0 = inlined_call_operand.vmem [shape: f32[8,128], index: 0, kind: input, shape index: {}, may-alias: {0,1}]   ;;  %s1630_s1 = inlined_call_operand.vmem [shape: f32[8,128], index: 1, kind: input, shape index: {}, may-alias: {0,1}]   ;;  %s1631_s8 = inlined_call_operand.vmem [shape: f32[8,128], index: 8, kind: input, shape index: {}]   ;;  %s1632_s3 = inlined_call_operand.vmem [shape: f32[8,8], index: 3, kind: input, shape index: {}, may-alias: {2,3}]   ;;  %s1633_s2 = inlined_call_operand.vmem [shape: f32[8,8], index: 2, kind: input, shape index: {}, may-alias: {2,3}]   ;;  %s1634_s6 = inlined_call_operand.vmem [shape: f32[3,32], index: 6, kind: input, shape index: {}]   ;;  %s1635_s9 = inlined_call_operand.vmem [shape: f32[8,128], index: 9, kind: output, shape index: {}]  }
   0x1   :  { %1163 = vmatprep.subr.bf16.mxu0 %v1324_v1  ;;  %1183 = vmatprep.subr.bf16.mxu1 %v1324_v1  ;;  %v1300_v2 = vld [vmem:[%s1626_s5] sm:$0xff]   ;;  %v1301_v3 = vld [vmem:[%s1626_s5 + $0x8] sm:$0xff]   ;;  %v1302_v5 = vld [vmem:[%s1626_s5 + $0x10] sm:$0xff]   ;;  %vm402_vm6 = vcmask 64512   ;;  %vm409_vm7 = vcmask 1043456  }
   0x2   :  { %1179 = vmatprep.mubr.msk.bf16.mxu0 %vm1325_vm0, %v1324_v1  ;;  %1199 = vmatprep.mubr.msk.bf16.mxu1 %vm1325_vm0, %v1324_v1  ;;  %v349_v4 = vshrl.u32 %v346_v0, 7  ;;  %v1405_v8 = vld [vmem:[%s1627_s7 + $0x4] ss:$12 sps:$4 sm:$0xff]   ;;  %v1303_v9 = vld [vmem:[%s1626_s5 + $0x18] sm:$0xff]   ;;  %v345_v10 = vld [vmem:[%s1628_s4] sm:$0xf] }
   0x3   :  { %1164 = vmatpush3.bf16.msra.mxu0 %v1300_v2  ;;  %1184 = vmatpush3.bf16.msra.mxu1 %v1300_v2  ;;  %v1418_v12 = vld [vmem:[%s1627_s7 + $0x1c] ss:$12 sps:$4 sm:$0xff]   ;;  %v1304_v16 = vld [vmem:[%s1626_s5 + $0x20] sm:$0xff]   ;;  %v1306_v20 = vld [vmem:[%s1626_s5 + $0x30] sm:$0xff]   ;;  %v347_v26 = vand.u32 127, %v346_v0 }
   0x4   :  { %1165 = vmatprep.subr.bf16.mxu0 %v1324_v1  ;;  %1185 = vmatprep.subr.bf16.mxu1 %v1324_v1  ;;  %v350_v6 = vsub.s32 0, %v349_v4  ;;  %v357_v7 = vsub.s32 1, %v349_v4  ;;  %v364_v11 = vsub.s32 2, %v349_v4  ;;  %v371_v15 = vsub.s32 3, %v349_v4  ;;  %v1305_v19 = vld [vmem:[%s1626_s5 + $0x28] sm:$0xff]   ;;  %v1307_v21 = vld [vmem:[%s1626_s5 + $0x38] sm:$0xff]  }
   0x5   :  { %248 = vrot.lane.b32.xlu0 %v1405_v8, %s1326_s23  ;;  %v1447_v22 = vld [vmem:[%s1629_s0] sm:$0xff] }
   0x6   :  { %v351_v13 = vrot.slane %v345_v10, %v350_v6  ;;  %v358_v14 = vrot.slane %v345_v10, %v357_v7  ;;  %v365_v17 = vrot.slane %v345_v10, %v364_v11  ;;  %v372_v18 = vrot.slane %v345_v10, %v371_v15  ;;  %v144_v23 = vld [vmem:[%s1630_s1] sm:$0xff] }
   0x7   :  { %1166 = vmatpush3.bf16.msra.mxu0 %v1301_v3  ;;  %1186 = vmatpush3.bf16.msra.mxu1 %v1301_v3  ;;  %v51_v24 = vpack.c.bf16 %v1447_v22, %v1447_v22  ;;  %v145_v25 = vpack.c.bf16 %v144_v23, %v144_v23  ;;  %v1061_v36 = vld [vmem:[%s1631_s8] ss:$0 sm:$0xff]  ;;  %v1329_v10 = vmov 0  }
   0x8   :  { %1167 = vmatprep.subr.bf16.mxu0 %v1324_v1  ;;  %1187 = vmatprep.subr.bf16.mxu1 %v1324_v1  ;;  %v514_v61 = vld [vmem:[%s1632_s3] sm:$0xff] }
   0x9   :  { %353 = vbcast.lane.b32.xlu1 %v351_v13, 256  ;;  %250 = vrot.lane.b32.xlu0 %v1418_v12, %s1326_s23 }
   0xa   :  { %1289 = vset.pattern.permute.xlu1 %v1329_v10 }
   0xb   :  { %1168 = vmatpush3.bf16.msra.mxu0 %v1302_v5  ;;  %1188 = vmatpush3.bf16.msra.mxu1 %v1302_v5 }
   0xc   :  { %1169 = vmatprep.subr.bf16.mxu0 %v1324_v1  ;;  %1189 = vmatprep.subr.bf16.mxu1 %v1324_v1 }
   0xd   :  { %360 = vbcast.lane.b32.xlu1 %v358_v14, 256  ;;  %367 = vbcast.lane.b32.xlu0 %v365_v17, 256 }
   0xf   :  { %1170 = vmatpush3.bf16.msra.mxu0 %v1303_v9  ;;  %1190 = vmatpush3.bf16.msra.mxu1 %v1303_v9  ;;  %v1328_v9 = vmov 1  }
  0x10   :  { %1171 = vmatprep.subr.bf16.mxu0 %v1324_v1  ;;  %1191 = vmatprep.subr.bf16.mxu1 %v1324_v1 }
  0x11   :  { %374 = vbcast.lane.b32.xlu1 %v372_v18, 256  ;;  %298 = vrot.lane.b32.xlu0 %v1405_v8, %s1327_s29 }
  0x12   :  { %1290 = vset.pattern.permute.xlu0 %v1328_v9 }
  0x13   :  { %1172 = vmatpush3.bf16.msra.mxu0 %v1304_v16  ;;  %1192 = vmatpush3.bf16.msra.mxu1 %v1304_v16 }
  0x14   :  { %1173 = vmatprep.subr.bf16.mxu0 %v1324_v1  ;;  %1193 = vmatprep.subr.bf16.mxu1 %v1324_v1 }
  0x15   :  { %300 = vrot.lane.b32.xlu1 %v1418_v12, %s1327_s29 }
  0x17   :  { %1174 = vmatpush3.bf16.msra.mxu0 %v1305_v19  ;;  %1194 = vmatpush3.bf16.msra.mxu1 %v1305_v19 }
  0x18   :  { %1175 = vmatprep.subr.bf16.mxu0 %v1324_v1  ;;  %1195 = vmatprep.subr.bf16.mxu1 %v1324_v1 }
  0x1b   :  { %1176 = vmatpush3.bf16.msra.mxu0 %v1306_v20  ;;  %1196 = vmatpush3.bf16.msra.mxu1 %v1306_v20  ;;  %v612_v20 = vld [vmem:[%s1633_s2] sm:$0xff]  ;;  %s1331_s2 = smov 32  }
  0x1c   :  { %1177 = vmatprep.subr.bf16.mxu0 %v1324_v1  ;;  %1197 = vmatprep.subr.bf16.mxu1 %v1324_v1 }
  0x1f   :  { %1178 = vmatpush3.bf16.msra.mxu0 %v1307_v21  ;;  %1198 = vmatpush3.bf16.msra.mxu1 %v1307_v21 }
  0x20   :  { %1203 = vmatprep.subr.bf16.mxu0 %v1324_v1  ;;  %1211 = vmatprep.subr.bf16.mxu1 %v1324_v1 }
  0x22   :  { %1180 = vmatmul.mubr.bf16.vlgmr.msra.gmra.mrb[0].mxu0 %v51_v24  ;;  %1200 = vmatmul.mubr.bf16.vlgmr.msra.gmra.mrb[0].mxu1 %v145_v25 }
  0x23   :  { %1204 = vmatpush3.bf16.msra.mxu0 %v1405_v8  ;;  %1207 = vmatprep.mubr.msk.bf16.mxu0 %vm1325_vm0, %v1324_v1 }
  0x24   :  { %1205 = vmatprep.subr.bf16.mxu0 %v1324_v1  ;;  %1215 = vmatprep.mubr.msk.bf16.mxu1 %vm1325_vm0, %v1324_v1 }
  0x27   :  { %1206 = vmatpush3.bf16.msra.mxu0 %v1418_v12 }
  0x28   :  { %1219 = vmatprep.subr.bf16.mxu0 %v1324_v1 }
  0x77   :  { %v249_v27 = vpop.permute.xlu0 %248 }
  0x78   :  { %1212 = vmatpush3.bf16.msra.mxu1 %v249_v27 }
  0x79   :  { %1213 = vmatprep.subr.bf16.mxu1 %v1324_v1 }
  0x7b   :  { %v354_v28 = vpop.permute.xlu1 %353  ;;  %v251_v29 = vpop.permute.xlu0 %250 }
  0x7c   :  { %vm376_vm1 = vcmp.eq.s32.totalorder %v354_v28, %v347_v26  ;;  %1214 = vmatpush3.bf16.msra.mxu1 %v251_v29 }
  0x7d   :  { %v1075_v51 = vsel %vm376_vm1, 1.0, %v1324_v1 }
  0x7f   :  { %v361_v30 = vpop.permute.xlu1 %360  ;;  %v368_v31 = vpop.permute.xlu0 %367 }
  0x80   :  { %vm377_vm2 = vcmp.eq.s32.totalorder %v361_v30, %v347_v26  ;;  %vm378_vm3 = vcmp.eq.s32.totalorder %v368_v31, %v347_v26 }
  0x81   :  { %v1469_v33 = vsel %vm378_vm3, 1.0, %v1324_v1  ;;  %v1076_v52 = vsel %vm377_vm2, 1.0, %v1324_v1 }
  0x82   :  { %v1108_v53 = vpack.c.bf16 %v1076_v52, %v1075_v51 }
  0x83   :  { %v375_v32 = vpop.permute.xlu1 %374  ;;  %v299_v37 = vpop.permute.xlu0 %298 }
  0x84   :  { %vm379_vm4 = vcmp.eq.s32.totalorder %v375_v32, %v347_v26  ;;  %v1330_v32 = vmov 2  }
  0x85   :  { %v1078_v34 = vsel %vm379_vm4, 1.0, %v1324_v1 }
  0x86   :  { %v1109_v35 = vpack.c.bf16 %v1078_v34, %v1469_v33 }
  0x87   :  { %v301_v50 = vpop.permute.xlu1 %300 }
  0xf5   :  { %v138_v38 = vpop.f32.mrb[0].mxu0  ;;  %v180_v39 = vpop.f32.mrb[0].mxu1 }
  0xf6   :  { %v139_v40 = vadd.f32 %v1061_v36, %v138_v38  ;;  %v181_v41 = vadd.f32 %v1061_v36, %v180_v39  ;;  %v1201_v42 = vpop.f32.mrb[1].mxu1  ;;  %v1181_v43 = vpop.f32.mrb[1].mxu0  ;;  %v1090_v39 = vld [vmem:[%s1631_s8 + $0x1] ss:$0 sm:$0xff] }
  0xf7   :  { %v183_v44 = vpop.f32.mrb[2].mxu1  ;;  %v141_v45 = vpop.f32.mrb[2].mxu0 }
  0xf8   :  { %v190_v46 = vpack.c.bf16 %v139_v40, %v139_v40  ;;  %v247_v47 = vpack.c.bf16 %v181_v41, %v181_v41  ;;  %v1202_v48 = vpop.f32.mrb[3].mxu1  ;;  %v1182_v49 = vpop.f32.mrb[3].mxu0  ;;  %v1091_v40 = vld [vmem:[%s1634_s6 + $0x1] ss:$0 sm:$0xff] }
  0xfa   :  { %1208 = vmatmul.mubr.msk.bf16.vlgmr.msra.gmra.mrb[4].mxu0 %vm203_vm5, %v190_v46  ;;  %1216 = vmatmul.mubr.msk.bf16.vlgmr.msra.gmra.mrb[4].mxu1 %vm203_vm5, %v247_v47 }
  0xfb   :  { %1220 = vmatpush3.bf16.msra.mxu0 %v299_v37  ;;  %1223 = vmatprep.mubr.msk.bf16.mxu0 %vm1325_vm0, %v1324_v1 }
  0xfc   :  { %1221 = vmatprep.subr.bf16.mxu0 %v1324_v1  ;;  %1229 = vmatprep.mubr.msk.bf16.mxu1 %vm402_vm6, %v1108_v53 }
  0xff   :  { %1222 = vmatpush3.bf16.msra.mxu0 %v301_v50 }
 0x102   :  { %1224 = vmatmul.mubr.msk.bf16.vlgmr.msra.gmra.mrb[8].mxu0 %vm203_vm5, %v247_v47 }
 0x103   :  { %1235 = vmatprep.mubr.msk.bf16.mxu0 %vm402_vm6, %v1108_v53 }
 0x1cd   :  { %v291_v54 = vpop.f32.mrb[4].mxu1  ;;  %v1488_v55 = vpop.f32.mrb[4].mxu0 }
 0x1ce   :  { %v297_v56 = vpack.c.bf16 %v291_v54, %v291_v54  ;;  %v1217_v57 = vpop.f32.mrb[5].mxu1  ;;  %v1209_v58 = vpop.f32.mrb[5].mxu0 }
 0x1cf   :  { %v294_v59 = vpop.f32.mrb[6].mxu1  ;;  %v244_v60 = vpop.f32.mrb[6].mxu0 }
 0x1d0   :  { %v411_v62 = vsel %vm409_vm7, %v297_v56, 0  ;;  %v1218_v63 = vpop.f32.mrb[7].mxu1  ;;  %1279 = vmatprep.subr.msk.bf16.mxu1 %vm409_vm7, %v297_v56  ;;  %v1210_v0 = vpop.f32.mrb[7].mxu0 }
 0x1d1   :  { %1228 = vmatpush3.bf16.msra.mxu1 %v411_v62 }
 0x1d2   :  { %1239 = vmatprep.subr.mxu1 %v514_v61 }
 0x1d4   :  { %1230 = vmatmul.mubr.msk.bf16.vlgmr.msra.gmra.mrb[8].mxu1 %vm402_vm6, %v1109_v35 }
 0x1d5   :  { %v338_v2 = vpop.f32.mrb[8].mxu0  ;;  %1241 = vmatprep.mubr.msk.f32.mxu1 %vm402_vm6, %v1075_v51  ;;  %1240 = vmatpush3.msra.mxu1 %v514_v61 }
 0x1d6   :  { %v344_v3 = vpack.c.bf16 %v338_v2, %v338_v2  ;;  %v1225_v4 = vpop.f32.mrb[9].mxu0 }
 0x1d7   :  { %v341_v5 = vpop.f32.mrb[10].mxu0 }
 0x1d8   :  { %v463_v6 = vsel %vm409_vm7, %v344_v3, 0  ;;  %v1226_v7 = vpop.f32.mrb[11].mxu0  ;;  %1280 = vmatprep.subr.msk.bf16.mxu0 %vm409_vm7, %v344_v3 }
 0x1d9   :  { %1234 = vmatpush3.bf16.msra.mxu0 %v463_v6 }
 0x1dc   :  { %1236 = vmatmul.mubr.msk.bf16.vlgmr.msra.gmra.mrb[12].mxu0 %vm402_vm6, %v1109_v35  ;;  %1242 = vmatmul.mubr.msk.f32.vlgmr.msra.gmra.mrb[12].mxu1 %vm402_vm6, %v1076_v52  ;;  %v1089_v35 = vld [vmem:[%s1634_s6] ss:$0 sm:$0xff] }
 0x1dd   :  { %1244 = vmatprep.mubr.msk.f32.mxu1 %vm402_vm6, %v1469_v33 }
 0x1e0   :  { %1245 = vmatmul.mubr.msk.f32.gmra.mrb[14].mxu1 %vm402_vm6, %v1078_v34 }
 0x2a7   :  { %v1504_v11 = vpop.f32.mrb[8].mxu1 }
 0x2a8   :  { %v787_v13 = vsub.f32 %v1488_v55, %v1504_v11  ;;  %v1508_v14 = vpop.f32.mrb[9].mxu1 }
 0x2a9   :  { %v785_v15 = vsub.f32 %v1488_v55, %v1508_v14  ;;  %v1512_v16 = vpop.f32.mrb[10].mxu1 }
 0x2aa   :  { %v788_v17 = vsub.f32 %v1488_v55, %v1512_v16  ;;  %v1516_v18 = vpop.f32.mrb[11].mxu1 }
 0x2ab   :  { %v786_v19 = vsub.f32 %v1488_v55, %v1516_v18  ;;  %v1096_v55 = vld [vmem:[%s1631_s8 + $0x3] ss:$0 sm:$0xff] }
 0x2af   :  { %v1523_v21 = vpop.f32.mrb[12].mxu0  ;;  %v1243_v23 = vpop.f32.mrb[12].mxu1 }
 0x2b0   :  { %v614_v24 = vsub.f32 %v612_v20, %v1243_v23  ;;  %v1525_v25 = vpop.f32.mrb[13].mxu0  ;;  %v593_v26 = vpop.f32.mrb[13].mxu1 }
 0x2b1   :  { %v1527_v27 = vpop.f32.mrb[14].mxu0  ;;  %v613_v31 = vsub.f32 %v612_v20, %v593_v26 }
 0x2b2   :  { %661 = vperm.xlu0 %1290, %v614_v24   ;;  %626 = vperm.xlu1 %1289, %v614_v24   ;;  %v1529_v28 = vpop.f32.mrb[15].mxu0 }
 0x2b3   :  { %v1246_v29 = vpop.f32.mrb[14].mxu1 }
 0x2b4   :  { %v603_v30 = vpop.f32.mrb[15].mxu1  ;;  %v616_v33 = vsub.f32 %v612_v20, %v1246_v29 }
 0x2b5   :  { %v615_v34 = vsub.f32 %v612_v20, %v603_v30 }
 0x2b6   :  { %1292 = vset.pattern.permute.xlu0 %v1329_v10  ;;  %1291 = vset.pattern.permute.xlu1 %v1330_v32 }
 0x2b7   :  { %690 = vperm.xlu1 %1291, %v614_v24   ;;  %621 = vperm.xlu0 %1292, %v613_v31  }
 0x2bb   :  { %1293 = vset.pattern.permute.xlu1 %v1328_v9  ;;  %1294 = vset.pattern.permute.xlu0 %v1330_v32 }
 0x2bc   :  { %657 = vperm.xlu1 %1293, %v613_v31   ;;  %686 = vperm.xlu0 %1294, %v613_v31  }
 0x2c0   :  { %1295 = vset.pattern.permute.xlu0 %v1329_v10  ;;  %669 = vperm.xlu1 %1293, %v616_v33  }
 0x2c1   :  { %636 = vperm.xlu0 %1295, %v616_v33  }
 0x2c4   :  { %1296 = vset.pattern.permute.xlu1 %v1329_v10 }
 0x2c5   :  { %1299 = vset.pattern.permute.xlu0 %v1330_v32  ;;  %631 = vperm.xlu1 %1296, %v615_v34  }
 0x2c6   :  { %698 = vperm.xlu0 %1299, %v616_v33  }
 0x2c9   :  { %1297 = vset.pattern.permute.xlu1 %v1328_v9 }
 0x2ca   :  { %665 = vperm.xlu1 %1297, %v615_v34   ;;  %726 = vrot.lane.b32.xlu0 %v1418_v12, %s1331_s2 }
 0x2ce   :  { %1298 = vset.pattern.permute.xlu1 %v1330_v32 }
 0x2cf   :  { %694 = vperm.xlu1 %1298, %v615_v34   ;;  %v1310_v34 = vld [vmem:[%s1627_s7 + $0x8] ss:$12 sps:$4 sm:$0xff]  }
 0x2d0   :  { %1255 = vmatprep.subr.bf16.mxu1 %v1310_v34 }
 0x2d1   :  { %1256 = vmatpush3.bf16.msra.mxu1 %v1310_v34 }
 0x2d3   :  { %724 = vrot.lane.b32.xlu1 %v1405_v8, %s1331_s2  ;;  %v1092_v8 = vld [vmem:[%s1634_s6 + $0x2] ss:$0 sm:$0xff] }
 0x2d7   :  { %882 = vrot.lane.b32.xlu1 %v1310_v34, %s1326_s23 }
 0x331   :  { %v662_v36 = vpop.permute.xlu0 %661  ;;  %v627_v37 = vpop.permute.xlu1 %626 }
 0x332   :  { %v644_v38 = vmul.f32 %v1089_v35, %v627_v37  ;;  %v677_v43 = vmul.f32 %v1091_v40, %v662_v36  ;;  %v1093_v36 = vld [vmem:[%s1631_s8 + $0x2] ss:$0 sm:$0xff] }
 0x334   :  { %v652_v12 = vadd.f32 %v1090_v39, %v644_v38 }
 0x336   :  { %v691_v41 = vpop.permute.xlu1 %690  ;;  %v622_v42 = vpop.permute.xlu0 %621  ;;  %v681_v45 = vadd.f32 %v677_v43, %v652_v12 }
 0x337   :  { %v643_v44 = vmul.f32 %v1089_v35, %v622_v42  ;;  %v706_v46 = vmul.f32 %v1092_v8, %v691_v41 }
 0x339   :  { %v651_v49 = vadd.f32 %v1090_v39, %v643_v44  ;;  %v710_v51 = vadd.f32 %v706_v46, %v681_v45 }
 0x33b   :  { %v658_v47 = vpop.permute.xlu1 %657  ;;  %v687_v48 = vpop.permute.xlu0 %686  ;;  %v714_v57 = vmax.f32 %v710_v51, 0.0 }
 0x33c   :  { %v676_v50 = vmul.f32 %v1091_v40, %v658_v47  ;;  %v705_v53 = vmul.f32 %v1092_v8, %v687_v48 }
 0x33e   :  { %v680_v52 = vadd.f32 %v676_v50, %v651_v49 }
 0x33f   :  { %v670_v54 = vpop.permute.xlu1 %669 }
 0x340   :  { %v709_v56 = vadd.f32 %v705_v53, %v680_v52  ;;  %v637_v60 = vpop.permute.xlu0 %636  ;;  %v679_v5 = vmul.f32 %v1091_v40, %v670_v54 }
 0x341   :  { %v646_v62 = vmul.f32 %v1089_v35, %v637_v60  ;;  %v1101_v60 = vld [vmem:[%s1631_s8 + $0x4] ss:$0 sm:$0xff] }
 0x342   :  { %v713_v58 = vmax.f32 %v709_v56, 0.0 }
 0x343   :  { %v654_v2 = vadd.f32 %v1090_v39, %v646_v62 }
 0x344   :  { %v718_v59 = vpack.c.bf16 %v714_v57, %v713_v58  ;;  %v632_v61 = vpop.permute.xlu1 %631  ;;  %v1312_v58 = vld [vmem:[%s1627_s7] ss:$12 sps:$4 sm:$0xff]  }
 0x345   :  { %v645_v63 = vmul.f32 %v1089_v35, %v632_v61  ;;  %v699_v4 = vpop.permute.xlu0 %698  ;;  %v683_v9 = vadd.f32 %v679_v5, %v654_v2  ;;  %v1311_v35 = vld [vmem:[%s1627_s7 + $0x20] ss:$12 sps:$4 sm:$0xff]  }
 0x346   :  { %1251 = vmatprep.mubr.msk.bf16.mxu0 %vm203_vm5, %v718_v59  ;;  %v708_v10 = vmul.f32 %v1092_v8, %v699_v4  ;;  %1257 = vmatprep.subr.bf16.mxu1 %v1311_v35  ;;  %v1313_v59 = vld [vmem:[%s1627_s7 + $0x18] ss:$12 sps:$4 sm:$0xff]  }
 0x347   :  { %v653_v6 = vadd.f32 %v1090_v39, %v645_v63  ;;  %884 = vrot.lane.b32.xlu0 %v1311_v35, %s1326_s23  ;;  %1258 = vmatpush3.bf16.msra.mxu1 %v1311_v35 }
 0x348   :  { %v712_v30 = vadd.f32 %v708_v10, %v683_v9  ;;  %1271 = vmatprep.subr.bf16.mxu1 %v1324_v1 }
 0x349   :  { %v666_v0 = vpop.permute.xlu1 %665  ;;  %v727_v29 = vpop.permute.xlu0 %726 }
 0x34a   :  { %v678_v3 = vmul.f32 %v1091_v40, %v666_v0  ;;  %v716_v32 = vmax.f32 %v712_v30, 0.0 }
 0x34c   :  { %v682_v20 = vadd.f32 %v678_v3, %v653_v6 }
 0x34e   :  { %v695_v7 = vpop.permute.xlu1 %694 }
 0x34f   :  { %v707_v23 = vmul.f32 %v1092_v8, %v695_v7 }
 0x351   :  { %v711_v24 = vadd.f32 %v707_v23, %v682_v20 }
 0x352   :  { %v725_v26 = vpop.permute.xlu1 %724 }
 0x353   :  { %1247 = vmatprep.subr.bf16.mxu0 %v725_v26  ;;  %v715_v31 = vmax.f32 %v711_v24, 0.0 }
 0x354   :  { %1248 = vmatpush3.bf16.msra.mxu0 %v725_v26 }
 0x355   :  { %1249 = vmatprep.subr.bf16.mxu0 %v727_v29  ;;  %v719_v33 = vpack.c.bf16 %v716_v32, %v715_v31 }
 0x356   :  { %v883_v16 = vpop.permute.xlu1 %882 }
 0x358   :  { %1250 = vmatpush3.bf16.msra.mxu0 %v727_v29 }
 0x359   :  { %1263 = vmatprep.subr.bf16.mxu0 %v883_v16 }
 0x35b   :  { %1252 = vmatmul.mubr.msk.bf16.vlgmr.msra.gmra.mrb[16].mxu0 %vm203_vm5, %v719_v33 }
 0x35c   :  { %1264 = vmatpush3.bf16.msra.mxu0 %v883_v16 }
 0x42e   :  { %v1253_v37 = vpop.f32.mrb[16].mxu0 }
 0x42f   :  { %v779_v38 = vadd.f32 %v1253_v37, %v1093_v36  ;;  %v770_v39 = vpop.f32.mrb[17].mxu0 }
 0x430   :  { %v771_v40 = vadd.f32 %v1093_v36, %v770_v39  ;;  %v1254_v12 = vpop.f32.mrb[18].mxu0 }
 0x431   :  { %v791_v41 = vadd.f32 %v787_v13, %v779_v38  ;;  %v1563_v42 = vadd.f32 %v1523_v21, %v779_v38  ;;  %v782_v8 = vadd.f32 %v1254_v12, %v1093_v36  ;;  %v773_v43 = vpop.f32.mrb[19].mxu0 }
 0x432   :  { %v789_v44 = vadd.f32 %v785_v15, %v771_v40  ;;  %v1569_v45 = vadd.f32 %v771_v40, %v1525_v25  ;;  %v774_v46 = vadd.f32 %v1093_v36, %v773_v43 }
 0x433   :  { %v792_v47 = vadd.f32 %v788_v17, %v782_v8  ;;  %v1575_v11 = vadd.f32 %v1527_v27, %v782_v8  ;;  %v885_v17 = vpop.permute.xlu0 %884 }
 0x434   :  { %v790_v13 = vadd.f32 %v786_v19, %v774_v46  ;;  %v1581_v21 = vadd.f32 %v774_v46, %v1529_v28  ;;  %1265 = vmatprep.subr.bf16.mxu0 %v885_v17 }
 0x435   :  { %v800_v14 = vpack.c.bf16 %v792_v47, %v791_v41  ;;  %1266 = vmatpush3.bf16.msra.mxu0 %v885_v17 }
 0x436   :  { %v799_v15 = vpack.c.bf16 %v790_v13, %v789_v44 }
 0x438   :  { %1259 = vmatprep.mubr.msk.bf16.mxu1 %vm203_vm5, %v799_v15 }
 0x439   :  { %1260 = vmatmul.mubr.msk.bf16.vlgmr.msra.gmra.mrb[16].mxu1 %vm203_vm5, %v800_v14 }
 0x43a   :  { %1275 = vmatprep.mubr.msk.bf16.mxu1 %vm1325_vm0, %v1324_v1  ;;  %1272 = vmatpush3.bf16.msra.mxu1 %v1312_v58 }
 0x43b   :  { %1273 = vmatprep.subr.bf16.mxu1 %v1324_v1 }
 0x43e   :  { %1274 = vmatpush3.bf16.msra.mxu1 %v1313_v59 }
 0x50c   :  { %v1261_v18 = vpop.f32.mrb[16].mxu1 }
 0x50d   :  { %v866_v19 = vadd.f32 %v1261_v18, %v1096_v55  ;;  %v857_v25 = vpop.f32.mrb[17].mxu1 }
 0x50e   :  { %v858_v27 = vadd.f32 %v1096_v55, %v857_v25  ;;  %v1262_v28 = vpop.f32.mrb[18].mxu1 }
 0x50f   :  { %v869_v48 = vadd.f32 %v1262_v28, %v1096_v55  ;;  %v860_v49 = vpop.f32.mrb[19].mxu1  ;;  %v874_v51 = vmax.f32 %v866_v19, 0.0 }
 0x510   :  { %v861_v50 = vadd.f32 %v1096_v55, %v860_v49  ;;  %v872_v53 = vmax.f32 %v858_v27, 0.0 }
 0x511   :  { %v875_v52 = vmax.f32 %v869_v48, 0.0 }
 0x512   :  { %v873_v54 = vmax.f32 %v861_v50, 0.0 }
 0x513   :  { %v877_v56 = vpack.c.bf16 %v875_v52, %v874_v51 }
 0x514   :  { %v876_v57 = vpack.c.bf16 %v873_v54, %v872_v53 }
 0x516   :  { %1267 = vmatprep.mubr.msk.bf16.mxu0 %vm203_vm5, %v876_v57 }
 0x517   :  { %1268 = vmatmul.mubr.msk.bf16.vlgmr.msra.gmra.mrb[20].mxu0 %vm203_vm5, %v877_v56 }
 0x5ea   :  { %v1269_v61 = vpop.f32.mrb[20].mxu0 }
 0x5eb   :  { %v937_v62 = vadd.f32 %v1269_v61, %v1101_v60  ;;  %v928_v63 = vpop.f32.mrb[21].mxu0 }
 0x5ec   :  { %v929_v0 = vadd.f32 %v1101_v60, %v928_v63  ;;  %v1270_v2 = vpop.f32.mrb[22].mxu0 }
 0x5ed   :  { %v945_v3 = vmul.f32 0.17677669, %v937_v62  ;;  %v940_v4 = vadd.f32 %v1270_v2, %v1101_v60  ;;  %v931_v5 = vpop.f32.mrb[23].mxu0 }
 0x5ee   :  { %v943_v6 = vmul.f32 0.17677669, %v929_v0  ;;  %v932_v7 = vadd.f32 %v1101_v60, %v931_v5 }
 0x5ef   :  { %v946_v9 = vmul.f32 0.17677669, %v940_v4  ;;  %v949_v20 = vsel %vm203_vm5, %v945_v3, -inf }
 0x5f0   :  { %v944_v10 = vmul.f32 0.17677669, %v932_v7  ;;  %v947_v23 = vsel %vm203_vm5, %v943_v6, -inf }
 0x5f1   :  { %v950_v1 = vsel %vm203_vm5, %v946_v9, -inf }
 0x5f2   :  { %v952_v24 = vmax.f32 %v949_v20, %v950_v1  ;;  %v948_v26 = vsel %vm203_vm5, %v944_v10, -inf }
 0x5f3   :  { %v951_v29 = vmax.f32 %v947_v23, %v948_v26 }
 0x5f5   :  { %v953_v30 = vmax.f32 %v951_v29, %v952_v24 }
 0x5f7   :  { %v954_v31 = vsub.f32 %v943_v6, %v953_v30  ;;  %v955_v32 = vsub.f32 %v944_v10, %v953_v30  ;;  %v956_v33 = vsub.f32 %v945_v3, %v953_v30  ;;  %v957_v34 = vsub.f32 %v946_v9, %v953_v30 }
 0x5f9   :  { %v958_v35 = vmul.f32 1.442695, %v954_v31  ;;  %v960_v36 = vmul.f32 1.442695, %v955_v32  ;;  %v962_v37 = vmul.f32 1.442695, %v956_v33 }
 0x5fa   :  { %v964_v38 = vmul.f32 1.442695, %v957_v34 }
 0x5fb   :  { %1314 = vpow2.f32 %v958_v35 }
 0x5fc   :  { %1316 = vpow2.f32 %v960_v36 }
 0x5fd   :  { %1318 = vpow2.f32 %v962_v37 }
 0x5fe   :  { %1320 = vpow2.f32 %v964_v38 }
 0x605   :  { %v1315_v39 = vpop.eup %1314 }
 0x606   :  { %v1317_v40 = vpop.eup %1316  ;;  %v966_v12 = vsel %vm203_vm5, %v1315_v39, 0.0  ;;  %v977_v41 = vmul.f32 %v1315_v39, %v1569_v45 }
 0x607   :  { %v1319_v8 = vpop.eup %1318  ;;  %v967_v43 = vsel %vm203_vm5, %v1317_v40, 0.0  ;;  %v978_v44 = vmul.f32 %v1317_v40, %v1581_v21 }
 0x608   :  { %v1321_v46 = vpop.eup %1320  ;;  %v968_v47 = vadd.f32 %v967_v43, %v966_v12  ;;  %v981_v13 = vsel %vm203_vm5, %v977_v41, 0.0  ;;  %v979_v14 = vmul.f32 %v1319_v8, %v1563_v42  ;;  %v969_v15 = vsel %vm203_vm5, %v1319_v8, 0.0 }
 0x609   :  { %v982_v16 = vsel %vm203_vm5, %v978_v44, 0.0  ;;  %v980_v17 = vmul.f32 %v1321_v46, %v1575_v11  ;;  %v971_v45 = vsel %vm203_vm5, %v1321_v46, 0.0  ;;  %v1104_v11 = vld [vmem:[%s1631_s8 + $0x5] ss:$0 sm:$0xff] }
 0x60a   :  { %v970_v55 = vadd.f32 %v969_v15, %v968_v47  ;;  %v983_v18 = vadd.f32 %v982_v16, %v981_v13  ;;  %v984_v19 = vsel %vm203_vm5, %v979_v14, 0.0 }
 0x60b   :  { %v986_v27 = vsel %vm203_vm5, %v980_v17, 0.0 }
 0x60c   :  { %v972_v25 = vadd.f32 %v971_v45, %v970_v55  ;;  %v985_v21 = vadd.f32 %v984_v19, %v983_v18 }
 0x60e   :  { %1322 = vrcp.f32 %v972_v25  ;;  %v987_v28 = vadd.f32 %v986_v27, %v985_v21 }
 0x618   :  { %v1323_v48 = vpop.eup %1322 }
 0x619   :  { %v989_v42 = vmul.f32 %v1323_v48, %v987_v28 }
 0x61b   :  { %v995_v49 = vpack.c.bf16 %v989_v42, %v989_v42 }
 0x61d   :  { %1276 = vmatmul.mubr.msk.bf16.vlgmr.msra.gmra.mrb[20].mxu1 %vm203_vm5, %v995_v49 }
 0x6f0   :  { %v1049_v50 = vpop.f32.mrb[20].mxu1 }
 0x6f1   :  { %v1050_v51 = vadd.f32 %v1104_v11, %v1049_v50  ;;  %v1277_v52 = vpop.f32.mrb[21].mxu1 }
 0x6f2   :  { %v1052_v53 = vpop.f32.mrb[22].mxu1 }
 0x6f3   :  { %v1055_v54 = vadd.f32 %v1050_v51, %v1447_v22  ;;  %v1278_v56 = vpop.f32.mrb[23].mxu1 }
 0x6f5   :  { %1056 = vst [vmem:[%s1635_s9] sm:$0xff] %v1055_v54 }

</bundles_post_ra>
